<compile_context>
chip_gen: v7x
topology: tpu7x:2x2x1
jax: 0.10.0
libtpu: 0.0.40
codegen_flags: <defaults>
</compile_context>

<pallas_src>
import functools

import jax
import jax.numpy as jnp
from jax.experimental import pallas as pl
from jax.experimental.pallas import tpu as pltpu


def _round_up(x, m):
    return (x + m - 1) // m * m


def _conv_taps_accumulate(x_ref, w_ref, acc_ref, *, H, W, KH, KW):
    """Implicit-GEMM 3x3 conv of the current block into the f32 VMEM accumulator.

    x_ref : (tile_b, H+2, W+2, Cin)  bf16  (zero-padded halo already included)
    w_ref : (KH*KW, Cin, tile_n)     bf16
    acc_ref: (tile_b*H*W, tile_n)    f32
    """
    x = x_ref[...]
    tb = x.shape[0]
    cin = x.shape[-1]
    acc_ref[...] = jnp.zeros_like(acc_ref)
    for kh in range(KH):
        for kw in range(KW):
            tap = x[:, kh:kh + H, kw:kw + W, :].reshape(tb * H * W, cin)
            acc_ref[...] += jnp.dot(tap, w_ref[kh * KW + kw],
                                    preferred_element_type=jnp.float32)


def _stats_kernel(x_ref, w_ref, sum_ref, sq_ref, acc_ref, *, H, W, KH, KW):
    """Conv + per-channel sum / sumsq. Grid = (cout_blocks[parallel], batch_blocks[arbitrary])."""
    n = pl.program_id(1)  # batch reduction axis (innermost)

    _conv_taps_accumulate(x_ref, w_ref, acc_ref, H=H, W=W, KH=KH, KW=KW)

    @pl.when(n == 0)
    def _():
        sum_ref[...] = jnp.zeros_like(sum_ref)
        sq_ref[...] = jnp.zeros_like(sq_ref)

    y = acc_ref[...]
    sum_ref[...] += jnp.sum(y, axis=0, keepdims=True)
    sq_ref[...] += jnp.sum(y * y, axis=0, keepdims=True)


def _conv_bn_relu_kernel(x_ref, w_ref, scale_ref, shift_ref, o_ref, acc_ref,
                         *, H, W, KH, KW, relu):
    """Recompute conv, apply fused BN affine + ReLU in the epilogue."""
    _conv_taps_accumulate(x_ref, w_ref, acc_ref, H=H, W=W, KH=KH, KW=KW)
    out = acc_ref[...] * scale_ref[...] + shift_ref[...]
    if relu:
        out = jnp.maximum(out, 0.0)
    tb = o_ref.shape[0]
    o_ref[...] = out.reshape(tb, H, W, -1).astype(o_ref.dtype)


@functools.partial(jax.jit, static_argnames=("eps", "relu"))
def conv_bn_forward(x_nchw, w_oihw, gamma, beta, *, eps=1e-5, relu=True):
    N, Cin, H, W = x_nchw.shape
    Cout, Cin_w, KH, KW = w_oihw.shape
    assert Cin == Cin_w
    pad = KH // 2  # ConvBN default: kernel_size=3, stride=1, padding=1
    Hp, Wp = H + 2 * pad, W + 2 * pad

    # Lane-dense output channels: pad Cout up to a multiple of 128 (padded
    # channels get zero weights / zero gamma-beta and are sliced off at the end).
    Cout_p = _round_up(max(Cout, 128), 128)
    tile_n = 256 if Cout_p % 256 == 0 else 128
    n_cout = Cout_p // tile_n

    # Batch tiling: aim for tile_m = tile_b*H*W in the ~512-1024 row range.
    tile_b = 1
    for cand in range(N, 0, -1):
        if N % cand == 0 and cand * H * W <= max(1024, H * W):
            tile_b = cand
            break
    n_b = N // tile_b
    tile_m = tile_b * H * W
    M = N * H * W

    # ---- glue (single cheap passes; the 9x im2col blow-up is gone) -----------
    x = jnp.transpose(x_nchw, (0, 2, 3, 1))                               # NHWC
    xp = jnp.pad(x, ((0, 0), (pad, pad), (pad, pad), (0, 0))).astype(jnp.bfloat16)
    # (Cout,Cin,KH,KW) -> (KH*KW, Cin, Cout_p), bf16, matching tap order.
    wt = jnp.transpose(w_oihw, (2, 3, 1, 0)).reshape(KH * KW, Cin, Cout)
    wt = jnp.pad(wt, ((0, 0), (0, 0), (0, Cout_p - Cout))).astype(jnp.bfloat16)

    cparams_stats = pltpu.CompilerParams(
        dimension_semantics=("parallel", "arbitrary"),
        vmem_limit_bytes=32 * 1024 * 1024)
    cparams_apply = pltpu.CompilerParams(
        dimension_semantics=("parallel", "parallel"),
        vmem_limit_bytes=32 * 1024 * 1024)

    # ---- pass 1: conv + BN batch-stat reduction (no conv output writeback) ---
    csum, csq = pl.pallas_call(
        functools.partial(_stats_kernel, H=H, W=W, KH=KH, KW=KW),
        out_shape=(
            jax.ShapeDtypeStruct((1, Cout_p), jnp.float32),
            jax.ShapeDtypeStruct((1, Cout_p), jnp.float32),
        ),
        grid_spec=pltpu.PrefetchScalarGridSpec(
            num_scalar_prefetch=0,
            grid=(n_cout, n_b),  # reduction (batch) axis last
            in_specs=[
                pl.BlockSpec((tile_b, Hp, Wp, Cin), lambda j, n: (n, 0, 0, 0)),
                pl.BlockSpec((KH * KW, Cin, tile_n), lambda j, n: (0, 0, j)),
            ],
            out_specs=[
                pl.BlockSpec((1, tile_n), lambda j, n: (0, j)),  # resident accumulator
                pl.BlockSpec((1, tile_n), lambda j, n: (0, j)),  # resident accumulator
            ],
            scratch_shapes=[pltpu.VMEM((tile_m, tile_n), jnp.float32)],
        ),
        compiler_params=cparams_stats,
    )(xp, wt)

    # ---- glue: per-channel BN coefficients (training-mode batch stats) -------
    mean = csum / M
    # TODO(synk): E[y^2]-E[y]^2 can cancel catastrophically at ResNet-scale M /
    # large activations; switch to centered per-tile partials before scaling up.
    var = jnp.maximum(csq / M - mean * mean, 0.0)
    inv_std = jax.lax.rsqrt(var + eps)
    gamma_p = jnp.pad(gamma.astype(jnp.float32), (0, Cout_p - Cout)).reshape(1, Cout_p)
    beta_p = jnp.pad(beta.astype(jnp.float32), (0, Cout_p - Cout)).reshape(1, Cout_p)
    scale = gamma_p * inv_std
    shift = beta_p - mean * scale

    # ---- pass 2: recompute conv, fused BN affine + ReLU epilogue -------------
    out_nhwc = pl.pallas_call(
        functools.partial(_conv_bn_relu_kernel, H=H, W=W, KH=KH, KW=KW, relu=relu),
        out_shape=jax.ShapeDtypeStruct((N, H, W, Cout_p), jnp.float32),
        grid_spec=pltpu.PrefetchScalarGridSpec(
            num_scalar_prefetch=0,
            grid=(n_b, n_cout),
            in_specs=[
                pl.BlockSpec((tile_b, Hp, Wp, Cin), lambda n, j: (n, 0, 0, 0)),
                pl.BlockSpec((KH * KW, Cin, tile_n), lambda n, j: (0, 0, j)),
                pl.BlockSpec((1, tile_n), lambda n, j: (0, j)),
                pl.BlockSpec((1, tile_n), lambda n, j: (0, j)),
            ],
            out_specs=pl.BlockSpec((tile_b, H, W, tile_n), lambda n, j: (n, 0, 0, j)),
            scratch_shapes=[pltpu.VMEM((tile_m, tile_n), jnp.float32)],
        ),
        compiler_params=cparams_apply,
    )(xp, wt, scale, shift)

    out = out_nhwc[..., :Cout]
    return jnp.transpose(out, (0, 3, 1, 2))  # back to NCHW (framework interface)


def _reference(x, w, gamma, beta, eps=1e-5, relu=True):
    y = jax.lax.conv_general_dilated(
        x, w, window_strides=(1, 1), padding=((1, 1), (1, 1)),
        dimension_numbers=("NCHW", "OIHW", "NCHW"),
        precision=jax.lax.Precision.HIGHEST)
    mean = y.mean(axis=(0, 2, 3), keepdims=True)
    var = ((y - mean) ** 2).mean(axis=(0, 2, 3), keepdims=True)  # biased, training mode
    yn = (y - mean) * jax.lax.rsqrt(var + eps)
    yn = yn * gamma.reshape(1, -1, 1, 1) + beta.reshape(1, -1, 1, 1)
    return jnp.maximum(yn, 0.0) if relu else yn


if __name__ == "__main__":
    key = jax.random.PRNGKey(0)
    k_x, k_w = jax.random.split(key)

    N, Cin, H, W = 2, 4, 16, 16
    Cout, KH, KW = 8, 3, 3

    x = jax.random.normal(k_x, (N, Cin, H, W), dtype=jnp.float32)
    w = jax.random.normal(k_w, (Cout, Cin, KH, KW), dtype=jnp.float32) * 0.1
    gamma = jnp.ones((Cout,), dtype=jnp.float32)   # BatchNorm2d default init
    beta = jnp.zeros((Cout,), dtype=jnp.float32)

    out = conv_bn_forward(x, w, gamma, beta)
    out = jax.block_until_ready(out)

    # Kernel feeds the MXU bf16 operands (f32 accumulation), so validate against
    # the f32 reference evaluated on the same bf16-rounded operands.
    xb = x.astype(jnp.bfloat16).astype(jnp.float32)
    wb = w.astype(jnp.bfloat16).astype(jnp.float32)
    ref = _reference(xb, wb, gamma, beta)

    assert out.shape == (N, Cout, H, W)
    assert jnp.allclose(out, ref, atol=2e-3, rtol=2e-3), "mismatch vs reference"

    print("KERNEL_OK")
</pallas_src>

<mosaic_0001>
module attributes {stable_mosaic.version = 11 : i64} {
  func.func @_conv_bn_relu_kernel(%arg0: i32, %arg1: i32, %arg2: memref<2x18x18x4xbf16, #tpu.memory_space<vmem>>, %arg3: memref<9x4x128xbf16, #tpu.memory_space<vmem>>, %arg4: memref<1x128xf32, #tpu.memory_space<vmem>>, %arg5: memref<1x128xf32, #tpu.memory_space<vmem>>, %arg6: memref<2x16x16x128xf32, #tpu.memory_space<vmem>>, %arg7: memref<512x128xf32, #tpu.memory_space<vmem>>) attributes {dimension_semantics = [#tpu.dimension_semantics<parallel>, #tpu.dimension_semantics<parallel>], iteration_bounds = array<i64: 1, 1>, scalar_prefetch = 0 : i64, scratch_operands = 1 : i64, tpu.core_type = #tpu.core_type<tc>, window_params = [{transform_indices = @transform_0, window_bounds = array<i64: 2, 18, 18, 4>}, {transform_indices = @transform_1, window_bounds = array<i64: 9, 4, 128>}, {transform_indices = @transform_2, window_bounds = array<i64: 1, 128>}, {transform_indices = @transform_3, window_bounds = array<i64: 1, 128>}, {transform_indices = @transform_4, window_bounds = array<i64: 2, 16, 16, 128>}]} {
    %c0 = arith.constant 0 : index
    %c0_0 = arith.constant 0 : index
    %c0_1 = arith.constant 0 : index
    %c0_2 = arith.constant 0 : index
    %0 = vector.load %arg2[%c0, %c0_0, %c0_1, %c0_2] : memref<2x18x18x4xbf16, #tpu.memory_space<vmem>>, vector<2x18x18x4xbf16>
    %cst = arith.constant 0.000000e+00 : f32
    %1 = vector.broadcast %cst : f32 to vector<512x128xf32>
    %c0_3 = arith.constant 0 : index
    %c0_4 = arith.constant 0 : index
    %2 = vector.load %arg7[%c0_3, %c0_4] : memref<512x128xf32, #tpu.memory_space<vmem>>, vector<512x128xf32>
    tpu.vector_store %arg7[%c0_3, %c0_4], %1 {strides = array<i32>} : memref<512x128xf32, #tpu.memory_space<vmem>>, vector<512x128xf32>,
    %3 = vector.extract_strided_slice %0 {offsets = [0, 0, 0, 0], sizes = [2, 16, 16, 4], strides = [1, 1, 1, 1]} : vector<2x18x18x4xbf16> to vector<2x16x16x4xbf16>
    %4 = vector.shape_cast %3 : vector<2x16x16x4xbf16> to vector<512x4xbf16>
    %c0_5 = arith.constant 0 : index
    %c0_6 = arith.constant 0 : index
    %5 = vector.load %arg7[%c0_5, %c0_6] : memref<512x128xf32, #tpu.memory_space<vmem>>, vector<512x128xf32>
    %c0_7 = arith.constant 0 : index
    %c0_8 = arith.constant 0 : index
    %c0_9 = arith.constant 0 : index
    %6 = vector.load %arg3[%c0_7, %c0_8, %c0_9] : memref<9x4x128xbf16, #tpu.memory_space<vmem>>, vector<1x4x128xbf16>
    %7 = vector.shape_cast %6 : vector<1x4x128xbf16> to vector<4x128xbf16>
    %cst_10 = arith.constant dense<0.000000e+00> : vector<512x128xf32>
    %8 = tpu.matmul %4, %7, %cst_10 {dimension_numbers = #tpu.dot_dimension_numbers<[1], [0], [0], [1], [0, 0, 1, 1], [], []>} : vector<512x4xbf16>, vector<4x128xbf16>, vector<512x128xf32> -> vector<512x128xf32>
    %9 = arith.addf %5, %8 : vector<512x128xf32>
    %c0_11 = arith.constant 0 : index
    %c0_12 = arith.constant 0 : index
    %10 = vector.load %arg7[%c0_11, %c0_12] : memref<512x128xf32, #tpu.memory_space<vmem>>, vector<512x128xf32>
    tpu.vector_store %arg7[%c0_11, %c0_12], %9 {strides = array<i32>} : memref<512x128xf32, #tpu.memory_space<vmem>>, vector<512x128xf32>,
    %11 = vector.extract_strided_slice %0 {offsets = [0, 0, 1, 0], sizes = [2, 16, 16, 4], strides = [1, 1, 1, 1]} : vector<2x18x18x4xbf16> to vector<2x16x16x4xbf16>
    %12 = vector.shape_cast %11 : vector<2x16x16x4xbf16> to vector<512x4xbf16>
    %c0_13 = arith.constant 0 : index
    %c0_14 = arith.constant 0 : index
    %13 = vector.load %arg7[%c0_13, %c0_14] : memref<512x128xf32, #tpu.memory_space<vmem>>, vector<512x128xf32>
    %c1 = arith.constant 1 : index
    %c0_15 = arith.constant 0 : index
    %c0_16 = arith.constant 0 : index
    %14 = vector.load %arg3[%c1, %c0_15, %c0_16] : memref<9x4x128xbf16, #tpu.memory_space<vmem>>, vector<1x4x128xbf16>
    %15 = vector.shape_cast %14 : vector<1x4x128xbf16> to vector<4x128xbf16>
    %cst_17 = arith.constant dense<0.000000e+00> : vector<512x128xf32>
    %16 = tpu.matmul %12, %15, %cst_17 {dimension_numbers = #tpu.dot_dimension_numbers<[1], [0], [0], [1], [0, 0, 1, 1], [], []>} : vector<512x4xbf16>, vector<4x128xbf16>, vector<512x128xf32> -> vector<512x128xf32>
    %17 = arith.addf %13, %16 : vector<512x128xf32>
    %c0_18 = arith.constant 0 : index
    %c0_19 = arith.constant 0 : index
    %18 = vector.load %arg7[%c0_18, %c0_19] : memref<512x128xf32, #tpu.memory_space<vmem>>, vector<512x128xf32>
    tpu.vector_store %arg7[%c0_18, %c0_19], %17 {strides = array<i32>} : memref<512x128xf32, #tpu.memory_space<vmem>>, vector<512x128xf32>,
    %19 = vector.extract_strided_slice %0 {offsets = [0, 0, 2, 0], sizes = [2, 16, 16, 4], strides = [1, 1, 1, 1]} : vector<2x18x18x4xbf16> to vector<2x16x16x4xbf16>
    %20 = vector.shape_cast %19 : vector<2x16x16x4xbf16> to vector<512x4xbf16>
    %c0_20 = arith.constant 0 : index
    %c0_21 = arith.constant 0 : index
    %21 = vector.load %arg7[%c0_20, %c0_21] : memref<512x128xf32, #tpu.memory_space<vmem>>, vector<512x128xf32>
    %c2 = arith.constant 2 : index
    %c0_22 = arith.constant 0 : index
    %c0_23 = arith.constant 0 : index
    %22 = vector.load %arg3[%c2, %c0_22, %c0_23] : memref<9x4x128xbf16, #tpu.memory_space<vmem>>, vector<1x4x128xbf16>
    %23 = vector.shape_cast %22 : vector<1x4x128xbf16> to vector<4x128xbf16>
    %cst_24 = arith.constant dense<0.000000e+00> : vector<512x128xf32>
    %24 = tpu.matmul %20, %23, %cst_24 {dimension_numbers = #tpu.dot_dimension_numbers<[1], [0], [0], [1], [0, 0, 1, 1], [], []>} : vector<512x4xbf16>, vector<4x128xbf16>, vector<512x128xf32> -> vector<512x128xf32>
    %25 = arith.addf %21, %24 : vector<512x128xf32>
    %c0_25 = arith.constant 0 : index
    %c0_26 = arith.constant 0 : index
    %26 = vector.load %arg7[%c0_25, %c0_26] : memref<512x128xf32, #tpu.memory_space<vmem>>, vector<512x128xf32>
    tpu.vector_store %arg7[%c0_25, %c0_26], %25 {strides = array<i32>} : memref<512x128xf32, #tpu.memory_space<vmem>>, vector<512x128xf32>,
    %27 = vector.extract_strided_slice %0 {offsets = [0, 1, 0, 0], sizes = [2, 16, 16, 4], strides = [1, 1, 1, 1]} : vector<2x18x18x4xbf16> to vector<2x16x16x4xbf16>
    %28 = vector.shape_cast %27 : vector<2x16x16x4xbf16> to vector<512x4xbf16>
    %c0_27 = arith.constant 0 : index
    %c0_28 = arith.constant 0 : index
    %29 = vector.load %arg7[%c0_27, %c0_28] : memref<512x128xf32, #tpu.memory_space<vmem>>, vector<512x128xf32>
    %c3 = arith.constant 3 : index
    %c0_29 = arith.constant 0 : index
    %c0_30 = arith.constant 0 : index
    %30 = vector.load %arg3[%c3, %c0_29, %c0_30] : memref<9x4x128xbf16, #tpu.memory_space<vmem>>, vector<1x4x128xbf16>
    %31 = vector.shape_cast %30 : vector<1x4x128xbf16> to vector<4x128xbf16>
    %cst_31 = arith.constant dense<0.000000e+00> : vector<512x128xf32>
    %32 = tpu.matmul %28, %31, %cst_31 {dimension_numbers = #tpu.dot_dimension_numbers<[1], [0], [0], [1], [0, 0, 1, 1], [], []>} : vector<512x4xbf16>, vector<4x128xbf16>, vector<512x128xf32> -> vector<512x128xf32>
    %33 = arith.addf %29, %32 : vector<512x128xf32>
    %c0_32 = arith.constant 0 : index
    %c0_33 = arith.constant 0 : index
    %34 = vector.load %arg7[%c0_32, %c0_33] : memref<512x128xf32, #tpu.memory_space<vmem>>, vector<512x128xf32>
    tpu.vector_store %arg7[%c0_32, %c0_33], %33 {strides = array<i32>} : memref<512x128xf32, #tpu.memory_space<vmem>>, vector<512x128xf32>,
    %35 = vector.extract_strided_slice %0 {offsets = [0, 1, 1, 0], sizes = [2, 16, 16, 4], strides = [1, 1, 1, 1]} : vector<2x18x18x4xbf16> to vector<2x16x16x4xbf16>
    %36 = vector.shape_cast %35 : vector<2x16x16x4xbf16> to vector<512x4xbf16>
    %c0_34 = arith.constant 0 : index
    %c0_35 = arith.constant 0 : index
    %37 = vector.load %arg7[%c0_34, %c0_35] : memref<512x128xf32, #tpu.memory_space<vmem>>, vector<512x128xf32>
    %c4 = arith.constant 4 : index
    %c0_36 = arith.constant 0 : index
    %c0_37 = arith.constant 0 : index
    %38 = vector.load %arg3[%c4, %c0_36, %c0_37] : memref<9x4x128xbf16, #tpu.memory_space<vmem>>, vector<1x4x128xbf16>
    %39 = vector.shape_cast %38 : vector<1x4x128xbf16> to vector<4x128xbf16>
    %cst_38 = arith.constant dense<0.000000e+00> : vector<512x128xf32>
    %40 = tpu.matmul %36, %39, %cst_38 {dimension_numbers = #tpu.dot_dimension_numbers<[1], [0], [0], [1], [0, 0, 1, 1], [], []>} : vector<512x4xbf16>, vector<4x128xbf16>, vector<512x128xf32> -> vector<512x128xf32>
    %41 = arith.addf %37, %40 : vector<512x128xf32>
    %c0_39 = arith.constant 0 : index
    %c0_40 = arith.constant 0 : index
    %42 = vector.load %arg7[%c0_39, %c0_40] : memref<512x128xf32, #tpu.memory_space<vmem>>, vector<512x128xf32>
    tpu.vector_store %arg7[%c0_39, %c0_40], %41 {strides = array<i32>} : memref<512x128xf32, #tpu.memory_space<vmem>>, vector<512x128xf32>,
    %43 = vector.extract_strided_slice %0 {offsets = [0, 1, 2, 0], sizes = [2, 16, 16, 4], strides = [1, 1, 1, 1]} : vector<2x18x18x4xbf16> to vector<2x16x16x4xbf16>
    %44 = vector.shape_cast %43 : vector<2x16x16x4xbf16> to vector<512x4xbf16>
    %c0_41 = arith.constant 0 : index
    %c0_42 = arith.constant 0 : index
    %45 = vector.load %arg7[%c0_41, %c0_42] : memref<512x128xf32, #tpu.memory_space<vmem>>, vector<512x128xf32>
    %c5 = arith.constant 5 : index
    %c0_43 = arith.constant 0 : index
    %c0_44 = arith.constant 0 : index
    %46 = vector.load %arg3[%c5, %c0_43, %c0_44] : memref<9x4x128xbf16, #tpu.memory_space<vmem>>, vector<1x4x128xbf16>
    %47 = vector.shape_cast %46 : vector<1x4x128xbf16> to vector<4x128xbf16>
    %cst_45 = arith.constant dense<0.000000e+00> : vector<512x128xf32>
    %48 = tpu.matmul %44, %47, %cst_45 {dimension_numbers = #tpu.dot_dimension_numbers<[1], [0], [0], [1], [0, 0, 1, 1], [], []>} : vector<512x4xbf16>, vector<4x128xbf16>, vector<512x128xf32> -> vector<512x128xf32>
    %49 = arith.addf %45, %48 : vector<512x128xf32>
    %c0_46 = arith.constant 0 : index
    %c0_47 = arith.constant 0 : index
    %50 = vector.load %arg7[%c0_46, %c0_47] : memref<512x128xf32, #tpu.memory_space<vmem>>, vector<512x128xf32>
    tpu.vector_store %arg7[%c0_46, %c0_47], %49 {strides = array<i32>} : memref<512x128xf32, #tpu.memory_space<vmem>>, vector<512x128xf32>,
    %51 = vector.extract_strided_slice %0 {offsets = [0, 2, 0, 0], sizes = [2, 16, 16, 4], strides = [1, 1, 1, 1]} : vector<2x18x18x4xbf16> to vector<2x16x16x4xbf16>
    %52 = vector.shape_cast %51 : vector<2x16x16x4xbf16> to vector<512x4xbf16>
    %c0_48 = arith.constant 0 : index
    %c0_49 = arith.constant 0 : index
    %53 = vector.load %arg7[%c0_48, %c0_49] : memref<512x128xf32, #tpu.memory_space<vmem>>, vector<512x128xf32>
    %c6 = arith.constant 6 : index
    %c0_50 = arith.constant 0 : index
    %c0_51 = arith.constant 0 : index
    %54 = vector.load %arg3[%c6, %c0_50, %c0_51] : memref<9x4x128xbf16, #tpu.memory_space<vmem>>, vector<1x4x128xbf16>
    %55 = vector.shape_cast %54 : vector<1x4x128xbf16> to vector<4x128xbf16>
    %cst_52 = arith.constant dense<0.000000e+00> : vector<512x128xf32>
    %56 = tpu.matmul %52, %55, %cst_52 {dimension_numbers = #tpu.dot_dimension_numbers<[1], [0], [0], [1], [0, 0, 1, 1], [], []>} : vector<512x4xbf16>, vector<4x128xbf16>, vector<512x128xf32> -> vector<512x128xf32>
    %57 = arith.addf %53, %56 : vector<512x128xf32>
    %c0_53 = arith.constant 0 : index
    %c0_54 = arith.constant 0 : index
    %58 = vector.load %arg7[%c0_53, %c0_54] : memref<512x128xf32, #tpu.memory_space<vmem>>, vector<512x128xf32>
    tpu.vector_store %arg7[%c0_53, %c0_54], %57 {strides = array<i32>} : memref<512x128xf32, #tpu.memory_space<vmem>>, vector<512x128xf32>,
    %59 = vector.extract_strided_slice %0 {offsets = [0, 2, 1, 0], sizes = [2, 16, 16, 4], strides = [1, 1, 1, 1]} : vector<2x18x18x4xbf16> to vector<2x16x16x4xbf16>
    %60 = vector.shape_cast %59 : vector<2x16x16x4xbf16> to vector<512x4xbf16>
    %c0_55 = arith.constant 0 : index
    %c0_56 = arith.constant 0 : index
    %61 = vector.load %arg7[%c0_55, %c0_56] : memref<512x128xf32, #tpu.memory_space<vmem>>, vector<512x128xf32>
    %c7 = arith.constant 7 : index
    %c0_57 = arith.constant 0 : index
    %c0_58 = arith.constant 0 : index
    %62 = vector.load %arg3[%c7, %c0_57, %c0_58] : memref<9x4x128xbf16, #tpu.memory_space<vmem>>, vector<1x4x128xbf16>
    %63 = vector.shape_cast %62 : vector<1x4x128xbf16> to vector<4x128xbf16>
    %cst_59 = arith.constant dense<0.000000e+00> : vector<512x128xf32>
    %64 = tpu.matmul %60, %63, %cst_59 {dimension_numbers = #tpu.dot_dimension_numbers<[1], [0], [0], [1], [0, 0, 1, 1], [], []>} : vector<512x4xbf16>, vector<4x128xbf16>, vector<512x128xf32> -> vector<512x128xf32>
    %65 = arith.addf %61, %64 : vector<512x128xf32>
    %c0_60 = arith.constant 0 : index
    %c0_61 = arith.constant 0 : index
    %66 = vector.load %arg7[%c0_60, %c0_61] : memref<512x128xf32, #tpu.memory_space<vmem>>, vector<512x128xf32>
    tpu.vector_store %arg7[%c0_60, %c0_61], %65 {strides = array<i32>} : memref<512x128xf32, #tpu.memory_space<vmem>>, vector<512x128xf32>,
    %67 = vector.extract_strided_slice %0 {offsets = [0, 2, 2, 0], sizes = [2, 16, 16, 4], strides = [1, 1, 1, 1]} : vector<2x18x18x4xbf16> to vector<2x16x16x4xbf16>
    %68 = vector.shape_cast %67 : vector<2x16x16x4xbf16> to vector<512x4xbf16>
    %c0_62 = arith.constant 0 : index
    %c0_63 = arith.constant 0 : index
    %69 = vector.load %arg7[%c0_62, %c0_63] : memref<512x128xf32, #tpu.memory_space<vmem>>, vector<512x128xf32>
    %c8 = arith.constant 8 : index
    %c0_64 = arith.constant 0 : index
    %c0_65 = arith.constant 0 : index
    %70 = vector.load %arg3[%c8, %c0_64, %c0_65] : memref<9x4x128xbf16, #tpu.memory_space<vmem>>, vector<1x4x128xbf16>
    %71 = vector.shape_cast %70 : vector<1x4x128xbf16> to vector<4x128xbf16>
    %cst_66 = arith.constant dense<0.000000e+00> : vector<512x128xf32>
    %72 = tpu.matmul %68, %71, %cst_66 {dimension_numbers = #tpu.dot_dimension_numbers<[1], [0], [0], [1], [0, 0, 1, 1], [], []>} : vector<512x4xbf16>, vector<4x128xbf16>, vector<512x128xf32> -> vector<512x128xf32>
    %73 = arith.addf %69, %72 : vector<512x128xf32>
    %c0_67 = arith.constant 0 : index
    %c0_68 = arith.constant 0 : index
    %74 = vector.load %arg7[%c0_67, %c0_68] : memref<512x128xf32, #tpu.memory_space<vmem>>, vector<512x128xf32>
    tpu.vector_store %arg7[%c0_67, %c0_68], %73 {strides = array<i32>} : memref<512x128xf32, #tpu.memory_space<vmem>>, vector<512x128xf32>,
    %c0_69 = arith.constant 0 : index
    %c0_70 = arith.constant 0 : index
    %75 = vector.load %arg7[%c0_69, %c0_70] : memref<512x128xf32, #tpu.memory_space<vmem>>, vector<512x128xf32>
    %c0_71 = arith.constant 0 : index
    %c0_72 = arith.constant 0 : index
    %76 = vector.load %arg4[%c0_71, %c0_72] : memref<1x128xf32, #tpu.memory_space<vmem>>, vector<1x128xf32>
    %77 = vector.broadcast %76 : vector<1x128xf32> to vector<512x128xf32>
    %78 = arith.mulf %75, %77 : vector<512x128xf32>
    %c0_73 = arith.constant 0 : index
    %c0_74 = arith.constant 0 : index
    %79 = vector.load %arg5[%c0_73, %c0_74] : memref<1x128xf32, #tpu.memory_space<vmem>>, vector<1x128xf32>
    %80 = vector.broadcast %79 : vector<1x128xf32> to vector<512x128xf32>
    %81 = arith.addf %78, %80 : vector<512x128xf32>
    %cst_75 = arith.constant 0.000000e+00 : f32
    %82 = vector.broadcast %cst_75 : f32 to vector<512x128xf32>
    %83 = arith.maximumf %81, %82 : vector<512x128xf32>
    %84 = vector.shape_cast %83 : vector<512x128xf32> to vector<2x16x16x128xf32>
    %c0_76 = arith.constant 0 : index
    %c0_77 = arith.constant 0 : index
    %c0_78 = arith.constant 0 : index
    %c0_79 = arith.constant 0 : index
    %85 = vector.load %arg6[%c0_76, %c0_77, %c0_78, %c0_79] : memref<2x16x16x128xf32, #tpu.memory_space<vmem>>, vector<2x16x16x128xf32>
    tpu.vector_store %arg6[%c0_76, %c0_77, %c0_78, %c0_79], %84 {strides = array<i32>} : memref<2x16x16x128xf32, #tpu.memory_space<vmem>>, vector<2x16x16x128xf32>,
    return
  }
  func.func @transform_0(%arg0: i32, %arg1: i32) -> (i32, i32, i32, i32) {
    %c0_i32 = arith.constant 0 : i32
    %c0_i32_0 = arith.constant 0 : i32
    %c0_i32_1 = arith.constant 0 : i32
    %c0_i32_2 = arith.constant 0 : i32
    return %arg0, %c0_i32, %c0_i32_0, %c0_i32_1 : i32, i32, i32, i32
  }
  func.func @transform_1(%arg0: i32, %arg1: i32) -> (i32, i32, i32) {
    %c0_i32 = arith.constant 0 : i32
    %c0_i32_0 = arith.constant 0 : i32
    %c0_i32_1 = arith.constant 0 : i32
    return %c0_i32, %c0_i32_0, %arg1 : i32, i32, i32
  }
  func.func @transform_2(%arg0: i32, %arg1: i32) -> (i32, i32) {
    %c0_i32 = arith.constant 0 : i32
    %c0_i32_0 = arith.constant 0 : i32
    return %c0_i32, %arg1 : i32, i32
  }
  func.func @transform_3(%arg0: i32, %arg1: i32) -> (i32, i32) {
    %c0_i32 = arith.constant 0 : i32
    %c0_i32_0 = arith.constant 0 : i32
    return %c0_i32, %arg1 : i32, i32
  }
  func.func @transform_4(%arg0: i32, %arg1: i32) -> (i32, i32, i32, i32) {
    %c0_i32 = arith.constant 0 : i32
    %c0_i32_0 = arith.constant 0 : i32
    %c0_i32_1 = arith.constant 0 : i32
    return %arg0, %c0_i32, %c0_i32_0, %arg1 : i32, i32, i32, i32
  }
}

module attributes {stable_mosaic.version = 11 : i64} {
  func.func @_stats_kernel(%arg0: i32, %arg1: i32, %arg2: memref<2x18x18x4xbf16, #tpu.memory_space<vmem>>, %arg3: memref<9x4x128xbf16, #tpu.memory_space<vmem>>, %arg4: memref<1x128xf32, #tpu.memory_space<vmem>>, %arg5: memref<1x128xf32, #tpu.memory_space<vmem>>, %arg6: memref<512x128xf32, #tpu.memory_space<vmem>>) attributes {dimension_semantics = [#tpu.dimension_semantics<parallel>, #tpu.dimension_semantics<arbitrary>], iteration_bounds = array<i64: 1, 1>, scalar_prefetch = 0 : i64, scratch_operands = 1 : i64, tpu.core_type = #tpu.core_type<tc>, window_params = [{transform_indices = @transform_0, window_bounds = array<i64: 2, 18, 18, 4>}, {transform_indices = @transform_1, window_bounds = array<i64: 9, 4, 128>}, {transform_indices = @transform_2, window_bounds = array<i64: 1, 128>}, {transform_indices = @transform_3, window_bounds = array<i64: 1, 128>}]} {
    %c0 = arith.constant 0 : index
    %c0_0 = arith.constant 0 : index
    %c0_1 = arith.constant 0 : index
    %c0_2 = arith.constant 0 : index
    %0 = vector.load %arg2[%c0, %c0_0, %c0_1, %c0_2] : memref<2x18x18x4xbf16, #tpu.memory_space<vmem>>, vector<2x18x18x4xbf16>
    %cst = arith.constant 0.000000e+00 : f32
    %1 = vector.broadcast %cst : f32 to vector<512x128xf32>
    %c0_3 = arith.constant 0 : index
    %c0_4 = arith.constant 0 : index
    %2 = vector.load %arg6[%c0_3, %c0_4] : memref<512x128xf32, #tpu.memory_space<vmem>>, vector<512x128xf32>
    tpu.vector_store %arg6[%c0_3, %c0_4], %1 {strides = array<i32>} : memref<512x128xf32, #tpu.memory_space<vmem>>, vector<512x128xf32>,
    %3 = vector.extract_strided_slice %0 {offsets = [0, 0, 0, 0], sizes = [2, 16, 16, 4], strides = [1, 1, 1, 1]} : vector<2x18x18x4xbf16> to vector<2x16x16x4xbf16>
    %4 = vector.shape_cast %3 : vector<2x16x16x4xbf16> to vector<512x4xbf16>
    %c0_5 = arith.constant 0 : index
    %c0_6 = arith.constant 0 : index
    %5 = vector.load %arg6[%c0_5, %c0_6] : memref<512x128xf32, #tpu.memory_space<vmem>>, vector<512x128xf32>
    %c0_7 = arith.constant 0 : index
    %c0_8 = arith.constant 0 : index
    %c0_9 = arith.constant 0 : index
    %6 = vector.load %arg3[%c0_7, %c0_8, %c0_9] : memref<9x4x128xbf16, #tpu.memory_space<vmem>>, vector<1x4x128xbf16>
    %7 = vector.shape_cast %6 : vector<1x4x128xbf16> to vector<4x128xbf16>
    %cst_10 = arith.constant dense<0.000000e+00> : vector<512x128xf32>
    %8 = tpu.matmul %4, %7, %cst_10 {dimension_numbers = #tpu.dot_dimension_numbers<[1], [0], [0], [1], [0, 0, 1, 1], [], []>} : vector<512x4xbf16>, vector<4x128xbf16>, vector<512x128xf32> -> vector<512x128xf32>
    %9 = arith.addf %5, %8 : vector<512x128xf32>
    %c0_11 = arith.constant 0 : index
    %c0_12 = arith.constant 0 : index
    %10 = vector.load %arg6[%c0_11, %c0_12] : memref<512x128xf32, #tpu.memory_space<vmem>>, vector<512x128xf32>
    tpu.vector_store %arg6[%c0_11, %c0_12], %9 {strides = array<i32>} : memref<512x128xf32, #tpu.memory_space<vmem>>, vector<512x128xf32>,
    %11 = vector.extract_strided_slice %0 {offsets = [0, 0, 1, 0], sizes = [2, 16, 16, 4], strides = [1, 1, 1, 1]} : vector<2x18x18x4xbf16> to vector<2x16x16x4xbf16>
    %12 = vector.shape_cast %11 : vector<2x16x16x4xbf16> to vector<512x4xbf16>
    %c0_13 = arith.constant 0 : index
    %c0_14 = arith.constant 0 : index
    %13 = vector.load %arg6[%c0_13, %c0_14] : memref<512x128xf32, #tpu.memory_space<vmem>>, vector<512x128xf32>
    %c1 = arith.constant 1 : index
    %c0_15 = arith.constant 0 : index
    %c0_16 = arith.constant 0 : index
    %14 = vector.load %arg3[%c1, %c0_15, %c0_16] : memref<9x4x128xbf16, #tpu.memory_space<vmem>>, vector<1x4x128xbf16>
    %15 = vector.shape_cast %14 : vector<1x4x128xbf16> to vector<4x128xbf16>
    %cst_17 = arith.constant dense<0.000000e+00> : vector<512x128xf32>
    %16 = tpu.matmul %12, %15, %cst_17 {dimension_numbers = #tpu.dot_dimension_numbers<[1], [0], [0], [1], [0, 0, 1, 1], [], []>} : vector<512x4xbf16>, vector<4x128xbf16>, vector<512x128xf32> -> vector<512x128xf32>
    %17 = arith.addf %13, %16 : vector<512x128xf32>
    %c0_18 = arith.constant 0 : index
    %c0_19 = arith.constant 0 : index
    %18 = vector.load %arg6[%c0_18, %c0_19] : memref<512x128xf32, #tpu.memory_space<vmem>>, vector<512x128xf32>
    tpu.vector_store %arg6[%c0_18, %c0_19], %17 {strides = array<i32>} : memref<512x128xf32, #tpu.memory_space<vmem>>, vector<512x128xf32>,
    %19 = vector.extract_strided_slice %0 {offsets = [0, 0, 2, 0], sizes = [2, 16, 16, 4], strides = [1, 1, 1, 1]} : vector<2x18x18x4xbf16> to vector<2x16x16x4xbf16>
    %20 = vector.shape_cast %19 : vector<2x16x16x4xbf16> to vector<512x4xbf16>
    %c0_20 = arith.constant 0 : index
    %c0_21 = arith.constant 0 : index
    %21 = vector.load %arg6[%c0_20, %c0_21] : memref<512x128xf32, #tpu.memory_space<vmem>>, vector<512x128xf32>
    %c2 = arith.constant 2 : index
    %c0_22 = arith.constant 0 : index
    %c0_23 = arith.constant 0 : index
    %22 = vector.load %arg3[%c2, %c0_22, %c0_23] : memref<9x4x128xbf16, #tpu.memory_space<vmem>>, vector<1x4x128xbf16>
    %23 = vector.shape_cast %22 : vector<1x4x128xbf16> to vector<4x128xbf16>
    %cst_24 = arith.constant dense<0.000000e+00> : vector<512x128xf32>
    %24 = tpu.matmul %20, %23, %cst_24 {dimension_numbers = #tpu.dot_dimension_numbers<[1], [0], [0], [1], [0, 0, 1, 1], [], []>} : vector<512x4xbf16>, vector<4x128xbf16>, vector<512x128xf32> -> vector<512x128xf32>
    %25 = arith.addf %21, %24 : vector<512x128xf32>
    %c0_25 = arith.constant 0 : index
    %c0_26 = arith.constant 0 : index
    %26 = vector.load %arg6[%c0_25, %c0_26] : memref<512x128xf32, #tpu.memory_space<vmem>>, vector<512x128xf32>
    tpu.vector_store %arg6[%c0_25, %c0_26], %25 {strides = array<i32>} : memref<512x128xf32, #tpu.memory_space<vmem>>, vector<512x128xf32>,
    %27 = vector.extract_strided_slice %0 {offsets = [0, 1, 0, 0], sizes = [2, 16, 16, 4], strides = [1, 1, 1, 1]} : vector<2x18x18x4xbf16> to vector<2x16x16x4xbf16>
    %28 = vector.shape_cast %27 : vector<2x16x16x4xbf16> to vector<512x4xbf16>
    %c0_27 = arith.constant 0 : index
    %c0_28 = arith.constant 0 : index
    %29 = vector.load %arg6[%c0_27, %c0_28] : memref<512x128xf32, #tpu.memory_space<vmem>>, vector<512x128xf32>
    %c3 = arith.constant 3 : index
    %c0_29 = arith.constant 0 : index
    %c0_30 = arith.constant 0 : index
    %30 = vector.load %arg3[%c3, %c0_29, %c0_30] : memref<9x4x128xbf16, #tpu.memory_space<vmem>>, vector<1x4x128xbf16>
    %31 = vector.shape_cast %30 : vector<1x4x128xbf16> to vector<4x128xbf16>
    %cst_31 = arith.constant dense<0.000000e+00> : vector<512x128xf32>
    %32 = tpu.matmul %28, %31, %cst_31 {dimension_numbers = #tpu.dot_dimension_numbers<[1], [0], [0], [1], [0, 0, 1, 1], [], []>} : vector<512x4xbf16>, vector<4x128xbf16>, vector<512x128xf32> -> vector<512x128xf32>
    %33 = arith.addf %29, %32 : vector<512x128xf32>
    %c0_32 = arith.constant 0 : index
    %c0_33 = arith.constant 0 : index
    %34 = vector.load %arg6[%c0_32, %c0_33] : memref<512x128xf32, #tpu.memory_space<vmem>>, vector<512x128xf32>
    tpu.vector_store %arg6[%c0_32, %c0_33], %33 {strides = array<i32>} : memref<512x128xf32, #tpu.memory_space<vmem>>, vector<512x128xf32>,
    %35 = vector.extract_strided_slice %0 {offsets = [0, 1, 1, 0], sizes = [2, 16, 16, 4], strides = [1, 1, 1, 1]} : vector<2x18x18x4xbf16> to vector<2x16x16x4xbf16>
    %36 = vector.shape_cast %35 : vector<2x16x16x4xbf16> to vector<512x4xbf16>
    %c0_34 = arith.constant 0 : index
    %c0_35 = arith.constant 0 : index
    %37 = vector.load %arg6[%c0_34, %c0_35] : memref<512x128xf32, #tpu.memory_space<vmem>>, vector<512x128xf32>
    %c4 = arith.constant 4 : index
    %c0_36 = arith.constant 0 : index
    %c0_37 = arith.constant 0 : index
    %38 = vector.load %arg3[%c4, %c0_36, %c0_37] : memref<9x4x128xbf16, #tpu.memory_space<vmem>>, vector<1x4x128xbf16>
    %39 = vector.shape_cast %38 : vector<1x4x128xbf16> to vector<4x128xbf16>
    %cst_38 = arith.constant dense<0.000000e+00> : vector<512x128xf32>
    %40 = tpu.matmul %36, %39, %cst_38 {dimension_numbers = #tpu.dot_dimension_numbers<[1], [0], [0], [1], [0, 0, 1, 1], [], []>} : vector<512x4xbf16>, vector<4x128xbf16>, vector<512x128xf32> -> vector<512x128xf32>
    %41 = arith.addf %37, %40 : vector<512x128xf32>
    %c0_39 = arith.constant 0 : index
    %c0_40 = arith.constant 0 : index
    %42 = vector.load %arg6[%c0_39, %c0_40] : memref<512x128xf32, #tpu.memory_space<vmem>>, vector<512x128xf32>
    tpu.vector_store %arg6[%c0_39, %c0_40], %41 {strides = array<i32>} : memref<512x128xf32, #tpu.memory_space<vmem>>, vector<512x128xf32>,
    %43 = vector.extract_strided_slice %0 {offsets = [0, 1, 2, 0], sizes = [2, 16, 16, 4], strides = [1, 1, 1, 1]} : vector<2x18x18x4xbf16> to vector<2x16x16x4xbf16>
    %44 = vector.shape_cast %43 : vector<2x16x16x4xbf16> to vector<512x4xbf16>
    %c0_41 = arith.constant 0 : index
    %c0_42 = arith.constant 0 : index
    %45 = vector.load %arg6[%c0_41, %c0_42] : memref<512x128xf32, #tpu.memory_space<vmem>>, vector<512x128xf32>
    %c5 = arith.constant 5 : index
    %c0_43 = arith.constant 0 : index
    %c0_44 = arith.constant 0 : index
    %46 = vector.load %arg3[%c5, %c0_43, %c0_44] : memref<9x4x128xbf16, #tpu.memory_space<vmem>>, vector<1x4x128xbf16>
    %47 = vector.shape_cast %46 : vector<1x4x128xbf16> to vector<4x128xbf16>
    %cst_45 = arith.constant dense<0.000000e+00> : vector<512x128xf32>
    %48 = tpu.matmul %44, %47, %cst_45 {dimension_numbers = #tpu.dot_dimension_numbers<[1], [0], [0], [1], [0, 0, 1, 1], [], []>} : vector<512x4xbf16>, vector<4x128xbf16>, vector<512x128xf32> -> vector<512x128xf32>
    %49 = arith.addf %45, %48 : vector<512x128xf32>
    %c0_46 = arith.constant 0 : index
    %c0_47 = arith.constant 0 : index
    %50 = vector.load %arg6[%c0_46, %c0_47] : memref<512x128xf32, #tpu.memory_space<vmem>>, vector<512x128xf32>
    tpu.vector_store %arg6[%c0_46, %c0_47], %49 {strides = array<i32>} : memref<512x128xf32, #tpu.memory_space<vmem>>, vector<512x128xf32>,
    %51 = vector.extract_strided_slice %0 {offsets = [0, 2, 0, 0], sizes = [2, 16, 16, 4], strides = [1, 1, 1, 1]} : vector<2x18x18x4xbf16> to vector<2x16x16x4xbf16>
    %52 = vector.shape_cast %51 : vector<2x16x16x4xbf16> to vector<512x4xbf16>
    %c0_48 = arith.constant 0 : index
    %c0_49 = arith.constant 0 : index
    %53 = vector.load %arg6[%c0_48, %c0_49] : memref<512x128xf32, #tpu.memory_space<vmem>>, vector<512x128xf32>
    %c6 = arith.constant 6 : index
    %c0_50 = arith.constant 0 : index
    %c0_51 = arith.constant 0 : index
    %54 = vector.load %arg3[%c6, %c0_50, %c0_51] : memref<9x4x128xbf16, #tpu.memory_space<vmem>>, vector<1x4x128xbf16>
    %55 = vector.shape_cast %54 : vector<1x4x128xbf16> to vector<4x128xbf16>
    %cst_52 = arith.constant dense<0.000000e+00> : vector<512x128xf32>
    %56 = tpu.matmul %52, %55, %cst_52 {dimension_numbers = #tpu.dot_dimension_numbers<[1], [0], [0], [1], [0, 0, 1, 1], [], []>} : vector<512x4xbf16>, vector<4x128xbf16>, vector<512x128xf32> -> vector<512x128xf32>
    %57 = arith.addf %53, %56 : vector<512x128xf32>
    %c0_53 = arith.constant 0 : index
    %c0_54 = arith.constant 0 : index
    %58 = vector.load %arg6[%c0_53, %c0_54] : memref<512x128xf32, #tpu.memory_space<vmem>>, vector<512x128xf32>
    tpu.vector_store %arg6[%c0_53, %c0_54], %57 {strides = array<i32>} : memref<512x128xf32, #tpu.memory_space<vmem>>, vector<512x128xf32>,
    %59 = vector.extract_strided_slice %0 {offsets = [0, 2, 1, 0], sizes = [2, 16, 16, 4], strides = [1, 1, 1, 1]} : vector<2x18x18x4xbf16> to vector<2x16x16x4xbf16>
    %60 = vector.shape_cast %59 : vector<2x16x16x4xbf16> to vector<512x4xbf16>
    %c0_55 = arith.constant 0 : index
    %c0_56 = arith.constant 0 : index
    %61 = vector.load %arg6[%c0_55, %c0_56] : memref<512x128xf32, #tpu.memory_space<vmem>>, vector<512x128xf32>
    %c7 = arith.constant 7 : index
    %c0_57 = arith.constant 0 : index
    %c0_58 = arith.constant 0 : index
    %62 = vector.load %arg3[%c7, %c0_57, %c0_58] : memref<9x4x128xbf16, #tpu.memory_space<vmem>>, vector<1x4x128xbf16>
    %63 = vector.shape_cast %62 : vector<1x4x128xbf16> to vector<4x128xbf16>
    %cst_59 = arith.constant dense<0.000000e+00> : vector<512x128xf32>
    %64 = tpu.matmul %60, %63, %cst_59 {dimension_numbers = #tpu.dot_dimension_numbers<[1], [0], [0], [1], [0, 0, 1, 1], [], []>} : vector<512x4xbf16>, vector<4x128xbf16>, vector<512x128xf32> -> vector<512x128xf32>
    %65 = arith.addf %61, %64 : vector<512x128xf32>
    %c0_60 = arith.constant 0 : index
    %c0_61 = arith.constant 0 : index
    %66 = vector.load %arg6[%c0_60, %c0_61] : memref<512x128xf32, #tpu.memory_space<vmem>>, vector<512x128xf32>
    tpu.vector_store %arg6[%c0_60, %c0_61], %65 {strides = array<i32>} : memref<512x128xf32, #tpu.memory_space<vmem>>, vector<512x128xf32>,
    %67 = vector.extract_strided_slice %0 {offsets = [0, 2, 2, 0], sizes = [2, 16, 16, 4], strides = [1, 1, 1, 1]} : vector<2x18x18x4xbf16> to vector<2x16x16x4xbf16>
    %68 = vector.shape_cast %67 : vector<2x16x16x4xbf16> to vector<512x4xbf16>
    %c0_62 = arith.constant 0 : index
    %c0_63 = arith.constant 0 : index
    %69 = vector.load %arg6[%c0_62, %c0_63] : memref<512x128xf32, #tpu.memory_space<vmem>>, vector<512x128xf32>
    %c8 = arith.constant 8 : index
    %c0_64 = arith.constant 0 : index
    %c0_65 = arith.constant 0 : index
    %70 = vector.load %arg3[%c8, %c0_64, %c0_65] : memref<9x4x128xbf16, #tpu.memory_space<vmem>>, vector<1x4x128xbf16>
    %71 = vector.shape_cast %70 : vector<1x4x128xbf16> to vector<4x128xbf16>
    %cst_66 = arith.constant dense<0.000000e+00> : vector<512x128xf32>
    %72 = tpu.matmul %68, %71, %cst_66 {dimension_numbers = #tpu.dot_dimension_numbers<[1], [0], [0], [1], [0, 0, 1, 1], [], []>} : vector<512x4xbf16>, vector<4x128xbf16>, vector<512x128xf32> -> vector<512x128xf32>
    %73 = arith.addf %69, %72 : vector<512x128xf32>
    %c0_67 = arith.constant 0 : index
    %c0_68 = arith.constant 0 : index
    %74 = vector.load %arg6[%c0_67, %c0_68] : memref<512x128xf32, #tpu.memory_space<vmem>>, vector<512x128xf32>
    tpu.vector_store %arg6[%c0_67, %c0_68], %73 {strides = array<i32>} : memref<512x128xf32, #tpu.memory_space<vmem>>, vector<512x128xf32>,
    %c0_i32 = arith.constant 0 : i32
    %75 = arith.cmpi eq, %arg1, %c0_i32 : i32
    %76 = arith.extui %75 : i1 to i32
    %c0_i32_69 = arith.constant 0 : i32
    %77 = arith.cmpi ne, %76, %c0_i32_69 : i32
    scf.if %77 {
      %cst_82 = arith.constant 0.000000e+00 : f32
      %90 = vector.broadcast %cst_82 : f32 to vector<1x128xf32>
      %c0_83 = arith.constant 0 : index
      %c0_84 = arith.constant 0 : index
      %91 = vector.load %arg4[%c0_83, %c0_84] : memref<1x128xf32, #tpu.memory_space<vmem>>, vector<1x128xf32>
      tpu.vector_store %arg4[%c0_83, %c0_84], %90 {strides = array<i32>} : memref<1x128xf32, #tpu.memory_space<vmem>>, vector<1x128xf32>,
      %cst_85 = arith.constant 0.000000e+00 : f32
      %92 = vector.broadcast %cst_85 : f32 to vector<1x128xf32>
      %c0_86 = arith.constant 0 : index
      %c0_87 = arith.constant 0 : index
      %93 = vector.load %arg5[%c0_86, %c0_87] : memref<1x128xf32, #tpu.memory_space<vmem>>, vector<1x128xf32>
      tpu.vector_store %arg5[%c0_86, %c0_87], %92 {strides = array<i32>} : memref<1x128xf32, #tpu.memory_space<vmem>>, vector<1x128xf32>,
    } else {
    }
    %c0_70 = arith.constant 0 : index
    %c0_71 = arith.constant 0 : index
    %78 = vector.load %arg6[%c0_70, %c0_71] : memref<512x128xf32, #tpu.memory_space<vmem>>, vector<512x128xf32>
    %c0_72 = arith.constant 0 : index
    %c0_73 = arith.constant 0 : index
    %79 = vector.load %arg4[%c0_72, %c0_73] : memref<1x128xf32, #tpu.memory_space<vmem>>, vector<1x128xf32>
    %cst_74 = arith.constant dense<0.000000e+00> : vector<128xf32>
    %80 = vector.multi_reduction <add>, %78, %cst_74 [0] : vector<512x128xf32> to vector<128xf32>
    %81 = vector.shape_cast %80 : vector<128xf32> to vector<1x128xf32>
    %82 = arith.addf %79, %81 : vector<1x128xf32>
    %c0_75 = arith.constant 0 : index
    %c0_76 = arith.constant 0 : index
    %83 = vector.load %arg4[%c0_75, %c0_76] : memref<1x128xf32, #tpu.memory_space<vmem>>, vector<1x128xf32>
    tpu.vector_store %arg4[%c0_75, %c0_76], %82 {strides = array<i32>} : memref<1x128xf32, #tpu.memory_space<vmem>>, vector<1x128xf32>,
    %c0_77 = arith.constant 0 : index
    %c0_78 = arith.constant 0 : index
    %84 = vector.load %arg5[%c0_77, %c0_78] : memref<1x128xf32, #tpu.memory_space<vmem>>, vector<1x128xf32>
    %85 = arith.mulf %78, %78 : vector<512x128xf32>
    %cst_79 = arith.constant dense<0.000000e+00> : vector<128xf32>
    %86 = vector.multi_reduction <add>, %85, %cst_79 [0] : vector<512x128xf32> to vector<128xf32>
    %87 = vector.shape_cast %86 : vector<128xf32> to vector<1x128xf32>
    %88 = arith.addf %84, %87 : vector<1x128xf32>
    %c0_80 = arith.constant 0 : index
    %c0_81 = arith.constant 0 : index
    %89 = vector.load %arg5[%c0_80, %c0_81] : memref<1x128xf32, #tpu.memory_space<vmem>>, vector<1x128xf32>
    tpu.vector_store %arg5[%c0_80, %c0_81], %88 {strides = array<i32>} : memref<1x128xf32, #tpu.memory_space<vmem>>, vector<1x128xf32>,
    return
  }
  func.func @transform_0(%arg0: i32, %arg1: i32) -> (i32, i32, i32, i32) {
    %c0_i32 = arith.constant 0 : i32
    %c0_i32_0 = arith.constant 0 : i32
    %c0_i32_1 = arith.constant 0 : i32
    %c0_i32_2 = arith.constant 0 : i32
    return %arg1, %c0_i32, %c0_i32_0, %c0_i32_1 : i32, i32, i32, i32
  }
  func.func @transform_1(%arg0: i32, %arg1: i32) -> (i32, i32, i32) {
    %c0_i32 = arith.constant 0 : i32
    %c0_i32_0 = arith.constant 0 : i32
    %c0_i32_1 = arith.constant 0 : i32
    return %c0_i32, %c0_i32_0, %arg0 : i32, i32, i32
  }
  func.func @transform_2(%arg0: i32, %arg1: i32) -> (i32, i32) {
    %c0_i32 = arith.constant 0 : i32
    %c0_i32_0 = arith.constant 0 : i32
    return %c0_i32, %arg0 : i32, i32
  }
  func.func @transform_3(%arg0: i32, %arg1: i32) -> (i32, i32) {
    %c0_i32 = arith.constant 0 : i32
    %c0_i32_0 = arith.constant 0 : i32
    return %c0_i32, %arg0 : i32, i32
  }
}

</mosaic_0001>

<bundles_post_ra>
// kernel: conv_bn_forward.3
= control target key start
LH: loop header
LB: loop body
LE: loop exit
PB: predicated region body
PF: predicated region fallthrough
CT: control target
= control target key end

     0   :  { %vm512_vm0 = vcmask 1041408   ;;  %vm415_vm1 = vcmask 31744   ;;  %vm933_vm2 = vsmask.f32 3328  ;;  %vm934_vm3 = vsmask.f32 7440  ;;  %s11400_s1 = inlined_call_operand.vmem [shape: bf16[9,4,128], index: 1, kind: input, shape index: {}]   ;;  %s11401_s0 = inlined_call_operand.vmem [shape: bf16[2,18,18,4], index: 0, kind: input, shape index: {}]   ;;  %s11402_s2 = inlined_call_operand.vmem [shape: f32[1,128], index: 2, kind: input, shape index: {}]   ;;  %s11403_s3 = inlined_call_operand.vmem [shape: f32[1,128], index: 3, kind: input, shape index: {}]   ;;  %s11404_s4 = inlined_call_operand.vmem [shape: f32[2,16,16,128], index: 4, kind: output, shape index: {}]  }
   0x1   :  { %v254_v0 = vld [vmem:[%s11400_s1] sm:$0x3]  ;;  %v8717_v2 = vld [vmem:[%s11401_s0 + $0x4] sm:$0xf]  ;;  %v8726_v5 = vld [vmem:[%s11401_s0 + $0xc] sm:$0xf] }
   0x2   :  { %v8712_v1 = vld [vmem:[%s11401_s0] sm:$0xf]  ;;  %8628 = vmatprep.subr.msk.bf16.mxu1 %vm512_vm0, %v254_v0  ;;  %v514_v3 = vsel %vm512_vm0, %v254_v0, 0  ;;  %v8731_v6 = vld [vmem:[%s11401_s0 + $0x10] sm:$0xf]  ;;  %v961_v16 = vshrl.u32 %v8726_v5, 16  ;;  %vm8809_vm4 = vmor %vm933_vm2, %vm934_vm3 }
   0x3   :  { %v6781_v4 = vcombine.low %v8712_v1, %v8717_v2  ;;  %7521 = vmatpush3.bf16.msra.mxu1 %v514_v3  ;;  %v8736_v7 = vcombine.low %v8726_v5, %v8731_v6  ;;  %v7042_v8 = vld [vmem:[%s11400_s1 + $0x8] sm:$0x3]  ;;  %v8748_v10 = vld [vmem:[%s11401_s0 + $0x18] sm:$0xf]  ;;  %v8753_v11 = vld [vmem:[%s11401_s0 + $0x1c] sm:$0xf] }
   0x4   :  { %8632 = vmatprep.subr.msk.bf16.mxu0 %vm512_vm0, %v7042_v8  ;;  %v8743_v9 = vsel %vm512_vm0, %v7042_v8, 0  ;;  %v8760_v12 = vcombine.low %v8748_v10, %v8753_v11  ;;  %v6845_v13 = vld [vmem:[%s11400_s1 + $0x2] sm:$0x3]  ;;  %v8768_v14 = vld [vmem:[%s11401_s0 + $0x14] sm:$0x1]  ;;  %v964_v17 = vshll.u32 %v8726_v5, 16 }
   0x5   :  { %7522 = vmatprep.mubr.msk.bf16.mxu1 %vm415_vm1, %v6781_v4  ;;  %11606 = vst [vmem:[#allocation3_spill] sm:$0xff] %v8736_v7  ;;  %11607 = vst [vmem:[#allocation4_spill] sm:$0xff] %v8743_v9  ;;  %7785 = vmatpush3.bf16.msra.mxu0 %v8743_v9  ;;  %v7079_v15 = vld [vmem:[%s11400_s1 + $0xa] sm:$0x3]  ;;  %v970_v18 = vshll.u32 %v8731_v6, 16  ;;  %v985_v19 = vshrl.u32 %v8748_v10, 16 }
   0x6   :  { %7523 = vmatmul.mubr.msk.bf16.vlgmr.msra.gmra.mrb[0].mxu1 %vm415_vm1, %v8736_v7  ;;  %11608 = vst [vmem:[#allocation5_spill] sm:$0xff] %v8760_v12  ;;  %8629 = vmatprep.subr.msk.bf16.mxu1 %vm512_vm0, %v6845_v13  ;;  %v988_v20 = vshll.u32 %v8748_v10, 16  ;;  %v974_v21 = vshrl.u32 %v8731_v6, 16  ;;  %v980_v22 = vshll.u32 %v8768_v14, 16  ;;  %v8787_v23 = vld [vmem:[%s11401_s0 + $0x24] sm:$0xf] }
   0x7   :  { %7526 = vmatprep.mubr.msk.bf16.mxu1 %vm415_vm1, %v8760_v12  ;;  %8634 = vmatprep.subr.msk.bf16.mxu0 %vm512_vm0, %v7079_v15  ;;  %v998_v24 = vshrl.u32 %v8753_v11, 16  ;;  %v963_v25 = vrot.slane %v961_v16, 4  ;;  %v966_v26 = vrot.slane %v964_v17, 5  ;;  %v972_v27 = vrot.slane %v970_v18, 5  ;;  %v8793_v28 = vld [vmem:[%s11401_s0 + $0x28] sm:$0xf] }
   0x8   :  { %v976_v29 = vrot.slane %v974_v21, 4  ;;  %v982_v30 = vrot.slane %v980_v22, 5  ;;  %v8797_v31 = vcombine.low %v8787_v23, %v8793_v28  ;;  %v8802_v32 = vld [vmem:[%s11401_s0 + $0x20] sm:$0x1]  ;;  %v1009_v34 = vshrl.u32 %v8787_v23, 16 }
   0x9   :  { %v967_v33 = vor.u32 %v966_v26, %v963_v25  ;;  %v1012_v35 = vshll.u32 %v8787_v23, 16  ;;  %v1963_v36 = vsel %vm512_vm0, %v6845_v13, 0  ;;  %v987_v39 = vrot.slane %v985_v19, 4  ;;  %v8817_v42 = vld [vmem:[%s11401_s0 + $0x30] sm:$0xf] }
   0xa   :  { %11609 = vst [vmem:[#allocation6_spill] sm:$0xff] %v8797_v31  ;;  %v977_v38 = vor.u32 %v976_v29, %v972_v27  ;;  %7587 = vmatpush3.bf16.msra.mxu1 %v1963_v36  ;;  %v990_v40 = vrot.slane %v988_v20, 5  ;;  %v994_v41 = vshll.u32 %v8753_v11, 16  ;;  %v1022_v44 = vshrl.u32 %v8793_v28, 16  ;;  %v8827_v51 = vld [vmem:[%s11401_s0 + $0x34] sm:$0xf] }
   0xb   :  { %v968_v43 = vrot.slane %v967_v33, 4  ;;  %v1000_v45 = vrot.slane %v998_v24, 4  ;;  %v1004_v46 = vshll.u32 %v8802_v32, 16  ;;  %v4462_v50 = vsel %vm512_vm0, %v7079_v15, 0  ;;  %v8842_v60 = vld [vmem:[%s11401_s0 + $0x2c] sm:$0x1] }
   0xc   :  { %v978_v47 = vrot.slane %v977_v38, 4  ;;  %v991_v48 = vor.u32 %v990_v40, %v987_v39  ;;  %v996_v49 = vrot.slane %v994_v41, 5  ;;  %v8833_v54 = vcombine.low %v8817_v42, %v8827_v51  ;;  %v8847_v61 = vld [vmem:[%s11401_s0 + $0x3c] sm:$0xf]  ;;  %v8857_v4 = vld [vmem:[%s11401_s0 + $0x40] sm:$0xf] }
   0xd   :  { %v973_v52 = vsel %vm8809_vm4, %v968_v43, %v972_v27  ;;  %v1006_v53 = vrot.slane %v1004_v46, 5  ;;  %v1033_v55 = vshrl.u32 %v8817_v42, 16  ;;  %v1036_v59 = vshll.u32 %v8817_v42, 16  ;;  %v8873_v21 = vld [vmem:[%s11401_s0 + $0x38] sm:$0x1] }
   0xe   :  { %7527 = vmatmul.mubr.msk.bf16.gmra.mrb[4].mxu1 %vm415_vm1, %v8797_v31  ;;  %11612 = vst [vmem:[#allocation7_spill] sm:$0xff] %v8833_v54  ;;  %v983_v56 = vsel %vm8809_vm4, %v978_v47, %v982_v30  ;;  %v992_v57 = vrot.slane %v991_v48, 4  ;;  %v1001_v58 = vor.u32 %v1000_v45, %v996_v49  ;;  %v1046_v63 = vshrl.u32 %v8827_v51, 16  ;;  %v8882_v27 = vld [vmem:[%s11401_s0 + $0x48] sm:$0xf] }
   0xf   :  { %v8849_v62 = vcombine.low %v973_v52, %v983_v56  ;;  %7530 = vmatprep.mubr.msk.bf16.mxu1 %vm415_vm1, %v8833_v54  ;;  %v1011_v0 = vrot.slane %v1009_v34, 4  ;;  %v1014_v3 = vrot.slane %v1012_v35, 5  ;;  %v1018_v15 = vshll.u32 %v8793_v28, 16  ;;  %v8892_v40 = vld [vmem:[%s11401_s0 + $0x4c] sm:$0xf] }
  0x10   :  { %v997_v8 = vsel %vm8809_vm4, %v992_v57, %v996_v49  ;;  %v1002_v13 = vrot.slane %v1001_v58, 4  ;;  %v1024_v16 = vrot.slane %v1022_v44, 4  ;;  %v1028_v18 = vshll.u32 %v8842_v60, 16  ;;  %v8908_v52 = vld [vmem:[%s11401_s0 + $0x44] sm:$0x1] }
  0x11   :  { %11613 = vst [vmem:[#allocation8_spill] sm:$0xff] %v8849_v62  ;;  %7786 = vmatprep.mubr.msk.bf16.mxu0 %vm415_vm1, %v8849_v62  ;;  %v1015_v17 = vor.u32 %v1014_v3, %v1011_v0  ;;  %v8867_v19 = vcombine.low %v8847_v61, %v8857_v4  ;;  %v1057_v20 = vshrl.u32 %v8847_v61, 16  ;;  %v1020_v24 = vrot.slane %v1018_v15, 5  ;;  %v8919_v0 = vld [vmem:[%s11401_s0 + $0x54] sm:$0xf] }
  0x12   :  { %v1007_v22 = vsel %vm8809_vm4, %v1002_v13, %v1006_v53  ;;  %v1060_v25 = vshll.u32 %v8847_v61, 16  ;;  %v1070_v26 = vshrl.u32 %v8857_v4, 16  ;;  %v1030_v33 = vrot.slane %v1028_v18, 5 }
  0x13   :  { %11614 = vst [vmem:[#allocation9_spill] sm:$0xff] %v8867_v19  ;;  %v8884_v29 = vcombine.low %v997_v8, %v1007_v22  ;;  %v1016_v30 = vrot.slane %v1015_v17, 4  ;;  %v1035_v34 = vrot.slane %v1033_v55, 4  ;;  %v1025_v35 = vor.u32 %v1024_v16, %v1020_v24  ;;  %v8927_v16 = vld [vmem:[%s11401_s0 + $0x58] sm:$0xf] }
  0x14   :  { %v1038_v36 = vrot.slane %v1036_v59, 5  ;;  %v1042_v38 = vshll.u32 %v8827_v51, 16  ;;  %v1048_v39 = vrot.slane %v1046_v63, 4  ;;  %v1052_v43 = vshll.u32 %v8873_v21, 16 }
  0x15   :  { %11615 = vst [vmem:[#allocation10_spill] sm:$0xff] %v8884_v29  ;;  %7787 = vmatmul.mubr.msk.bf16.vlgmr.msra.gmra.mrb[0].mxu0 %vm415_vm1, %v8884_v29  ;;  %v1021_v41 = vsel %vm8809_vm4, %v1016_v30, %v1020_v24  ;;  %v8901_v44 = vcombine.low %v8882_v27, %v8892_v40  ;;  %v1081_v45 = vshrl.u32 %v8882_v27, 16  ;;  %v1026_v46 = vrot.slane %v1025_v35, 4 }
  0x16   :  { %7531 = vmatmul.mubr.msk.bf16.gmra.mrb[8].mxu1 %vm415_vm1, %v8867_v19  ;;  %7851 = vmatpush3.bf16.msra.mxu0 %v4462_v50  ;;  %v1039_v47 = vor.u32 %v1038_v36, %v1035_v34  ;;  %v1044_v48 = vrot.slane %v1042_v38, 5  ;;  %v1084_v49 = vshll.u32 %v8882_v27, 16  ;;  %v1054_v53 = vrot.slane %v1052_v43, 5 }
  0x17   :  { %11616 = vst [vmem:[#allocation11_spill] sm:$0xff] %v8901_v44  ;;  %7534 = vmatprep.mubr.msk.bf16.mxu1 %vm415_vm1, %v8901_v44  ;;  %v1094_v55 = vshrl.u32 %v8892_v40, 16  ;;  %v1059_v56 = vrot.slane %v1057_v20, 4  ;;  %v1062_v57 = vrot.slane %v1060_v25, 5  ;;  %v1031_v50 = vsel %vm8809_vm4, %v1026_v46, %v1030_v33  ;;  %v8942_v33 = vld [vmem:[%s11401_s0 + $0x50] sm:$0x1] }
  0x18   :  { %v1040_v58 = vrot.slane %v1039_v47, 4  ;;  %v1049_v59 = vor.u32 %v1048_v39, %v1044_v48  ;;  %v1066_v63 = vshll.u32 %v8857_v4, 16  ;;  %v8921_v3 = vcombine.low %v1021_v41, %v1031_v50  ;;  %v8952_v39 = vld [vmem:[%s11401_s0 + $0x60] sm:$0xf] }
  0x19   :  { %v1063_v8 = vor.u32 %v1062_v57, %v1059_v56  ;;  %v1072_v13 = vrot.slane %v1070_v26, 4  ;;  %v1076_v15 = vshll.u32 %v8908_v52, 16  ;;  %v8933_v22 = vcombine.low %v8919_v0, %v8927_v16 }
  0x1a   :  { %11617 = vst [vmem:[#allocation12_spill] sm:$0xff] %v8921_v3  ;;  %v1045_v17 = vsel %vm8809_vm4, %v1040_v58, %v1044_v48  ;;  %v1050_v18 = vrot.slane %v1049_v59, 4  ;;  %v1068_v20 = vrot.slane %v1066_v63, 5  ;;  %7790 = vmatprep.mubr.msk.bf16.mxu0 %vm415_vm1, %v8921_v3  ;;  %v1105_v26 = vshrl.u32 %v8919_v0, 16  ;;  %v8962_v48 = vld [vmem:[%s11401_s0 + $0x64] sm:$0xf] }
  0x1b   :  { %11618 = vst [vmem:[#allocation13_spill] sm:$0xff] %v8933_v22  ;;  %v1064_v24 = vrot.slane %v1063_v8, 4  ;;  %v1078_v25 = vrot.slane %v1076_v15, 5  ;;  %v1108_v30 = vshll.u32 %v8919_v0, 16  ;;  %v1118_v36 = vshrl.u32 %v8927_v16, 16 }
  0x1c   :  { %v1055_v34 = vsel %vm8809_vm4, %v1050_v18, %v1054_v53  ;;  %v1073_v35 = vor.u32 %v1072_v13, %v1068_v20  ;;  %v1083_v38 = vrot.slane %v1081_v45, 4  ;;  %v1086_v46 = vrot.slane %v1084_v49, 5  ;;  %v8976_v63 = vld [vmem:[%s11401_s0 + $0x5c] sm:$0x1] }
  0x1d   :  { %v8954_v41 = vcombine.low %v1045_v17, %v1055_v34  ;;  %v1069_v43 = vsel %vm8809_vm4, %v1064_v24, %v1068_v20  ;;  %v1090_v47 = vshll.u32 %v8892_v40, 16  ;;  %v1096_v45 = vrot.slane %v1094_v55, 4  ;;  %v8986_v17 = vld [vmem:[%s11401_s0 + $0x6c] sm:$0xf] }
  0x1e   :  { %7535 = vmatmul.mubr.msk.bf16.gmra.mrb[12].mxu1 %vm415_vm1, %v8933_v22  ;;  %v1074_v53 = vrot.slane %v1073_v35, 4  ;;  %v1100_v56 = vshll.u32 %v8942_v33, 16  ;;  %v8967_v57 = vcombine.low %v8952_v39, %v8962_v48  ;;  %v1087_v50 = vor.u32 %v1086_v46, %v1083_v38 }
  0x1f   :  { %11619 = vst [vmem:[#allocation14_spill] sm:$0xff] %v8954_v41  ;;  %7791 = vmatmul.mubr.msk.bf16.gmra.mrb[4].mxu0 %vm415_vm1, %v8954_v41  ;;  %v1092_v49 = vrot.slane %v1090_v47, 5  ;;  %v1129_v58 = vshrl.u32 %v8952_v39, 16  ;;  %v1132_v59 = vshll.u32 %v8952_v39, 16  ;;  %v1142_v13 = vshrl.u32 %v8962_v48, 16 }
  0x20   :  { %11620 = vst [vmem:[#allocation15_spill] sm:$0xff] %v8967_v57  ;;  %v1079_v55 = vsel %vm8809_vm4, %v1074_v53, %v1078_v25  ;;  %v1102_v8 = vrot.slane %v1100_v56, 5  ;;  %7538 = vmatprep.mubr.msk.bf16.mxu1 %vm415_vm1, %v8967_v57  ;;  %v1107_v15 = vrot.slane %v1105_v26, 4  ;;  %v1088_v20 = vrot.slane %v1087_v50, 4  ;;  %v8993_v25 = vld [vmem:[%s11401_s0 + $0x70] sm:$0xf] }
  0x21   :  { %v8988_v18 = vcombine.low %v1069_v43, %v1079_v55  ;;  %v1097_v24 = vor.u32 %v1096_v45, %v1092_v49  ;;  %v1110_v34 = vrot.slane %v1108_v30, 5  ;;  %v1114_v35 = vshll.u32 %v8927_v16, 16  ;;  %v9013_v55 = vld [vmem:[%s11401_s0 + $0x68] sm:$0x1] }
  0x22   :  { %v1120_v38 = vrot.slane %v1118_v36, 4  ;;  %v1124_v26 = vshll.u32 %v8976_v63, 16  ;;  %v8999_v46 = vcombine.low %v8986_v17, %v8993_v25  ;;  %v1093_v30 = vsel %vm8809_vm4, %v1088_v20, %v1092_v49 }
  0x23   :  { %11621 = vst [vmem:[#allocation16_spill] sm:$0xff] %v8988_v18  ;;  %7794 = vmatprep.mubr.msk.bf16.mxu0 %vm415_vm1, %v8988_v18  ;;  %v1098_v43 = vrot.slane %v1097_v24, 4  ;;  %v1111_v47 = vor.u32 %v1110_v34, %v1107_v15  ;;  %v1153_v53 = vshrl.u32 %v8986_v17, 16  ;;  %v1116_v45 = vrot.slane %v1114_v35, 5  ;;  %v9020_v34 = vld [vmem:[%s11401_s0 + $0x78] sm:$0xf] }
  0x24   :  { %11622 = vst [vmem:[#allocation17_spill] sm:$0xff] %v8999_v46  ;;  %v1126_v56 = vrot.slane %v1124_v26, 5  ;;  %v1156_v36 = vshll.u32 %v8986_v17, 16  ;;  %v1166_v50 = vshrl.u32 %v8993_v25, 16  ;;  %v1131_v20 = vrot.slane %v1129_v58, 4  ;;  %11623 = vst [vmem:[#allocation18_spill] sm:$0xff] %v9020_v34 }
  0x25   :  { %v1103_v49 = vsel %vm8809_vm4, %v1098_v43, %v1102_v8  ;;  %v1112_v15 = vrot.slane %v1111_v47, 4  ;;  %v1134_v24 = vrot.slane %v1132_v59, 5  ;;  %v1121_v26 = vor.u32 %v1120_v38, %v1116_v45 }
  0x26   :  { %7539 = vmatmul.mubr.msk.bf16.gmra.mrb[16].mxu1 %vm415_vm1, %v8999_v46  ;;  %v9022_v35 = vcombine.low %v1093_v30, %v1103_v49  ;;  %v1138_v9 = vshll.u32 %v8962_v48, 16  ;;  %v1144_v7 = vrot.slane %v1142_v13, 4  ;;  %v9028_v46 = vld [vmem:[%s11401_s0 + $0x7c] sm:$0xf]  ;;  %v1148_v8 = vshll.u32 %v9013_v55, 16 }
  0x27   :  { %11625 = vst [vmem:[#allocation20_spill] sm:$0xff] %v9028_v46  ;;  %v1117_v58 = vsel %vm8809_vm4, %v1112_v15, %v1116_v45  ;;  %v1135_v59 = vor.u32 %v1134_v24, %v1131_v20  ;;  %v9035_v43 = vcombine.low %v9020_v34, %v9028_v46  ;;  %v1122_v38 = vrot.slane %v1121_v26, 4  ;;  %v9044_v45 = vld [vmem:[%s11401_s0 + $0x74] sm:$0x1] }
  0x28   :  { %11624 = vst [vmem:[#allocation19_spill] sm:$0xff] %v9022_v35  ;;  %7795 = vmatmul.mubr.msk.bf16.gmra.mrb[8].mxu0 %vm415_vm1, %v9022_v35  ;;  %v1140_v13 = vrot.slane %v1138_v9, 5  ;;  %v1177_v30 = vshrl.u32 %v9020_v34, 16  ;;  %v1180_v47 = vshll.u32 %v9020_v34, 16  ;;  %v1150_v15 = vrot.slane %v1148_v8, 5 }
  0x29   :  { %11626 = vst [vmem:[#allocation21_spill] sm:$0xff] %v9035_v43  ;;  %v1136_v49 = vrot.slane %v1135_v59, 4  ;;  %7542 = vmatprep.mubr.msk.bf16.mxu1 %vm415_vm1, %v9035_v43  ;;  %v1190_v20 = vshrl.u32 %v9028_v46, 16  ;;  %v1155_v24 = vrot.slane %v1153_v53, 4  ;;  %v9052_v9 = vld [vmem:[%s11400_s1 + $0xc] sm:$0x3]  ;;  %v1127_v26 = vsel %vm8809_vm4, %v1122_v38, %v1126_v56 }
  0x2a   :  { %v1145_v57 = vor.u32 %v1144_v7, %v1140_v13  ;;  %v1158_v22 = vrot.slane %v1156_v36, 5  ;;  %v1162_v44 = vshll.u32 %v8993_v25, 16  ;;  %v9060_v59 = vld [vmem:[%s11401_s0 + $0x84] sm:$0xf]  ;;  %v9065_v53 = vld [vmem:[%s11401_s0 + $0x88] sm:$0xf]  ;;  %8635 = vmatprep.subr.msk.bf16.mxu0 %vm512_vm0, %v9052_v9  ;;  %v9069_v8 = vcombine.low %v1117_v58, %v1127_v26 }
  0x2b   :  { %v1141_v7 = vsel %vm8809_vm4, %v1136_v49, %v1140_v13  ;;  %v1168_v56 = vrot.slane %v1166_v50, 4  ;;  %v1172_v36 = vshll.u32 %v9044_v45, 16  ;;  %v9076_v54 = vcombine.low %v9060_v59, %v9065_v53 }
  0x2c   :  { %11627 = vst [vmem:[#allocation22_spill] sm:$0xff] %v9069_v8  ;;  %v1146_v38 = vrot.slane %v1145_v57, 4  ;;  %v1159_v43 = vor.u32 %v1158_v22, %v1155_v24  ;;  %v1164_v19 = vrot.slane %v1162_v44, 5  ;;  %7798 = vmatprep.mubr.msk.bf16.mxu0 %vm415_vm1, %v9069_v8  ;;  %v1201_v58 = vshrl.u32 %v9060_v59, 16  ;;  %v9086_v57 = vld [vmem:[%s11401_s0 + $0x80] sm:$0x1] }
  0x2d   :  { %11628 = vst [vmem:[#allocation23_spill] sm:$0xff] %v9076_v54  ;;  %v1174_v31 = vrot.slane %v1172_v36, 5  ;;  %v1204_v26 = vshll.u32 %v9060_v59, 16  ;;  %v1214_v13 = vshrl.u32 %v9065_v53, 16  ;;  %11629 = vst [vmem:[#allocation24_spill] sm:$0xff] %v9086_v57  ;;  %v1179_v49 = vrot.slane %v1177_v30, 4 }
  0x2e   :  { %v1151_v44 = vsel %vm8809_vm4, %v1146_v38, %v1150_v15  ;;  %v1160_v22 = vrot.slane %v1159_v43, 4  ;;  %v1169_v50 = vor.u32 %v1168_v56, %v1164_v19  ;;  %7543 = vmatmul.mubr.msk.bf16.gmra.mrb[20].mxu1 %vm415_vm1, %v9076_v54  ;;  %v9095_v24 = vld [vmem:[%s11401_s0 + $0x90] sm:$0xf]  ;;  %v1182_v12 = vrot.slane %v1180_v47, 5  ;;  %v9103_v43 = vld [vmem:[%s11401_s0 + $0x94] sm:$0xf] }
  0x2f   :  { %11630 = vst [vmem:[#allocation25_spill] sm:$0xff] %v9095_v24  ;;  %v9097_v36 = vcombine.low %v1141_v7, %v1151_v44  ;;  %v1186_v8 = vshll.u32 %v9028_v46, 16  ;;  %v1192_v35 = vrot.slane %v1190_v20, 4  ;;  %11632 = vst [vmem:[#allocation27_spill] sm:$0xff] %v9103_v43  ;;  %v1196_v56 = vshll.u32 %v9086_v57, 16 }
  0x30   :  { %v1165_v15 = vsel %vm8809_vm4, %v1160_v22, %v1164_v19  ;;  %v1170_v30 = vrot.slane %v1169_v50, 4  ;;  %v9110_v38 = vcombine.low %v9095_v24, %v9103_v43  ;;  %v1183_v47 = vor.u32 %v1182_v12, %v1179_v49  ;;  %v9119_v19 = vld [vmem:[%s11401_s0 + $0x8c] sm:$0x1] }
  0x31   :  { %11631 = vst [vmem:[#allocation26_spill] sm:$0xff] %v9097_v36  ;;  %7799 = vmatmul.mubr.msk.bf16.gmra.mrb[12].mxu0 %vm415_vm1, %v9097_v36  ;;  %v1188_v20 = vrot.slane %v1186_v8, 5  ;;  %v1225_v7 = vshrl.u32 %v9095_v24, 16  ;;  %v1228_v44 = vshll.u32 %v9095_v24, 16  ;;  %v1198_v50 = vrot.slane %v1196_v56, 5 }
  0x32   :  { %11633 = vst [vmem:[#allocation28_spill] sm:$0xff] %v9110_v38  ;;  %v1175_v22 = vsel %vm8809_vm4, %v1170_v30, %v1174_v31  ;;  %7546 = vmatprep.mubr.msk.bf16.mxu1 %vm415_vm1, %v9110_v38  ;;  %v1238_v54 = vshrl.u32 %v9103_v43, 16  ;;  %v1203_v12 = vrot.slane %v1201_v58, 4  ;;  %v9129_v8 = vld [vmem:[%s11401_s0 + $0x9c] sm:$0xf]  ;;  %v1184_v36 = vrot.slane %v1183_v47, 4 }
  0x33   :  { %11634 = vst [vmem:[#allocation29_spill] sm:$0xff] %v9129_v8  ;;  %v9131_v49 = vcombine.low %v1165_v15, %v1175_v22  ;;  %v1193_v18 = vor.u32 %v1192_v35, %v1188_v20  ;;  %v1206_v41 = vrot.slane %v1204_v26, 5  ;;  %v9136_v31 = vld [vmem:[%s11401_s0 + $0xa0] sm:$0xf]  ;;  %v1210_v30 = vshll.u32 %v9065_v53, 16 }
  0x34   :  { %11636 = vst [vmem:[#allocation31_spill] sm:$0xff] %v9136_v31  ;;  %v1216_v56 = vrot.slane %v1214_v13, 4  ;;  %v1220_v58 = vshll.u32 %v9119_v19, 16  ;;  %v9142_v38 = vcombine.low %v9129_v8, %v9136_v31  ;;  %v1189_v35 = vsel %vm8809_vm4, %v1184_v36, %v1188_v20 }
  0x35   :  { %11635 = vst [vmem:[#allocation30_spill] sm:$0xff] %v9131_v49  ;;  %7802 = vmatprep.mubr.msk.bf16.mxu0 %vm415_vm1, %v9131_v49  ;;  %v1194_v26 = vrot.slane %v1193_v18, 4  ;;  %v1207_v15 = vor.u32 %v1206_v41, %v1203_v12  ;;  %v1249_v47 = vshrl.u32 %v9129_v8, 16  ;;  %v1212_v22 = vrot.slane %v1210_v30, 5  ;;  %v9156_v49 = vld [vmem:[%s11401_s0 + $0x98] sm:$0x1] }
  0x36   :  { %11637 = vst [vmem:[#allocation32_spill] sm:$0xff] %v9142_v38  ;;  %v1222_v3 = vrot.slane %v1220_v58, 5  ;;  %7547 = vmatmul.mubr.msk.bf16.gmra.mrb[24].mxu1 %vm415_vm1, %v9142_v38  ;;  %v1252_v13 = vshll.u32 %v9129_v8, 16  ;;  %v1262_v29 = vshrl.u32 %v9136_v31, 16  ;;  %11638 = vst [vmem:[#allocation33_spill] sm:$0xff] %v9156_v49  ;;  %v1227_v36 = vrot.slane %v1225_v7, 4 }
  0x37   :  { %v1199_v18 = vsel %vm8809_vm4, %v1194_v26, %v1198_v50  ;;  %v1208_v41 = vrot.slane %v1207_v15, 4  ;;  %v1230_v20 = vrot.slane %v1228_v44, 5  ;;  %v9163_v12 = vld [vmem:[%s11401_s0 + $0xa8] sm:$0xf]  ;;  %v1217_v58 = vor.u32 %v1216_v56, %v1212_v22  ;;  %v9171_v8 = vld [vmem:[%s11401_s0 + $0xac] sm:$0xf] }
  0x38   :  { %11639 = vst [vmem:[#allocation34_spill] sm:$0xff] %v9163_v12  ;;  %v9165_v30 = vcombine.low %v1189_v35, %v1199_v18  ;;  %v1234_v38 = vshll.u32 %v9103_v43, 16  ;;  %v1240_v62 = vrot.slane %v1238_v54, 4  ;;  %v1244_v50 = vshll.u32 %v9156_v49, 16 }
  0x39   :  { %v1213_v7 = vsel %vm8809_vm4, %v1208_v41, %v1212_v22  ;;  %v1231_v44 = vor.u32 %v1230_v20, %v1227_v36  ;;  %v9178_v26 = vcombine.low %v9163_v12, %v9171_v8  ;;  %v1218_v56 = vrot.slane %v1217_v58, 4  ;;  %v9187_v22 = vld [vmem:[%s11401_s0 + $0xa4] sm:$0x1] }
  0x3a   :  { %11640 = vst [vmem:[#allocation35_spill] sm:$0xff] %v9165_v30  ;;  %7803 = vmatmul.mubr.msk.bf16.gmra.mrb[16].mxu0 %vm415_vm1, %v9165_v30  ;;  %v1236_v54 = vrot.slane %v1234_v38, 5  ;;  %v1273_v35 = vshrl.u32 %v9163_v12, 16  ;;  %v1276_v15 = vshll.u32 %v9163_v12, 16  ;;  %11642 = vst [vmem:[#allocation37_spill] sm:$0xff] %v9187_v22  ;;  %v1246_v41 = vrot.slane %v1244_v50, 5 }
  0x3b   :  { %11641 = vst [vmem:[#allocation36_spill] sm:$0xff] %v9178_v26  ;;  %v1232_v18 = vrot.slane %v1231_v44, 4  ;;  %7550 = vmatprep.mubr.msk.bf16.mxu1 %vm415_vm1, %v9178_v26  ;;  %v1286_v36 = vshrl.u32 %v9171_v8, 16  ;;  %v1251_v20 = vrot.slane %v1249_v47, 4  ;;  %v9195_v38 = vld [vmem:[%s11401_s0 + $0xb4] sm:$0xf]  ;;  %v1223_v58 = vsel %vm8809_vm4, %v1218_v56, %v1222_v3 }
  0x3c   :  { %11643 = vst [vmem:[#allocation38_spill] sm:$0xff] %v9195_v38  ;;  %v1241_v30 = vor.u32 %v1240_v62, %v1236_v54  ;;  %v1254_v12 = vrot.slane %v1252_v13, 5  ;;  %v1258_v49 = vshll.u32 %v9136_v31, 16  ;;  %v9203_v44 = vld [vmem:[%s11401_s0 + $0xb8] sm:$0xf]  ;;  %v9210_v50 = vcombine.low %v1213_v7, %v1223_v58 }
  0x3d   :  { %v9208_v47 = vld [vmem:[%s11400_s1 + $0x4] sm:$0x3]  ;;  %v1237_v26 = vsel %vm8809_vm4, %v1232_v18, %v1236_v54  ;;  %v1264_v3 = vrot.slane %v1262_v29, 4  ;;  %v1268_v62 = vshll.u32 %v9187_v22, 16  ;;  %v9219_v57 = vcombine.low %v9195_v38, %v9203_v44  ;;  %v9224_v7 = vld [vmem:[%s11401_s0 + $0xb0] sm:$0x1] }
  0x3e   :  { %11644 = vst [vmem:[#allocation39_spill] sm:$0xff] %v9208_v47  ;;  %11645 = vst [vmem:[#allocation40_spill] sm:$0xff] %v9210_v50  ;;  %8630 = vmatprep.subr.msk.bf16.mxu1 %vm512_vm0, %v9208_v47  ;;  %v1242_v13 = vrot.slane %v1241_v30, 4  ;;  %v1255_v56 = vor.u32 %v1254_v12, %v1251_v20  ;;  %v1260_v31 = vrot.slane %v1258_v49, 5  ;;  %v9229_v29 = vld [vmem:[%s11401_s0 + $0xd8] sm:$0xf]  ;;  %7806 = vmatprep.mubr.msk.bf16.mxu0 %vm415_vm1, %v9210_v50 }
  0x3f   :  { %11646 = vst [vmem:[#allocation41_spill] sm:$0xff] %v9219_v57  ;;  %11647 = vst [vmem:[#allocation42_spill] sm:$0xff] %v9229_v29  ;;  %v1270_v30 = vrot.slane %v1268_v62, 5  ;;  %v1297_v49 = vshrl.u32 %v9195_v38, 16  ;;  %v1300_v12 = vshll.u32 %v9195_v38, 16  ;;  %v1310_v54 = vshrl.u32 %v9203_v44, 16  ;;  %7551 = vmatmul.mubr.msk.bf16.gmra.mrb[28].mxu1 %vm415_vm1, %v9219_v57 }
  0x40   :  { %v9239_v18 = vld [vmem:[%s11401_s0 + $0xdc] sm:$0xf]  ;;  %v1247_v20 = vsel %vm8809_vm4, %v1242_v13, %v1246_v41  ;;  %v1256_v58 = vrot.slane %v1255_v56, 4  ;;  %v1265_v47 = vor.u32 %v1264_v3, %v1260_v31  ;;  %v1275_v62 = vrot.slane %v1273_v35, 4 }
  0x41   :  { %11648 = vst [vmem:[#allocation43_spill] sm:$0xff] %v9239_v18  ;;  %v9245_v50 = vcombine.low %v1237_v26, %v1247_v20  ;;  %v1278_v22 = vrot.slane %v1276_v15, 5  ;;  %v1282_v38 = vshll.u32 %v9171_v8, 16  ;;  %v1288_v43 = vrot.slane %v1286_v36, 4  ;;  %v9256_v3 = vld [vmem:[%s11401_s0 + $0xbc] sm:$0x1] }
  0x42   :  { %v1261_v46 = vsel %vm8809_vm4, %v1256_v58, %v1260_v31  ;;  %v1266_v24 = vrot.slane %v1265_v47, 4  ;;  %v1292_v34 = vshll.u32 %v9224_v7, 16  ;;  %v6797_v41 = vcombine.low %v9229_v29, %v9239_v18  ;;  %v9264_v31 = vld [vmem:[%s11401_s0 + $0xe4] sm:$0xf]  ;;  %v9269_v36 = vld [vmem:[%s11401_s0 + $0xe8] sm:$0xf] }
  0x43   :  { %11649 = vst [vmem:[#allocation44_spill] sm:$0xff] %v9245_v50  ;;  %7807 = vmatmul.mubr.msk.bf16.gmra.mrb[20].mxu0 %vm415_vm1, %v9245_v50  ;;  %v1279_v35 = vor.u32 %v1278_v22, %v1275_v62  ;;  %v1284_v15 = vrot.slane %v1282_v38, 5  ;;  %11650 = vst [vmem:[#allocation45_spill] sm:$0xff] %v9264_v31  ;;  %v1299_v22 = vrot.slane %v1297_v49, 4  ;;  %v1302_v62 = vrot.slane %v1300_v12, 5 }
  0x44   :  { %v1271_v13 = vsel %vm8809_vm4, %v1266_v24, %v1270_v30  ;;  %v1294_v56 = vrot.slane %v1292_v34, 5  ;;  %7554 = vmatprep.mubr.msk.bf16.mxu1 %vm415_vm1, %v6797_v41  ;;  %v1306_v26 = vshll.u32 %v9203_v44, 16  ;;  %v1312_v57 = vrot.slane %v1310_v54, 4  ;;  %v9286_v34 = vld [vmem:[%s11401_s0 + $0xc0] sm:$0xf] }
  0x45   :  { %v9275_v38 = vcombine.low %v1261_v46, %v1271_v13  ;;  %v1280_v20 = vrot.slane %v1279_v35, 4  ;;  %v1289_v58 = vor.u32 %v1288_v43, %v1284_v15  ;;  %v1316_v50 = vshll.u32 %v9256_v3, 16  ;;  %11653 = vst [vmem:[#allocation48_spill] sm:$0xff] %v9286_v34  ;;  %v9297_v12 = vld [vmem:[%s11401_s0 + $0xc4] sm:$0xf] }
  0x46   :  { %v9281_v47 = vcombine.low %v9264_v31, %v9269_v36  ;;  %v11654_v46 = vrot.slane %v8753_v11, 5  ;;  %v1303_v49 = vor.u32 %v1302_v62, %v1299_v22  ;;  %v1308_v54 = vrot.slane %v1306_v26, 5  ;;  %v9304_v35 = vld [vmem:[%s11401_s0 + $0xc8] sm:$0x1] }
  0x47   :  { %11651 = vst [vmem:[#allocation46_spill] sm:$0xff] %v9275_v38  ;;  %7810 = vmatprep.mubr.msk.bf16.mxu0 %vm415_vm1, %v9275_v38  ;;  %v1285_v43 = vsel %vm8809_vm4, %v1280_v20, %v1284_v15  ;;  %v1290_v30 = vrot.slane %v1289_v58, 4  ;;  %v1318_v41 = vrot.slane %v1316_v50, 5  ;;  %v9309_v15 = vld [vmem:[%s11401_s0 + $0xf0] sm:$0xf]  ;;  %v3822_v26 = vshrl.u32 %v9286_v34, 16 }
  0x48   :  { %11652 = vst [vmem:[#allocation47_spill] sm:$0xff] %v9281_v47  ;;  %v2435_v24 = vrot.slane %v11654_v46, 4  ;;  %7555 = vmatmul.mubr.msk.bf16.gmra.mrb[32].mxu1 %vm415_vm1, %v9281_v47  ;;  %v1304_v22 = vrot.slane %v1303_v49, 4  ;;  %v3825_v50 = vshll.u32 %v9286_v34, 16  ;;  %v9318_v20 = vld [vmem:[%s11401_s0 + $0xf4] sm:$0xf]  ;;  %v1313_v62 = vor.u32 %v1312_v57, %v1308_v54 }
  0x49   :  { %v1295_v13 = vsel %vm8809_vm4, %v1290_v30, %v1294_v56  ;;  %v3831_v46 = vshll.u32 %v9297_v12, 16  ;;  %v3835_v47 = vshrl.u32 %v9297_v12, 16  ;;  %v3824_v30 = vrot.slane %v3822_v26, 4 }
  0x4a   :  { %v9320_v58 = vcombine.low %v1285_v43, %v1295_v13  ;;  %v1309_v56 = vsel %vm8809_vm4, %v1304_v22, %v1308_v54  ;;  %v3827_v49 = vrot.slane %v3825_v50, 5  ;;  %v3841_v38 = vshll.u32 %v9304_v35, 16  ;;  %v9338_v54 = vld [vmem:[%s11401_s0 + $0xfc] sm:$0xf]  ;;  %v9343_v22 = vld [vmem:[%s11401_s0 + $0x100] sm:$0xf] }
  0x4b   :  { %v1314_v18 = vrot.slane %v1313_v62, 4  ;;  %v3833_v29 = vrot.slane %v3831_v46, 5  ;;  %v3837_v31 = vrot.slane %v3835_v47, 4  ;;  %v9331_v57 = vcombine.low %v9309_v15, %v9318_v20 }
  0x4c   :  { %11655 = vst [vmem:[#allocation49_spill] sm:$0xff] %v9320_v58  ;;  %7811 = vmatmul.mubr.msk.bf16.gmra.mrb[24].mxu0 %vm415_vm1, %v9320_v58  ;;  %v2429_v43 = vrot.slane %v8768_v14, 5  ;;  %v2436_v13 = vrot.slane %v8802_v32, 5  ;;  %v3828_v34 = vor.u32 %v3827_v49, %v3824_v30  ;;  %v3843_v50 = vrot.slane %v3841_v38, 5 }
  0x4d   :  { %11656 = vst [vmem:[#allocation50_spill] sm:$0xff] %v9331_v57  ;;  %v1319_v47 = vsel %vm8809_vm4, %v1314_v18, %v1318_v41  ;;  %v3838_v26 = vor.u32 %v3837_v31, %v3833_v29  ;;  %7558 = vmatprep.mubr.msk.bf16.mxu1 %vm415_vm1, %v9331_v57  ;;  %vm2414_vm5 = vcmask 1042432   ;;  %vm2415_vm6 = vcmask 1046532   ;;  %v9364_v31 = vld [vmem:[%s11401_s0 + $0x108] sm:$0xf] }
  0x4e   :  { %v9349_v14 = vcombine.low %v1309_v56, %v1319_v47  ;;  %v3829_v32 = vrot.slane %v3828_v34, 4  ;;  %v6911_v62 = vrot.slane %v8726_v5, 9  ;;  %vm9352_vm7 = vmor %vm2414_vm5, %vm2415_vm6  ;;  %v11657_v30 = vmov 0  ;;  %v9369_v5 = vld [vmem:[%s11401_s0 + $0x10c] sm:$0xf] }
  0x4f   :  { %v3839_v46 = vrot.slane %v3838_v26, 4  ;;  %v11658_v30 = vsel %vm9352_vm7, 4294967295, %v11657_v30  ;;  %v2426_v49 = vrot.slane %v8731_v6, 5  ;;  %v9359_v18 = vcombine.low %v9338_v54, %v9343_v22 }
  0x50   :  { %11659 = vst [vmem:[#allocation51_spill] sm:$0xff] %v11658_v30  ;;  %7814 = vmatprep.mubr.msk.bf16.mxu0 %vm415_vm1, %v9349_v14  ;;  %v3834_v6 = vsel %vm8809_vm4, %v3829_v32, %v3833_v29  ;;  %v11661_v38 = vrot.slane %v8753_v11, 5  ;;  %v11662_v34 = vrot.slane %v8748_v10, 9  ;;  %v2437_v29 = vsel %vm9352_vm7, %v2435_v24, %v2436_v13  ;;  %v9412_v13 = vld [vmem:[%s11401_s0 + $0x120] sm:$0xf]  ;;  %v11872_v30 = vld [vmem:[#allocation10_spill] sm:$0xff] }
  0x51   :  { %11660 = vst [vmem:[#allocation52_spill] sm:$0xff] %v9359_v18  ;;  %v3844_v56 = vsel %vm8809_vm4, %v3839_v46, %v3843_v50  ;;  %v2427_v47 = vsel %vm9352_vm7, %v6911_v62, %v2426_v49  ;;  %v2428_v26 = vrot.slane %v2426_v49, 4  ;;  %7559 = vmatmul.mubr.msk.bf16.gmra.mrb[36].mxu1 %vm415_vm1, %v9359_v18  ;;  %v9395_v10 = vcombine.low %v9364_v31, %v9369_v5  ;;  %v9400_v50 = vld [vmem:[%s11401_s0 + $0x114] sm:$0xf]  ;;  %v9405_v62 = vld [vmem:[%s11401_s0 + $0x118] sm:$0xf] }
  0x52   :  { %v2434_v41 = vsel %vm9352_vm7, %v11662_v34, %v11661_v38  ;;  %v9389_v32 = vcombine.low %v3834_v6, %v3844_v56  ;;  %v6913_v49 = vrot.slane %v8787_v23, 9  ;;  %v2440_v6 = vrot.slane %v8793_v28, 5 }
  0x53   :  { %v9391_v11 = vcombine.low %v2434_v41, %v2437_v29  ;;  %11665 = vst [vmem:[#allocation55_spill] sm:$0xff] %v9395_v10  ;;  %v2430_v24 = vsel %vm9352_vm7, %v2428_v26, %v2429_v43  ;;  %7562 = vmatprep.mubr.msk.bf16.mxu1 %vm415_vm1, %v9395_v10  ;;  %v2443_v38 = vrot.slane %v8842_v60, 5  ;;  %v9426_v43 = vld [vmem:[%s11401_s0 + $0x124] sm:$0xf]  ;;  %v9430_v34 = vcombine.low %v9400_v50, %v9405_v62 }
  0x54   :  { %11663 = vst [vmem:[#allocation53_spill] sm:$0xff] %v9389_v32  ;;  %7815 = vmatmul.mubr.msk.bf16.gmra.mrb[28].mxu0 %vm415_vm1, %v9389_v32  ;;  %v9416_v46 = vcombine.low %v2427_v47, %v2430_v24  ;;  %v2441_v41 = vsel %vm9352_vm7, %v6913_v49, %v2440_v6  ;;  %v2442_v23 = vrot.slane %v2440_v6, 4  ;;  %v2447_v28 = vrot.slane %v8827_v51, 5 }
  0x55   :  { %11664 = vst [vmem:[#allocation54_spill] sm:$0xff] %v9391_v11  ;;  %11667 = vst [vmem:[#allocation57_spill] sm:$0xff] %v9430_v34  ;;  %v9439_v60 = vcombine.low %v9412_v13, %v9426_v43  ;;  %v6914_v47 = vrot.slane %v8817_v42, 9  ;;  %v2450_v29 = vrot.slane %v8873_v21, 5  ;;  %v6915_v49 = vrot.slane %v8847_v61, 9 }
  0x56   :  { %11666 = vst [vmem:[#allocation56_spill] sm:$0xff] %v9416_v46  ;;  %7852 = vmatprep.mubr.msk.bf16.mxu0 %vm415_vm1, %v9416_v46  ;;  %v2444_v56 = vsel %vm9352_vm7, %v2442_v23, %v2443_v38  ;;  %v2449_v26 = vrot.slane %v2447_v28, 4  ;;  %v2454_v51 = vrot.slane %v8857_v4, 5  ;;  %v2457_v6 = vrot.slane %v8908_v52, 5  ;;  %v9455_v38 = vld [vmem:[%s11401_s0 + $0x12c] sm:$0xf] }
  0x57   :  { %11668 = vst [vmem:[#allocation58_spill] sm:$0xff] %v9439_v60  ;;  %v9445_v24 = vcombine.low %v2441_v41, %v2444_v56  ;;  %v4964_v42 = vsel %vm512_vm0, %v9052_v9, 0  ;;  %v9464_v21 = vld [vmem:[%s11401_s0 + $0x130] sm:$0xf]  ;;  %v9469_v61 = vld [vmem:[%s11401_s0 + $0x138] sm:$0xf]  ;;  %v2448_v41 = vsel %vm9352_vm7, %v6914_v47, %v2447_v28 }
  0x58   :  { %11670 = vst [vmem:[#allocation60_spill] sm:$0xff] %v9469_v61  ;;  %v2456_v4 = vrot.slane %v2454_v51, 4  ;;  %v9474_v52 = vld [vmem:[%s11401_s0 + $0x13c] sm:$0xf]  ;;  %v9479_v9 = vld [vmem:[%s11400_s1 + $0xe] sm:$0x3]  ;;  %v2451_v23 = vsel %vm9352_vm7, %v2449_v26, %v2450_v29  ;;  %v9497_v28 = vcombine.low %v9455_v38, %v9464_v21 }
  0x59   :  { %11669 = vst [vmem:[#allocation59_spill] sm:$0xff] %v9445_v24  ;;  %7563 = vmatmul.mubr.msk.bf16.gmra.mrb[40].mxu1 %vm415_vm1, %v9430_v34  ;;  %11671 = vst [vmem:[#allocation61_spill] sm:$0xff] %v9479_v9  ;;  %v2461_v56 = vrot.slane %v8892_v40, 5  ;;  %v937_v32 = vshrl.u32 %v8712_v1, 16  ;;  %v940_v47 = vshll.u32 %v8712_v1, 16  ;;  %v946_v40 = vshll.u32 %v8717_v2, 16 }
  0x5a   :  { %7566 = vmatprep.mubr.msk.bf16.mxu1 %vm415_vm1, %v9439_v60  ;;  %v2455_v60 = vsel %vm9352_vm7, %v6915_v49, %v2454_v51  ;;  %v2458_v34 = vsel %vm9352_vm7, %v2456_v4, %v2457_v6  ;;  %11672 = vst [vmem:[#allocation62_spill] sm:$0xff] %v9497_v28  ;;  %v950_v26 = vshrl.u32 %v8717_v2, 16  ;;  %v9504_v29 = vcombine.low %v9469_v61, %v9474_v52  ;;  %v9518_v2 = vld [vmem:[%s11401_s0 + $0x144] sm:$0xf] }
  0x5b   :  { %v6916_v49 = vrot.slane %v8882_v27, 9  ;;  %v2468_v51 = vrot.slane %v8927_v16, 5  ;;  %v9510_v6 = vcombine.low %v2448_v41, %v2451_v23  ;;  %v2463_v1 = vrot.slane %v2461_v56, 4  ;;  %11676 = vst [vmem:[#allocation66_spill] sm:$0xff] %v9518_v2 }
  0x5c   :  { %7853 = vmatmul.mubr.msk.bf16.vlgmr.msra.gmra.mrb[0].mxu0 %vm415_vm1, %v9391_v11  ;;  %11673 = vst [vmem:[#allocation63_spill] sm:$0xff] %v9504_v29  ;;  %v2464_v4 = vrot.slane %v8942_v33, 5  ;;  %v6917_v10 = vrot.slane %v8919_v0, 9  ;;  %v2471_v16 = vrot.slane %v8976_v63, 5  ;;  %v2475_v33 = vrot.slane %v8962_v48, 5 }
  0x5d   :  { %7917 = vmatpush3.bf16.msra.mxu0 %v4964_v42  ;;  %7856 = vmatprep.mubr.msk.bf16.mxu0 %vm415_vm1, %v9445_v24  ;;  %11674 = vst [vmem:[#allocation64_spill] sm:$0xff] %v9510_v6  ;;  %v9512_v42 = vcombine.low %v2455_v60, %v2458_v34  ;;  %v2470_v27 = vrot.slane %v2468_v51, 4  ;;  %v9527_v34 = vld [vmem:[%s11401_s0 + $0x148] sm:$0xf]  ;;  %v939_v60 = vrot.slane %v937_v32, 4  ;;  %v942_v41 = vrot.slane %v940_v47, 5 }
  0x5e   :  { %8636 = vmatprep.subr.msk.bf16.mxu0 %vm512_vm0, %v9479_v9  ;;  %11677 = vst [vmem:[#allocation67_spill] sm:$0xff] %v9527_v34  ;;  %v9530_v23 = vrot.slane %v946_v40, 5  ;;  %v952_v18 = vrot.slane %v950_v26, 4  ;;  %v2462_v0 = vsel %vm9352_vm7, %v6916_v49, %v2461_v56  ;;  %v9539_v63 = vld [vmem:[%s11401_s0 + $0x150] sm:$0xf]  ;;  %v9550_v32 = vcombine.low %v9518_v2, %v9527_v34 }
  0x5f   :  { %11675 = vst [vmem:[#allocation65_spill] sm:$0xff] %v9512_v42  ;;  %11678 = vst [vmem:[#allocation68_spill] sm:$0xff] %v9539_v63  ;;  %v9544_v48 = vld [vmem:[%s11401_s0 + $0x154] sm:$0xf]  ;;  %v6918_v47 = vrot.slane %v8952_v39, 9  ;;  %v2477_v56 = vrot.slane %v2475_v33, 4  ;;  %v2465_v26 = vsel %vm9352_vm7, %v2463_v1, %v2464_v4  ;;  %v2469_v49 = vsel %vm9352_vm7, %v6917_v10, %v2468_v51 }
  0x60   :  { %11679 = vst [vmem:[#allocation69_spill] sm:$0xff] %v9550_v32  ;;  %v2478_v40 = vrot.slane %v9013_v55, 5  ;;  %v943_v57 = vor.u32 %v942_v41, %v939_v60  ;;  %v953_v39 = vor.u32 %v952_v18, %v9530_v23  ;;  %v9566_v55 = vcombine.low %v9539_v63, %v9544_v48  ;;  %v9584_v18 = vld [vmem:[%s11401_s0 + $0x160] sm:$0xf] }
  0x61   :  { %7567 = vmatmul.mubr.msk.bf16.gmra.mrb[44].mxu1 %vm415_vm1, %v9497_v28  ;;  %v2482_v28 = vrot.slane %v8993_v25, 5  ;;  %v2476_v1 = vsel %vm9352_vm7, %v6918_v47, %v2475_v33  ;;  %v9579_v25 = vld [vmem:[%s11401_s0 + $0x15c] sm:$0xf]  ;;  %11684 = vst [vmem:[#allocation74_spill] sm:$0xff] %v9584_v18  ;;  %v2485_v4 = vrot.slane %v9044_v45, 5  ;;  %v2496_v60 = vrot.slane %v9065_v53, 5 }
  0x62   :  { %7570 = vmatprep.mubr.msk.bf16.mxu1 %vm415_vm1, %v9504_v29  ;;  %v2472_v29 = vsel %vm9352_vm7, %v2470_v27, %v2471_v16  ;;  %11680 = vst [vmem:[#allocation70_spill] sm:$0xff] %v9566_v55  ;;  %v2479_v10 = vsel %vm9352_vm7, %v2477_v56, %v2478_v40  ;;  %11683 = vst [vmem:[#allocation73_spill] sm:$0xff] %v9579_v25  ;;  %v6921_v27 = vrot.slane %v9060_v59, 9  ;;  %v9591_v16 = vrot.slane %v943_v57, 4  ;;  %v11687_v45 = vld [vmem:[#allocation18_spill] sm:$0xff]  ;;  %v11690_v53 = vld [vmem:[#allocation25_spill] sm:$0xff] }
  0x63   :  { %v2484_v51 = vrot.slane %v2482_v28, 4  ;;  %v9593_v33 = vrot.slane %v953_v39, 4  ;;  %v2499_v41 = vrot.slane %v9119_v19, 5  ;;  %v6920_v47 = vrot.slane %v11687_v45, 9  ;;  %v9609_v59 = vld [vmem:[%s11401_s0 + $0x168] sm:$0xf] }
  0x64   :  { %7857 = vmatmul.mubr.msk.bf16.gmra.mrb[4].mxu0 %vm415_vm1, %v9510_v6  ;;  %v9568_v6 = vcombine.low %v2462_v0, %v2465_v26  ;;  %v9599_v0 = vcombine.low %v2476_v1, %v2479_v10  ;;  %11688 = vst [vmem:[#allocation18_spill] sm:$0xff] %v9609_v59  ;;  %v9614_v57 = vld [vmem:[%s11401_s0 + $0x16c] sm:$0xf]  ;;  %v6922_v19 = vrot.slane %v11690_v53, 9  ;;  %v2497_v26 = vsel %vm9352_vm7, %v6921_v27, %v2496_v60  ;;  %v11692_v39 = vld [vmem:[#allocation27_spill] sm:$0xff] }
  0x65   :  { %7860 = vmatprep.mubr.msk.bf16.mxu0 %vm415_vm1, %v9512_v42  ;;  %v9570_v42 = vcombine.low %v2469_v49, %v2472_v29  ;;  %v6919_v29 = vrot.slane %v8986_v17, 9  ;;  %v9603_v17 = vcombine.low %v9579_v25, %v9584_v18  ;;  %11689 = vst [vmem:[#allocation77_spill] sm:$0xff] %v9614_v57  ;;  %v11691_v56 = vld [vmem:[#allocation20_spill] sm:$0xff]  ;;  %v2498_v49 = vrot.slane %v2496_v60, 4  ;;  %v9640_v60 = vld [vmem:[%s11401_s0 + $0x174] sm:$0xf] }
  0x66   :  { %11681 = vst [vmem:[#allocation71_spill] sm:$0xff] %v9568_v6  ;;  %11685 = vst [vmem:[#allocation75_spill] sm:$0xff] %v9599_v0  ;;  %v2489_v40 = vrot.slane %v11691_v56, 5  ;;  %v2503_v1 = vrot.slane %v11692_v39, 5  ;;  %v2486_v45 = vsel %vm9352_vm7, %v2484_v51, %v2485_v4  ;;  %v11693_v53 = vld [vmem:[#allocation24_spill] sm:$0xff]  ;;  %v9633_v56 = vcombine.low %v9609_v59, %v9614_v57  ;;  %v11699_v4 = vld [vmem:[#allocation29_spill] sm:$0xff] }
  0x67   :  { %11682 = vst [vmem:[#allocation72_spill] sm:$0xff] %v9570_v42  ;;  %11686 = vst [vmem:[#allocation76_spill] sm:$0xff] %v9603_v17  ;;  %v2483_v10 = vsel %vm9352_vm7, %v6919_v29, %v2482_v28  ;;  %v2500_v27 = vsel %vm9352_vm7, %v2498_v49, %v2499_v41  ;;  %v9645_v28 = vld [vmem:[%s11401_s0 + $0x178] sm:$0xf]  ;;  %v6923_v39 = vrot.slane %v11699_v4, 9  ;;  %v11701_v49 = vld [vmem:[#allocation37_spill] sm:$0xff] }
  0x68   :  { %11695 = vst [vmem:[#allocation25_spill] sm:$0xff] %v9633_v56  ;;  %11696 = vst [vmem:[#allocation20_spill] sm:$0xff] %v9640_v60  ;;  %v2505_v29 = vrot.slane %v2503_v1, 4  ;;  %v9649_v51 = vcombine.low %v2497_v26, %v2500_v27  ;;  %v9654_v24 = vcombine.low %v2483_v10, %v2486_v45  ;;  %v2490_v11 = vsel %vm9352_vm7, %v6920_v47, %v2489_v40  ;;  %v11706_v10 = vld [vmem:[#allocation34_spill] sm:$0xff]  ;;  %v11897_v37 = vld [vmem:[#allocation65_spill] sm:$0xff] }
  0x69   :  { %7571 = vmatmul.mubr.msk.bf16.gmra.mrb[48].mxu1 %vm415_vm1, %v9550_v32  ;;  %v11694_v32 = vld [vmem:[#allocation33_spill] sm:$0xff]  ;;  %11697 = vst [vmem:[#allocation27_spill] sm:$0xff] %v9645_v28  ;;  %v2491_v46 = vrot.slane %v2489_v40, 4  ;;  %v9669_v26 = vcombine.low %v9640_v60, %v9645_v28  ;;  %v6924_v45 = vrot.slane %v11706_v10, 9  ;;  %v2517_v27 = vrot.slane %v9171_v8, 5 }
  0x6a   :  { %7574 = vmatprep.mubr.msk.bf16.mxu1 %vm415_vm1, %v9566_v55  ;;  %v2492_v55 = vrot.slane %v11693_v53, 5  ;;  %11698 = vst [vmem:[#allocation24_spill] sm:$0xff] %v9649_v51  ;;  %v11700_v53 = vld [vmem:[#allocation31_spill] sm:$0xff]  ;;  %11702 = vst [vmem:[#allocation33_spill] sm:$0xff] %v9654_v24  ;;  %v2524_v8 = vrot.slane %v9203_v44, 5 }
  0x6b   :  { %v2510_v41 = vrot.slane %v11700_v53, 5  ;;  %11704 = vst [vmem:[#allocation31_spill] sm:$0xff] %v9669_v26  ;;  %v11707_v53 = vld [vmem:[#allocation38_spill] sm:$0xff] }
  0x6c   :  { %7861 = vmatmul.mubr.msk.bf16.gmra.mrb[8].mxu0 %vm415_vm1, %v9568_v6  ;;  %v2506_v6 = vrot.slane %v11694_v32, 5  ;;  %v2504_v32 = vsel %vm9352_vm7, %v6922_v19, %v2503_v1  ;;  %v9663_v19 = vld [vmem:[%s11401_s0 + $0x8] sm:$0x1]  ;;  %v2526_v10 = vrot.slane %v2524_v8, 4 }
  0x6d   :  { %7864 = vmatprep.mubr.msk.bf16.mxu0 %vm415_vm1, %v9570_v42  ;;  %v2513_v42 = vrot.slane %v11701_v49, 5  ;;  %11703 = vst [vmem:[#allocation29_spill] sm:$0xff] %v9663_v19  ;;  %v2511_v47 = vsel %vm9352_vm7, %v6923_v39, %v2510_v41  ;;  %v2512_v40 = vrot.slane %v2510_v41, 4  ;;  %v956_v39 = vshll.u32 %v9663_v19, 16 }
  0x6e   :  { %v2507_v9 = vsel %vm9352_vm7, %v2505_v29, %v2506_v6  ;;  %v9680_v6 = vld [vmem:[%s11401_s0 + $0x180] sm:$0xf]  ;;  %v2520_v29 = vrot.slane %v9224_v7, 5  ;;  %v6925_v41 = vrot.slane %v11707_v53, 9  ;;  %v2527_v49 = vrot.slane %v9256_v3, 5 }
  0x6f   :  { %v9671_v1 = vcombine.low %v2504_v32, %v2507_v9  ;;  %v949_v9 = vsel %vm8809_vm4, %v9591_v16, %v9530_v23  ;;  %v9692_v32 = vld [vmem:[%s11401_s0 + $0x184] sm:$0xf]  ;;  %v2514_v4 = vsel %vm9352_vm7, %v2512_v40, %v2513_v42  ;;  %v2518_v23 = vsel %vm9352_vm7, %v6924_v45, %v2517_v27 }
  0x70   :  { %v9701_v7 = vcombine.low %v2511_v47, %v2514_v4  ;;  %v2519_v16 = vrot.slane %v2517_v27, 4  ;;  %v2493_v42 = vsel %vm9352_vm7, %v2491_v46, %v2492_v55  ;;  %v958_v40 = vrot.slane %v956_v39, 5 }
  0x71   :  { %7575 = vmatmul.mubr.msk.bf16.gmra.mrb[52].mxu1 %vm415_vm1, %v9603_v17  ;;  %11705 = vst [vmem:[#allocation37_spill] sm:$0xff] %v9671_v1  ;;  %v2525_v44 = vsel %vm9352_vm7, %v6925_v41, %v2524_v8  ;;  %v9714_v47 = vcombine.low %v9680_v6, %v9692_v32  ;;  %v2528_v46 = vsel %vm9352_vm7, %v2526_v10, %v2527_v49  ;;  %v2538_v53 = vrot.slane %v9269_v36, 5  ;;  %v9763_v41 = vld [vmem:[%s11401_s0 + $0xec] sm:$0x1]  ;;  %v11714_v8 = vld [vmem:[#allocation39_spill] sm:$0xff]  ;;  %v11717_v10 = vld [vmem:[#allocation10_spill] sm:$0xff] }
  0x72   :  { %7578 = vmatprep.mubr.msk.bf16.mxu1 %vm415_vm1, %v9633_v56  ;;  %11708 = vst [vmem:[#allocation34_spill] sm:$0xff] %v9701_v7  ;;  %v2521_v45 = vsel %vm9352_vm7, %v2519_v16, %v2520_v29  ;;  %v959_v3 = vsel %vm8809_vm4, %v9593_v33, %v958_v40  ;;  %v9725_v55 = vcombine.low %v2490_v11, %v2493_v42  ;;  %v9736_v29 = vld [vmem:[%s11401_s0 + $0x18c] sm:$0xf]  ;;  %v9741_v33 = vld [vmem:[%s11401_s0 + $0x190] sm:$0xf]  ;;  %v11727_v17 = vld [vmem:[#allocation43_spill] sm:$0xff] }
  0x73   :  { %11709 = vst [vmem:[#allocation38_spill] sm:$0xff] %v9714_v47  ;;  %v9718_v27 = vcombine.low %v2518_v23, %v2521_v45  ;;  %v6846_v4 = vcombine.low %v949_v9, %v959_v3  ;;  %v9727_v39 = vcombine.low %v2525_v44, %v2528_v46  ;;  %v9749_v11 = vcombine.low %v9736_v29, %v9741_v33  ;;  %v11715_v16 = vld [vmem:[#allocation8_spill] sm:$0xff] }
  0x74   :  { %7865 = vmatmul.mubr.msk.bf16.gmra.mrb[12].mxu0 %vm415_vm1, %v9599_v0  ;;  %11711 = vst [vmem:[#allocation79_spill] sm:$0xff] %v9725_v55  ;;  %v4371_v9 = vrot.slane %v9297_v12, 5  ;;  %v2900_v23 = vsel %vm512_vm0, %v11714_v8, 0  ;;  %v11716_v49 = vld [vmem:[#allocation48_spill] sm:$0xff]  ;;  %v4374_v44 = vrot.slane %v9304_v35, 5  ;;  %v11718_v12 = vld [vmem:[#allocation45_spill] sm:$0xff] }
  0x75   :  { %7868 = vmatprep.mubr.msk.bf16.mxu0 %vm415_vm1, %v9654_v24  ;;  %11710 = vst [vmem:[#allocation78_spill] sm:$0xff] %v9718_v27  ;;  %11712 = vst [vmem:[#allocation80_spill] sm:$0xff] %v9727_v39  ;;  %v7077_v42 = vrot.slane %v11716_v49, 9  ;;  %v6927_v45 = vrot.slane %v11718_v12, 9  ;;  %v2540_v3 = vrot.slane %v2538_v53, 4  ;;  %v2541_v46 = vrot.slane %v9763_v41, 5 }
  0x76   :  { %11713 = vst [vmem:[#allocation81_spill] sm:$0xff] %v9749_v11  ;;  %v4373_v40 = vrot.slane %v4371_v9, 4  ;;  %v2545_v8 = vrot.slane %v9318_v20, 5  ;;  %v9791_v49 = vld [vmem:[%s11401_s0 + $0xf8] sm:$0x1]  ;;  %v2566_v56 = vrot.slane %v9405_v62, 5 }
  0x77   :  { %v11732_v0 = vld [vmem:[#allocation19_spill] sm:$0xff]  ;;  %v6935_v19 = vrot.slane %v9518_v2, 9  ;;  %v6936_v2 = vrot.slane %v9539_v63, 9 }
  0x78   :  { %v4375_v35 = vsel %vm9352_vm7, %v4373_v40, %v4374_v44  ;;  %v2568_v24 = vrot.slane %v2566_v56, 4 }
  0x79   :  { %7579 = vmatmul.mubr.msk.bf16.gmra.mrb[56].mxu1 %vm415_vm1, %v9669_v26  ;;  %v6929_v26 = vrot.slane %v9338_v54, 9 }
  0x7a   :  { %7582 = vmatprep.mubr.msk.bf16.mxu1 %vm415_vm1, %v9714_v47  ;;  %v11722_v47 = vld [vmem:[#allocation14_spill] sm:$0xff] }
  0x7c   :  { %7869 = vmatmul.mubr.msk.bf16.gmra.mrb[16].mxu0 %vm415_vm1, %v9725_v55  ;;  %v11731_v55 = vld [vmem:[#allocation16_spill] sm:$0xff] }
  0x7d   :  { %7872 = vmatprep.mubr.msk.bf16.mxu0 %vm415_vm1, %v9649_v51 }
  0x81   :  { %7583 = vmatmul.mubr.msk.bf16.gmra.mrb[60].mxu1 %vm415_vm1, %v9749_v11  ;;  %v2548_v11 = vrot.slane %v9791_v49, 5 }
  0x82   :  { %7588 = vmatprep.mubr.msk.bf16.mxu1 %vm415_vm1, %v6846_v4  ;;  %v4372_v4 = vsel %vm9352_vm7, %v7077_v42, %v4371_v9  ;;  %v9797_v9 = vld [vmem:[%s11401_s0 + $0x104] sm:$0x1] }
  0x83   :  { %v9802_v42 = vld [vmem:[%s11401_s0 + $0x4] sm:$0xf]  ;;  %v9805_v40 = vcombine.low %v4372_v4, %v4375_v35  ;;  %v9820_v4 = vld [vmem:[%s11401_s0] sm:$0xf] }
  0x84   :  { %7873 = vmatmul.mubr.msk.bf16.gmra.mrb[20].mxu0 %vm415_vm1, %v9671_v1  ;;  %11723 = vst [vmem:[#allocation48_spill] sm:$0xff] %v9820_v4 }
  0x85   :  { %7876 = vmatprep.mubr.msk.bf16.mxu0 %vm415_vm1, %v9701_v7  ;;  %11719 = vst [vmem:[#allocation39_spill] sm:$0xff] %v9805_v40  ;;  %v9835_v7 = vld [vmem:[%s11400_s1 + $0x6] sm:$0x3] }
  0x89   :  { %7589 = vmatmul.mubr.msk.bf16.vlgmr.msra.gmra.mrb[0].mxu1 %vm415_vm1, %v11715_v16  ;;  %v2539_v16 = vsel %vm9352_vm7, %v6927_v45, %v2538_v53  ;;  %v11721_v45 = vld [vmem:[#allocation12_spill] sm:$0xff]  ;;  %v2555_v53 = vrot.slane %v9797_v9, 5 }
  0x8a   :  { %7592 = vmatprep.mubr.msk.bf16.mxu1 %vm415_vm1, %v11717_v10  ;;  %7653 = vmatpush3.bf16.msra.mxu1 %v2900_v23  ;;  %v2542_v23 = vsel %vm9352_vm7, %v2540_v3, %v2541_v46  ;;  %v2552_v10 = vrot.slane %v9343_v22, 5  ;;  %v6928_v3 = vrot.slane %v9309_v15, 9  ;;  %v2547_v46 = vrot.slane %v2545_v8, 4 }
  0x8b   :  { %v9807_v44 = vcombine.low %v2539_v16, %v2542_v23  ;;  %v11724_v16 = vrot.slane %v9802_v42, 5  ;;  %8631 = vmatprep.subr.msk.bf16.mxu1 %vm512_vm0, %v9835_v7 }
  0x8c   :  { %7877 = vmatmul.mubr.msk.bf16.gmra.mrb[24].mxu0 %vm415_vm1, %v9718_v27  ;;  %v2549_v35 = vsel %vm9352_vm7, %v2547_v46, %v2548_v11  ;;  %v9846_v27 = vld [vmem:[%s11401_s0 + $0x110] sm:$0x1] }
  0x8d   :  { %7880 = vmatprep.mubr.msk.bf16.mxu0 %vm415_vm1, %v9727_v39  ;;  %11720 = vst [vmem:[#allocation8_spill] sm:$0xff] %v9807_v44  ;;  %v2554_v39 = vrot.slane %v2552_v10, 4  ;;  %v9825_v23 = vrot.slane %v11724_v16, 4  ;;  %v2546_v16 = vsel %vm9352_vm7, %v6928_v3, %v2545_v8  ;;  %v2553_v8 = vsel %vm9352_vm7, %v6929_v26, %v2552_v10  ;;  %v9861_v3 = vld [vmem:[%s11401_s0 + $0x11c] sm:$0x1] }
  0x8e   :  { %v6930_v26 = vrot.slane %v9364_v31, 9  ;;  %v2562_v10 = vrot.slane %v9846_v27, 5  ;;  %v2569_v1 = vrot.slane %v9861_v3, 5 }
  0x8f   :  { %11725 = vst [vmem:[#allocation45_spill] sm:$0xff] %v9825_v23  ;;  %v2556_v11 = vsel %vm9352_vm7, %v2554_v39, %v2555_v53  ;;  %v6931_v39 = vrot.slane %v9400_v50, 9  ;;  %v9905_v23 = vld [vmem:[%s11401_s0 + $0x128] sm:$0x1] }
  0x90   :  { %v9872_v53 = vcombine.low %v2553_v8, %v2556_v11  ;;  %v2570_v51 = vsel %vm9352_vm7, %v2568_v24, %v2569_v1  ;;  %v9932_v1 = vld [vmem:[%s11401_s0 + $0x140] sm:$0x1]  ;;  %v2587_v24 = vrot.slane %v9474_v52, 5 }
  0x91   :  { %7593 = vmatmul.mubr.msk.bf16.gmra.mrb[4].mxu1 %vm415_vm1, %v11721_v45  ;;  %v11726_v45 = vld [vmem:[#allocation42_spill] sm:$0xff]  ;;  %11737 = vst [vmem:[#allocation86_spill] sm:$0xff] %v9932_v1 }
  0x92   :  { %7596 = vmatprep.mubr.msk.bf16.mxu1 %vm415_vm1, %v11722_v47  ;;  %11728 = vst [vmem:[#allocation42_spill] sm:$0xff] %v9835_v7  ;;  %v2559_v47 = vrot.slane %v9369_v5, 5  ;;  %11730 = vst [vmem:[#allocation82_spill] sm:$0xff] %v9872_v53  ;;  %v2567_v7 = vsel %vm9352_vm7, %v6931_v39, %v2566_v56  ;;  %v9915_v56 = vld [vmem:[%s11401_s0 + $0x134] sm:$0x1]  ;;  %v6933_v39 = vrot.slane %v9455_v38, 9 }
  0x93   :  { %11733 = vst [vmem:[#allocation83_spill] sm:$0xff] %v9915_v56  ;;  %v9923_v11 = vcombine.low %v2567_v7, %v2570_v51  ;;  %v6934_v51 = vrot.slane %v9469_v61, 9 }
  0x94   :  { %7881 = vmatmul.mubr.msk.bf16.gmra.mrb[28].mxu0 %vm415_vm1, %v9805_v40  ;;  %v2561_v46 = vrot.slane %v2559_v47, 4  ;;  %v2560_v40 = vsel %vm9352_vm7, %v6930_v26, %v2559_v47  ;;  %v2580_v47 = vrot.slane %v9464_v21, 5 }
  0x95   :  { %7884 = vmatprep.mubr.msk.bf16.mxu0 %vm415_vm1, %v9807_v44  ;;  %v9867_v44 = vcombine.low %v2546_v16, %v2549_v35  ;;  %v2573_v16 = vrot.slane %v9426_v43, 5  ;;  %11735 = vst [vmem:[#allocation85_spill] sm:$0xff] %v9923_v11  ;;  %v11736_v35 = vld [vmem:[#allocation22_spill] sm:$0xff] }
  0x96   :  { %v2581_v7 = vsel %vm9352_vm7, %v6933_v39, %v2580_v47 }
  0x97   :  { %11729 = vst [vmem:[#allocation43_spill] sm:$0xff] %v9867_v44  ;;  %v2575_v8 = vrot.slane %v2573_v16, 4 }
  0x99   :  { %7597 = vmatmul.mubr.msk.bf16.gmra.mrb[8].mxu1 %vm415_vm1, %v11731_v55  ;;  %v2563_v55 = vsel %vm9352_vm7, %v2561_v46, %v2562_v10  ;;  %v6932_v10 = vrot.slane %v9412_v13, 9  ;;  %v2576_v46 = vrot.slane %v9905_v23, 5 }
  0x9a   :  { %7600 = vmatprep.mubr.msk.bf16.mxu1 %vm415_vm1, %v11732_v0  ;;  %v9921_v26 = vcombine.low %v2560_v40, %v2563_v55  ;;  %v2582_v0 = vrot.slane %v2580_v47, 4  ;;  %v2594_v55 = vrot.slane %v9527_v34, 5  ;;  %v2601_v40 = vrot.slane %v9544_v48, 5 }
  0x9b   :  { %v2574_v4 = vsel %vm9352_vm7, %v6932_v10, %v2573_v16  ;;  %v9963_v16 = vld [vmem:[%s11401_s0 + $0x158] sm:$0x1]  ;;  %v2589_v10 = vrot.slane %v2587_v24, 4 }
  0x9c   :  { %7885 = vmatmul.mubr.msk.bf16.gmra.mrb[32].mxu0 %vm415_vm1, %v9867_v44  ;;  %11734 = vst [vmem:[#allocation84_spill] sm:$0xff] %v9921_v26  ;;  %v11738_v44 = vld [vmem:[#allocation26_spill] sm:$0xff]  ;;  %11740 = vst [vmem:[#allocation88_spill] sm:$0xff] %v9963_v16  ;;  %v2596_v39 = vrot.slane %v2594_v55, 4  ;;  %v2603_v61 = vrot.slane %v2601_v40, 4 }
  0x9d   :  { %7888 = vmatprep.mubr.msk.bf16.mxu0 %vm415_vm1, %v9872_v53  ;;  %v2583_v53 = vrot.slane %v9915_v56, 5  ;;  %v9945_v56 = vld [vmem:[%s11401_s0 + $0x14c] sm:$0x1] }
  0x9e   :  { %11739 = vst [vmem:[#allocation87_spill] sm:$0xff] %v9945_v56 }
  0x9f   :  { %v2584_v47 = vsel %vm9352_vm7, %v2582_v0, %v2583_v53  ;;  %v9980_v0 = vld [vmem:[%s11401_s0 + $0x164] sm:$0x1]  ;;  %v2615_v53 = vrot.slane %v9614_v57, 5 }
  0xa0   :  { %11742 = vst [vmem:[#allocation90_spill] sm:$0xff] %v9980_v0 }
  0xa1   :  { %7601 = vmatmul.mubr.msk.bf16.gmra.mrb[12].mxu1 %vm415_vm1, %v11736_v35  ;;  %v2577_v35 = vsel %vm9352_vm7, %v2575_v8, %v2576_v46  ;;  %v2597_v8 = vrot.slane %v9945_v56, 5  ;;  %v9983_v56 = vcombine.low %v2581_v7, %v2584_v47  ;;  %v2595_v46 = vsel %vm9352_vm7, %v6935_v19, %v2594_v55  ;;  %v10005_v19 = vld [vmem:[%s11401_s0 + $0x17c] sm:$0x1] }
  0xa2   :  { %7604 = vmatprep.mubr.msk.bf16.mxu1 %vm415_vm1, %v11738_v44  ;;  %v2590_v44 = vrot.slane %v9932_v1, 5  ;;  %v2608_v1 = vrot.slane %v9584_v18, 5  ;;  %v9974_v34 = vcombine.low %v2574_v4, %v2577_v35  ;;  %v9992_v4 = vld [vmem:[%s11401_s0 + $0x170] sm:$0x1]  ;;  %v2622_v35 = vrot.slane %v9645_v28, 5  ;;  %11746 = vst [vmem:[#allocation93_spill] sm:$0xff] %v10005_v19 }
  0xa3   :  { %11743 = vst [vmem:[#allocation91_spill] sm:$0xff] %v9983_v56  ;;  %11744 = vst [vmem:[#allocation92_spill] sm:$0xff] %v9992_v4  ;;  %v2598_v47 = vsel %vm9352_vm7, %v2596_v39, %v2597_v8  ;;  %v1330_v55 = vshll.u32 %v11727_v17, 16  ;;  %v2617_v8 = vrot.slane %v2615_v53, 4  ;;  %v2618_v57 = vrot.slane %v9992_v4, 5 }
  0xa4   :  { %7889 = vmatmul.mubr.msk.bf16.gmra.mrb[36].mxu0 %vm415_vm1, %v9921_v26  ;;  %11741 = vst [vmem:[#allocation89_spill] sm:$0xff] %v9974_v34  ;;  %v2588_v26 = vsel %vm9352_vm7, %v6934_v51, %v2587_v24  ;;  %v2591_v7 = vsel %vm9352_vm7, %v2589_v10, %v2590_v44  ;;  %v6937_v24 = vrot.slane %v9579_v25, 9  ;;  %v11747_v51 = vld [vmem:[#allocation35_spill] sm:$0xff]  ;;  %v2610_v28 = vrot.slane %v2608_v1, 4 }
  0xa5   :  { %7892 = vmatprep.mubr.msk.bf16.mxu0 %vm415_vm1, %v9923_v11  ;;  %v2604_v11 = vrot.slane %v9963_v16, 5  ;;  %v11745_v16 = vld [vmem:[#allocation30_spill] sm:$0xff]  ;;  %v2611_v44 = vrot.slane %v9980_v0, 5  ;;  %v6938_v10 = vrot.slane %v9609_v59, 9  ;;  %v6939_v18 = vrot.slane %v9640_v60, 9 }
  0xa6   :  { %v2625_v63 = vrot.slane %v10005_v19, 5  ;;  %v11749_v0 = vshll.u32 %v11726_v45, 16  ;;  %v10034_v60 = vcombine.low %v2595_v46, %v2598_v47 }
  0xa7   :  { %v2605_v39 = vsel %vm9352_vm7, %v2603_v61, %v2604_v11  ;;  %v10028_v61 = vcombine.low %v2588_v26, %v2591_v7  ;;  %v10030_v11 = vrot.slane %v1330_v55, 5  ;;  %v10045_v26 = vld [vmem:[%s11401_s0 + $0xe0] sm:$0x1]  ;;  %v2616_v7 = vsel %vm9352_vm7, %v6938_v10, %v2615_v53 }
  0xa8   :  { %v1326_v59 = vrot.slane %v11749_v0, 5  ;;  %11752 = vst [vmem:[#allocation95_spill] sm:$0xff] %v10034_v60  ;;  %v2612_v0 = vsel %vm9352_vm7, %v2610_v28, %v2611_v44  ;;  %v1354_v28 = vshll.u32 %v9269_v36, 16  ;;  %v6940_v53 = vrot.slane %v9680_v6, 9 }
  0xa9   :  { %7605 = vmatmul.mubr.msk.bf16.gmra.mrb[16].mxu1 %vm415_vm1, %v11745_v16  ;;  %v2602_v16 = vsel %vm9352_vm7, %v6936_v2, %v2601_v40  ;;  %v11748_v2 = vshrl.u32 %v11726_v45, 16  ;;  %11750 = vst [vmem:[#allocation94_spill] sm:$0xff] %v10028_v61  ;;  %v2609_v45 = vsel %vm9352_vm7, %v6937_v24, %v2608_v1  ;;  %v2629_v1 = vrot.slane %v9692_v32, 5  ;;  %v11754_v24 = vld [vmem:[#allocation40_spill] sm:$0xff] }
  0xaa   :  { %7608 = vmatprep.mubr.msk.bf16.mxu1 %vm415_vm1, %v11747_v51  ;;  %v2624_v51 = vrot.slane %v2622_v35, 4  ;;  %v10036_v19 = vcombine.low %v2602_v16, %v2605_v39  ;;  %v2623_v16 = vsel %vm9352_vm7, %v6939_v18, %v2622_v35  ;;  %v1340_v55 = vshll.u32 %v10045_v26, 16  ;;  %v11757_v18 = vld [vmem:[#allocation44_spill] sm:$0xff] }
  0xab   :  { %v1323_v40 = vrot.slane %v11748_v2, 4  ;;  %v11755_v44 = vshrl.u32 %v11718_v12, 16  ;;  %v11756_v39 = vshll.u32 %v11718_v12, 16  ;;  %v2631_v2 = vrot.slane %v2629_v1, 4 }
  0xac   :  { %7893 = vmatmul.mubr.msk.bf16.gmra.mrb[40].mxu0 %vm415_vm1, %v9974_v34  ;;  %v11751_v34 = vshrl.u32 %v11727_v17, 16  ;;  %11753 = vst [vmem:[#allocation96_spill] sm:$0xff] %v10036_v19  ;;  %v10054_v17 = vld [vmem:[%s11401_s0 + $0x188] sm:$0x1]  ;;  %v2626_v46 = vsel %vm9352_vm7, %v2624_v51, %v2625_v63  ;;  %v10073_v63 = vcombine.low %v2609_v45, %v2612_v0  ;;  %v1378_v51 = vshll.u32 %v9318_v20, 16 }
  0xad   :  { %7896 = vmatprep.mubr.msk.bf16.mxu0 %vm415_vm1, %v9983_v56  ;;  %v1327_v47 = vor.u32 %v1326_v59, %v1323_v40  ;;  %v1347_v10 = vrot.slane %v11755_v44, 4  ;;  %v2632_v59 = vrot.slane %v10054_v17, 5  ;;  %v10081_v40 = vrot.slane %v1354_v28, 5 }
  0xae   :  { %v1336_v4 = vrot.slane %v11751_v34, 4  ;;  %v2619_v34 = vsel %vm9352_vm7, %v2617_v8, %v2618_v57  ;;  %v1350_v8 = vrot.slane %v11756_v39, 5  ;;  %11758 = vst [vmem:[#allocation97_spill] sm:$0xff] %v10073_v63  ;;  %v11761_v44 = vshrl.u32 %v9269_v36, 16  ;;  %v10098_v36 = vld [vmem:[%s11401_s0 + $0x194] sm:$0x1] }
  0xaf   :  { %v10075_v35 = vcombine.low %v2616_v7, %v2619_v34  ;;  %v10089_v45 = vsel %vm9352_vm7, %v6940_v53, %v2629_v1  ;;  %v1328_v0 = vrot.slane %v1327_v47, 4  ;;  %v6941_v7 = vrot.slane %v9736_v29, 9 }
  0xb0   :  { %v1337_v57 = vor.u32 %v1336_v4, %v10030_v11  ;;  %v10079_v4 = vcombine.low %v2623_v16, %v2626_v46  ;;  %v1360_v12 = vrot.slane %v11761_v44, 4  ;;  %v1402_v34 = vshll.u32 %v9343_v22, 16 }
  0xb1   :  { %7609 = vmatmul.mubr.msk.bf16.gmra.mrb[20].mxu1 %vm415_vm1, %v11754_v24  ;;  %11759 = vst [vmem:[#allocation98_spill] sm:$0xff] %v10075_v35  ;;  %v1342_v16 = vrot.slane %v1340_v55, 5  ;;  %v1351_v46 = vor.u32 %v1350_v8, %v1347_v10  ;;  %v1364_v39 = vshll.u32 %v9763_v41, 16  ;;  %v11762_v1 = vshrl.u32 %v9309_v15, 16 }
  0xb2   :  { %7612 = vmatprep.mubr.msk.bf16.mxu1 %vm415_vm1, %v11757_v18  ;;  %11760 = vst [vmem:[#allocation99_spill] sm:$0xff] %v10079_v4  ;;  %v1338_v28 = vrot.slane %v1337_v57, 4  ;;  %v11763_v47 = vshll.u32 %v9309_v15, 16  ;;  %v10105_v25 = vrot.slane %v1378_v51, 5  ;;  %v11764_v18 = vshrl.u32 %v9318_v20, 16 }
  0xb3   :  { %v1371_v53 = vrot.slane %v11762_v1, 4  ;;  %v10111_v55 = vsel %vm9352_vm7, %v2631_v2, %v2632_v59  ;;  %v1361_v24 = vor.u32 %v1360_v12, %v10081_v40  ;;  %v11765_v10 = vshrl.u32 %v9338_v54, 16 }
  0xb4   :  { %7897 = vmatmul.mubr.msk.bf16.gmra.mrb[44].mxu0 %vm415_vm1, %v10028_v61  ;;  %v1374_v44 = vrot.slane %v11763_v47, 5  ;;  %v1384_v57 = vrot.slane %v11764_v18, 4  ;;  %v11766_v8 = vshll.u32 %v9338_v54, 16  ;;  %v2636_v15 = vrot.slane %v9741_v33, 5 }
  0xb5   :  { %7900 = vmatprep.mubr.msk.bf16.mxu0 %vm415_vm1, %v10034_v60  ;;  %v1395_v41 = vrot.slane %v11765_v10, 4  ;;  %v2639_v51 = vrot.slane %v10098_v36, 5  ;;  %v10120_v47 = vrot.slane %v1402_v34, 5  ;;  %v11767_v20 = vshrl.u32 %v9343_v22, 16  ;;  %v11768_v60 = vld [vmem:[#allocation46_spill] sm:$0xff] }
  0xb6   :  { %v1398_v1 = vrot.slane %v11766_v8, 5  ;;  %v1333_v59 = vsel %vm8809_vm4, %v1328_v0, %v10030_v11  ;;  %v1343_v54 = vsel %vm8809_vm4, %v1338_v28, %v1342_v16  ;;  %v1366_v2 = vrot.slane %v1364_v39, 5  ;;  %v10137_v22 = vld [vmem:[%s11401_s0 + $0x19c] sm:$0xf] }
  0xb7   :  { %v1408_v18 = vrot.slane %v11767_v20, 4  ;;  %v1426_v12 = vshll.u32 %v9369_v5, 16  ;;  %v1352_v34 = vrot.slane %v1351_v46, 4  ;;  %v1375_v10 = vor.u32 %v1374_v44, %v1371_v53 }
  0xb8   :  { %v1385_v8 = vor.u32 %v1384_v57, %v10105_v25  ;;  %v1388_v11 = vshll.u32 %v9791_v49, 16  ;;  %v1362_v0 = vrot.slane %v1361_v24, 4  ;;  %v1399_v20 = vor.u32 %v1398_v1, %v1395_v41  ;;  %v10169_v1 = vld [vmem:[%s11401_s0 + $0x1a0] sm:$0x1] }
  0xb9   :  { %7613 = vmatmul.mubr.msk.bf16.gmra.mrb[24].mxu1 %vm415_vm1, %v11768_v60  ;;  %v11769_v28 = vshrl.u32 %v9364_v31, 16  ;;  %v11770_v39 = vshll.u32 %v9364_v31, 16  ;;  %v2637_v46 = vsel %vm9352_vm7, %v6941_v7, %v2636_v15  ;;  %v1409_v53 = vor.u32 %v1408_v18, %v10120_v47  ;;  %v10156_v31 = vld [vmem:[%s11401_s0 + $0x198] sm:$0xf]  ;;  %11772 = vst [vmem:[#allocation100_spill] sm:$0xff] %v10169_v1 }
  0xba   :  { %7616 = vmatprep.mubr.msk.bf16.mxu1 %vm415_vm1, %v9320_v58  ;;  %v2638_v58 = vrot.slane %v2636_v15, 4  ;;  %v1412_v44 = vshll.u32 %v9797_v9, 16  ;;  %v6862_v49 = vcombine.low %v1333_v59, %v1343_v54  ;;  %v4378_v24 = vrot.slane %v10137_v22, 5 }
  0xbb   :  { %v1419_v16 = vrot.slane %v11769_v28, 4  ;;  %v1422_v60 = vrot.slane %v11770_v39, 5  ;;  %v10159_v57 = vrot.slane %v1426_v12, 5  ;;  %v11771_v7 = vshrl.u32 %v9369_v5, 16 }
  0xbc   :  { %7901 = vmatmul.mubr.msk.bf16.gmra.mrb[48].mxu0 %vm415_vm1, %v10036_v19  ;;  %v1357_v9 = vsel %vm8809_vm4, %v1352_v34, %v10081_v40  ;;  %v1376_v15 = vrot.slane %v1375_v10, 4  ;;  %v1386_v18 = vrot.slane %v1385_v8, 4  ;;  %v1390_v59 = vrot.slane %v1388_v11, 5 }
  0xbd   :  { %7904 = vmatprep.mubr.msk.bf16.mxu0 %vm415_vm1, %v10073_v63  ;;  %v1432_v41 = vrot.slane %v11771_v7, 4  ;;  %v1367_v54 = vsel %vm8809_vm4, %v1362_v0, %v1366_v2  ;;  %v1400_v12 = vrot.slane %v1399_v20, 4  ;;  %v1423_v28 = vor.u32 %v1422_v60, %v1419_v16 }
  0xbe   :  { %v1436_v5 = vshll.u32 %v9846_v27, 16  ;;  %v2640_v39 = vsel %vm9352_vm7, %v2638_v58, %v2639_v51  ;;  %v1410_v7 = vrot.slane %v1409_v53, 4  ;;  %v1414_v40 = vrot.slane %v1412_v44, 5 }
  0xbf   :  { %v1450_v34 = vshll.u32 %v9405_v62, 16  ;;  %v7078_v10 = vrot.slane %v10156_v31, 9  ;;  %v4380_v8 = vrot.slane %v4378_v24, 4  ;;  %v4381_v11 = vrot.slane %v10169_v1, 5 }
  0xc0   :  { %v1433_v2 = vor.u32 %v1432_v41, %v10159_v57  ;;  %v10183_v60 = vcombine.low %v1357_v9, %v1367_v54  ;;  %v1381_v58 = vsel %vm8809_vm4, %v1376_v15, %v10105_v25  ;;  %v1391_v27 = vsel %vm8809_vm4, %v1386_v18, %v1390_v59 }
  0xc1   :  { %7617 = vmatmul.mubr.msk.bf16.gmra.mrb[28].mxu1 %vm415_vm1, %v9349_v14  ;;  %v1474_v51 = vshll.u32 %v9426_v43, 16  ;;  %v1405_v0 = vsel %vm8809_vm4, %v1400_v12, %v10120_v47  ;;  %v1424_v20 = vrot.slane %v1423_v28, 4  ;;  %v1438_v16 = vrot.slane %v1436_v5, 5 }
  0xc2   :  { %7620 = vmatprep.mubr.msk.bf16.mxu1 %vm415_vm1, %v6862_v49  ;;  %11773 = vst [vmem:[#allocation101_spill] sm:$0xff] %v10183_v60  ;;  %v11774_v53 = vshrl.u32 %v9400_v50, 16  ;;  %v1415_v25 = vsel %vm8809_vm4, %v1410_v7, %v1414_v40  ;;  %v11775_v49 = vshll.u32 %v9400_v50, 16  ;;  %v10202_v9 = vrot.slane %v1450_v34, 5 }
  0xc3   :  { %v11776_v15 = vshrl.u32 %v9405_v62, 16  ;;  %v1434_v47 = vrot.slane %v1433_v2, 4  ;;  %v1460_v59 = vshll.u32 %v9861_v3, 16  ;;  %v11777_v54 = vshrl.u32 %v9412_v13, 16 }
  0xc4   :  { %v1443_v44 = vrot.slane %v11774_v53, 4  ;;  %7905 = vmatmul.mubr.msk.bf16.gmra.mrb[52].mxu0 %vm415_vm1, %v10075_v35  ;;  %v1446_v41 = vrot.slane %v11775_v49, 5  ;;  %v11778_v28 = vshll.u32 %v9412_v13, 16  ;;  %v10215_v50 = vcombine.low %v10089_v45, %v10111_v55 }
  0xc5   :  { %v1456_v18 = vrot.slane %v11776_v15, 4  ;;  %7908 = vmatprep.mubr.msk.bf16.mxu0 %vm415_vm1, %v10079_v4  ;;  %v1467_v12 = vrot.slane %v11777_v54, 4  ;;  %v10217_v7 = vcombine.low %v1381_v58, %v1391_v27  ;;  %v10219_v62 = vrot.slane %v1474_v51, 5  ;;  %v11789_v54 = vld [vmem:[#allocation60_spill] sm:$0xff] }
  0xc6   :  { %v1470_v5 = vrot.slane %v11778_v28, 5  ;;  %11779 = vst [vmem:[#allocation102_spill] sm:$0xff] %v10215_v50  ;;  %v11780_v40 = vshrl.u32 %v9426_v43, 16  ;;  %v10223_v2 = vcombine.low %v2637_v46, %v2640_v39  ;;  %v4379_v3 = vsel %vm9352_vm7, %v7078_v10, %v4378_v24 }
  0xc7   :  { %v4382_v13 = vsel %vm9352_vm7, %v4380_v8, %v4381_v11  ;;  %v1498_v53 = vshll.u32 %v9464_v21, 16  ;;  %v10230_v49 = vcombine.low %v1405_v0, %v1415_v25  ;;  %v1429_v45 = vsel %vm8809_vm4, %v1424_v20, %v10159_v57  ;;  %v11786_v25 = vld [vmem:[#allocation48_spill] sm:$0xff] }
  0xc8   :  { %v1480_v34 = vrot.slane %v11780_v40, 4  ;;  %11781 = vst [vmem:[#allocation103_spill] sm:$0xff] %v10223_v2  ;;  %v1447_v55 = vor.u32 %v1446_v41, %v1443_v44  ;;  %v1457_v43 = vor.u32 %v1456_v18, %v10202_v9  ;;  %v1439_v46 = vsel %vm8809_vm4, %v1434_v47, %v1438_v16 }
  0xc9   :  { %7621 = vmatmul.mubr.msk.bf16.gmra.mrb[32].mxu1 %vm415_vm1, %v10183_v60  ;;  %v1462_v24 = vrot.slane %v1460_v59, 5  ;;  %v1471_v39 = vor.u32 %v1470_v5, %v1467_v12  ;;  %v1522_v10 = vshll.u32 %v9474_v52, 16  ;;  %v1484_v57 = vshll.u32 %v9905_v23, 16  ;;  %v11788_v23 = vld [vmem:[#allocation29_spill] sm:$0xff]  ;;  %v11812_v60 = vld [vmem:[#allocation87_spill] sm:$0xff] }
  0xca   :  { %7624 = vmatprep.mubr.msk.bf16.mxu1 %vm415_vm1, %v10217_v7  ;;  %v1481_v8 = vor.u32 %v1480_v34, %v10219_v62  ;;  %v11782_v11 = vshrl.u32 %v9455_v38, 16  ;;  %v11783_v27 = vshll.u32 %v9455_v38, 16  ;;  %v10249_v0 = vrot.slane %v1498_v53, 5  ;;  %v11793_v53 = vld [vmem:[#allocation45_spill] sm:$0xff] }
  0xcb   :  { %v11784_v20 = vshrl.u32 %v9464_v21, 16  ;;  %v11785_v44 = vrot.slane %v9802_v42, 5  ;;  %v11787_v41 = vrot.slane %v11786_v25, 9  ;;  %v2422_v18 = vrot.slane %v11788_v23, 5 }
  0xcc   :  { %v1491_v58 = vrot.slane %v11782_v11, 4  ;;  %v1494_v51 = vrot.slane %v11783_v27, 5  ;;  %7909 = vmatmul.mubr.msk.bf16.gmra.mrb[56].mxu0 %vm415_vm1, %v10215_v50  ;;  %v10264_v38 = vcombine.low %v1429_v45, %v1439_v46  ;;  %v1448_v47 = vrot.slane %v1447_v55, 4  ;;  %v11794_v46 = vld [vmem:[#allocation83_spill] sm:$0xff]  ;;  %v11811_v27 = vld [vmem:[#allocation18_spill] sm:$0xff] }
  0xcd   :  { %v1504_v16 = vrot.slane %v11784_v20, 4  ;;  %v10259_v15 = vsel %vm9352_vm7, %v11787_v41, %v11785_v44  ;;  %v1458_v59 = vrot.slane %v1457_v43, 4  ;;  %v11790_v21 = vshrl.u32 %v11789_v54, 16  ;;  %7912 = vmatprep.mubr.msk.bf16.mxu0 %vm415_vm1, %v10223_v2  ;;  %v11795_v20 = vld [vmem:[#allocation73_spill] sm:$0xff] }
  0xce   :  { %v11791_v42 = vshll.u32 %v11789_v54, 16  ;;  %v10272_v5 = vrot.slane %v1522_v10, 5  ;;  %v11792_v40 = vshrl.u32 %v9474_v52, 16  ;;  %v10279_v45 = vsel %vm9352_vm7, %v11793_v53, %v2422_v18 }
  0xcf   :  { %v1515_v12 = vrot.slane %v11790_v21, 4  ;;  %v1472_v55 = vrot.slane %v1471_v39, 4  ;;  %v1495_v43 = vor.u32 %v1494_v51, %v1491_v58  ;;  %v1508_v11 = vshll.u32 %v11794_v46, 16  ;;  %v11797_v58 = vld [vmem:[#allocation67_spill] sm:$0xff] }
  0xd0   :  { %v1518_v28 = vrot.slane %v11791_v42, 5  ;;  %v1528_v34 = vrot.slane %v11792_v40, 4  ;;  %v1585_v44 = vshrl.u32 %v11795_v20, 16  ;;  %v1482_v25 = vrot.slane %v1481_v8, 4 }
  0xd1   :  { %v1486_v10 = vrot.slane %v1484_v57, 5  ;;  %v1505_v41 = vor.u32 %v1504_v16, %v10249_v0  ;;  %v1588_v52 = vshll.u32 %v11795_v20, 16  ;;  %v10287_v23 = vcombine.low %v4379_v3, %v4382_v13  ;;  %7625 = vmatmul.mubr.msk.bf16.gmra.mrb[36].mxu1 %vm415_vm1, %v10230_v49  ;;  %v11798_v16 = vld [vmem:[#allocation86_spill] sm:$0xff] }
  0xd2   :  { %v1453_v39 = vsel %vm8809_vm4, %v1448_v47, %v10202_v9  ;;  %v1546_v51 = vshll.u32 %v11797_v58, 16  ;;  %v1463_v18 = vsel %vm8809_vm4, %v1458_v59, %v1462_v24  ;;  %v1519_v8 = vor.u32 %v1518_v28, %v1515_v12  ;;  %7628 = vmatprep.mubr.msk.bf16.mxu1 %vm415_vm1, %v10264_v38  ;;  %v11799_v59 = vld [vmem:[#allocation66_spill] sm:$0xff] }
  0xd3   :  { %11796 = vst [vmem:[#allocation48_spill] sm:$0xff] %v10287_v23  ;;  %v1529_v57 = vor.u32 %v1528_v34, %v10272_v5  ;;  %v1532_v54 = vshll.u32 %v11798_v16, 16  ;;  %v1477_v9 = vsel %vm8809_vm4, %v1472_v55, %v10219_v62  ;;  %v1496_v3 = vrot.slane %v1495_v43, 4  ;;  %v11803_v55 = vld [vmem:[#allocation68_spill] sm:$0xff] }
  0xd4   :  { %v1510_v13 = vrot.slane %v1508_v11, 5  ;;  %v1570_v47 = vshll.u32 %v9544_v48, 16  ;;  %v1487_v21 = vsel %vm8809_vm4, %v1482_v25, %v1486_v10  ;;  %v1506_v24 = vrot.slane %v1505_v41, 4  ;;  %7913 = vmatmul.mubr.msk.bf16.gmra.mrb[60].mxu0 %vm415_vm1, %v10287_v23  ;;  %v11806_v25 = vld [vmem:[#allocation5_spill] sm:$0xff] }
  0xd5   :  { %v11800_v12 = vshrl.u32 %v11799_v59, 16  ;;  %v11801_v28 = vshll.u32 %v11799_v59, 16  ;;  %v10313_v34 = vrot.slane %v1546_v51, 5  ;;  %v11802_v62 = vshrl.u32 %v11797_v58, 16  ;;  %7918 = vmatprep.mubr.msk.bf16.mxu0 %vm415_vm1, %v11806_v25 }
  0xd6   :  { %v11804_v43 = vshrl.u32 %v11803_v55, 16  ;;  %v11805_v11 = vshll.u32 %v11803_v55, 16  ;;  %v10323_v10 = vcombine.low %v1453_v39, %v1463_v18  ;;  %v1520_v41 = vrot.slane %v1519_v8, 4 }
  0xd7   :  { %v1539_v42 = vrot.slane %v11800_v12, 4  ;;  %v1542_v40 = vrot.slane %v11801_v28, 5  ;;  %v1552_v53 = vrot.slane %v11802_v62, 4  ;;  %v1530_v16 = vrot.slane %v1529_v57, 4  ;;  %v11808_v12 = vld [vmem:[#allocation74_spill] sm:$0xff] }
  0xd8   :  { %v1563_v46 = vrot.slane %v11804_v43, 4  ;;  %v1566_v20 = vrot.slane %v11805_v11, 5  ;;  %11807 = vst [vmem:[#allocation29_spill] sm:$0xff] %v10323_v10  ;;  %v1534_v59 = vrot.slane %v1532_v54, 5  ;;  %v1598_v51 = vshrl.u32 %v11808_v12, 16 }
  0xd9   :  { %v10326_v28 = vcombine.low %v1477_v9, %v1487_v21  ;;  %v10328_v58 = vrot.slane %v1570_v47, 5  ;;  %v11810_v62 = vshrl.u32 %v9544_v48, 16  ;;  %v1609_v55 = vshrl.u32 %v11811_v27, 16  ;;  %v11813_v9 = vld [vmem:[#allocation77_spill] sm:$0xff]  ;;  %7629 = vmatmul.mubr.msk.bf16.gmra.mrb[40].mxu1 %vm415_vm1, %v10323_v10  ;;  %v11815_v21 = vld [vmem:[#allocation88_spill] sm:$0xff] }
  0xda   :  { %v1612_v11 = vshll.u32 %v11811_v27, 16  ;;  %v1543_v23 = vor.u32 %v1542_v40, %v1539_v42  ;;  %v1556_v39 = vshll.u32 %v11812_v60, 16  ;;  %v1501_v18 = vsel %vm8809_vm4, %v1496_v3, %v10249_v0  ;;  %v11814_v3 = vld [vmem:[#allocation61_spill] sm:$0xff] }
  0xdb   :  { %11809 = vst [vmem:[#allocation60_spill] sm:$0xff] %v10326_v28  ;;  %v1576_v43 = vrot.slane %v11810_v62, 4  ;;  %v1511_v8 = vsel %vm8809_vm4, %v1506_v24, %v1510_v13  ;;  %v1553_v57 = vor.u32 %v1552_v53, %v10313_v34  ;;  %v1567_v54 = vor.u32 %v1566_v20, %v1563_v46  ;;  %7632 = vmatprep.mubr.msk.bf16.mxu1 %vm415_vm1, %v10326_v28  ;;  %v10362_v20 = vld [vmem:[%s11400_s1 + $0x10] sm:$0x3] }
  0xdc   :  { %v1622_v48 = vshrl.u32 %v11813_v9, 16  ;;  %v1525_v27 = vsel %vm8809_vm4, %v1520_v41, %v10272_v5  ;;  %v1535_v60 = vsel %vm8809_vm4, %v1530_v16, %v1534_v59  ;;  %v1594_v0 = vshll.u32 %v11808_v12, 16  ;;  %v11817_v41 = vld [vmem:[#allocation6_spill] sm:$0xff] }
  0xdd   :  { %v5510_v13 = vsel %vm512_vm0, %v11814_v3, 0  ;;  %v1577_v47 = vor.u32 %v1576_v43, %v10328_v58  ;;  %v1580_v24 = vshll.u32 %v11815_v21, 16  ;;  %v1618_v42 = vshll.u32 %v11813_v9, 16  ;;  %7919 = vmatmul.mubr.msk.bf16.vlgmr.msra.gmra.mrb[0].mxu0 %vm415_vm1, %v11817_v41  ;;  %v11819_v43 = vld [vmem:[#allocation7_spill] sm:$0xff] }
  0xde   :  { %v10357_v40 = vcombine.low %v1501_v18, %v1511_v8  ;;  %v1544_v5 = vrot.slane %v1543_v23, 4  ;;  %v1558_v53 = vrot.slane %v1556_v39, 5  ;;  %v1587_v46 = vrot.slane %v1585_v44, 4  ;;  %7983 = vmatpush3.bf16.msra.mxu0 %v5510_v13  ;;  %7922 = vmatprep.mubr.msk.bf16.mxu0 %vm415_vm1, %v11819_v43 }
  0xdf   :  { %v10366_v16 = vcombine.low %v1525_v27, %v1535_v60  ;;  %v1554_v59 = vrot.slane %v1553_v57, 4  ;;  %v1568_v12 = vrot.slane %v1567_v54, 4  ;;  %v1590_v62 = vrot.slane %v1588_v52, 5  ;;  %8637 = vmatprep.subr.msk.bf16.mxu0 %vm512_vm0, %v10362_v20  ;;  %v11820_v27 = vld [vmem:[#allocation20_spill] sm:$0xff]  ;;  %v11821_v54 = vld [vmem:[#allocation27_spill] sm:$0xff] }
  0xe0   :  { %11816 = vst [vmem:[#allocation45_spill] sm:$0xff] %v10357_v40  ;;  %v10370_v23 = vrot.slane %v1594_v0, 5  ;;  %v1600_v44 = vrot.slane %v1598_v51, 4  ;;  %v1611_v39 = vrot.slane %v1609_v55, 4  ;;  %v1614_v18 = vrot.slane %v1612_v11, 5  ;;  %v11822_v55 = vld [vmem:[#allocation90_spill] sm:$0xff] }
  0xe1   :  { %11818 = vst [vmem:[#allocation83_spill] sm:$0xff] %v10366_v16  ;;  %v1578_v8 = vrot.slane %v1577_v47, 4  ;;  %v1582_v9 = vrot.slane %v1580_v24, 5  ;;  %v1620_v3 = vrot.slane %v1618_v42, 5  ;;  %v1624_v21 = vrot.slane %v1622_v48, 4  ;;  %7633 = vmatmul.mubr.msk.bf16.gmra.mrb[44].mxu1 %vm415_vm1, %v10357_v40 }
  0xe2   :  { %v1633_v57 = vshrl.u32 %v11820_v27, 16  ;;  %v1636_v52 = vshll.u32 %v11820_v27, 16  ;;  %v1646_v60 = vshrl.u32 %v11821_v54, 16  ;;  %v1549_v0 = vsel %vm8809_vm4, %v1544_v5, %v10313_v34  ;;  %7636 = vmatprep.mubr.msk.bf16.mxu1 %vm415_vm1, %v10366_v16  ;;  %v11823_v5 = vld [vmem:[#allocation92_spill] sm:$0xff] }
  0xe3   :  { %v1591_v51 = vor.u32 %v1590_v62, %v1587_v46  ;;  %v1604_v11 = vshll.u32 %v11822_v55, 16  ;;  %v1559_v48 = vsel %vm8809_vm4, %v1554_v59, %v1558_v53  ;;  %v1573_v13 = vsel %vm8809_vm4, %v1568_v12, %v10328_v58 }
  0xe4   :  { %v1601_v47 = vor.u32 %v1600_v44, %v10370_v23  ;;  %v1615_v24 = vor.u32 %v1614_v18, %v1611_v39  ;;  %v1583_v34 = vsel %vm8809_vm4, %v1578_v8, %v1582_v9  ;;  %v1625_v42 = vor.u32 %v1624_v21, %v1620_v3  ;;  %v11824_v44 = vld [vmem:[#allocation9_spill] sm:$0xff]  ;;  %v11825_v21 = vld [vmem:[#allocation11_spill] sm:$0xff] }
  0xe5   :  { %v1628_v46 = vshll.u32 %v11823_v5, 16  ;;  %v1642_v62 = vshll.u32 %v11821_v54, 16  ;;  %v1657_v53 = vshrl.u32 %v9680_v6, 16  ;;  %v1660_v59 = vshll.u32 %v9680_v6, 16  ;;  %7923 = vmatmul.mubr.msk.bf16.gmra.mrb[4].mxu0 %vm415_vm1, %v11824_v44 }
  0xe6   :  { %v1670_v58 = vshrl.u32 %v9692_v32, 16  ;;  %v1666_v12 = vshll.u32 %v9692_v32, 16  ;;  %v10401_v39 = vcombine.low %v1549_v0, %v1559_v48  ;;  %v1592_v18 = vrot.slane %v1591_v51, 4  ;;  %7926 = vmatprep.mubr.msk.bf16.mxu0 %vm415_vm1, %v11825_v21 }
  0xe7   :  { %v1606_v8 = vrot.slane %v1604_v11, 5  ;;  %v1635_v9 = vrot.slane %v1633_v57, 4  ;;  %v10405_v27 = vcombine.low %v1573_v13, %v1583_v34  ;;  %v1602_v54 = vrot.slane %v1601_v47, 4  ;;  %v11826_v13 = vld [vmem:[#allocation93_spill] sm:$0xff] }
  0xe8   :  { %v1616_v55 = vrot.slane %v1615_v24, 4  ;;  %v1638_v6 = vrot.slane %v1636_v52, 5  ;;  %v1626_v5 = vrot.slane %v1625_v42, 4  ;;  %v1630_v1 = vrot.slane %v1628_v46, 5 }
  0xe9   :  { %v1644_v16 = vrot.slane %v1642_v62, 5  ;;  %v1648_v32 = vrot.slane %v1646_v60, 4  ;;  %v1659_v40 = vrot.slane %v1657_v53, 4  ;;  %v1662_v28 = vrot.slane %v1660_v59, 5  ;;  %7637 = vmatmul.mubr.msk.bf16.gmra.mrb[48].mxu1 %vm415_vm1, %v10401_v39  ;;  %v11827_v53 = vld [vmem:[#allocation13_spill] sm:$0xff] }
  0xea   :  { %v1668_v10 = vrot.slane %v1666_v12, 5  ;;  %v1672_v0 = vrot.slane %v1670_v58, 4  ;;  %v1681_v51 = vshrl.u32 %v9736_v29, 16  ;;  %v1684_v57 = vshll.u32 %v9736_v29, 16  ;;  %7640 = vmatprep.mubr.msk.bf16.mxu1 %vm415_vm1, %v10405_v27  ;;  %v11828_v58 = vld [vmem:[#allocation15_spill] sm:$0xff] }
  0xeb   :  { %v1694_v11 = vshrl.u32 %v9741_v33, 16  ;;  %v1597_v52 = vsel %vm8809_vm4, %v1592_v18, %v10370_v23  ;;  %v1607_v60 = vsel %vm8809_vm4, %v1602_v54, %v1606_v8  ;;  %v1639_v48 = vor.u32 %v1638_v6, %v1635_v9 }
  0xec   :  { %v1652_v47 = vshll.u32 %v11826_v13, 16  ;;  %v1621_v29 = vsel %vm8809_vm4, %v1616_v55, %v1620_v3  ;;  %v1631_v24 = vsel %vm8809_vm4, %v1626_v5, %v1630_v1  ;;  %v1649_v34 = vor.u32 %v1648_v32, %v1644_v16 }
  0xed   :  { %v1690_v42 = vshll.u32 %v9741_v33, 16  ;;  %v1663_v46 = vor.u32 %v1662_v28, %v1659_v40  ;;  %v1673_v23 = vor.u32 %v1672_v0, %v1668_v10  ;;  %v1676_v62 = vshll.u32 %v10054_v17, 16  ;;  %7927 = vmatmul.mubr.msk.bf16.gmra.mrb[8].mxu0 %vm415_vm1, %v11827_v53 }
  0xee   :  { %v10428_v59 = vcombine.low %v1597_v52, %v1607_v60  ;;  %7930 = vmatprep.mubr.msk.bf16.mxu0 %vm415_vm1, %v11828_v58  ;;  %v10432_v12 = vcombine.low %v1621_v29, %v1631_v24  ;;  %v1640_v3 = vrot.slane %v1639_v48, 4  ;;  %v1654_v18 = vrot.slane %v1652_v47, 5  ;;  %v11831_v29 = vld [vmem:[#allocation23_spill] sm:$0xff]  ;;  %v11832_v24 = vld [vmem:[#allocation28_spill] sm:$0xff] }
  0xef   :  { %v1683_v1 = vrot.slane %v1681_v51, 4  ;;  %v1650_v8 = vrot.slane %v1649_v34, 4  ;;  %v1686_v9 = vrot.slane %v1684_v57, 5  ;;  %v1692_v33 = vrot.slane %v1690_v42, 5 }
  0xf0   :  { %v1696_v28 = vrot.slane %v1694_v11, 4  ;;  %v1664_v40 = vrot.slane %v1663_v46, 4  ;;  %v1674_v54 = vrot.slane %v1673_v23, 4  ;;  %v1678_v17 = vrot.slane %v1676_v62, 5  ;;  %v11829_v11 = vld [vmem:[#allocation17_spill] sm:$0xff]  ;;  %v11834_v46 = vld [vmem:[#allocation32_spill] sm:$0xff] }
  0xf1   :  { %7641 = vmatmul.mubr.msk.bf16.gmra.mrb[52].mxu1 %vm415_vm1, %v10428_v59  ;;  %v1645_v55 = vsel %vm8809_vm4, %v1640_v3, %v1644_v16  ;;  %v1655_v6 = vsel %vm8809_vm4, %v1650_v8, %v1654_v18  ;;  %v1687_v5 = vor.u32 %v1686_v9, %v1683_v1  ;;  %v1700_v0 = vshll.u32 %v10098_v36, 16  ;;  %v11830_v16 = vld [vmem:[#allocation21_spill] sm:$0xff]  ;;  %v11835_v23 = vld [vmem:[#allocation36_spill] sm:$0xff]  ;;  %v11836_v62 = vld [vmem:[#allocation42_spill] sm:$0xff] }
  0xf2   :  { %7644 = vmatprep.mubr.msk.bf16.mxu1 %vm415_vm1, %v10432_v12  ;;  %v1697_v32 = vor.u32 %v1696_v28, %v1692_v33  ;;  %v1669_v51 = vsel %vm8809_vm4, %v1664_v40, %v1668_v10  ;;  %v1679_v57 = vsel %vm8809_vm4, %v1674_v54, %v1678_v17  ;;  %v10451_v52 = vcombine.low %v1645_v55, %v1655_v6  ;;  %v8676_v18 = vld [vmem:[%s11401_s0 + $0xc0] sm:$0xf]  ;;  %v8677_v1 = vld [vmem:[%s11401_s0 + $0xc4] sm:$0xf]  ;;  %v11838_v8 = vld [vmem:[#allocation54_spill] sm:$0xff] }
  0xf3   :  { %v10453_v60 = vcombine.low %v1669_v51, %v1679_v57  ;;  %v1688_v48 = vrot.slane %v1687_v5, 4  ;;  %v1702_v47 = vrot.slane %v1700_v0, 5  ;;  %v11833_v42 = vcombine.low %v10259_v15, %v10279_v45  ;;  %v11837_v45 = vld [vmem:[#allocation56_spill] sm:$0xff]  ;;  %v10509_v40 = vld [vmem:[%s11401_s0 + $0xd0] sm:$0xf]  ;;  %v11840_v17 = vld [vmem:[#allocation59_spill] sm:$0xff] }
  0xf4   :  { %v1698_v13 = vrot.slane %v1697_v32, 4  ;;  %v3402_v3 = vsel %vm512_vm0, %v11836_v62, 0  ;;  %v10487_v15 = vcombine.low %v8676_v18, %v8677_v1  ;;  %v8678_v9 = vld [vmem:[%s11400_s1 + $0x8] sm:$0x3]  ;;  %v10504_v28 = vld [vmem:[%s11401_s0 + $0xcc] sm:$0xf] }
  0xf5   :  { %7931 = vmatmul.mubr.msk.bf16.gmra.mrb[12].mxu0 %vm415_vm1, %v11829_v11  ;;  %v1693_v36 = vsel %vm8809_vm4, %v1688_v48, %v1692_v33  ;;  %v11839_v33 = vld [vmem:[#allocation41_spill] sm:$0xff]  ;;  %v7115_v54 = vcombine.low %v10504_v28, %v10509_v40  ;;  %v11841_v55 = vld [vmem:[#allocation64_spill] sm:$0xff]  ;;  %v11842_v6 = vld [vmem:[#allocation50_spill] sm:$0xff] }
  0xf6   :  { %7934 = vmatprep.mubr.msk.bf16.mxu0 %vm415_vm1, %v11830_v16  ;;  %v1703_v10 = vsel %vm8809_vm4, %v1698_v13, %v1702_v47  ;;  %v11843_v5 = vld [vmem:[#allocation65_spill] sm:$0xff]  ;;  %v11844_v32 = vld [vmem:[#allocation71_spill] sm:$0xff]  ;;  %v11845_v0 = vld [vmem:[#allocation52_spill] sm:$0xff] }
  0xf7   :  { %v10467_v34 = vcombine.low %v1693_v36, %v1703_v10  ;;  %v11846_v51 = vld [vmem:[#allocation55_spill] sm:$0xff]  ;;  %v11847_v57 = vld [vmem:[#allocation72_spill] sm:$0xff]  ;;  %v11849_v13 = vld [vmem:[#allocation57_spill] sm:$0xff] }
  0xf8   :  { %v11848_v48 = vld [vmem:[#allocation75_spill] sm:$0xff]  ;;  %v11850_v47 = vld [vmem:[#allocation58_spill] sm:$0xff]  ;;  %v11851_v36 = vld [vmem:[#allocation33_spill] sm:$0xff] }
  0xf9   :  { %7645 = vmatmul.mubr.msk.bf16.gmra.mrb[56].mxu1 %vm415_vm1, %v10451_v52  ;;  %v11852_v10 = vld [vmem:[#allocation79_spill] sm:$0xff]  ;;  %v11856_v18 = vld [vmem:[#allocation37_spill] sm:$0xff]  ;;  %v8679_v1 = vld [vmem:[%s11401_s0 + $0xdc] sm:$0xf] }
  0xfa   :  { %7648 = vmatprep.mubr.msk.bf16.mxu1 %vm415_vm1, %v10453_v60  ;;  %v11854_v62 = vld [vmem:[#allocation63_spill] sm:$0xff] }
  0xfd   :  { %7935 = vmatmul.mubr.msk.bf16.gmra.mrb[16].mxu0 %vm415_vm1, %v11831_v29 }
  0xfe   :  { %7938 = vmatprep.mubr.msk.bf16.mxu0 %vm415_vm1, %v11832_v24 }
 0x101   :  { %7649 = vmatmul.mubr.msk.bf16.gmra.mrb[60].mxu1 %vm415_vm1, %v10467_v34 }
 0x102   :  { %7654 = vmatprep.mubr.msk.bf16.mxu1 %vm415_vm1, %v11833_v42  ;;  %v11853_v42 = vld [vmem:[#allocation62_spill] sm:$0xff] }
 0x105   :  { %7939 = vmatmul.mubr.msk.bf16.gmra.mrb[20].mxu0 %vm415_vm1, %v11834_v46 }
 0x106   :  { %7942 = vmatprep.mubr.msk.bf16.mxu0 %vm415_vm1, %v11835_v23 }
 0x109   :  { %7655 = vmatmul.mubr.msk.bf16.vlgmr.msra.gmra.mrb[0].mxu1 %vm415_vm1, %v11837_v45  ;;  %v2531_v45 = vrot.slane %v8679_v1, 5 }
 0x10a   :  { %7658 = vmatprep.mubr.msk.bf16.mxu1 %vm415_vm1, %v11838_v8  ;;  %7719 = vmatpush3.bf16.msra.mxu1 %v3402_v3  ;;  %v11855_v3 = vld [vmem:[#allocation24_spill] sm:$0xff] }
 0x10b   :  { %8633 = vmatprep.subr.msk.bf16.mxu1 %vm512_vm0, %v8678_v9  ;;  %v11857_v9 = vld [vmem:[#allocation69_spill] sm:$0xff] }
 0x10d   :  { %7943 = vmatmul.mubr.msk.bf16.gmra.mrb[24].mxu0 %vm415_vm1, %v11839_v33 }
 0x10e   :  { %7946 = vmatprep.mubr.msk.bf16.mxu0 %vm415_vm1, %v10487_v15 }
 0x111   :  { %7659 = vmatmul.mubr.msk.bf16.gmra.mrb[4].mxu1 %vm415_vm1, %v11840_v17 }
 0x112   :  { %7662 = vmatprep.mubr.msk.bf16.mxu1 %vm415_vm1, %v11841_v55 }
 0x115   :  { %7947 = vmatmul.mubr.msk.bf16.gmra.mrb[28].mxu0 %vm415_vm1, %v7115_v54  ;;  %v11858_v54 = vld [vmem:[#allocation70_spill] sm:$0xff] }
 0x116   :  { %7950 = vmatprep.mubr.msk.bf16.mxu0 %vm415_vm1, %v11842_v6 }
 0x119   :  { %7663 = vmatmul.mubr.msk.bf16.gmra.mrb[8].mxu1 %vm415_vm1, %v11843_v5  ;;  %v11862_v5 = vld [vmem:[#allocation25_spill] sm:$0xff] }
 0x11a   :  { %7666 = vmatprep.mubr.msk.bf16.mxu1 %vm415_vm1, %v11844_v32  ;;  %v11861_v32 = vld [vmem:[#allocation76_spill] sm:$0xff] }
 0x11d   :  { %7951 = vmatmul.mubr.msk.bf16.gmra.mrb[32].mxu0 %vm415_vm1, %v11845_v0 }
 0x11e   :  { %7954 = vmatprep.mubr.msk.bf16.mxu0 %vm415_vm1, %v11846_v51 }
 0x121   :  { %7667 = vmatmul.mubr.msk.bf16.gmra.mrb[12].mxu1 %vm415_vm1, %v11847_v57  ;;  %v11860_v57 = vld [vmem:[#allocation78_spill] sm:$0xff] }
 0x122   :  { %7670 = vmatprep.mubr.msk.bf16.mxu1 %vm415_vm1, %v11848_v48  ;;  %v2534_v48 = vrot.slane %v10045_v26, 5  ;;  %v11863_v26 = vld [vmem:[#allocation80_spill] sm:$0xff] }
 0x125   :  { %7955 = vmatmul.mubr.msk.bf16.gmra.mrb[36].mxu0 %vm415_vm1, %v11849_v13 }
 0x126   :  { %7958 = vmatprep.mubr.msk.bf16.mxu0 %vm415_vm1, %v11850_v47 }
 0x129   :  { %7671 = vmatmul.mubr.msk.bf16.gmra.mrb[16].mxu1 %vm415_vm1, %v11851_v36 }
 0x12a   :  { %7674 = vmatprep.mubr.msk.bf16.mxu1 %vm415_vm1, %v11852_v10  ;;  %v8680_v10 = vld [vmem:[%s11401_s0 + $0xd8] sm:$0xf] }
 0x12b   :  { %v6926_v36 = vrot.slane %v8680_v10, 9 }
 0x12d   :  { %7959 = vmatmul.mubr.msk.bf16.gmra.mrb[40].mxu0 %vm415_vm1, %v11853_v42  ;;  %v2532_v1 = vsel %vm9352_vm7, %v6926_v36, %v2531_v45  ;;  %v11867_v36 = vld [vmem:[#allocation8_spill] sm:$0xff] }
 0x12e   :  { %7962 = vmatprep.mubr.msk.bf16.mxu0 %vm415_vm1, %v11854_v62 }
 0x131   :  { %7675 = vmatmul.mubr.msk.bf16.gmra.mrb[20].mxu1 %vm415_vm1, %v11855_v3  ;;  %v2533_v3 = vrot.slane %v2531_v45, 4  ;;  %v11869_v45 = vld [vmem:[#allocation81_spill] sm:$0xff] }
 0x132   :  { %7678 = vmatprep.mubr.msk.bf16.mxu1 %vm415_vm1, %v11856_v18  ;;  %v11859_v18 = vld [vmem:[#allocation34_spill] sm:$0xff] }
 0x135   :  { %7963 = vmatmul.mubr.msk.bf16.gmra.mrb[44].mxu0 %vm415_vm1, %v11857_v9 }
 0x136   :  { %7966 = vmatprep.mubr.msk.bf16.mxu0 %vm415_vm1, %v11858_v54  ;;  %v2535_v54 = vsel %vm9352_vm7, %v2533_v3, %v2534_v48  ;;  %v10580_v48 = vcombine.low %v10156_v31, %v10137_v22  ;;  %v11868_v3 = vld [vmem:[#allocation43_spill] sm:$0xff] }
 0x137   :  { %v6959_v10 = vcombine.low %v2532_v1, %v2535_v54  ;;  %v10593_v54 = vld [vmem:[%s11401_s0 + $0x1a4] sm:$0xf]  ;;  %v10598_v1 = vld [vmem:[%s11401_s0 + $0x1a8] sm:$0xf] }
 0x138   :  { %11866 = vst [vmem:[#allocation73_spill] sm:$0xff] %v10580_v48 }
 0x139   :  { %7679 = vmatmul.mubr.msk.bf16.gmra.mrb[24].mxu1 %vm415_vm1, %v11859_v18  ;;  %v11864_v18 = vld [vmem:[#allocation31_spill] sm:$0xff] }
 0x13a   :  { %7682 = vmatprep.mubr.msk.bf16.mxu1 %vm415_vm1, %v11860_v57  ;;  %v11865_v57 = vld [vmem:[#allocation38_spill] sm:$0xff] }
 0x13d   :  { %7967 = vmatmul.mubr.msk.bf16.gmra.mrb[48].mxu0 %vm415_vm1, %v11861_v32 }
 0x13e   :  { %7970 = vmatprep.mubr.msk.bf16.mxu0 %vm415_vm1, %v11862_v5 }
 0x141   :  { %7683 = vmatmul.mubr.msk.bf16.gmra.mrb[28].mxu1 %vm415_vm1, %v11863_v26  ;;  %v11873_v26 = vld [vmem:[#allocation85_spill] sm:$0xff] }
 0x142   :  { %7686 = vmatprep.mubr.msk.bf16.mxu1 %vm415_vm1, %v6959_v10  ;;  %v7116_v10 = vcombine.low %v10593_v54, %v10598_v1 }
 0x145   :  { %7971 = vmatmul.mubr.msk.bf16.gmra.mrb[52].mxu0 %vm415_vm1, %v11864_v18 }
 0x146   :  { %7974 = vmatprep.mubr.msk.bf16.mxu0 %vm415_vm1, %v11865_v57  ;;  %v11875_v57 = vld [vmem:[#allocation12_spill] sm:$0xff] }
 0x149   :  { %7687 = vmatmul.mubr.msk.bf16.gmra.mrb[32].mxu1 %vm415_vm1, %v11867_v36  ;;  %v11870_v36 = vld [vmem:[#allocation82_spill] sm:$0xff] }
 0x14a   :  { %7690 = vmatprep.mubr.msk.bf16.mxu1 %vm415_vm1, %v11868_v3  ;;  %v11871_v3 = vld [vmem:[#allocation84_spill] sm:$0xff] }
 0x14d   :  { %7975 = vmatmul.mubr.msk.bf16.gmra.mrb[56].mxu0 %vm415_vm1, %v11869_v45  ;;  %v11874_v45 = vld [vmem:[#allocation89_spill] sm:$0xff] }
 0x14e   :  { %7978 = vmatprep.mubr.msk.bf16.mxu0 %vm415_vm1, %v10580_v48  ;;  %v6024_v48 = vsel %vm512_vm0, %v10362_v20, 0  ;;  %v11878_v20 = vld [vmem:[#allocation19_spill] sm:$0xff] }
 0x151   :  { %7691 = vmatmul.mubr.msk.bf16.gmra.mrb[36].mxu1 %vm415_vm1, %v11870_v36  ;;  %v11876_v36 = vld [vmem:[#allocation14_spill] sm:$0xff] }
 0x152   :  { %7694 = vmatprep.mubr.msk.bf16.mxu1 %vm415_vm1, %v11871_v3 }
 0x155   :  { %7979 = vmatmul.mubr.msk.bf16.gmra.mrb[60].mxu0 %vm415_vm1, %v7116_v10  ;;  %v11879_v10 = vld [vmem:[#allocation95_spill] sm:$0xff] }
 0x156   :  { %7984 = vmatprep.mubr.msk.bf16.mxu0 %vm415_vm1, %v11872_v30  ;;  %v11877_v30 = vld [vmem:[#allocation16_spill] sm:$0xff] }
 0x159   :  { %7695 = vmatmul.mubr.msk.bf16.gmra.mrb[40].mxu1 %vm415_vm1, %v11873_v26 }
 0x15a   :  { %7698 = vmatprep.mubr.msk.bf16.mxu1 %vm415_vm1, %v11874_v45 }
 0x15d   :  { %7985 = vmatmul.mubr.msk.bf16.vlgmr.msra.gmra.mrb[0].mxu0 %vm415_vm1, %v11875_v57  ;;  %v11880_v57 = vld [vmem:[#allocation22_spill] sm:$0xff] }
 0x15e   :  { %8049 = vmatpush3.bf16.msra.mxu0 %v6024_v48  ;;  %7988 = vmatprep.mubr.msk.bf16.mxu0 %vm415_vm1, %v11876_v36  ;;  %v11881_v48 = vld [vmem:[#allocation26_spill] sm:$0xff] }
 0x15f   :  { %v11882_v36 = vld [vmem:[#allocation30_spill] sm:$0xff] }
 0x161   :  { %7699 = vmatmul.mubr.msk.bf16.gmra.mrb[44].mxu1 %vm415_vm1, %v9983_v56 }
 0x162   :  { %7702 = vmatprep.mubr.msk.bf16.mxu1 %vm415_vm1, %v10028_v61  ;;  %v11887_v61 = vld [vmem:[#allocation46_spill] sm:$0xff] }
 0x165   :  { %7989 = vmatmul.mubr.msk.bf16.gmra.mrb[4].mxu0 %vm415_vm1, %v11877_v30  ;;  %v11883_v30 = vld [vmem:[#allocation35_spill] sm:$0xff] }
 0x166   :  { %7992 = vmatprep.mubr.msk.bf16.mxu0 %vm415_vm1, %v11878_v20  ;;  %v11884_v20 = vld [vmem:[#allocation40_spill] sm:$0xff] }
 0x169   :  { %7703 = vmatmul.mubr.msk.bf16.gmra.mrb[48].mxu1 %vm415_vm1, %v11879_v10  ;;  %v11886_v10 = vld [vmem:[#allocation3_spill] sm:$0xff] }
 0x16a   :  { %7706 = vmatprep.mubr.msk.bf16.mxu1 %vm415_vm1, %v10036_v19 }
 0x16d   :  { %7993 = vmatmul.mubr.msk.bf16.gmra.mrb[8].mxu0 %vm415_vm1, %v11880_v57  ;;  %v5384_v57 = vshrl.u32 %v10504_v28, 16 }
 0x16e   :  { %7996 = vmatprep.mubr.msk.bf16.mxu0 %vm415_vm1, %v11881_v48  ;;  %v5387_v48 = vshll.u32 %v10504_v28, 16 }
 0x171   :  { %7707 = vmatmul.mubr.msk.bf16.gmra.mrb[52].mxu1 %vm415_vm1, %v10073_v63  ;;  %v11885_v63 = vld [vmem:[#allocation44_spill] sm:$0xff] }
 0x172   :  { %7710 = vmatprep.mubr.msk.bf16.mxu1 %vm415_vm1, %v10075_v35  ;;  %v5397_v35 = vshrl.u32 %v10509_v40, 16 }
 0x174   :  { %v5399_v19 = vrot.slane %v5397_v35, 4 }
 0x175   :  { %7997 = vmatmul.mubr.msk.bf16.gmra.mrb[12].mxu0 %vm415_vm1, %v11882_v36  ;;  %v5393_v36 = vshll.u32 %v10509_v40, 16 }
 0x176   :  { %8000 = vmatprep.mubr.msk.bf16.mxu0 %vm415_vm1, %v11883_v30  ;;  %v5386_v30 = vrot.slane %v5384_v57, 4 }
 0x179   :  { %7711 = vmatmul.mubr.msk.bf16.gmra.mrb[56].mxu1 %vm415_vm1, %v10079_v4  ;;  %v5389_v4 = vrot.slane %v5387_v48, 5 }
 0x17a   :  { %7714 = vmatprep.mubr.msk.bf16.mxu1 %vm415_vm1, %v10215_v50  ;;  %v5395_v50 = vrot.slane %v5393_v36, 5  ;;  %v11889_v36 = vld [vmem:[#allocation4_spill] sm:$0xff] }
 0x17b   :  { %v5390_v56 = vor.u32 %v5389_v4, %v5386_v30 }
 0x17d   :  { %8001 = vmatmul.mubr.msk.bf16.gmra.mrb[16].mxu0 %vm415_vm1, %v11884_v20  ;;  %v10662_v20 = vld [vmem:[%s11401_s0 + $0xd4] sm:$0x1]  ;;  %v5391_v35 = vrot.slane %v5390_v56, 4 }
 0x17e   :  { %8004 = vmatprep.mubr.msk.bf16.mxu0 %vm415_vm1, %v11885_v63  ;;  %v11888_v63 = vld [vmem:[#allocation49_spill] sm:$0xff]  ;;  %v5403_v57 = vshll.u32 %v10662_v20, 16 }
 0x180   :  { %v5405_v48 = vrot.slane %v5403_v57, 5 }
 0x181   :  { %7715 = vmatmul.mubr.msk.bf16.gmra.mrb[60].mxu1 %vm415_vm1, %v10223_v2  ;;  %v5400_v2 = vor.u32 %v5399_v19, %v5395_v50  ;;  %v5396_v19 = vsel %vm8809_vm4, %v5391_v35, %v5395_v50  ;;  %v11892_v50 = vld [vmem:[#allocation60_spill] sm:$0xff] }
 0x182   :  { %7720 = vmatprep.mubr.msk.bf16.mxu1 %vm415_vm1, %v11886_v10 }
 0x183   :  { %v5401_v10 = vrot.slane %v5400_v2, 4  ;;  %v11893_v2 = vld [vmem:[#allocation45_spill] sm:$0xff] }
 0x185   :  { %8005 = vmatmul.mubr.msk.bf16.gmra.mrb[20].mxu0 %vm415_vm1, %v11887_v61  ;;  %v11890_v61 = vld [vmem:[#allocation53_spill] sm:$0xff]  ;;  %v5406_v4 = vsel %vm8809_vm4, %v5401_v10, %v5405_v48  ;;  %v11896_v48 = vld [vmem:[#allocation47_spill] sm:$0xff] }
 0x186   :  { %8008 = vmatprep.mubr.msk.bf16.mxu0 %vm415_vm1, %v11888_v63  ;;  %v7150_v56 = vcombine.low %v5396_v19, %v5406_v4  ;;  %v10745_v4 = vld [vmem:[%s11401_s0 + $0x1ac] sm:$0x1] }
 0x189   :  { %7721 = vmatmul.mubr.msk.bf16.vlgmr.msra.gmra.mrb[0].mxu1 %vm415_vm1, %v11806_v25  ;;  %v11894_v25 = vld [vmem:[#allocation83_spill] sm:$0xff] }
 0x18a   :  { %7724 = vmatprep.mubr.msk.bf16.mxu1 %vm415_vm1, %v11817_v41  ;;  %8115 = vmatpush3.bf16.msra.mxu1 %v11889_v36  ;;  %v3846_v41 = vshrl.u32 %v10156_v31, 16 }
 0x18d   :  { %8009 = vmatmul.mubr.msk.bf16.gmra.mrb[24].mxu0 %vm415_vm1, %v9349_v14  ;;  %v11891_v14 = vld [vmem:[#allocation29_spill] sm:$0xff] }
 0x18e   :  { %8012 = vmatprep.mubr.msk.bf16.mxu0 %vm415_vm1, %v11890_v61 }
 0x191   :  { %7725 = vmatmul.mubr.msk.bf16.gmra.mrb[4].mxu1 %vm415_vm1, %v11819_v43  ;;  %v3849_v43 = vshll.u32 %v10156_v31, 16  ;;  %v5411_v31 = vshll.u32 %v10593_v54, 16 }
 0x192   :  { %7728 = vmatprep.mubr.msk.bf16.mxu1 %vm415_vm1, %v11824_v44  ;;  %v3855_v44 = vshll.u32 %v10137_v22, 16 }
 0x193   :  { %v5413_v57 = vrot.slane %v5411_v31, 5 }
 0x195   :  { %8013 = vmatmul.mubr.msk.bf16.gmra.mrb[28].mxu0 %vm415_vm1, %v7150_v56 }
 0x196   :  { %8016 = vmatprep.mubr.msk.bf16.mxu0 %vm415_vm1, %v10217_v7 }
 0x199   :  { %7729 = vmatmul.mubr.msk.bf16.gmra.mrb[8].mxu1 %vm415_vm1, %v11825_v21  ;;  %v3859_v21 = vshrl.u32 %v10137_v22, 16  ;;  %v5417_v22 = vshll.u32 %v10598_v1, 16 }
 0x19a   :  { %7732 = vmatprep.mubr.msk.bf16.mxu1 %vm415_vm1, %v11827_v53  ;;  %v3848_v53 = vrot.slane %v3846_v41, 4  ;;  %v5427_v41 = vshll.u32 %v10745_v4, 16 }
 0x19b   :  { %v5419_v35 = vrot.slane %v5417_v22, 5  ;;  %v7184_v22 = vrot.slane %v10504_v28, 9  ;;  %v11916_v28 = vld [vmem:[#allocation82_spill] sm:$0xff] }
 0x19d   :  { %8017 = vmatmul.mubr.msk.bf16.gmra.mrb[32].mxu0 %vm415_vm1, %v10230_v49 }
 0x19e   :  { %8020 = vmatprep.mubr.msk.bf16.mxu0 %vm415_vm1, %v10264_v38 }
 0x1a1   :  { %7733 = vmatmul.mubr.msk.bf16.gmra.mrb[12].mxu1 %vm415_vm1, %v11828_v58  ;;  %v3851_v58 = vrot.slane %v3849_v43, 5 }
 0x1a2   :  { %7736 = vmatprep.mubr.msk.bf16.mxu1 %vm415_vm1, %v11829_v11  ;;  %v3857_v11 = vrot.slane %v3855_v44, 5 }
 0x1a5   :  { %8021 = vmatmul.mubr.msk.bf16.gmra.mrb[36].mxu0 %vm415_vm1, %v11891_v14 }
 0x1a6   :  { %8024 = vmatprep.mubr.msk.bf16.mxu0 %vm415_vm1, %v11892_v50 }
 0x1a9   :  { %7737 = vmatmul.mubr.msk.bf16.gmra.mrb[16].mxu1 %vm415_vm1, %v11830_v16  ;;  %v3861_v16 = vrot.slane %v3859_v21, 4 }
 0x1aa   :  { %7740 = vmatprep.mubr.msk.bf16.mxu1 %vm415_vm1, %v11831_v29  ;;  %v5408_v29 = vshrl.u32 %v10593_v54, 16 }
 0x1ac   :  { %v5410_v63 = vrot.slane %v5408_v29, 4 }
 0x1ad   :  { %8025 = vmatmul.mubr.msk.bf16.gmra.mrb[40].mxu0 %vm415_vm1, %v11893_v2 }
 0x1ae   :  { %8028 = vmatprep.mubr.msk.bf16.mxu0 %vm415_vm1, %v11894_v25 }
 0x1b1   :  { %7741 = vmatmul.mubr.msk.bf16.gmra.mrb[20].mxu1 %vm415_vm1, %v11832_v24  ;;  %v5421_v24 = vshrl.u32 %v10598_v1, 16 }
 0x1b2   :  { %7744 = vmatprep.mubr.msk.bf16.mxu1 %vm415_vm1, %v11834_v46  ;;  %v3852_v46 = vor.u32 %v3851_v58, %v3848_v53 }
 0x1b3   :  { %v5423_v10 = vrot.slane %v5421_v24, 4  ;;  %v5933_v24 = vrot.slane %v10509_v40, 5 }
 0x1b4   :  { %v3853_v36 = vrot.slane %v3852_v46, 4 }
 0x1b5   :  { %8029 = vmatmul.mubr.msk.bf16.gmra.mrb[44].mxu0 %vm415_vm1, %v10401_v39  ;;  %v5424_v56 = vor.u32 %v5423_v10, %v5419_v35  ;;  %v5935_v46 = vrot.slane %v5933_v24, 4  ;;  %v5934_v40 = vsel %vm9352_vm7, %v7184_v22, %v5933_v24  ;;  %v10963_v22 = vld [vmem:[%s11403_s3] ss:$0 sm:$0xff] }
 0x1b6   :  { %8032 = vmatprep.mubr.msk.bf16.mxu0 %vm415_vm1, %v10405_v27  ;;  %v3858_v43 = vsel %vm8809_vm4, %v3853_v36, %v3857_v11 }
 0x1b7   :  { %v5425_v58 = vrot.slane %v5424_v56, 4 }
 0x1b9   :  { %7745 = vmatmul.mubr.msk.bf16.gmra.mrb[24].mxu1 %vm415_vm1, %v11835_v23  ;;  %v3862_v23 = vor.u32 %v3861_v16, %v3857_v11  ;;  %v5429_v16 = vrot.slane %v5427_v41, 5 }
 0x1ba   :  { %7748 = vmatprep.mubr.msk.bf16.mxu1 %vm415_vm1, %v11839_v33  ;;  %v11895_v33 = vld [vmem:[#allocation100_spill] sm:$0xff] }
 0x1bb   :  { %v3865_v30 = vshll.u32 %v11895_v33, 16  ;;  %v3863_v61 = vrot.slane %v3862_v23, 4  ;;  %v5430_v29 = vsel %vm8809_vm4, %v5425_v58, %v5429_v16  ;;  %v5936_v23 = vrot.slane %v10662_v20, 5  ;;  %v11912_v33 = vld [vmem:[#allocation80_spill] sm:$0xff] }
 0x1bc   :  { %v5943_v20 = vrot.slane %v10745_v4, 5 }
 0x1bd   :  { %8033 = vmatmul.mubr.msk.bf16.gmra.mrb[48].mxu0 %vm415_vm1, %v10428_v59  ;;  %v3867_v19 = vrot.slane %v3865_v30, 5  ;;  %v11913_v30 = vld [vmem:[#allocation39_spill] sm:$0xff] }
 0x1be   :  { %8036 = vmatprep.mubr.msk.bf16.mxu0 %vm415_vm1, %v10432_v12 }
 0x1bf   :  { %v3868_v44 = vsel %vm8809_vm4, %v3863_v61, %v3867_v19 }
 0x1c0   :  { %v10756_v21 = vcombine.low %v3858_v43, %v3868_v44 }
 0x1c1   :  { %7749 = vmatmul.mubr.msk.bf16.gmra.mrb[28].mxu1 %vm415_vm1, %v10487_v15  ;;  %v5414_v15 = vor.u32 %v5413_v57, %v5410_v63 }
 0x1c2   :  { %7752 = vmatprep.mubr.msk.bf16.mxu1 %vm415_vm1, %v11896_v48 }
 0x1c3   :  { %v5415_v53 = vrot.slane %v5414_v15, 4 }
 0x1c5   :  { %8037 = vmatmul.mubr.msk.bf16.gmra.mrb[52].mxu0 %vm415_vm1, %v10451_v52  ;;  %v5420_v11 = vsel %vm8809_vm4, %v5415_v53, %v5419_v35 }
 0x1c6   :  { %8040 = vmatprep.mubr.msk.bf16.mxu0 %vm415_vm1, %v10453_v60  ;;  %v7151_v31 = vcombine.low %v5420_v11, %v5430_v29 }
 0x1c9   :  { %7753 = vmatmul.mubr.msk.bf16.gmra.mrb[32].mxu1 %vm415_vm1, %v11842_v6  ;;  %v11899_v6 = vld [vmem:[#allocation70_spill] sm:$0xff] }
 0x1ca   :  { %7756 = vmatprep.mubr.msk.bf16.mxu1 %vm415_vm1, %v11845_v0  ;;  %v11902_v0 = vld [vmem:[#allocation33_spill] sm:$0xff] }
 0x1cd   :  { %8041 = vmatmul.mubr.msk.bf16.gmra.mrb[56].mxu0 %vm415_vm1, %v10467_v34 }
 0x1ce   :  { %8044 = vmatprep.mubr.msk.bf16.mxu0 %vm415_vm1, %v10756_v21 }
 0x1d1   :  { %7757 = vmatmul.mubr.msk.bf16.gmra.mrb[36].mxu1 %vm415_vm1, %v11846_v51  ;;  %v11903_v51 = vld [vmem:[#allocation79_spill] sm:$0xff] }
 0x1d2   :  { %7760 = vmatprep.mubr.msk.bf16.mxu1 %vm415_vm1, %v11849_v13  ;;  %v11904_v13 = vld [vmem:[#allocation38_spill] sm:$0xff] }
 0x1d5   :  { %8045 = vmatmul.mubr.msk.bf16.gmra.mrb[60].mxu0 %vm415_vm1, %v7151_v31 }
 0x1d6   :  { %8050 = vmatprep.mubr.msk.bf16.mxu0 %vm415_vm1, %v11838_v8  ;;  %v11898_v8 = vld [vmem:[#allocation71_spill] sm:$0xff] }
 0x1d9   :  { %7761 = vmatmul.mubr.msk.bf16.gmra.mrb[40].mxu1 %vm415_vm1, %v11850_v47  ;;  %v11906_v47 = vld [vmem:[#allocation24_spill] sm:$0xff] }
 0x1da   :  { %7764 = vmatprep.mubr.msk.bf16.mxu1 %vm415_vm1, %v11853_v42  ;;  %v11907_v42 = vld [vmem:[#allocation37_spill] sm:$0xff] }
 0x1dd   :  { %8051 = vmatmul.mubr.msk.bf16.vlgmr.msra.gmra.mrb[0].mxu0 %vm415_vm1, %v11840_v17  ;;  %v11900_v17 = vld [vmem:[#allocation72_spill] sm:$0xff] }
 0x1de   :  { %8054 = vmatprep.mubr.msk.bf16.mxu0 %vm415_vm1, %v11841_v55  ;;  %v11901_v55 = vld [vmem:[#allocation75_spill] sm:$0xff] }
 0x1e1   :  { %7765 = vmatmul.mubr.msk.bf16.gmra.mrb[44].mxu1 %vm415_vm1, %v11854_v62  ;;  %v11909_v62 = vld [vmem:[#allocation101_spill] sm:$0xff] }
 0x1e2   :  { %7768 = vmatprep.mubr.msk.bf16.mxu1 %vm415_vm1, %v11857_v9  ;;  %v11911_v9 = vld [vmem:[#allocation78_spill] sm:$0xff] }
 0x1e5   :  { %8055 = vmatmul.mubr.msk.bf16.gmra.mrb[4].mxu0 %vm415_vm1, %v11897_v37 }
 0x1e6   :  { %8058 = vmatprep.mubr.msk.bf16.mxu0 %vm415_vm1, %v11898_v8 }
 0x1e9   :  { %7769 = vmatmul.mubr.msk.bf16.gmra.mrb[48].mxu1 %vm415_vm1, %v11899_v6 }
 0x1ea   :  { %7772 = vmatprep.mubr.msk.bf16.mxu1 %vm415_vm1, %v11861_v32  ;;  %v11905_v32 = vld [vmem:[#allocation81_spill] sm:$0xff] }
 0x1ed   :  { %8059 = vmatmul.mubr.msk.bf16.gmra.mrb[8].mxu0 %vm415_vm1, %v11900_v17 }
 0x1ee   :  { %8062 = vmatprep.mubr.msk.bf16.mxu0 %vm415_vm1, %v11901_v55 }
 0x1f1   :  { %7773 = vmatmul.mubr.msk.bf16.gmra.mrb[52].mxu1 %vm415_vm1, %v11862_v5  ;;  %v11908_v5 = vld [vmem:[#allocation73_spill] sm:$0xff] }
 0x1f2   :  { %7776 = vmatprep.mubr.msk.bf16.mxu1 %vm415_vm1, %v11864_v18  ;;  %v11910_v18 = vld [vmem:[#allocation34_spill] sm:$0xff] }
 0x1f5   :  { %8063 = vmatmul.mubr.msk.bf16.gmra.mrb[12].mxu0 %vm415_vm1, %v11902_v0 }
 0x1f6   :  { %8066 = vmatprep.mubr.msk.bf16.mxu0 %vm415_vm1, %v11903_v51 }
 0x1f9   :  { %7777 = vmatmul.mubr.msk.bf16.gmra.mrb[56].mxu1 %vm415_vm1, %v11904_v13 }
 0x1fa   :  { %7780 = vmatprep.mubr.msk.bf16.mxu1 %vm415_vm1, %v11905_v32 }
 0x1fd   :  { %8067 = vmatmul.mubr.msk.bf16.gmra.mrb[16].mxu0 %vm415_vm1, %v11906_v47 }
 0x1fe   :  { %8070 = vmatprep.mubr.msk.bf16.mxu0 %vm415_vm1, %v11907_v42 }
 0x201   :  { %7781 = vmatmul.mubr.msk.bf16.gmra.mrb[60].mxu1 %vm415_vm1, %v11908_v5 }
 0x202   :  { %7818 = vmatprep.mubr.msk.bf16.mxu1 %vm415_vm1, %v11909_v62 }
 0x205   :  { %8071 = vmatmul.mubr.msk.bf16.gmra.mrb[20].mxu0 %vm415_vm1, %v11910_v18  ;;  %v10958_v18 = vld [vmem:[%s11402_s2] ss:$0 sm:$0xff] }
 0x206   :  { %8074 = vmatprep.mubr.msk.bf16.mxu0 %vm415_vm1, %v11911_v9 }
 0x209   :  { %7819 = vmatmul.mubr.msk.bf16.vlgmr.msra.gmra.mrb[32].mxu1 %vm415_vm1, %v10217_v7  ;;  %v5937_v7 = vsel %vm9352_vm7, %v5935_v46, %v5936_v23 }
 0x20a   :  { %7822 = vmatprep.mubr.msk.bf16.mxu1 %vm415_vm1, %v10230_v49  ;;  %v7187_v57 = vcombine.low %v5934_v40, %v5937_v7  ;;  %v11915_v49 = vld [vmem:[#allocation43_spill] sm:$0xff] }
 0x20d   :  { %8075 = vmatmul.mubr.msk.bf16.gmra.mrb[24].mxu0 %vm415_vm1, %v11912_v33 }
 0x20e   :  { %8078 = vmatprep.mubr.msk.bf16.mxu0 %vm415_vm1, %v11913_v30 }
 0x211   :  { %7823 = vmatmul.mubr.msk.bf16.gmra.mrb[36].mxu1 %vm415_vm1, %v10264_v38  ;;  %v11917_v38 = vld [vmem:[#allocation91_spill] sm:$0xff] }
 0x212   :  { %7826 = vmatprep.mubr.msk.bf16.mxu1 %vm415_vm1, %v11891_v14  ;;  %v11925_v14 = vld [vmem:[#allocation103_spill] sm:$0xff] }
 0x215   :  { %8079 = vmatmul.mubr.msk.bf16.gmra.mrb[28].mxu0 %vm415_vm1, %v7187_v57 }
 0x216   :  { %8082 = vmatprep.mubr.msk.bf16.mxu0 %vm415_vm1, %v11915_v49 }
 0x219   :  { %7827 = vmatmul.mubr.msk.bf16.gmra.mrb[40].mxu1 %vm415_vm1, %v11892_v50  ;;  %v11926_v50 = vld [vmem:[#allocation48_spill] sm:$0xff] }
 0x21a   :  { %7830 = vmatprep.mubr.msk.bf16.mxu1 %vm415_vm1, %v11893_v2 }
 0x21d   :  { %8083 = vmatmul.mubr.msk.bf16.gmra.mrb[32].mxu0 %vm415_vm1, %v11916_v28 }
 0x21e   :  { %8086 = vmatprep.mubr.msk.bf16.mxu0 %vm415_vm1, %v11871_v3  ;;  %v11918_v3 = vld [vmem:[#allocation94_spill] sm:$0xff] }
 0x221   :  { %7831 = vmatmul.mubr.msk.bf16.gmra.mrb[44].mxu1 %vm415_vm1, %v11894_v25 }
 0x222   :  { %7834 = vmatprep.mubr.msk.bf16.mxu1 %vm415_vm1, %v10401_v39  ;;  %v11919_v39 = vld [vmem:[#allocation95_spill] sm:$0xff] }
 0x225   :  { %8087 = vmatmul.mubr.msk.bf16.gmra.mrb[36].mxu0 %vm415_vm1, %v11873_v26  ;;  %v11920_v26 = vld [vmem:[#allocation96_spill] sm:$0xff] }
 0x226   :  { %8090 = vmatprep.mubr.msk.bf16.mxu0 %vm415_vm1, %v11874_v45  ;;  %v7185_v45 = vrot.slane %v10593_v54, 9 }
 0x229   :  { %7835 = vmatmul.mubr.msk.bf16.gmra.mrb[48].mxu1 %vm415_vm1, %v10405_v27  ;;  %v11921_v27 = vld [vmem:[#allocation97_spill] sm:$0xff] }
 0x22a   :  { %7838 = vmatprep.mubr.msk.bf16.mxu1 %vm415_vm1, %v10428_v59  ;;  %v11922_v59 = vld [vmem:[#allocation98_spill] sm:$0xff] }
 0x22d   :  { %8091 = vmatmul.mubr.msk.bf16.gmra.mrb[40].mxu0 %vm415_vm1, %v11917_v38 }
 0x22e   :  { %8094 = vmatprep.mubr.msk.bf16.mxu0 %vm415_vm1, %v11918_v3 }
 0x231   :  { %7839 = vmatmul.mubr.msk.bf16.gmra.mrb[52].mxu1 %vm415_vm1, %v10432_v12  ;;  %v11923_v12 = vld [vmem:[#allocation99_spill] sm:$0xff] }
 0x232   :  { %7842 = vmatprep.mubr.msk.bf16.mxu1 %vm415_vm1, %v10451_v52  ;;  %v11924_v52 = vld [vmem:[#allocation102_spill] sm:$0xff] }
 0x235   :  { %8095 = vmatmul.mubr.msk.bf16.gmra.mrb[44].mxu0 %vm415_vm1, %v11919_v39 }
 0x236   :  { %8098 = vmatprep.mubr.msk.bf16.mxu0 %vm415_vm1, %v11920_v26 }
 0x239   :  { %7843 = vmatmul.mubr.msk.bf16.gmra.mrb[56].mxu1 %vm415_vm1, %v10453_v60  ;;  %v5940_v60 = vrot.slane %v10598_v1, 5 }
 0x23a   :  { %7846 = vmatprep.mubr.msk.bf16.mxu1 %vm415_vm1, %v10467_v34 }
 0x23b   :  { %v5942_v34 = vrot.slane %v5940_v60, 4  ;;  %v5941_v2 = vsel %vm9352_vm7, %v7185_v45, %v5940_v60 }
 0x23d   :  { %8099 = vmatmul.mubr.msk.bf16.gmra.mrb[48].mxu0 %vm415_vm1, %v11921_v27  ;;  %v5944_v25 = vsel %vm9352_vm7, %v5942_v34, %v5943_v20 }
 0x23e   :  { %8102 = vmatprep.mubr.msk.bf16.mxu0 %vm415_vm1, %v11922_v59  ;;  %v7188_v35 = vcombine.low %v5941_v2, %v5944_v25 }
 0x241   :  { %7847 = vmatmul.mubr.msk.bf16.gmra.mrb[60].mxu1 %vm415_vm1, %v10756_v21 }
 0x245   :  { %8103 = vmatmul.mubr.msk.bf16.gmra.mrb[52].mxu0 %vm415_vm1, %v11923_v12 }
 0x246   :  { %8106 = vmatprep.mubr.msk.bf16.mxu0 %vm415_vm1, %v11924_v52 }
 0x24d   :  { %8107 = vmatmul.mubr.msk.bf16.gmra.mrb[56].mxu0 %vm415_vm1, %v11925_v14 }
 0x24e   :  { %8110 = vmatprep.mubr.msk.bf16.mxu0 %vm415_vm1, %v11926_v50 }
 0x255   :  { %8111 = vmatmul.mubr.msk.bf16.gmra.mrb[60].mxu0 %vm415_vm1, %v7188_v35 }
 0x25c   :  { %v7722_v1 = vpop.f32.mrb[0].mxu1 }
 0x25d   :  { %v3438_v54 = vpop.f32.mrb[1].mxu1 }
 0x25e   :  { %v7723_v10 = vpop.f32.mrb[2].mxu1 }
 0x25f   :  { %v3441_v48 = vpop.f32.mrb[3].mxu1 }
 0x264   :  { %v7726_v36 = vpop.f32.mrb[4].mxu1 }
 0x265   :  { %v3454_v61 = vpop.f32.mrb[5].mxu1 }
 0x266   :  { %v7727_v19 = vpop.f32.mrb[6].mxu1 }
 0x267   :  { %v10905_v4 = vpop.f32.mrb[7].mxu1 }
 0x26c   :  { %v10907_v15 = vpop.f32.mrb[8].mxu1 }
 0x26d   :  { %v10909_v56 = vpop.f32.mrb[9].mxu1 }
 0x26e   :  { %v10911_v41 = vpop.f32.mrb[10].mxu1 }
 0x26f   :  { %v10913_v43 = vpop.f32.mrb[11].mxu1 }
 0x274   :  { %v10915_v44 = vpop.f32.mrb[12].mxu1 }
 0x275   :  { %v10917_v21 = vpop.f32.mrb[13].mxu1 }
 0x276   :  { %v10919_v53 = vpop.f32.mrb[14].mxu1 }
 0x277   :  { %v10921_v58 = vpop.f32.mrb[15].mxu1 }
 0x27c   :  { %v10923_v16 = vpop.f32.mrb[16].mxu1 }
 0x27d   :  { %v10925_v11 = vpop.f32.mrb[17].mxu1 }
 0x27e   :  { %v10927_v29 = vpop.f32.mrb[18].mxu1 }
 0x27f   :  { %v10929_v31 = vpop.f32.mrb[19].mxu1 }
 0x284   :  { %v10931_v37 = vpop.f32.mrb[20].mxu1 }
 0x285   :  { %v10933_v8 = vpop.f32.mrb[21].mxu1 }
 0x286   :  { %v10935_v6 = vpop.f32.mrb[22].mxu1 }
 0x287   :  { %v10937_v17 = vpop.f32.mrb[23].mxu1 }
 0x28c   :  { %v10939_v55 = vpop.f32.mrb[24].mxu1 }
 0x28d   :  { %v10941_v0 = vpop.f32.mrb[25].mxu1 }
 0x28e   :  { %v10943_v51 = vpop.f32.mrb[26].mxu1 }
 0x28f   :  { %v10945_v13 = vpop.f32.mrb[27].mxu1 }
 0x294   :  { %v10947_v32 = vpop.f32.mrb[28].mxu1 }
 0x295   :  { %v10949_v47 = vpop.f32.mrb[29].mxu1 }
 0x296   :  { %v10951_v42 = vpop.f32.mrb[30].mxu1 }
 0x297   :  { %v10953_v5 = vpop.f32.mrb[31].mxu1 }
 0x2b0   :  { %v8052_v62 = vpop.f32.mrb[0].mxu0 }
 0x2b1   :  { %v8116_v9 = vadd.f32 %v8052_v62, %v7722_v1  ;;  %v6060_v24 = vpop.f32.mrb[1].mxu0 }
 0x2b2   :  { %v8117_v46 = vadd.f32 %v6060_v24, %v3438_v54  ;;  %v8053_v23 = vpop.f32.mrb[2].mxu0 }
 0x2b3   :  { %v6516_v33 = vmul.f32 %v8116_v9, %v10958_v18  ;;  %v8118_v30 = vadd.f32 %v8053_v23, %v7723_v10  ;;  %v6063_v63 = vpop.f32.mrb[3].mxu0 }
 0x2b4   :  { %v6514_v40 = vmul.f32 %v8117_v46, %v10958_v18  ;;  %v8119_v7 = vadd.f32 %v6063_v63, %v3441_v48 }
 0x2b5   :  { %v6587_v57 = vadd.f32 %v10963_v22, %v6516_v33  ;;  %v6517_v49 = vmul.f32 %v8118_v30, %v10958_v18 }
 0x2b6   :  { %v6585_v28 = vadd.f32 %v10963_v22, %v6514_v40  ;;  %v6515_v38 = vmul.f32 %v8119_v7, %v10958_v18 }
 0x2b7   :  { %v6651_v3 = vmax.f32 %v6587_v57, 0.0  ;;  %v6588_v39 = vadd.f32 %v10963_v22, %v6517_v49 }
 0x2b8   :  { %v6649_v26 = vmax.f32 %v6585_v28, 0.0  ;;  %v6586_v27 = vadd.f32 %v10963_v22, %v6515_v38  ;;  %v8056_v59 = vpop.f32.mrb[4].mxu0 }
 0x2b9   :  { %6715 = vst [vmem:[%s11404_s4 + $0x10] sm:$0xff] %v6651_v3  ;;  %v6652_v12 = vmax.f32 %v6588_v39, 0.0  ;;  %v8120_v52 = vadd.f32 %v8056_v59, %v7726_v36  ;;  %v6076_v60 = vpop.f32.mrb[5].mxu0 }
 0x2ba   :  { %6713 = vst [vmem:[%s11404_s4] sm:$0xff] %v6649_v26  ;;  %v6650_v45 = vmax.f32 %v6586_v27, 0.0  ;;  %v8121_v34 = vadd.f32 %v6076_v60, %v3454_v61  ;;  %v8057_v20 = vpop.f32.mrb[6].mxu0 }
 0x2bb   :  { %6716 = vst [vmem:[%s11404_s4 + $0x18] sm:$0xff] %v6652_v12  ;;  %v6520_v14 = vmul.f32 %v8120_v52, %v10958_v18  ;;  %v8122_v50 = vadd.f32 %v8057_v20, %v7727_v19  ;;  %v6079_v2 = vpop.f32.mrb[7].mxu0 }
 0x2bc   :  { %6714 = vst [vmem:[%s11404_s4 + $0x8] sm:$0xff] %v6650_v45  ;;  %v6518_v25 = vmul.f32 %v8121_v34, %v10958_v18  ;;  %v8123_v35 = vadd.f32 %v6079_v2, %v10905_v4 }
 0x2bd   :  { %v6591_v1 = vadd.f32 %v10963_v22, %v6520_v14  ;;  %v6521_v54 = vmul.f32 %v8122_v50, %v10958_v18 }
 0x2be   :  { %v6589_v10 = vadd.f32 %v10963_v22, %v6518_v25  ;;  %v6519_v48 = vmul.f32 %v8123_v35, %v10958_v18 }
 0x2bf   :  { %v6655_v36 = vmax.f32 %v6591_v1, 0.0  ;;  %v6592_v61 = vadd.f32 %v10963_v22, %v6521_v54 }
 0x2c0   :  { %v6653_v19 = vmax.f32 %v6589_v10, 0.0  ;;  %v6590_v62 = vadd.f32 %v10963_v22, %v6519_v48  ;;  %v8060_v9 = vpop.f32.mrb[8].mxu0 }
 0x2c1   :  { %6719 = vst [vmem:[%s11404_s4 + $0x30] sm:$0xff] %v6655_v36  ;;  %v6656_v4 = vmax.f32 %v6592_v61, 0.0  ;;  %v8124_v24 = vadd.f32 %v8060_v9, %v10907_v15  ;;  %v6092_v46 = vpop.f32.mrb[9].mxu0 }
 0x2c2   :  { %6717 = vst [vmem:[%s11404_s4 + $0x20] sm:$0xff] %v6653_v19  ;;  %v6654_v23 = vmax.f32 %v6590_v62, 0.0  ;;  %v8125_v33 = vadd.f32 %v6092_v46, %v10909_v56  ;;  %v8061_v30 = vpop.f32.mrb[10].mxu0 }
 0x2c3   :  { %6720 = vst [vmem:[%s11404_s4 + $0x38] sm:$0xff] %v6656_v4  ;;  %v6524_v63 = vmul.f32 %v8124_v24, %v10958_v18  ;;  %v8126_v40 = vadd.f32 %v8061_v30, %v10911_v41  ;;  %v6095_v7 = vpop.f32.mrb[11].mxu0 }
 0x2c4   :  { %6718 = vst [vmem:[%s11404_s4 + $0x28] sm:$0xff] %v6654_v23  ;;  %v6522_v15 = vmul.f32 %v8125_v33, %v10958_v18  ;;  %v8127_v57 = vadd.f32 %v6095_v7, %v10913_v43 }
 0x2c5   :  { %v6595_v56 = vadd.f32 %v10963_v22, %v6524_v63  ;;  %v6525_v49 = vmul.f32 %v8126_v40, %v10958_v18 }
 0x2c6   :  { %v6593_v28 = vadd.f32 %v10963_v22, %v6522_v15  ;;  %v6523_v38 = vmul.f32 %v8127_v57, %v10958_v18 }
 0x2c7   :  { %v6659_v3 = vmax.f32 %v6595_v56, 0.0  ;;  %v6596_v41 = vadd.f32 %v10963_v22, %v6525_v49 }
 0x2c8   :  { %v6657_v39 = vmax.f32 %v6593_v28, 0.0  ;;  %v6594_v26 = vadd.f32 %v10963_v22, %v6523_v38  ;;  %v8064_v27 = vpop.f32.mrb[12].mxu0 }
 0x2c9   :  { %6723 = vst [vmem:[%s11404_s4 + $0x50] sm:$0xff] %v6659_v3  ;;  %v6660_v43 = vmax.f32 %v6596_v41, 0.0  ;;  %v8128_v59 = vadd.f32 %v8064_v27, %v10915_v44  ;;  %v6108_v12 = vpop.f32.mrb[13].mxu0 }
 0x2ca   :  { %6721 = vst [vmem:[%s11404_s4 + $0x40] sm:$0xff] %v6657_v39  ;;  %v6658_v52 = vmax.f32 %v6594_v26, 0.0  ;;  %v8129_v60 = vadd.f32 %v6108_v12, %v10917_v21  ;;  %v8065_v45 = vpop.f32.mrb[14].mxu0 }
 0x2cb   :  { %6724 = vst [vmem:[%s11404_s4 + $0x58] sm:$0xff] %v6660_v43  ;;  %v6528_v34 = vmul.f32 %v8128_v59, %v10958_v18  ;;  %v8130_v20 = vadd.f32 %v8065_v45, %v10919_v53  ;;  %v6111_v14 = vpop.f32.mrb[15].mxu0 }
 0x2cc   :  { %6722 = vst [vmem:[%s11404_s4 + $0x48] sm:$0xff] %v6658_v52  ;;  %v6526_v44 = vmul.f32 %v8129_v60, %v10958_v18  ;;  %v8131_v50 = vadd.f32 %v6111_v14, %v10921_v58 }
 0x2cd   :  { %v6599_v21 = vadd.f32 %v10963_v22, %v6528_v34  ;;  %v6529_v2 = vmul.f32 %v8130_v20, %v10958_v18 }
 0x2ce   :  { %v6597_v25 = vadd.f32 %v10963_v22, %v6526_v44  ;;  %v6527_v35 = vmul.f32 %v8131_v50, %v10958_v18 }
 0x2cf   :  { %v6663_v1 = vmax.f32 %v6599_v21, 0.0  ;;  %v6600_v53 = vadd.f32 %v10963_v22, %v6529_v2 }
 0x2d0   :  { %v6661_v54 = vmax.f32 %v6597_v25, 0.0  ;;  %v6598_v10 = vadd.f32 %v10963_v22, %v6527_v35  ;;  %v8068_v48 = vpop.f32.mrb[16].mxu0 }
 0x2d1   :  { %6727 = vst [vmem:[%s11404_s4 + $0x70] sm:$0xff] %v6663_v1  ;;  %v6664_v58 = vmax.f32 %v6600_v53, 0.0  ;;  %v8132_v36 = vadd.f32 %v8068_v48, %v10923_v16  ;;  %v6124_v61 = vpop.f32.mrb[17].mxu0 }
 0x2d2   :  { %6725 = vst [vmem:[%s11404_s4 + $0x60] sm:$0xff] %v6661_v54  ;;  %v6662_v19 = vmax.f32 %v6598_v10, 0.0  ;;  %v8133_v62 = vadd.f32 %v6124_v61, %v10925_v11  ;;  %v8069_v9 = vpop.f32.mrb[18].mxu0 }
 0x2d3   :  { %6728 = vst [vmem:[%s11404_s4 + $0x78] sm:$0xff] %v6664_v58  ;;  %v6532_v4 = vmul.f32 %v8132_v36, %v10958_v18  ;;  %v8134_v24 = vadd.f32 %v8069_v9, %v10927_v29  ;;  %v6127_v46 = vpop.f32.mrb[19].mxu0 }
 0x2d4   :  { %6726 = vst [vmem:[%s11404_s4 + $0x68] sm:$0xff] %v6662_v19  ;;  %v6530_v16 = vmul.f32 %v8133_v62, %v10958_v18  ;;  %v8135_v23 = vadd.f32 %v6127_v46, %v10929_v31 }
 0x2d5   :  { %v6603_v11 = vadd.f32 %v10963_v22, %v6532_v4  ;;  %v6533_v33 = vmul.f32 %v8134_v24, %v10958_v18 }
 0x2d6   :  { %v6601_v30 = vadd.f32 %v10963_v22, %v6530_v16  ;;  %v6531_v63 = vmul.f32 %v8135_v23, %v10958_v18 }
 0x2d7   :  { %v6667_v40 = vmax.f32 %v6603_v11, 0.0  ;;  %v6604_v29 = vadd.f32 %v10963_v22, %v6533_v33 }
 0x2d8   :  { %v6665_v7 = vmax.f32 %v6601_v30, 0.0  ;;  %v6602_v15 = vadd.f32 %v10963_v22, %v6531_v63  ;;  %v8072_v57 = vpop.f32.mrb[20].mxu0 }
 0x2d9   :  { %6731 = vst [vmem:[%s11404_s4 + $0x90] sm:$0xff] %v6667_v40  ;;  %v6668_v31 = vmax.f32 %v6604_v29, 0.0  ;;  %v8136_v56 = vadd.f32 %v8072_v57, %v10931_v37  ;;  %v6140_v49 = vpop.f32.mrb[21].mxu0 }
 0x2da   :  { %6729 = vst [vmem:[%s11404_s4 + $0x80] sm:$0xff] %v6665_v7  ;;  %v6666_v28 = vmax.f32 %v6602_v15, 0.0  ;;  %v8137_v38 = vadd.f32 %v6140_v49, %v10933_v8  ;;  %v8073_v3 = vpop.f32.mrb[22].mxu0 }
 0x2db   :  { %6732 = vst [vmem:[%s11404_s4 + $0x98] sm:$0xff] %v6668_v31  ;;  %v6536_v41 = vmul.f32 %v8136_v56, %v10958_v18  ;;  %v8138_v39 = vadd.f32 %v8073_v3, %v10935_v6  ;;  %v6143_v26 = vpop.f32.mrb[23].mxu0 }
 0x2dc   :  { %6730 = vst [vmem:[%s11404_s4 + $0x88] sm:$0xff] %v6666_v28  ;;  %v6534_v37 = vmul.f32 %v8137_v38, %v10958_v18  ;;  %v8139_v27 = vadd.f32 %v6143_v26, %v10937_v17  ;;  %v11086_v59 = vpop.f32.mrb[32].mxu1 }
 0x2dd   :  { %v6607_v8 = vadd.f32 %v10963_v22, %v6536_v41  ;;  %v6537_v43 = vmul.f32 %v8138_v39, %v10958_v18  ;;  %v11090_v6 = vpop.f32.mrb[33].mxu1 }
 0x2de   :  { %v6605_v12 = vadd.f32 %v10963_v22, %v6534_v37  ;;  %v6535_v52 = vmul.f32 %v8139_v27, %v10958_v18  ;;  %v11093_v34 = vpop.f32.mrb[34].mxu1 }
 0x2df   :  { %v6671_v60 = vmax.f32 %v6607_v8, 0.0  ;;  %v6608_v45 = vadd.f32 %v10963_v22, %v6537_v43  ;;  %v11096_v44 = vpop.f32.mrb[35].mxu1 }
 0x2e0   :  { %v6669_v20 = vmax.f32 %v6605_v12, 0.0  ;;  %v6606_v17 = vadd.f32 %v10963_v22, %v6535_v52  ;;  %v8076_v14 = vpop.f32.mrb[24].mxu0 }
 0x2e1   :  { %6735 = vst [vmem:[%s11404_s4 + $0xb0] sm:$0xff] %v6671_v60  ;;  %v6672_v50 = vmax.f32 %v6608_v45, 0.0  ;;  %v8140_v21 = vadd.f32 %v8076_v14, %v10939_v55  ;;  %v6156_v2 = vpop.f32.mrb[25].mxu0 }
 0x2e2   :  { %6733 = vst [vmem:[%s11404_s4 + $0xa0] sm:$0xff] %v6669_v20  ;;  %v6670_v25 = vmax.f32 %v6606_v17, 0.0  ;;  %v8141_v35 = vadd.f32 %v6156_v2, %v10941_v0  ;;  %v8077_v1 = vpop.f32.mrb[26].mxu0 }
 0x2e3   :  { %6736 = vst [vmem:[%s11404_s4 + $0xb8] sm:$0xff] %v6672_v50  ;;  %v6540_v53 = vmul.f32 %v8140_v21, %v10958_v18  ;;  %v8142_v54 = vadd.f32 %v8077_v1, %v10943_v51  ;;  %v6159_v10 = vpop.f32.mrb[27].mxu0 }
 0x2e4   :  { %6734 = vst [vmem:[%s11404_s4 + $0xa8] sm:$0xff] %v6670_v25  ;;  %v6538_v55 = vmul.f32 %v8141_v35, %v10958_v18  ;;  %v8143_v48 = vadd.f32 %v6159_v10, %v10945_v13  ;;  %v11118_v36 = vpop.f32.mrb[36].mxu1 }
 0x2e5   :  { %v6611_v0 = vadd.f32 %v10963_v22, %v6540_v53  ;;  %v6541_v58 = vmul.f32 %v8142_v54, %v10958_v18  ;;  %v11122_v51 = vpop.f32.mrb[37].mxu1 }
 0x2e6   :  { %v6609_v61 = vadd.f32 %v10963_v22, %v6538_v55  ;;  %v6539_v19 = vmul.f32 %v8143_v48, %v10958_v18  ;;  %v11125_v4 = vpop.f32.mrb[38].mxu1 }
 0x2e7   :  { %v6675_v62 = vmax.f32 %v6611_v0, 0.0  ;;  %v6612_v9 = vadd.f32 %v10963_v22, %v6541_v58  ;;  %v11128_v16 = vpop.f32.mrb[39].mxu1 }
 0x2e8   :  { %v6673_v24 = vmax.f32 %v6609_v61, 0.0  ;;  %v6610_v13 = vadd.f32 %v10963_v22, %v6539_v19  ;;  %v8080_v46 = vpop.f32.mrb[28].mxu0 }
 0x2e9   :  { %6739 = vst [vmem:[%s11404_s4 + $0xd0] sm:$0xff] %v6675_v62  ;;  %v6676_v23 = vmax.f32 %v6612_v9, 0.0  ;;  %v8144_v11 = vadd.f32 %v8080_v46, %v10947_v32  ;;  %v6172_v33 = vpop.f32.mrb[29].mxu0 }
 0x2ea   :  { %6737 = vst [vmem:[%s11404_s4 + $0xc0] sm:$0xff] %v6673_v24  ;;  %v6674_v30 = vmax.f32 %v6610_v13, 0.0  ;;  %v8145_v63 = vadd.f32 %v6172_v33, %v10949_v47  ;;  %v8081_v40 = vpop.f32.mrb[30].mxu0 }
 0x2eb   :  { %6740 = vst [vmem:[%s11404_s4 + $0xd8] sm:$0xff] %v6676_v23  ;;  %v6544_v29 = vmul.f32 %v8144_v11, %v10958_v18  ;;  %v8146_v7 = vadd.f32 %v8081_v40, %v10951_v42  ;;  %v6175_v15 = vpop.f32.mrb[31].mxu0 }
 0x2ec   :  { %6738 = vst [vmem:[%s11404_s4 + $0xc8] sm:$0xff] %v6674_v30  ;;  %v6542_v32 = vmul.f32 %v8145_v63, %v10958_v18  ;;  %v8147_v57 = vadd.f32 %v6175_v15, %v10953_v5  ;;  %v11150_v56 = vpop.f32.mrb[40].mxu1 }
 0x2ed   :  { %v6615_v47 = vadd.f32 %v10963_v22, %v6544_v29  ;;  %v6545_v31 = vmul.f32 %v8146_v7, %v10958_v18  ;;  %v11154_v42 = vpop.f32.mrb[41].mxu1 }
 0x2ee   :  { %v6613_v49 = vadd.f32 %v10963_v22, %v6542_v32  ;;  %v6543_v28 = vmul.f32 %v8147_v57, %v10958_v18  ;;  %v11157_v41 = vpop.f32.mrb[42].mxu1 }
 0x2ef   :  { %v6679_v38 = vmax.f32 %v6615_v47, 0.0  ;;  %v6616_v3 = vadd.f32 %v10963_v22, %v6545_v31  ;;  %v11160_v37 = vpop.f32.mrb[43].mxu1 }
 0x2f0   :  { %v6677_v39 = vmax.f32 %v6613_v49, 0.0  ;;  %v6614_v5 = vadd.f32 %v10963_v22, %v6543_v28  ;;  %v8084_v26 = vpop.f32.mrb[32].mxu0 }
 0x2f1   :  { %6743 = vst [vmem:[%s11404_s4 + $0xf0] sm:$0xff] %v6679_v38  ;;  %v6680_v27 = vmax.f32 %v6616_v3, 0.0  ;;  %v8148_v8 = vadd.f32 %v8084_v26, %v11086_v59  ;;  %v6188_v43 = vpop.f32.mrb[33].mxu0 }
 0x2f2   :  { %6741 = vst [vmem:[%s11404_s4 + $0xe0] sm:$0xff] %v6677_v39  ;;  %v6678_v12 = vmax.f32 %v6614_v5, 0.0  ;;  %v8149_v52 = vadd.f32 %v6188_v43, %v11090_v6  ;;  %v8085_v60 = vpop.f32.mrb[34].mxu0 }
 0x2f3   :  { %6744 = vst [vmem:[%s11404_s4 + $0xf8] sm:$0xff] %v6680_v27  ;;  %v6548_v45 = vmul.f32 %v8148_v8, %v10958_v18  ;;  %v8150_v20 = vadd.f32 %v8085_v60, %v11093_v34  ;;  %v6191_v17 = vpop.f32.mrb[35].mxu0 }
 0x2f4   :  { %6742 = vst [vmem:[%s11404_s4 + $0xe8] sm:$0xff] %v6678_v12  ;;  %v6546_v59 = vmul.f32 %v8149_v52, %v10958_v18  ;;  %v8151_v14 = vadd.f32 %v6191_v17, %v11096_v44  ;;  %v11182_v21 = vpop.f32.mrb[44].mxu1 }
 0x2f5   :  { %v6619_v6 = vadd.f32 %v10963_v22, %v6548_v45  ;;  %v6549_v50 = vmul.f32 %v8150_v20, %v10958_v18  ;;  %v11186_v34 = vpop.f32.mrb[45].mxu1 }
 0x2f6   :  { %v6617_v2 = vadd.f32 %v10963_v22, %v6546_v59  ;;  %v6547_v25 = vmul.f32 %v8151_v14, %v10958_v18  ;;  %v11189_v53 = vpop.f32.mrb[46].mxu1 }
 0x2f7   :  { %v6683_v35 = vmax.f32 %v6619_v6, 0.0  ;;  %v6620_v1 = vadd.f32 %v10963_v22, %v6549_v50  ;;  %v11192_v55 = vpop.f32.mrb[47].mxu1 }
 0x2f8   :  { %v6681_v54 = vmax.f32 %v6617_v2, 0.0  ;;  %v6618_v44 = vadd.f32 %v10963_v22, %v6547_v25  ;;  %v8088_v10 = vpop.f32.mrb[36].mxu0 }
 0x2f9   :  { %6747 = vst [vmem:[%s11404_s4 + $0x110] sm:$0xff] %v6683_v35  ;;  %v6684_v48 = vmax.f32 %v6620_v1, 0.0  ;;  %v8152_v0 = vadd.f32 %v8088_v10, %v11118_v36  ;;  %v6204_v58 = vpop.f32.mrb[37].mxu0 }
 0x2fa   :  { %6745 = vst [vmem:[%s11404_s4 + $0x100] sm:$0xff] %v6681_v54  ;;  %v6682_v61 = vmax.f32 %v6618_v44, 0.0  ;;  %v8153_v19 = vadd.f32 %v6204_v58, %v11122_v51  ;;  %v8089_v62 = vpop.f32.mrb[38].mxu0 }
 0x2fb   :  { %6748 = vst [vmem:[%s11404_s4 + $0x118] sm:$0xff] %v6684_v48  ;;  %v6552_v9 = vmul.f32 %v8152_v0, %v10958_v18  ;;  %v8154_v24 = vadd.f32 %v8089_v62, %v11125_v4  ;;  %v6207_v13 = vpop.f32.mrb[39].mxu0 }
 0x2fc   :  { %6746 = vst [vmem:[%s11404_s4 + $0x108] sm:$0xff] %v6682_v61  ;;  %v6550_v36 = vmul.f32 %v8153_v19, %v10958_v18  ;;  %v8155_v46 = vadd.f32 %v6207_v13, %v11128_v16  ;;  %v11214_v11 = vpop.f32.mrb[48].mxu1 }
 0x2fd   :  { %v6623_v51 = vadd.f32 %v10963_v22, %v6552_v9  ;;  %v6553_v23 = vmul.f32 %v8154_v24, %v10958_v18  ;;  %v11218_v4 = vpop.f32.mrb[49].mxu1 }
 0x2fe   :  { %v6621_v33 = vadd.f32 %v10963_v22, %v6550_v36  ;;  %v6551_v30 = vmul.f32 %v8155_v46, %v10958_v18  ;;  %v11221_v29 = vpop.f32.mrb[50].mxu1 }
 0x2ff   :  { %v6687_v63 = vmax.f32 %v6623_v51, 0.0  ;;  %v6624_v40 = vadd.f32 %v10963_v22, %v6553_v23  ;;  %v11224_v32 = vpop.f32.mrb[51].mxu1 }
 0x300   :  { %v6685_v7 = vmax.f32 %v6621_v33, 0.0  ;;  %v6622_v16 = vadd.f32 %v10963_v22, %v6551_v30  ;;  %v8092_v15 = vpop.f32.mrb[40].mxu0 }
 0x301   :  { %6751 = vst [vmem:[%s11404_s4 + $0x130] sm:$0xff] %v6687_v63  ;;  %v6688_v57 = vmax.f32 %v6624_v40, 0.0  ;;  %v8156_v47 = vadd.f32 %v8092_v15, %v11150_v56  ;;  %v6220_v31 = vpop.f32.mrb[41].mxu0 }
 0x302   :  { %6749 = vst [vmem:[%s11404_s4 + $0x120] sm:$0xff] %v6685_v7  ;;  %v6686_v49 = vmax.f32 %v6622_v16, 0.0  ;;  %v8157_v28 = vadd.f32 %v6220_v31, %v11154_v42  ;;  %v8093_v38 = vpop.f32.mrb[42].mxu0 }
 0x303   :  { %6752 = vst [vmem:[%s11404_s4 + $0x138] sm:$0xff] %v6688_v57  ;;  %v6556_v3 = vmul.f32 %v8156_v47, %v10958_v18  ;;  %v8158_v39 = vadd.f32 %v8093_v38, %v11157_v41  ;;  %v6223_v5 = vpop.f32.mrb[43].mxu0 }
 0x304   :  { %6750 = vst [vmem:[%s11404_s4 + $0x128] sm:$0xff] %v6686_v49  ;;  %v6554_v56 = vmul.f32 %v8157_v28, %v10958_v18  ;;  %v8159_v26 = vadd.f32 %v6223_v5, %v11160_v37  ;;  %v11246_v8 = vpop.f32.mrb[52].mxu1 }
 0x305   :  { %v6627_v42 = vadd.f32 %v10963_v22, %v6556_v3  ;;  %v6557_v27 = vmul.f32 %v8158_v39, %v10958_v18  ;;  %v11250_v41 = vpop.f32.mrb[53].mxu1 }
 0x306   :  { %v6625_v43 = vadd.f32 %v10963_v22, %v6554_v56  ;;  %v6555_v12 = vmul.f32 %v8159_v26, %v10958_v18  ;;  %v11253_v45 = vpop.f32.mrb[54].mxu1 }
 0x307   :  { %v6691_v52 = vmax.f32 %v6627_v42, 0.0  ;;  %v6628_v60 = vadd.f32 %v10963_v22, %v6557_v27  ;;  %v11256_v59 = vpop.f32.mrb[55].mxu1 }
 0x308   :  { %v6689_v20 = vmax.f32 %v6625_v43, 0.0  ;;  %v6626_v37 = vadd.f32 %v10963_v22, %v6555_v12  ;;  %v8096_v17 = vpop.f32.mrb[44].mxu0 }
 0x309   :  { %6755 = vst [vmem:[%s11404_s4 + $0x150] sm:$0xff] %v6691_v52  ;;  %v6692_v14 = vmax.f32 %v6628_v60, 0.0  ;;  %v8160_v6 = vadd.f32 %v8096_v17, %v11182_v21  ;;  %v6236_v50 = vpop.f32.mrb[45].mxu0 }
 0x30a   :  { %6753 = vst [vmem:[%s11404_s4 + $0x140] sm:$0xff] %v6689_v20  ;;  %v6690_v2 = vmax.f32 %v6626_v37, 0.0  ;;  %v8161_v25 = vadd.f32 %v6236_v50, %v11186_v34  ;;  %v8097_v35 = vpop.f32.mrb[46].mxu0 }
 0x30b   :  { %6756 = vst [vmem:[%s11404_s4 + $0x158] sm:$0xff] %v6692_v14  ;;  %v6560_v1 = vmul.f32 %v8160_v6, %v10958_v18  ;;  %v8162_v54 = vadd.f32 %v8097_v35, %v11189_v53  ;;  %v6239_v44 = vpop.f32.mrb[47].mxu0 }
 0x30c   :  { %6754 = vst [vmem:[%s11404_s4 + $0x148] sm:$0xff] %v6690_v2  ;;  %v6558_v21 = vmul.f32 %v8161_v25, %v10958_v18  ;;  %v8163_v10 = vadd.f32 %v6239_v44, %v11192_v55  ;;  %v11278_v0 = vpop.f32.mrb[56].mxu1 }
 0x30d   :  { %v6631_v34 = vadd.f32 %v10963_v22, %v6560_v1  ;;  %v6561_v48 = vmul.f32 %v8162_v54, %v10958_v18  ;;  %v11282_v53 = vpop.f32.mrb[57].mxu1 }
 0x30e   :  { %v6629_v58 = vadd.f32 %v10963_v22, %v6558_v21  ;;  %v6559_v61 = vmul.f32 %v8163_v10, %v10958_v18  ;;  %v11285_v9 = vpop.f32.mrb[58].mxu1 }
 0x30f   :  { %v6695_v19 = vmax.f32 %v6631_v34, 0.0  ;;  %v6632_v62 = vadd.f32 %v10963_v22, %v6561_v48  ;;  %v11288_v36 = vpop.f32.mrb[59].mxu1 }
 0x310   :  { %v6693_v24 = vmax.f32 %v6629_v58, 0.0  ;;  %v6630_v55 = vadd.f32 %v10963_v22, %v6559_v61  ;;  %v8100_v13 = vpop.f32.mrb[48].mxu0 }
 0x311   :  { %6759 = vst [vmem:[%s11404_s4 + $0x170] sm:$0xff] %v6695_v19  ;;  %v6696_v46 = vmax.f32 %v6632_v62, 0.0  ;;  %v8164_v51 = vadd.f32 %v8100_v13, %v11214_v11  ;;  %v6252_v23 = vpop.f32.mrb[49].mxu0 }
 0x312   :  { %6757 = vst [vmem:[%s11404_s4 + $0x160] sm:$0xff] %v6693_v24  ;;  %v6694_v33 = vmax.f32 %v6630_v55, 0.0  ;;  %v8165_v30 = vadd.f32 %v6252_v23, %v11218_v4  ;;  %v8101_v63 = vpop.f32.mrb[50].mxu0 }
 0x313   :  { %6760 = vst [vmem:[%s11404_s4 + $0x178] sm:$0xff] %v6696_v46  ;;  %v6564_v40 = vmul.f32 %v8164_v51, %v10958_v18  ;;  %v8166_v7 = vadd.f32 %v8101_v63, %v11221_v29  ;;  %v6255_v16 = vpop.f32.mrb[51].mxu0 }
 0x314   :  { %6758 = vst [vmem:[%s11404_s4 + $0x168] sm:$0xff] %v6694_v33  ;;  %v6562_v11 = vmul.f32 %v8165_v30, %v10958_v18  ;;  %v8167_v15 = vadd.f32 %v6255_v16, %v11224_v32  ;;  %v7848_v47 = vpop.f32.mrb[60].mxu1 }
 0x315   :  { %v6635_v4 = vadd.f32 %v10963_v22, %v6564_v40  ;;  %v6565_v57 = vmul.f32 %v8166_v7, %v10958_v18  ;;  %v4224_v28 = vpop.f32.mrb[61].mxu1 }
 0x316   :  { %v6633_v31 = vadd.f32 %v10963_v22, %v6562_v11  ;;  %v6563_v49 = vmul.f32 %v8167_v15, %v10958_v18  ;;  %v11313_v3 = vpop.f32.mrb[62].mxu1 }
 0x317   :  { %v6699_v29 = vmax.f32 %v6635_v4, 0.0  ;;  %v6636_v38 = vadd.f32 %v10963_v22, %v6565_v57  ;;  %v11316_v32 = vpop.f32.mrb[63].mxu1 }
 0x318   :  { %v6697_v39 = vmax.f32 %v6633_v31, 0.0  ;;  %v6634_v5 = vadd.f32 %v10963_v22, %v6563_v49  ;;  %v8104_v56 = vpop.f32.mrb[52].mxu0 }
 0x319   :  { %6763 = vst [vmem:[%s11404_s4 + $0x190] sm:$0xff] %v6699_v29  ;;  %v6700_v26 = vmax.f32 %v6636_v38, 0.0  ;;  %v8168_v42 = vadd.f32 %v8104_v56, %v11246_v8  ;;  %v6268_v27 = vpop.f32.mrb[53].mxu0 }
 0x31a   :  { %6761 = vst [vmem:[%s11404_s4 + $0x180] sm:$0xff] %v6697_v39  ;;  %v6698_v43 = vmax.f32 %v6634_v5, 0.0  ;;  %v8169_v12 = vadd.f32 %v6268_v27, %v11250_v41  ;;  %v8105_v52 = vpop.f32.mrb[54].mxu0 }
 0x31b   :  { %6764 = vst [vmem:[%s11404_s4 + $0x198] sm:$0xff] %v6700_v26  ;;  %v6568_v60 = vmul.f32 %v8168_v42, %v10958_v18  ;;  %v8170_v20 = vadd.f32 %v8105_v52, %v11253_v45  ;;  %v6271_v37 = vpop.f32.mrb[55].mxu0 }
 0x31c   :  { %6762 = vst [vmem:[%s11404_s4 + $0x188] sm:$0xff] %v6698_v43  ;;  %v6566_v8 = vmul.f32 %v8169_v12, %v10958_v18  ;;  %v8171_v17 = vadd.f32 %v6271_v37, %v11256_v59 }
 0x31d   :  { %v6639_v41 = vadd.f32 %v10963_v22, %v6568_v60  ;;  %v6569_v14 = vmul.f32 %v8170_v20, %v10958_v18 }
 0x31e   :  { %v6637_v6 = vadd.f32 %v10963_v22, %v6566_v8  ;;  %v6567_v50 = vmul.f32 %v8171_v17, %v10958_v18 }
 0x31f   :  { %v6703_v2 = vmax.f32 %v6639_v41, 0.0  ;;  %v6640_v45 = vadd.f32 %v10963_v22, %v6569_v14 }
 0x320   :  { %v6701_v25 = vmax.f32 %v6637_v6, 0.0  ;;  %v6638_v35 = vadd.f32 %v10963_v22, %v6567_v50  ;;  %v8108_v1 = vpop.f32.mrb[56].mxu0 }
 0x321   :  { %6767 = vst [vmem:[%s11404_s4 + $0x1b0] sm:$0xff] %v6703_v2  ;;  %v6704_v59 = vmax.f32 %v6640_v45, 0.0  ;;  %v8172_v54 = vadd.f32 %v8108_v1, %v11278_v0  ;;  %v6284_v44 = vpop.f32.mrb[57].mxu0 }
 0x322   :  { %6765 = vst [vmem:[%s11404_s4 + $0x1a0] sm:$0xff] %v6701_v25  ;;  %v6702_v21 = vmax.f32 %v6638_v35, 0.0  ;;  %v8173_v10 = vadd.f32 %v6284_v44, %v11282_v53  ;;  %v8109_v34 = vpop.f32.mrb[58].mxu0 }
 0x323   :  { %6768 = vst [vmem:[%s11404_s4 + $0x1b8] sm:$0xff] %v6704_v59  ;;  %v6572_v48 = vmul.f32 %v8172_v54, %v10958_v18  ;;  %v8174_v58 = vadd.f32 %v8109_v34, %v11285_v9  ;;  %v6287_v61 = vpop.f32.mrb[59].mxu0 }
 0x324   :  { %6766 = vst [vmem:[%s11404_s4 + $0x1a8] sm:$0xff] %v6702_v21  ;;  %v6570_v0 = vmul.f32 %v8173_v10, %v10958_v18  ;;  %v8175_v19 = vadd.f32 %v6287_v61, %v11288_v36 }
 0x325   :  { %v6643_v53 = vadd.f32 %v10963_v22, %v6572_v48  ;;  %v6573_v62 = vmul.f32 %v8174_v58, %v10958_v18 }
 0x326   :  { %v6641_v24 = vadd.f32 %v10963_v22, %v6570_v0  ;;  %v6571_v55 = vmul.f32 %v8175_v19, %v10958_v18 }
 0x327   :  { %v6707_v13 = vmax.f32 %v6643_v53, 0.0  ;;  %v6644_v9 = vadd.f32 %v10963_v22, %v6573_v62 }
 0x328   :  { %v6705_v46 = vmax.f32 %v6641_v24, 0.0  ;;  %v6642_v51 = vadd.f32 %v10963_v22, %v6571_v55  ;;  %v8112_v23 = vpop.f32.mrb[60].mxu0 }
 0x329   :  { %6771 = vst [vmem:[%s11404_s4 + $0x1d0] sm:$0xff] %v6707_v13  ;;  %v6708_v36 = vmax.f32 %v6644_v9, 0.0  ;;  %v8176_v33 = vadd.f32 %v8112_v23, %v7848_v47  ;;  %v6300_v30 = vpop.f32.mrb[61].mxu0 }
 0x32a   :  { %6769 = vst [vmem:[%s11404_s4 + $0x1c0] sm:$0xff] %v6705_v46  ;;  %v6706_v63 = vmax.f32 %v6642_v51, 0.0  ;;  %v8177_v40 = vadd.f32 %v6300_v30, %v4224_v28  ;;  %v8113_v7 = vpop.f32.mrb[62].mxu0 }
 0x32b   :  { %6772 = vst [vmem:[%s11404_s4 + $0x1d8] sm:$0xff] %v6708_v36  ;;  %v6576_v16 = vmul.f32 %v8176_v33, %v10958_v18  ;;  %v8178_v11 = vadd.f32 %v8113_v7, %v11313_v3  ;;  %v6303_v15 = vpop.f32.mrb[63].mxu0 }
 0x32c   :  { %6770 = vst [vmem:[%s11404_s4 + $0x1c8] sm:$0xff] %v6706_v63  ;;  %v6574_v4 = vmul.f32 %v8177_v40, %v10958_v18  ;;  %v8179_v57 = vadd.f32 %v6303_v15, %v11316_v32 }
 0x32d   :  { %v6647_v47 = vadd.f32 %v10963_v22, %v6576_v16  ;;  %v6577_v31 = vmul.f32 %v8178_v11, %v10958_v18 }
 0x32e   :  { %v6645_v49 = vadd.f32 %v10963_v22, %v6574_v4  ;;  %v6575_v28 = vmul.f32 %v8179_v57, %v10958_v18 }
 0x32f   :  { %v6711_v29 = vmax.f32 %v6647_v47, 0.0  ;;  %v6648_v38 = vadd.f32 %v10963_v22, %v6577_v31 }
 0x330   :  { %v6709_v3 = vmax.f32 %v6645_v49, 0.0  ;;  %v6646_v39 = vadd.f32 %v10963_v22, %v6575_v28 }
 0x331   :  { %6775 = vst [vmem:[%s11404_s4 + $0x1f0] sm:$0xff] %v6711_v29  ;;  %v6712_v5 = vmax.f32 %v6648_v38, 0.0 }
 0x332   :  { %6773 = vst [vmem:[%s11404_s4 + $0x1e0] sm:$0xff] %v6709_v3  ;;  %v6710_v56 = vmax.f32 %v6646_v39, 0.0 }
 0x333   :  { %6776 = vst [vmem:[%s11404_s4 + $0x1f8] sm:$0xff] %v6712_v5 }
 0x334   :  { %6774 = vst [vmem:[%s11404_s4 + $0x1e8] sm:$0xff] %v6710_v56 }

// kernel: conv_bn_forward.2
= control target key start
LH: loop header
LB: loop body
LE: loop exit
PB: predicated region body
PF: predicated region fallthrough
CT: control target
= control target key end

     0   :  { %vm508_vm0 = vcmask 1041408   ;;  %vm411_vm1 = vcmask 31744   ;;  %vm929_vm2 = vsmask.f32 3328  ;;  %vm930_vm3 = vsmask.f32 7440  ;;  %s10934_s1 = inlined_call_operand.vmem [shape: bf16[9,4,128], index: 1, kind: input, shape index: {}]   ;;  %s10935_s0 = inlined_call_operand.vmem [shape: bf16[2,18,18,4], index: 0, kind: input, shape index: {}]   ;;  %s10936_s2 = inlined_call_operand.vmem [shape: f32[1,128], index: 2, kind: output, shape index: {0}]   ;;  %s10937_s3 = inlined_call_operand.vmem [shape: f32[1,128], index: 3, kind: output, shape index: {1}]  }
   0x1   :  { %v250_v0 = vld [vmem:[%s10934_s1] sm:$0x3]  ;;  %v8656_v2 = vld [vmem:[%s10935_s0 + $0x4] sm:$0xf]  ;;  %v8665_v5 = vld [vmem:[%s10935_s0 + $0xc] sm:$0xf] }
   0x2   :  { %v8651_v1 = vld [vmem:[%s10935_s0] sm:$0xf]  ;;  %8570 = vmatprep.subr.msk.bf16.mxu1 %vm508_vm0, %v250_v0  ;;  %v510_v3 = vsel %vm508_vm0, %v250_v0, 0  ;;  %v8670_v6 = vld [vmem:[%s10935_s0 + $0x10] sm:$0xf]  ;;  %v957_v16 = vshrl.u32 %v8665_v5, 16  ;;  %vm8748_vm4 = vmor %vm929_vm2, %vm930_vm3 }
   0x3   :  { %v6725_v4 = vcombine.low %v8651_v1, %v8656_v2  ;;  %7463 = vmatpush3.bf16.msra.mxu1 %v510_v3  ;;  %v8675_v7 = vcombine.low %v8665_v5, %v8670_v6  ;;  %v6986_v8 = vld [vmem:[%s10934_s1 + $0x8] sm:$0x3]  ;;  %v8687_v10 = vld [vmem:[%s10935_s0 + $0x18] sm:$0xf]  ;;  %v8692_v11 = vld [vmem:[%s10935_s0 + $0x1c] sm:$0xf] }
   0x4   :  { %8574 = vmatprep.subr.msk.bf16.mxu0 %vm508_vm0, %v6986_v8  ;;  %v8682_v9 = vsel %vm508_vm0, %v6986_v8, 0  ;;  %v8699_v12 = vcombine.low %v8687_v10, %v8692_v11  ;;  %v6789_v13 = vld [vmem:[%s10934_s1 + $0x2] sm:$0x3]  ;;  %v8707_v14 = vld [vmem:[%s10935_s0 + $0x14] sm:$0x1]  ;;  %v960_v17 = vshll.u32 %v8665_v5, 16 }
   0x5   :  { %7464 = vmatprep.mubr.msk.bf16.mxu1 %vm411_vm1, %v6725_v4  ;;  %11139 = vst [vmem:[#allocation3_spill] sm:$0xff] %v8675_v7  ;;  %11140 = vst [vmem:[#allocation4_spill] sm:$0xff] %v8682_v9  ;;  %7727 = vmatpush3.bf16.msra.mxu0 %v8682_v9  ;;  %v7023_v15 = vld [vmem:[%s10934_s1 + $0xa] sm:$0x3]  ;;  %v966_v18 = vshll.u32 %v8670_v6, 16  ;;  %v981_v19 = vshrl.u32 %v8687_v10, 16 }
   0x6   :  { %7465 = vmatmul.mubr.msk.bf16.vlgmr.msra.gmra.mrb[0].mxu1 %vm411_vm1, %v8675_v7  ;;  %11141 = vst [vmem:[#allocation5_spill] sm:$0xff] %v8699_v12  ;;  %8571 = vmatprep.subr.msk.bf16.mxu1 %vm508_vm0, %v6789_v13  ;;  %v984_v20 = vshll.u32 %v8687_v10, 16  ;;  %v970_v21 = vshrl.u32 %v8670_v6, 16  ;;  %v976_v22 = vshll.u32 %v8707_v14, 16  ;;  %v8726_v23 = vld [vmem:[%s10935_s0 + $0x24] sm:$0xf] }
   0x7   :  { %7468 = vmatprep.mubr.msk.bf16.mxu1 %vm411_vm1, %v8699_v12  ;;  %8576 = vmatprep.subr.msk.bf16.mxu0 %vm508_vm0, %v7023_v15  ;;  %v994_v24 = vshrl.u32 %v8692_v11, 16  ;;  %v959_v25 = vrot.slane %v957_v16, 4  ;;  %v962_v26 = vrot.slane %v960_v17, 5  ;;  %v968_v27 = vrot.slane %v966_v18, 5  ;;  %v8732_v28 = vld [vmem:[%s10935_s0 + $0x28] sm:$0xf] }
   0x8   :  { %v972_v29 = vrot.slane %v970_v21, 4  ;;  %v978_v30 = vrot.slane %v976_v22, 5  ;;  %v8736_v31 = vcombine.low %v8726_v23, %v8732_v28  ;;  %v8741_v32 = vld [vmem:[%s10935_s0 + $0x20] sm:$0x1]  ;;  %v1005_v34 = vshrl.u32 %v8726_v23, 16 }
   0x9   :  { %v963_v33 = vor.u32 %v962_v26, %v959_v25  ;;  %v1008_v35 = vshll.u32 %v8726_v23, 16  ;;  %v1959_v36 = vsel %vm508_vm0, %v6789_v13, 0  ;;  %v983_v39 = vrot.slane %v981_v19, 4  ;;  %v8756_v42 = vld [vmem:[%s10935_s0 + $0x30] sm:$0xf] }
   0xa   :  { %11142 = vst [vmem:[#allocation6_spill] sm:$0xff] %v8736_v31  ;;  %v973_v38 = vor.u32 %v972_v29, %v968_v27  ;;  %7529 = vmatpush3.bf16.msra.mxu1 %v1959_v36  ;;  %v986_v40 = vrot.slane %v984_v20, 5  ;;  %v990_v41 = vshll.u32 %v8692_v11, 16  ;;  %v1018_v44 = vshrl.u32 %v8732_v28, 16  ;;  %v8766_v51 = vld [vmem:[%s10935_s0 + $0x34] sm:$0xf] }
   0xb   :  { %v964_v43 = vrot.slane %v963_v33, 4  ;;  %v996_v45 = vrot.slane %v994_v24, 4  ;;  %v1000_v46 = vshll.u32 %v8741_v32, 16  ;;  %v4458_v50 = vsel %vm508_vm0, %v7023_v15, 0  ;;  %v8781_v60 = vld [vmem:[%s10935_s0 + $0x2c] sm:$0x1] }
   0xc   :  { %v974_v47 = vrot.slane %v973_v38, 4  ;;  %v987_v48 = vor.u32 %v986_v40, %v983_v39  ;;  %v992_v49 = vrot.slane %v990_v41, 5  ;;  %v8772_v54 = vcombine.low %v8756_v42, %v8766_v51  ;;  %v8786_v61 = vld [vmem:[%s10935_s0 + $0x3c] sm:$0xf]  ;;  %v8796_v4 = vld [vmem:[%s10935_s0 + $0x40] sm:$0xf] }
   0xd   :  { %v969_v52 = vsel %vm8748_vm4, %v964_v43, %v968_v27  ;;  %v1002_v53 = vrot.slane %v1000_v46, 5  ;;  %v1029_v55 = vshrl.u32 %v8756_v42, 16  ;;  %v1032_v59 = vshll.u32 %v8756_v42, 16  ;;  %v8812_v21 = vld [vmem:[%s10935_s0 + $0x38] sm:$0x1] }
   0xe   :  { %7469 = vmatmul.mubr.msk.bf16.gmra.mrb[4].mxu1 %vm411_vm1, %v8736_v31  ;;  %11145 = vst [vmem:[#allocation7_spill] sm:$0xff] %v8772_v54  ;;  %v979_v56 = vsel %vm8748_vm4, %v974_v47, %v978_v30  ;;  %v988_v57 = vrot.slane %v987_v48, 4  ;;  %v997_v58 = vor.u32 %v996_v45, %v992_v49  ;;  %v1042_v63 = vshrl.u32 %v8766_v51, 16  ;;  %v8821_v27 = vld [vmem:[%s10935_s0 + $0x48] sm:$0xf] }
   0xf   :  { %v8788_v62 = vcombine.low %v969_v52, %v979_v56  ;;  %7472 = vmatprep.mubr.msk.bf16.mxu1 %vm411_vm1, %v8772_v54  ;;  %v1007_v0 = vrot.slane %v1005_v34, 4  ;;  %v1010_v3 = vrot.slane %v1008_v35, 5  ;;  %v1014_v15 = vshll.u32 %v8732_v28, 16  ;;  %v8831_v40 = vld [vmem:[%s10935_s0 + $0x4c] sm:$0xf] }
  0x10   :  { %v993_v8 = vsel %vm8748_vm4, %v988_v57, %v992_v49  ;;  %v998_v13 = vrot.slane %v997_v58, 4  ;;  %v1020_v16 = vrot.slane %v1018_v44, 4  ;;  %v1024_v18 = vshll.u32 %v8781_v60, 16  ;;  %v8847_v52 = vld [vmem:[%s10935_s0 + $0x44] sm:$0x1] }
  0x11   :  { %11146 = vst [vmem:[#allocation8_spill] sm:$0xff] %v8788_v62  ;;  %7728 = vmatprep.mubr.msk.bf16.mxu0 %vm411_vm1, %v8788_v62  ;;  %v1011_v17 = vor.u32 %v1010_v3, %v1007_v0  ;;  %v8806_v19 = vcombine.low %v8786_v61, %v8796_v4  ;;  %v1053_v20 = vshrl.u32 %v8786_v61, 16  ;;  %v1016_v24 = vrot.slane %v1014_v15, 5  ;;  %v8858_v0 = vld [vmem:[%s10935_s0 + $0x54] sm:$0xf] }
  0x12   :  { %v1003_v22 = vsel %vm8748_vm4, %v998_v13, %v1002_v53  ;;  %v1056_v25 = vshll.u32 %v8786_v61, 16  ;;  %v1066_v26 = vshrl.u32 %v8796_v4, 16  ;;  %v1026_v33 = vrot.slane %v1024_v18, 5 }
  0x13   :  { %11147 = vst [vmem:[#allocation9_spill] sm:$0xff] %v8806_v19  ;;  %v8823_v29 = vcombine.low %v993_v8, %v1003_v22  ;;  %v1012_v30 = vrot.slane %v1011_v17, 4  ;;  %v1031_v34 = vrot.slane %v1029_v55, 4  ;;  %v1021_v35 = vor.u32 %v1020_v16, %v1016_v24  ;;  %v8866_v16 = vld [vmem:[%s10935_s0 + $0x58] sm:$0xf] }
  0x14   :  { %v1034_v36 = vrot.slane %v1032_v59, 5  ;;  %v1038_v38 = vshll.u32 %v8766_v51, 16  ;;  %v1044_v39 = vrot.slane %v1042_v63, 4  ;;  %v1048_v43 = vshll.u32 %v8812_v21, 16 }
  0x15   :  { %11148 = vst [vmem:[#allocation10_spill] sm:$0xff] %v8823_v29  ;;  %7729 = vmatmul.mubr.msk.bf16.vlgmr.msra.gmra.mrb[0].mxu0 %vm411_vm1, %v8823_v29  ;;  %v1017_v41 = vsel %vm8748_vm4, %v1012_v30, %v1016_v24  ;;  %v8840_v44 = vcombine.low %v8821_v27, %v8831_v40  ;;  %v1077_v45 = vshrl.u32 %v8821_v27, 16  ;;  %v1022_v46 = vrot.slane %v1021_v35, 4 }
  0x16   :  { %7473 = vmatmul.mubr.msk.bf16.gmra.mrb[8].mxu1 %vm411_vm1, %v8806_v19  ;;  %7793 = vmatpush3.bf16.msra.mxu0 %v4458_v50  ;;  %v1035_v47 = vor.u32 %v1034_v36, %v1031_v34  ;;  %v1040_v48 = vrot.slane %v1038_v38, 5  ;;  %v1080_v49 = vshll.u32 %v8821_v27, 16  ;;  %v1050_v53 = vrot.slane %v1048_v43, 5 }
  0x17   :  { %11149 = vst [vmem:[#allocation11_spill] sm:$0xff] %v8840_v44  ;;  %7476 = vmatprep.mubr.msk.bf16.mxu1 %vm411_vm1, %v8840_v44  ;;  %v1090_v55 = vshrl.u32 %v8831_v40, 16  ;;  %v1055_v56 = vrot.slane %v1053_v20, 4  ;;  %v1058_v57 = vrot.slane %v1056_v25, 5  ;;  %v1027_v50 = vsel %vm8748_vm4, %v1022_v46, %v1026_v33  ;;  %v8881_v33 = vld [vmem:[%s10935_s0 + $0x50] sm:$0x1] }
  0x18   :  { %v1036_v58 = vrot.slane %v1035_v47, 4  ;;  %v1045_v59 = vor.u32 %v1044_v39, %v1040_v48  ;;  %v1062_v63 = vshll.u32 %v8796_v4, 16  ;;  %v8860_v3 = vcombine.low %v1017_v41, %v1027_v50  ;;  %v8891_v39 = vld [vmem:[%s10935_s0 + $0x60] sm:$0xf] }
  0x19   :  { %v1059_v8 = vor.u32 %v1058_v57, %v1055_v56  ;;  %v1068_v13 = vrot.slane %v1066_v26, 4  ;;  %v1072_v15 = vshll.u32 %v8847_v52, 16  ;;  %v8872_v22 = vcombine.low %v8858_v0, %v8866_v16 }
  0x1a   :  { %11150 = vst [vmem:[#allocation12_spill] sm:$0xff] %v8860_v3  ;;  %v1041_v17 = vsel %vm8748_vm4, %v1036_v58, %v1040_v48  ;;  %v1046_v18 = vrot.slane %v1045_v59, 4  ;;  %v1064_v20 = vrot.slane %v1062_v63, 5  ;;  %7732 = vmatprep.mubr.msk.bf16.mxu0 %vm411_vm1, %v8860_v3  ;;  %v1101_v26 = vshrl.u32 %v8858_v0, 16  ;;  %v8901_v48 = vld [vmem:[%s10935_s0 + $0x64] sm:$0xf] }
  0x1b   :  { %11151 = vst [vmem:[#allocation13_spill] sm:$0xff] %v8872_v22  ;;  %v1060_v24 = vrot.slane %v1059_v8, 4  ;;  %v1074_v25 = vrot.slane %v1072_v15, 5  ;;  %v1104_v30 = vshll.u32 %v8858_v0, 16  ;;  %v1114_v36 = vshrl.u32 %v8866_v16, 16 }
  0x1c   :  { %v1051_v34 = vsel %vm8748_vm4, %v1046_v18, %v1050_v53  ;;  %v1069_v35 = vor.u32 %v1068_v13, %v1064_v20  ;;  %v1079_v38 = vrot.slane %v1077_v45, 4  ;;  %v1082_v46 = vrot.slane %v1080_v49, 5  ;;  %v8915_v63 = vld [vmem:[%s10935_s0 + $0x5c] sm:$0x1] }
  0x1d   :  { %v8893_v41 = vcombine.low %v1041_v17, %v1051_v34  ;;  %v1065_v43 = vsel %vm8748_vm4, %v1060_v24, %v1064_v20  ;;  %v1086_v47 = vshll.u32 %v8831_v40, 16  ;;  %v1092_v45 = vrot.slane %v1090_v55, 4  ;;  %v8925_v17 = vld [vmem:[%s10935_s0 + $0x6c] sm:$0xf] }
  0x1e   :  { %7477 = vmatmul.mubr.msk.bf16.gmra.mrb[12].mxu1 %vm411_vm1, %v8872_v22  ;;  %v1070_v53 = vrot.slane %v1069_v35, 4  ;;  %v1096_v56 = vshll.u32 %v8881_v33, 16  ;;  %v8906_v57 = vcombine.low %v8891_v39, %v8901_v48  ;;  %v1083_v50 = vor.u32 %v1082_v46, %v1079_v38 }
  0x1f   :  { %11152 = vst [vmem:[#allocation14_spill] sm:$0xff] %v8893_v41  ;;  %7733 = vmatmul.mubr.msk.bf16.gmra.mrb[4].mxu0 %vm411_vm1, %v8893_v41  ;;  %v1088_v49 = vrot.slane %v1086_v47, 5  ;;  %v1125_v58 = vshrl.u32 %v8891_v39, 16  ;;  %v1128_v59 = vshll.u32 %v8891_v39, 16  ;;  %v1138_v13 = vshrl.u32 %v8901_v48, 16 }
  0x20   :  { %11153 = vst [vmem:[#allocation15_spill] sm:$0xff] %v8906_v57  ;;  %v1075_v55 = vsel %vm8748_vm4, %v1070_v53, %v1074_v25  ;;  %v1098_v8 = vrot.slane %v1096_v56, 5  ;;  %7480 = vmatprep.mubr.msk.bf16.mxu1 %vm411_vm1, %v8906_v57  ;;  %v1103_v15 = vrot.slane %v1101_v26, 4  ;;  %v1084_v20 = vrot.slane %v1083_v50, 4  ;;  %v8932_v25 = vld [vmem:[%s10935_s0 + $0x70] sm:$0xf] }
  0x21   :  { %v8927_v18 = vcombine.low %v1065_v43, %v1075_v55  ;;  %v1093_v24 = vor.u32 %v1092_v45, %v1088_v49  ;;  %v1106_v34 = vrot.slane %v1104_v30, 5  ;;  %v1110_v35 = vshll.u32 %v8866_v16, 16  ;;  %v8952_v55 = vld [vmem:[%s10935_s0 + $0x68] sm:$0x1] }
  0x22   :  { %v1116_v38 = vrot.slane %v1114_v36, 4  ;;  %v1120_v26 = vshll.u32 %v8915_v63, 16  ;;  %v8938_v46 = vcombine.low %v8925_v17, %v8932_v25  ;;  %v1089_v30 = vsel %vm8748_vm4, %v1084_v20, %v1088_v49 }
  0x23   :  { %11154 = vst [vmem:[#allocation16_spill] sm:$0xff] %v8927_v18  ;;  %7736 = vmatprep.mubr.msk.bf16.mxu0 %vm411_vm1, %v8927_v18  ;;  %v1094_v43 = vrot.slane %v1093_v24, 4  ;;  %v1107_v47 = vor.u32 %v1106_v34, %v1103_v15  ;;  %v1149_v53 = vshrl.u32 %v8925_v17, 16  ;;  %v1112_v45 = vrot.slane %v1110_v35, 5  ;;  %v8959_v34 = vld [vmem:[%s10935_s0 + $0x78] sm:$0xf] }
  0x24   :  { %11155 = vst [vmem:[#allocation17_spill] sm:$0xff] %v8938_v46  ;;  %v1122_v56 = vrot.slane %v1120_v26, 5  ;;  %v1152_v36 = vshll.u32 %v8925_v17, 16  ;;  %v1162_v50 = vshrl.u32 %v8932_v25, 16  ;;  %v1127_v20 = vrot.slane %v1125_v58, 4  ;;  %11156 = vst [vmem:[#allocation18_spill] sm:$0xff] %v8959_v34 }
  0x25   :  { %v1099_v49 = vsel %vm8748_vm4, %v1094_v43, %v1098_v8  ;;  %v1108_v15 = vrot.slane %v1107_v47, 4  ;;  %v1130_v24 = vrot.slane %v1128_v59, 5  ;;  %v1117_v26 = vor.u32 %v1116_v38, %v1112_v45 }
  0x26   :  { %7481 = vmatmul.mubr.msk.bf16.gmra.mrb[16].mxu1 %vm411_vm1, %v8938_v46  ;;  %v8961_v35 = vcombine.low %v1089_v30, %v1099_v49  ;;  %v1134_v9 = vshll.u32 %v8901_v48, 16  ;;  %v1140_v7 = vrot.slane %v1138_v13, 4  ;;  %v8967_v46 = vld [vmem:[%s10935_s0 + $0x7c] sm:$0xf]  ;;  %v1144_v8 = vshll.u32 %v8952_v55, 16 }
  0x27   :  { %11158 = vst [vmem:[#allocation20_spill] sm:$0xff] %v8967_v46  ;;  %v1113_v58 = vsel %vm8748_vm4, %v1108_v15, %v1112_v45  ;;  %v1131_v59 = vor.u32 %v1130_v24, %v1127_v20  ;;  %v8974_v43 = vcombine.low %v8959_v34, %v8967_v46  ;;  %v1118_v38 = vrot.slane %v1117_v26, 4  ;;  %v8983_v45 = vld [vmem:[%s10935_s0 + $0x74] sm:$0x1] }
  0x28   :  { %11157 = vst [vmem:[#allocation19_spill] sm:$0xff] %v8961_v35  ;;  %7737 = vmatmul.mubr.msk.bf16.gmra.mrb[8].mxu0 %vm411_vm1, %v8961_v35  ;;  %v1136_v13 = vrot.slane %v1134_v9, 5  ;;  %v1173_v30 = vshrl.u32 %v8959_v34, 16  ;;  %v1176_v47 = vshll.u32 %v8959_v34, 16  ;;  %v1146_v15 = vrot.slane %v1144_v8, 5 }
  0x29   :  { %11159 = vst [vmem:[#allocation21_spill] sm:$0xff] %v8974_v43  ;;  %v1132_v49 = vrot.slane %v1131_v59, 4  ;;  %7484 = vmatprep.mubr.msk.bf16.mxu1 %vm411_vm1, %v8974_v43  ;;  %v1186_v20 = vshrl.u32 %v8967_v46, 16  ;;  %v1151_v24 = vrot.slane %v1149_v53, 4  ;;  %v8991_v9 = vld [vmem:[%s10934_s1 + $0xc] sm:$0x3]  ;;  %v1123_v26 = vsel %vm8748_vm4, %v1118_v38, %v1122_v56 }
  0x2a   :  { %v1141_v57 = vor.u32 %v1140_v7, %v1136_v13  ;;  %v1154_v22 = vrot.slane %v1152_v36, 5  ;;  %v1158_v44 = vshll.u32 %v8932_v25, 16  ;;  %v8999_v59 = vld [vmem:[%s10935_s0 + $0x84] sm:$0xf]  ;;  %v9004_v53 = vld [vmem:[%s10935_s0 + $0x88] sm:$0xf]  ;;  %8577 = vmatprep.subr.msk.bf16.mxu0 %vm508_vm0, %v8991_v9  ;;  %v9008_v8 = vcombine.low %v1113_v58, %v1123_v26 }
  0x2b   :  { %v1137_v7 = vsel %vm8748_vm4, %v1132_v49, %v1136_v13  ;;  %v1164_v56 = vrot.slane %v1162_v50, 4  ;;  %v1168_v36 = vshll.u32 %v8983_v45, 16  ;;  %v9015_v54 = vcombine.low %v8999_v59, %v9004_v53 }
  0x2c   :  { %11160 = vst [vmem:[#allocation22_spill] sm:$0xff] %v9008_v8  ;;  %v1142_v38 = vrot.slane %v1141_v57, 4  ;;  %v1155_v43 = vor.u32 %v1154_v22, %v1151_v24  ;;  %v1160_v19 = vrot.slane %v1158_v44, 5  ;;  %7740 = vmatprep.mubr.msk.bf16.mxu0 %vm411_vm1, %v9008_v8  ;;  %v1197_v58 = vshrl.u32 %v8999_v59, 16  ;;  %v9025_v57 = vld [vmem:[%s10935_s0 + $0x80] sm:$0x1] }
  0x2d   :  { %11161 = vst [vmem:[#allocation23_spill] sm:$0xff] %v9015_v54  ;;  %v1170_v31 = vrot.slane %v1168_v36, 5  ;;  %v1200_v26 = vshll.u32 %v8999_v59, 16  ;;  %v1210_v13 = vshrl.u32 %v9004_v53, 16  ;;  %11162 = vst [vmem:[#allocation24_spill] sm:$0xff] %v9025_v57  ;;  %v1175_v49 = vrot.slane %v1173_v30, 4 }
  0x2e   :  { %v1147_v44 = vsel %vm8748_vm4, %v1142_v38, %v1146_v15  ;;  %v1156_v22 = vrot.slane %v1155_v43, 4  ;;  %v1165_v50 = vor.u32 %v1164_v56, %v1160_v19  ;;  %7485 = vmatmul.mubr.msk.bf16.gmra.mrb[20].mxu1 %vm411_vm1, %v9015_v54  ;;  %v9034_v24 = vld [vmem:[%s10935_s0 + $0x90] sm:$0xf]  ;;  %v1178_v12 = vrot.slane %v1176_v47, 5  ;;  %v9042_v43 = vld [vmem:[%s10935_s0 + $0x94] sm:$0xf] }
  0x2f   :  { %11163 = vst [vmem:[#allocation25_spill] sm:$0xff] %v9034_v24  ;;  %v9036_v36 = vcombine.low %v1137_v7, %v1147_v44  ;;  %v1182_v8 = vshll.u32 %v8967_v46, 16  ;;  %v1188_v35 = vrot.slane %v1186_v20, 4  ;;  %11165 = vst [vmem:[#allocation27_spill] sm:$0xff] %v9042_v43  ;;  %v1192_v56 = vshll.u32 %v9025_v57, 16 }
  0x30   :  { %v1161_v15 = vsel %vm8748_vm4, %v1156_v22, %v1160_v19  ;;  %v1166_v30 = vrot.slane %v1165_v50, 4  ;;  %v9049_v38 = vcombine.low %v9034_v24, %v9042_v43  ;;  %v1179_v47 = vor.u32 %v1178_v12, %v1175_v49  ;;  %v9058_v19 = vld [vmem:[%s10935_s0 + $0x8c] sm:$0x1] }
  0x31   :  { %11164 = vst [vmem:[#allocation26_spill] sm:$0xff] %v9036_v36  ;;  %7741 = vmatmul.mubr.msk.bf16.gmra.mrb[12].mxu0 %vm411_vm1, %v9036_v36  ;;  %v1184_v20 = vrot.slane %v1182_v8, 5  ;;  %v1221_v7 = vshrl.u32 %v9034_v24, 16  ;;  %v1224_v44 = vshll.u32 %v9034_v24, 16  ;;  %v1194_v50 = vrot.slane %v1192_v56, 5 }
  0x32   :  { %11166 = vst [vmem:[#allocation28_spill] sm:$0xff] %v9049_v38  ;;  %v1171_v22 = vsel %vm8748_vm4, %v1166_v30, %v1170_v31  ;;  %7488 = vmatprep.mubr.msk.bf16.mxu1 %vm411_vm1, %v9049_v38  ;;  %v1234_v54 = vshrl.u32 %v9042_v43, 16  ;;  %v1199_v12 = vrot.slane %v1197_v58, 4  ;;  %v9068_v8 = vld [vmem:[%s10935_s0 + $0x9c] sm:$0xf]  ;;  %v1180_v36 = vrot.slane %v1179_v47, 4 }
  0x33   :  { %11167 = vst [vmem:[#allocation29_spill] sm:$0xff] %v9068_v8  ;;  %v9070_v49 = vcombine.low %v1161_v15, %v1171_v22  ;;  %v1189_v18 = vor.u32 %v1188_v35, %v1184_v20  ;;  %v1202_v41 = vrot.slane %v1200_v26, 5  ;;  %v9075_v31 = vld [vmem:[%s10935_s0 + $0xa0] sm:$0xf]  ;;  %v1206_v30 = vshll.u32 %v9004_v53, 16 }
  0x34   :  { %11169 = vst [vmem:[#allocation31_spill] sm:$0xff] %v9075_v31  ;;  %v1212_v56 = vrot.slane %v1210_v13, 4  ;;  %v1216_v58 = vshll.u32 %v9058_v19, 16  ;;  %v9081_v38 = vcombine.low %v9068_v8, %v9075_v31  ;;  %v1185_v35 = vsel %vm8748_vm4, %v1180_v36, %v1184_v20 }
  0x35   :  { %11168 = vst [vmem:[#allocation30_spill] sm:$0xff] %v9070_v49  ;;  %7744 = vmatprep.mubr.msk.bf16.mxu0 %vm411_vm1, %v9070_v49  ;;  %v1190_v26 = vrot.slane %v1189_v18, 4  ;;  %v1203_v15 = vor.u32 %v1202_v41, %v1199_v12  ;;  %v1245_v47 = vshrl.u32 %v9068_v8, 16  ;;  %v1208_v22 = vrot.slane %v1206_v30, 5  ;;  %v9095_v49 = vld [vmem:[%s10935_s0 + $0x98] sm:$0x1] }
  0x36   :  { %11170 = vst [vmem:[#allocation32_spill] sm:$0xff] %v9081_v38  ;;  %v1218_v3 = vrot.slane %v1216_v58, 5  ;;  %7489 = vmatmul.mubr.msk.bf16.gmra.mrb[24].mxu1 %vm411_vm1, %v9081_v38  ;;  %v1248_v13 = vshll.u32 %v9068_v8, 16  ;;  %v1258_v29 = vshrl.u32 %v9075_v31, 16  ;;  %11171 = vst [vmem:[#allocation33_spill] sm:$0xff] %v9095_v49  ;;  %v1223_v36 = vrot.slane %v1221_v7, 4 }
  0x37   :  { %v1195_v18 = vsel %vm8748_vm4, %v1190_v26, %v1194_v50  ;;  %v1204_v41 = vrot.slane %v1203_v15, 4  ;;  %v1226_v20 = vrot.slane %v1224_v44, 5  ;;  %v9102_v12 = vld [vmem:[%s10935_s0 + $0xa8] sm:$0xf]  ;;  %v1213_v58 = vor.u32 %v1212_v56, %v1208_v22  ;;  %v9110_v8 = vld [vmem:[%s10935_s0 + $0xac] sm:$0xf] }
  0x38   :  { %11172 = vst [vmem:[#allocation34_spill] sm:$0xff] %v9102_v12  ;;  %v9104_v30 = vcombine.low %v1185_v35, %v1195_v18  ;;  %v1230_v38 = vshll.u32 %v9042_v43, 16  ;;  %v1236_v62 = vrot.slane %v1234_v54, 4  ;;  %v1240_v50 = vshll.u32 %v9095_v49, 16 }
  0x39   :  { %v1209_v7 = vsel %vm8748_vm4, %v1204_v41, %v1208_v22  ;;  %v1227_v44 = vor.u32 %v1226_v20, %v1223_v36  ;;  %v9117_v26 = vcombine.low %v9102_v12, %v9110_v8  ;;  %v1214_v56 = vrot.slane %v1213_v58, 4  ;;  %v9126_v22 = vld [vmem:[%s10935_s0 + $0xa4] sm:$0x1] }
  0x3a   :  { %11173 = vst [vmem:[#allocation35_spill] sm:$0xff] %v9104_v30  ;;  %7745 = vmatmul.mubr.msk.bf16.gmra.mrb[16].mxu0 %vm411_vm1, %v9104_v30  ;;  %v1232_v54 = vrot.slane %v1230_v38, 5  ;;  %v1269_v35 = vshrl.u32 %v9102_v12, 16  ;;  %v1272_v15 = vshll.u32 %v9102_v12, 16  ;;  %11175 = vst [vmem:[#allocation37_spill] sm:$0xff] %v9126_v22  ;;  %v1242_v41 = vrot.slane %v1240_v50, 5 }
  0x3b   :  { %11174 = vst [vmem:[#allocation36_spill] sm:$0xff] %v9117_v26  ;;  %v1228_v18 = vrot.slane %v1227_v44, 4  ;;  %7492 = vmatprep.mubr.msk.bf16.mxu1 %vm411_vm1, %v9117_v26  ;;  %v1282_v36 = vshrl.u32 %v9110_v8, 16  ;;  %v1247_v20 = vrot.slane %v1245_v47, 4  ;;  %v9134_v38 = vld [vmem:[%s10935_s0 + $0xb4] sm:$0xf]  ;;  %v1219_v58 = vsel %vm8748_vm4, %v1214_v56, %v1218_v3 }
  0x3c   :  { %11176 = vst [vmem:[#allocation38_spill] sm:$0xff] %v9134_v38  ;;  %v1237_v30 = vor.u32 %v1236_v62, %v1232_v54  ;;  %v1250_v12 = vrot.slane %v1248_v13, 5  ;;  %v1254_v49 = vshll.u32 %v9075_v31, 16  ;;  %v9142_v44 = vld [vmem:[%s10935_s0 + $0xb8] sm:$0xf]  ;;  %v9149_v50 = vcombine.low %v1209_v7, %v1219_v58 }
  0x3d   :  { %v9147_v47 = vld [vmem:[%s10934_s1 + $0x4] sm:$0x3]  ;;  %v1233_v26 = vsel %vm8748_vm4, %v1228_v18, %v1232_v54  ;;  %v1260_v3 = vrot.slane %v1258_v29, 4  ;;  %v1264_v62 = vshll.u32 %v9126_v22, 16  ;;  %v9158_v57 = vcombine.low %v9134_v38, %v9142_v44  ;;  %v9163_v7 = vld [vmem:[%s10935_s0 + $0xb0] sm:$0x1] }
  0x3e   :  { %11177 = vst [vmem:[#allocation39_spill] sm:$0xff] %v9147_v47  ;;  %11178 = vst [vmem:[#allocation40_spill] sm:$0xff] %v9149_v50  ;;  %8572 = vmatprep.subr.msk.bf16.mxu1 %vm508_vm0, %v9147_v47  ;;  %v1238_v13 = vrot.slane %v1237_v30, 4  ;;  %v1251_v56 = vor.u32 %v1250_v12, %v1247_v20  ;;  %v1256_v31 = vrot.slane %v1254_v49, 5  ;;  %v9168_v29 = vld [vmem:[%s10935_s0 + $0xd8] sm:$0xf]  ;;  %7748 = vmatprep.mubr.msk.bf16.mxu0 %vm411_vm1, %v9149_v50 }
  0x3f   :  { %11179 = vst [vmem:[#allocation41_spill] sm:$0xff] %v9158_v57  ;;  %11180 = vst [vmem:[#allocation42_spill] sm:$0xff] %v9168_v29  ;;  %v1266_v30 = vrot.slane %v1264_v62, 5  ;;  %v1293_v49 = vshrl.u32 %v9134_v38, 16  ;;  %v1296_v12 = vshll.u32 %v9134_v38, 16  ;;  %v1306_v54 = vshrl.u32 %v9142_v44, 16  ;;  %7493 = vmatmul.mubr.msk.bf16.gmra.mrb[28].mxu1 %vm411_vm1, %v9158_v57 }
  0x40   :  { %v9178_v18 = vld [vmem:[%s10935_s0 + $0xdc] sm:$0xf]  ;;  %v1243_v20 = vsel %vm8748_vm4, %v1238_v13, %v1242_v41  ;;  %v1252_v58 = vrot.slane %v1251_v56, 4  ;;  %v1261_v47 = vor.u32 %v1260_v3, %v1256_v31  ;;  %v1271_v62 = vrot.slane %v1269_v35, 4 }
  0x41   :  { %11181 = vst [vmem:[#allocation43_spill] sm:$0xff] %v9178_v18  ;;  %v9184_v50 = vcombine.low %v1233_v26, %v1243_v20  ;;  %v1274_v22 = vrot.slane %v1272_v15, 5  ;;  %v1278_v38 = vshll.u32 %v9110_v8, 16  ;;  %v1284_v43 = vrot.slane %v1282_v36, 4  ;;  %v9195_v3 = vld [vmem:[%s10935_s0 + $0xbc] sm:$0x1] }
  0x42   :  { %v1257_v46 = vsel %vm8748_vm4, %v1252_v58, %v1256_v31  ;;  %v1262_v24 = vrot.slane %v1261_v47, 4  ;;  %v1288_v34 = vshll.u32 %v9163_v7, 16  ;;  %v6741_v41 = vcombine.low %v9168_v29, %v9178_v18  ;;  %v9203_v31 = vld [vmem:[%s10935_s0 + $0xe4] sm:$0xf]  ;;  %v9208_v36 = vld [vmem:[%s10935_s0 + $0xe8] sm:$0xf] }
  0x43   :  { %11182 = vst [vmem:[#allocation44_spill] sm:$0xff] %v9184_v50  ;;  %7749 = vmatmul.mubr.msk.bf16.gmra.mrb[20].mxu0 %vm411_vm1, %v9184_v50  ;;  %v1275_v35 = vor.u32 %v1274_v22, %v1271_v62  ;;  %v1280_v15 = vrot.slane %v1278_v38, 5  ;;  %11183 = vst [vmem:[#allocation45_spill] sm:$0xff] %v9203_v31  ;;  %v1295_v22 = vrot.slane %v1293_v49, 4  ;;  %v1298_v62 = vrot.slane %v1296_v12, 5 }
  0x44   :  { %v1267_v13 = vsel %vm8748_vm4, %v1262_v24, %v1266_v30  ;;  %v1290_v56 = vrot.slane %v1288_v34, 5  ;;  %7496 = vmatprep.mubr.msk.bf16.mxu1 %vm411_vm1, %v6741_v41  ;;  %v1302_v26 = vshll.u32 %v9142_v44, 16  ;;  %v1308_v57 = vrot.slane %v1306_v54, 4  ;;  %v9225_v34 = vld [vmem:[%s10935_s0 + $0xc0] sm:$0xf] }
  0x45   :  { %v9214_v38 = vcombine.low %v1257_v46, %v1267_v13  ;;  %v1276_v20 = vrot.slane %v1275_v35, 4  ;;  %v1285_v58 = vor.u32 %v1284_v43, %v1280_v15  ;;  %v1312_v50 = vshll.u32 %v9195_v3, 16  ;;  %11186 = vst [vmem:[#allocation48_spill] sm:$0xff] %v9225_v34  ;;  %v9236_v12 = vld [vmem:[%s10935_s0 + $0xc4] sm:$0xf] }
  0x46   :  { %v9220_v47 = vcombine.low %v9203_v31, %v9208_v36  ;;  %v11187_v46 = vrot.slane %v8692_v11, 5  ;;  %v1299_v49 = vor.u32 %v1298_v62, %v1295_v22  ;;  %v1304_v54 = vrot.slane %v1302_v26, 5  ;;  %v9243_v35 = vld [vmem:[%s10935_s0 + $0xc8] sm:$0x1] }
  0x47   :  { %11184 = vst [vmem:[#allocation46_spill] sm:$0xff] %v9214_v38  ;;  %7752 = vmatprep.mubr.msk.bf16.mxu0 %vm411_vm1, %v9214_v38  ;;  %v1281_v43 = vsel %vm8748_vm4, %v1276_v20, %v1280_v15  ;;  %v1286_v30 = vrot.slane %v1285_v58, 4  ;;  %v1314_v41 = vrot.slane %v1312_v50, 5  ;;  %v9248_v15 = vld [vmem:[%s10935_s0 + $0xf0] sm:$0xf]  ;;  %v3818_v26 = vshrl.u32 %v9225_v34, 16 }
  0x48   :  { %11185 = vst [vmem:[#allocation47_spill] sm:$0xff] %v9220_v47  ;;  %v2431_v24 = vrot.slane %v11187_v46, 4  ;;  %7497 = vmatmul.mubr.msk.bf16.gmra.mrb[32].mxu1 %vm411_vm1, %v9220_v47  ;;  %v1300_v22 = vrot.slane %v1299_v49, 4  ;;  %v3821_v50 = vshll.u32 %v9225_v34, 16  ;;  %v9257_v20 = vld [vmem:[%s10935_s0 + $0xf4] sm:$0xf]  ;;  %v1309_v62 = vor.u32 %v1308_v57, %v1304_v54 }
  0x49   :  { %v1291_v13 = vsel %vm8748_vm4, %v1286_v30, %v1290_v56  ;;  %v3827_v46 = vshll.u32 %v9236_v12, 16  ;;  %v3831_v47 = vshrl.u32 %v9236_v12, 16  ;;  %v3820_v30 = vrot.slane %v3818_v26, 4 }
  0x4a   :  { %v9259_v58 = vcombine.low %v1281_v43, %v1291_v13  ;;  %v1305_v56 = vsel %vm8748_vm4, %v1300_v22, %v1304_v54  ;;  %v3823_v49 = vrot.slane %v3821_v50, 5  ;;  %v3837_v38 = vshll.u32 %v9243_v35, 16  ;;  %v9277_v54 = vld [vmem:[%s10935_s0 + $0xfc] sm:$0xf]  ;;  %v9282_v22 = vld [vmem:[%s10935_s0 + $0x100] sm:$0xf] }
  0x4b   :  { %v1310_v18 = vrot.slane %v1309_v62, 4  ;;  %v3829_v29 = vrot.slane %v3827_v46, 5  ;;  %v3833_v31 = vrot.slane %v3831_v47, 4  ;;  %v9270_v57 = vcombine.low %v9248_v15, %v9257_v20 }
  0x4c   :  { %11188 = vst [vmem:[#allocation49_spill] sm:$0xff] %v9259_v58  ;;  %7753 = vmatmul.mubr.msk.bf16.gmra.mrb[24].mxu0 %vm411_vm1, %v9259_v58  ;;  %v2425_v43 = vrot.slane %v8707_v14, 5  ;;  %v2432_v13 = vrot.slane %v8741_v32, 5  ;;  %v3824_v34 = vor.u32 %v3823_v49, %v3820_v30  ;;  %v3839_v50 = vrot.slane %v3837_v38, 5 }
  0x4d   :  { %11189 = vst [vmem:[#allocation50_spill] sm:$0xff] %v9270_v57  ;;  %v1315_v47 = vsel %vm8748_vm4, %v1310_v18, %v1314_v41  ;;  %v3834_v26 = vor.u32 %v3833_v31, %v3829_v29  ;;  %7500 = vmatprep.mubr.msk.bf16.mxu1 %vm411_vm1, %v9270_v57  ;;  %vm2410_vm5 = vcmask 1042432   ;;  %vm2411_vm6 = vcmask 1046532   ;;  %v9303_v31 = vld [vmem:[%s10935_s0 + $0x108] sm:$0xf] }
  0x4e   :  { %v9288_v14 = vcombine.low %v1305_v56, %v1315_v47  ;;  %v3825_v32 = vrot.slane %v3824_v34, 4  ;;  %v6855_v62 = vrot.slane %v8665_v5, 9  ;;  %vm9291_vm7 = vmor %vm2410_vm5, %vm2411_vm6  ;;  %v11190_v30 = vmov 0  ;;  %v9308_v5 = vld [vmem:[%s10935_s0 + $0x10c] sm:$0xf] }
  0x4f   :  { %v3835_v46 = vrot.slane %v3834_v26, 4  ;;  %v11191_v30 = vsel %vm9291_vm7, 4294967295, %v11190_v30  ;;  %v2422_v49 = vrot.slane %v8670_v6, 5  ;;  %v9298_v18 = vcombine.low %v9277_v54, %v9282_v22 }
  0x50   :  { %11192 = vst [vmem:[#allocation51_spill] sm:$0xff] %v11191_v30  ;;  %7756 = vmatprep.mubr.msk.bf16.mxu0 %vm411_vm1, %v9288_v14  ;;  %v3830_v6 = vsel %vm8748_vm4, %v3825_v32, %v3829_v29  ;;  %v11194_v38 = vrot.slane %v8692_v11, 5  ;;  %v11195_v34 = vrot.slane %v8687_v10, 9  ;;  %v2433_v29 = vsel %vm9291_vm7, %v2431_v24, %v2432_v13  ;;  %v9351_v13 = vld [vmem:[%s10935_s0 + $0x120] sm:$0xf]  ;;  %v11405_v30 = vld [vmem:[#allocation10_spill] sm:$0xff] }
  0x51   :  { %11193 = vst [vmem:[#allocation52_spill] sm:$0xff] %v9298_v18  ;;  %v3840_v56 = vsel %vm8748_vm4, %v3835_v46, %v3839_v50  ;;  %v2423_v47 = vsel %vm9291_vm7, %v6855_v62, %v2422_v49  ;;  %v2424_v26 = vrot.slane %v2422_v49, 4  ;;  %7501 = vmatmul.mubr.msk.bf16.gmra.mrb[36].mxu1 %vm411_vm1, %v9298_v18  ;;  %v9334_v10 = vcombine.low %v9303_v31, %v9308_v5  ;;  %v9339_v50 = vld [vmem:[%s10935_s0 + $0x114] sm:$0xf]  ;;  %v9344_v62 = vld [vmem:[%s10935_s0 + $0x118] sm:$0xf] }
  0x52   :  { %v2430_v41 = vsel %vm9291_vm7, %v11195_v34, %v11194_v38  ;;  %v9328_v32 = vcombine.low %v3830_v6, %v3840_v56  ;;  %v6857_v49 = vrot.slane %v8726_v23, 9  ;;  %v2436_v6 = vrot.slane %v8732_v28, 5 }
  0x53   :  { %v9330_v11 = vcombine.low %v2430_v41, %v2433_v29  ;;  %11198 = vst [vmem:[#allocation55_spill] sm:$0xff] %v9334_v10  ;;  %v2426_v24 = vsel %vm9291_vm7, %v2424_v26, %v2425_v43  ;;  %7504 = vmatprep.mubr.msk.bf16.mxu1 %vm411_vm1, %v9334_v10  ;;  %v2439_v38 = vrot.slane %v8781_v60, 5  ;;  %v9365_v43 = vld [vmem:[%s10935_s0 + $0x124] sm:$0xf]  ;;  %v9369_v34 = vcombine.low %v9339_v50, %v9344_v62 }
  0x54   :  { %11196 = vst [vmem:[#allocation53_spill] sm:$0xff] %v9328_v32  ;;  %7757 = vmatmul.mubr.msk.bf16.gmra.mrb[28].mxu0 %vm411_vm1, %v9328_v32  ;;  %v9355_v46 = vcombine.low %v2423_v47, %v2426_v24  ;;  %v2437_v41 = vsel %vm9291_vm7, %v6857_v49, %v2436_v6  ;;  %v2438_v23 = vrot.slane %v2436_v6, 4  ;;  %v2443_v28 = vrot.slane %v8766_v51, 5 }
  0x55   :  { %11197 = vst [vmem:[#allocation54_spill] sm:$0xff] %v9330_v11  ;;  %11200 = vst [vmem:[#allocation57_spill] sm:$0xff] %v9369_v34  ;;  %v9378_v60 = vcombine.low %v9351_v13, %v9365_v43  ;;  %v6858_v47 = vrot.slane %v8756_v42, 9  ;;  %v2446_v29 = vrot.slane %v8812_v21, 5  ;;  %v6859_v49 = vrot.slane %v8786_v61, 9 }
  0x56   :  { %11199 = vst [vmem:[#allocation56_spill] sm:$0xff] %v9355_v46  ;;  %7794 = vmatprep.mubr.msk.bf16.mxu0 %vm411_vm1, %v9355_v46  ;;  %v2440_v56 = vsel %vm9291_vm7, %v2438_v23, %v2439_v38  ;;  %v2445_v26 = vrot.slane %v2443_v28, 4  ;;  %v2450_v51 = vrot.slane %v8796_v4, 5  ;;  %v2453_v6 = vrot.slane %v8847_v52, 5  ;;  %v9394_v38 = vld [vmem:[%s10935_s0 + $0x12c] sm:$0xf] }
  0x57   :  { %11201 = vst [vmem:[#allocation58_spill] sm:$0xff] %v9378_v60  ;;  %v9384_v24 = vcombine.low %v2437_v41, %v2440_v56  ;;  %v4960_v42 = vsel %vm508_vm0, %v8991_v9, 0  ;;  %v9403_v21 = vld [vmem:[%s10935_s0 + $0x130] sm:$0xf]  ;;  %v9408_v61 = vld [vmem:[%s10935_s0 + $0x138] sm:$0xf]  ;;  %v2444_v41 = vsel %vm9291_vm7, %v6858_v47, %v2443_v28 }
  0x58   :  { %11203 = vst [vmem:[#allocation60_spill] sm:$0xff] %v9408_v61  ;;  %v2452_v4 = vrot.slane %v2450_v51, 4  ;;  %v9413_v52 = vld [vmem:[%s10935_s0 + $0x13c] sm:$0xf]  ;;  %v9418_v9 = vld [vmem:[%s10934_s1 + $0xe] sm:$0x3]  ;;  %v2447_v23 = vsel %vm9291_vm7, %v2445_v26, %v2446_v29  ;;  %v9436_v28 = vcombine.low %v9394_v38, %v9403_v21 }
  0x59   :  { %11202 = vst [vmem:[#allocation59_spill] sm:$0xff] %v9384_v24  ;;  %7505 = vmatmul.mubr.msk.bf16.gmra.mrb[40].mxu1 %vm411_vm1, %v9369_v34  ;;  %11204 = vst [vmem:[#allocation61_spill] sm:$0xff] %v9418_v9  ;;  %v2457_v56 = vrot.slane %v8831_v40, 5  ;;  %v933_v32 = vshrl.u32 %v8651_v1, 16  ;;  %v936_v47 = vshll.u32 %v8651_v1, 16  ;;  %v942_v40 = vshll.u32 %v8656_v2, 16 }
  0x5a   :  { %7508 = vmatprep.mubr.msk.bf16.mxu1 %vm411_vm1, %v9378_v60  ;;  %v2451_v60 = vsel %vm9291_vm7, %v6859_v49, %v2450_v51  ;;  %v2454_v34 = vsel %vm9291_vm7, %v2452_v4, %v2453_v6  ;;  %11205 = vst [vmem:[#allocation62_spill] sm:$0xff] %v9436_v28  ;;  %v946_v26 = vshrl.u32 %v8656_v2, 16  ;;  %v9443_v29 = vcombine.low %v9408_v61, %v9413_v52  ;;  %v9457_v2 = vld [vmem:[%s10935_s0 + $0x144] sm:$0xf] }
  0x5b   :  { %v6860_v49 = vrot.slane %v8821_v27, 9  ;;  %v2464_v51 = vrot.slane %v8866_v16, 5  ;;  %v9449_v6 = vcombine.low %v2444_v41, %v2447_v23  ;;  %v2459_v1 = vrot.slane %v2457_v56, 4  ;;  %11209 = vst [vmem:[#allocation66_spill] sm:$0xff] %v9457_v2 }
  0x5c   :  { %7795 = vmatmul.mubr.msk.bf16.vlgmr.msra.gmra.mrb[0].mxu0 %vm411_vm1, %v9330_v11  ;;  %11206 = vst [vmem:[#allocation63_spill] sm:$0xff] %v9443_v29  ;;  %v2460_v4 = vrot.slane %v8881_v33, 5  ;;  %v6861_v10 = vrot.slane %v8858_v0, 9  ;;  %v2467_v16 = vrot.slane %v8915_v63, 5  ;;  %v2471_v33 = vrot.slane %v8901_v48, 5 }
  0x5d   :  { %7859 = vmatpush3.bf16.msra.mxu0 %v4960_v42  ;;  %7798 = vmatprep.mubr.msk.bf16.mxu0 %vm411_vm1, %v9384_v24  ;;  %11207 = vst [vmem:[#allocation64_spill] sm:$0xff] %v9449_v6  ;;  %v9451_v42 = vcombine.low %v2451_v60, %v2454_v34  ;;  %v2466_v27 = vrot.slane %v2464_v51, 4  ;;  %v9466_v34 = vld [vmem:[%s10935_s0 + $0x148] sm:$0xf]  ;;  %v935_v60 = vrot.slane %v933_v32, 4  ;;  %v938_v41 = vrot.slane %v936_v47, 5 }
  0x5e   :  { %8578 = vmatprep.subr.msk.bf16.mxu0 %vm508_vm0, %v9418_v9  ;;  %11210 = vst [vmem:[#allocation67_spill] sm:$0xff] %v9466_v34  ;;  %v9469_v23 = vrot.slane %v942_v40, 5  ;;  %v948_v18 = vrot.slane %v946_v26, 4  ;;  %v2458_v0 = vsel %vm9291_vm7, %v6860_v49, %v2457_v56  ;;  %v9478_v63 = vld [vmem:[%s10935_s0 + $0x150] sm:$0xf]  ;;  %v9489_v32 = vcombine.low %v9457_v2, %v9466_v34 }
  0x5f   :  { %11208 = vst [vmem:[#allocation65_spill] sm:$0xff] %v9451_v42  ;;  %11211 = vst [vmem:[#allocation68_spill] sm:$0xff] %v9478_v63  ;;  %v9483_v48 = vld [vmem:[%s10935_s0 + $0x154] sm:$0xf]  ;;  %v6862_v47 = vrot.slane %v8891_v39, 9  ;;  %v2473_v56 = vrot.slane %v2471_v33, 4  ;;  %v2461_v26 = vsel %vm9291_vm7, %v2459_v1, %v2460_v4  ;;  %v2465_v49 = vsel %vm9291_vm7, %v6861_v10, %v2464_v51 }
  0x60   :  { %11212 = vst [vmem:[#allocation69_spill] sm:$0xff] %v9489_v32  ;;  %v2474_v40 = vrot.slane %v8952_v55, 5  ;;  %v939_v57 = vor.u32 %v938_v41, %v935_v60  ;;  %v949_v39 = vor.u32 %v948_v18, %v9469_v23  ;;  %v9505_v55 = vcombine.low %v9478_v63, %v9483_v48  ;;  %v9523_v18 = vld [vmem:[%s10935_s0 + $0x160] sm:$0xf] }
  0x61   :  { %7509 = vmatmul.mubr.msk.bf16.gmra.mrb[44].mxu1 %vm411_vm1, %v9436_v28  ;;  %v2478_v28 = vrot.slane %v8932_v25, 5  ;;  %v2472_v1 = vsel %vm9291_vm7, %v6862_v47, %v2471_v33  ;;  %v9518_v25 = vld [vmem:[%s10935_s0 + $0x15c] sm:$0xf]  ;;  %11217 = vst [vmem:[#allocation74_spill] sm:$0xff] %v9523_v18  ;;  %v2481_v4 = vrot.slane %v8983_v45, 5  ;;  %v2492_v60 = vrot.slane %v9004_v53, 5 }
  0x62   :  { %7512 = vmatprep.mubr.msk.bf16.mxu1 %vm411_vm1, %v9443_v29  ;;  %v2468_v29 = vsel %vm9291_vm7, %v2466_v27, %v2467_v16  ;;  %11213 = vst [vmem:[#allocation70_spill] sm:$0xff] %v9505_v55  ;;  %v2475_v10 = vsel %vm9291_vm7, %v2473_v56, %v2474_v40  ;;  %11216 = vst [vmem:[#allocation73_spill] sm:$0xff] %v9518_v25  ;;  %v6865_v27 = vrot.slane %v8999_v59, 9  ;;  %v9530_v16 = vrot.slane %v939_v57, 4  ;;  %v11220_v45 = vld [vmem:[#allocation18_spill] sm:$0xff]  ;;  %v11223_v53 = vld [vmem:[#allocation25_spill] sm:$0xff] }
  0x63   :  { %v2480_v51 = vrot.slane %v2478_v28, 4  ;;  %v9532_v33 = vrot.slane %v949_v39, 4  ;;  %v2495_v41 = vrot.slane %v9058_v19, 5  ;;  %v6864_v47 = vrot.slane %v11220_v45, 9  ;;  %v9548_v59 = vld [vmem:[%s10935_s0 + $0x168] sm:$0xf] }
  0x64   :  { %7799 = vmatmul.mubr.msk.bf16.gmra.mrb[4].mxu0 %vm411_vm1, %v9449_v6  ;;  %v9507_v6 = vcombine.low %v2458_v0, %v2461_v26  ;;  %v9538_v0 = vcombine.low %v2472_v1, %v2475_v10  ;;  %11221 = vst [vmem:[#allocation18_spill] sm:$0xff] %v9548_v59  ;;  %v9553_v57 = vld [vmem:[%s10935_s0 + $0x16c] sm:$0xf]  ;;  %v6866_v19 = vrot.slane %v11223_v53, 9  ;;  %v2493_v26 = vsel %vm9291_vm7, %v6865_v27, %v2492_v60  ;;  %v11225_v39 = vld [vmem:[#allocation27_spill] sm:$0xff] }
  0x65   :  { %7802 = vmatprep.mubr.msk.bf16.mxu0 %vm411_vm1, %v9451_v42  ;;  %v9509_v42 = vcombine.low %v2465_v49, %v2468_v29  ;;  %v6863_v29 = vrot.slane %v8925_v17, 9  ;;  %v9542_v17 = vcombine.low %v9518_v25, %v9523_v18  ;;  %11222 = vst [vmem:[#allocation77_spill] sm:$0xff] %v9553_v57  ;;  %v11224_v56 = vld [vmem:[#allocation20_spill] sm:$0xff]  ;;  %v2494_v49 = vrot.slane %v2492_v60, 4  ;;  %v9579_v60 = vld [vmem:[%s10935_s0 + $0x174] sm:$0xf] }
  0x66   :  { %11214 = vst [vmem:[#allocation71_spill] sm:$0xff] %v9507_v6  ;;  %11218 = vst [vmem:[#allocation75_spill] sm:$0xff] %v9538_v0  ;;  %v2485_v40 = vrot.slane %v11224_v56, 5  ;;  %v2499_v1 = vrot.slane %v11225_v39, 5  ;;  %v2482_v45 = vsel %vm9291_vm7, %v2480_v51, %v2481_v4  ;;  %v11226_v53 = vld [vmem:[#allocation24_spill] sm:$0xff]  ;;  %v9572_v56 = vcombine.low %v9548_v59, %v9553_v57  ;;  %v11232_v4 = vld [vmem:[#allocation29_spill] sm:$0xff] }
  0x67   :  { %11215 = vst [vmem:[#allocation72_spill] sm:$0xff] %v9509_v42  ;;  %11219 = vst [vmem:[#allocation76_spill] sm:$0xff] %v9542_v17  ;;  %v2479_v10 = vsel %vm9291_vm7, %v6863_v29, %v2478_v28  ;;  %v2496_v27 = vsel %vm9291_vm7, %v2494_v49, %v2495_v41  ;;  %v9584_v28 = vld [vmem:[%s10935_s0 + $0x178] sm:$0xf]  ;;  %v6867_v39 = vrot.slane %v11232_v4, 9  ;;  %v11234_v49 = vld [vmem:[#allocation37_spill] sm:$0xff] }
  0x68   :  { %11228 = vst [vmem:[#allocation25_spill] sm:$0xff] %v9572_v56  ;;  %11229 = vst [vmem:[#allocation20_spill] sm:$0xff] %v9579_v60  ;;  %v2501_v29 = vrot.slane %v2499_v1, 4  ;;  %v9588_v51 = vcombine.low %v2493_v26, %v2496_v27  ;;  %v9593_v24 = vcombine.low %v2479_v10, %v2482_v45  ;;  %v2486_v11 = vsel %vm9291_vm7, %v6864_v47, %v2485_v40  ;;  %v11239_v10 = vld [vmem:[#allocation34_spill] sm:$0xff]  ;;  %v11430_v37 = vld [vmem:[#allocation65_spill] sm:$0xff] }
  0x69   :  { %7513 = vmatmul.mubr.msk.bf16.gmra.mrb[48].mxu1 %vm411_vm1, %v9489_v32  ;;  %v11227_v32 = vld [vmem:[#allocation33_spill] sm:$0xff]  ;;  %11230 = vst [vmem:[#allocation27_spill] sm:$0xff] %v9584_v28  ;;  %v2487_v46 = vrot.slane %v2485_v40, 4  ;;  %v9608_v26 = vcombine.low %v9579_v60, %v9584_v28  ;;  %v6868_v45 = vrot.slane %v11239_v10, 9  ;;  %v2513_v27 = vrot.slane %v9110_v8, 5 }
  0x6a   :  { %7516 = vmatprep.mubr.msk.bf16.mxu1 %vm411_vm1, %v9505_v55  ;;  %v2488_v55 = vrot.slane %v11226_v53, 5  ;;  %11231 = vst [vmem:[#allocation24_spill] sm:$0xff] %v9588_v51  ;;  %v11233_v53 = vld [vmem:[#allocation31_spill] sm:$0xff]  ;;  %11235 = vst [vmem:[#allocation33_spill] sm:$0xff] %v9593_v24  ;;  %v2520_v8 = vrot.slane %v9142_v44, 5 }
  0x6b   :  { %v2506_v41 = vrot.slane %v11233_v53, 5  ;;  %11237 = vst [vmem:[#allocation31_spill] sm:$0xff] %v9608_v26  ;;  %v11240_v53 = vld [vmem:[#allocation38_spill] sm:$0xff] }
  0x6c   :  { %7803 = vmatmul.mubr.msk.bf16.gmra.mrb[8].mxu0 %vm411_vm1, %v9507_v6  ;;  %v2502_v6 = vrot.slane %v11227_v32, 5  ;;  %v2500_v32 = vsel %vm9291_vm7, %v6866_v19, %v2499_v1  ;;  %v9602_v19 = vld [vmem:[%s10935_s0 + $0x8] sm:$0x1]  ;;  %v2522_v10 = vrot.slane %v2520_v8, 4 }
  0x6d   :  { %7806 = vmatprep.mubr.msk.bf16.mxu0 %vm411_vm1, %v9509_v42  ;;  %v2509_v42 = vrot.slane %v11234_v49, 5  ;;  %11236 = vst [vmem:[#allocation29_spill] sm:$0xff] %v9602_v19  ;;  %v2507_v47 = vsel %vm9291_vm7, %v6867_v39, %v2506_v41  ;;  %v2508_v40 = vrot.slane %v2506_v41, 4  ;;  %v952_v39 = vshll.u32 %v9602_v19, 16 }
  0x6e   :  { %v2503_v9 = vsel %vm9291_vm7, %v2501_v29, %v2502_v6  ;;  %v9619_v6 = vld [vmem:[%s10935_s0 + $0x180] sm:$0xf]  ;;  %v2516_v29 = vrot.slane %v9163_v7, 5  ;;  %v6869_v41 = vrot.slane %v11240_v53, 9  ;;  %v2523_v49 = vrot.slane %v9195_v3, 5 }
  0x6f   :  { %v9610_v1 = vcombine.low %v2500_v32, %v2503_v9  ;;  %v945_v9 = vsel %vm8748_vm4, %v9530_v16, %v9469_v23  ;;  %v9631_v32 = vld [vmem:[%s10935_s0 + $0x184] sm:$0xf]  ;;  %v2510_v4 = vsel %vm9291_vm7, %v2508_v40, %v2509_v42  ;;  %v2514_v23 = vsel %vm9291_vm7, %v6868_v45, %v2513_v27 }
  0x70   :  { %v9640_v7 = vcombine.low %v2507_v47, %v2510_v4  ;;  %v2515_v16 = vrot.slane %v2513_v27, 4  ;;  %v2489_v42 = vsel %vm9291_vm7, %v2487_v46, %v2488_v55  ;;  %v954_v40 = vrot.slane %v952_v39, 5 }
  0x71   :  { %7517 = vmatmul.mubr.msk.bf16.gmra.mrb[52].mxu1 %vm411_vm1, %v9542_v17  ;;  %11238 = vst [vmem:[#allocation37_spill] sm:$0xff] %v9610_v1  ;;  %v2521_v44 = vsel %vm9291_vm7, %v6869_v41, %v2520_v8  ;;  %v9653_v47 = vcombine.low %v9619_v6, %v9631_v32  ;;  %v2524_v46 = vsel %vm9291_vm7, %v2522_v10, %v2523_v49  ;;  %v2534_v53 = vrot.slane %v9208_v36, 5  ;;  %v9702_v41 = vld [vmem:[%s10935_s0 + $0xec] sm:$0x1]  ;;  %v11247_v8 = vld [vmem:[#allocation39_spill] sm:$0xff]  ;;  %v11250_v10 = vld [vmem:[#allocation10_spill] sm:$0xff] }
  0x72   :  { %7520 = vmatprep.mubr.msk.bf16.mxu1 %vm411_vm1, %v9572_v56  ;;  %11241 = vst [vmem:[#allocation34_spill] sm:$0xff] %v9640_v7  ;;  %v2517_v45 = vsel %vm9291_vm7, %v2515_v16, %v2516_v29  ;;  %v955_v3 = vsel %vm8748_vm4, %v9532_v33, %v954_v40  ;;  %v9664_v55 = vcombine.low %v2486_v11, %v2489_v42  ;;  %v9675_v29 = vld [vmem:[%s10935_s0 + $0x18c] sm:$0xf]  ;;  %v9680_v33 = vld [vmem:[%s10935_s0 + $0x190] sm:$0xf]  ;;  %v11260_v17 = vld [vmem:[#allocation43_spill] sm:$0xff] }
  0x73   :  { %11242 = vst [vmem:[#allocation38_spill] sm:$0xff] %v9653_v47  ;;  %v9657_v27 = vcombine.low %v2514_v23, %v2517_v45  ;;  %v6790_v4 = vcombine.low %v945_v9, %v955_v3  ;;  %v9666_v39 = vcombine.low %v2521_v44, %v2524_v46  ;;  %v9688_v11 = vcombine.low %v9675_v29, %v9680_v33  ;;  %v11248_v16 = vld [vmem:[#allocation8_spill] sm:$0xff] }
  0x74   :  { %7807 = vmatmul.mubr.msk.bf16.gmra.mrb[12].mxu0 %vm411_vm1, %v9538_v0  ;;  %11244 = vst [vmem:[#allocation79_spill] sm:$0xff] %v9664_v55  ;;  %v4367_v9 = vrot.slane %v9236_v12, 5  ;;  %v2896_v23 = vsel %vm508_vm0, %v11247_v8, 0  ;;  %v11249_v49 = vld [vmem:[#allocation48_spill] sm:$0xff]  ;;  %v4370_v44 = vrot.slane %v9243_v35, 5  ;;  %v11251_v12 = vld [vmem:[#allocation45_spill] sm:$0xff] }
  0x75   :  { %7810 = vmatprep.mubr.msk.bf16.mxu0 %vm411_vm1, %v9593_v24  ;;  %11243 = vst [vmem:[#allocation78_spill] sm:$0xff] %v9657_v27  ;;  %11245 = vst [vmem:[#allocation80_spill] sm:$0xff] %v9666_v39  ;;  %v7021_v42 = vrot.slane %v11249_v49, 9  ;;  %v6871_v45 = vrot.slane %v11251_v12, 9  ;;  %v2536_v3 = vrot.slane %v2534_v53, 4  ;;  %v2537_v46 = vrot.slane %v9702_v41, 5 }
  0x76   :  { %11246 = vst [vmem:[#allocation81_spill] sm:$0xff] %v9688_v11  ;;  %v4369_v40 = vrot.slane %v4367_v9, 4  ;;  %v2541_v8 = vrot.slane %v9257_v20, 5  ;;  %v9730_v49 = vld [vmem:[%s10935_s0 + $0xf8] sm:$0x1]  ;;  %v2562_v56 = vrot.slane %v9344_v62, 5 }
  0x77   :  { %v11265_v0 = vld [vmem:[#allocation19_spill] sm:$0xff]  ;;  %v6879_v19 = vrot.slane %v9457_v2, 9  ;;  %v6880_v2 = vrot.slane %v9478_v63, 9 }
  0x78   :  { %v4371_v35 = vsel %vm9291_vm7, %v4369_v40, %v4370_v44  ;;  %v2564_v24 = vrot.slane %v2562_v56, 4 }
  0x79   :  { %7521 = vmatmul.mubr.msk.bf16.gmra.mrb[56].mxu1 %vm411_vm1, %v9608_v26  ;;  %v6873_v26 = vrot.slane %v9277_v54, 9 }
  0x7a   :  { %7524 = vmatprep.mubr.msk.bf16.mxu1 %vm411_vm1, %v9653_v47  ;;  %v11255_v47 = vld [vmem:[#allocation14_spill] sm:$0xff] }
  0x7c   :  { %7811 = vmatmul.mubr.msk.bf16.gmra.mrb[16].mxu0 %vm411_vm1, %v9664_v55  ;;  %v11264_v55 = vld [vmem:[#allocation16_spill] sm:$0xff] }
  0x7d   :  { %7814 = vmatprep.mubr.msk.bf16.mxu0 %vm411_vm1, %v9588_v51 }
  0x81   :  { %7525 = vmatmul.mubr.msk.bf16.gmra.mrb[60].mxu1 %vm411_vm1, %v9688_v11  ;;  %v2544_v11 = vrot.slane %v9730_v49, 5 }
  0x82   :  { %7530 = vmatprep.mubr.msk.bf16.mxu1 %vm411_vm1, %v6790_v4  ;;  %v4368_v4 = vsel %vm9291_vm7, %v7021_v42, %v4367_v9  ;;  %v9736_v9 = vld [vmem:[%s10935_s0 + $0x104] sm:$0x1] }
  0x83   :  { %v9741_v42 = vld [vmem:[%s10935_s0 + $0x4] sm:$0xf]  ;;  %v9744_v40 = vcombine.low %v4368_v4, %v4371_v35  ;;  %v9759_v4 = vld [vmem:[%s10935_s0] sm:$0xf] }
  0x84   :  { %7815 = vmatmul.mubr.msk.bf16.gmra.mrb[20].mxu0 %vm411_vm1, %v9610_v1  ;;  %11256 = vst [vmem:[#allocation48_spill] sm:$0xff] %v9759_v4 }
  0x85   :  { %7818 = vmatprep.mubr.msk.bf16.mxu0 %vm411_vm1, %v9640_v7  ;;  %11252 = vst [vmem:[#allocation39_spill] sm:$0xff] %v9744_v40  ;;  %v9774_v7 = vld [vmem:[%s10934_s1 + $0x6] sm:$0x3] }
  0x89   :  { %7531 = vmatmul.mubr.msk.bf16.vlgmr.msra.gmra.mrb[0].mxu1 %vm411_vm1, %v11248_v16  ;;  %v2535_v16 = vsel %vm9291_vm7, %v6871_v45, %v2534_v53  ;;  %v11254_v45 = vld [vmem:[#allocation12_spill] sm:$0xff]  ;;  %v2551_v53 = vrot.slane %v9736_v9, 5 }
  0x8a   :  { %7534 = vmatprep.mubr.msk.bf16.mxu1 %vm411_vm1, %v11250_v10  ;;  %7595 = vmatpush3.bf16.msra.mxu1 %v2896_v23  ;;  %v2538_v23 = vsel %vm9291_vm7, %v2536_v3, %v2537_v46  ;;  %v2548_v10 = vrot.slane %v9282_v22, 5  ;;  %v6872_v3 = vrot.slane %v9248_v15, 9  ;;  %v2543_v46 = vrot.slane %v2541_v8, 4 }
  0x8b   :  { %v9746_v44 = vcombine.low %v2535_v16, %v2538_v23  ;;  %v11257_v16 = vrot.slane %v9741_v42, 5  ;;  %8573 = vmatprep.subr.msk.bf16.mxu1 %vm508_vm0, %v9774_v7 }
  0x8c   :  { %7819 = vmatmul.mubr.msk.bf16.gmra.mrb[24].mxu0 %vm411_vm1, %v9657_v27  ;;  %v2545_v35 = vsel %vm9291_vm7, %v2543_v46, %v2544_v11  ;;  %v9785_v27 = vld [vmem:[%s10935_s0 + $0x110] sm:$0x1] }
  0x8d   :  { %7822 = vmatprep.mubr.msk.bf16.mxu0 %vm411_vm1, %v9666_v39  ;;  %11253 = vst [vmem:[#allocation8_spill] sm:$0xff] %v9746_v44  ;;  %v2550_v39 = vrot.slane %v2548_v10, 4  ;;  %v9764_v23 = vrot.slane %v11257_v16, 4  ;;  %v2542_v16 = vsel %vm9291_vm7, %v6872_v3, %v2541_v8  ;;  %v2549_v8 = vsel %vm9291_vm7, %v6873_v26, %v2548_v10  ;;  %v9800_v3 = vld [vmem:[%s10935_s0 + $0x11c] sm:$0x1] }
  0x8e   :  { %v6874_v26 = vrot.slane %v9303_v31, 9  ;;  %v2558_v10 = vrot.slane %v9785_v27, 5  ;;  %v2565_v1 = vrot.slane %v9800_v3, 5 }
  0x8f   :  { %11258 = vst [vmem:[#allocation45_spill] sm:$0xff] %v9764_v23  ;;  %v2552_v11 = vsel %vm9291_vm7, %v2550_v39, %v2551_v53  ;;  %v6875_v39 = vrot.slane %v9339_v50, 9  ;;  %v9844_v23 = vld [vmem:[%s10935_s0 + $0x128] sm:$0x1] }
  0x90   :  { %v9811_v53 = vcombine.low %v2549_v8, %v2552_v11  ;;  %v2566_v51 = vsel %vm9291_vm7, %v2564_v24, %v2565_v1  ;;  %v9871_v1 = vld [vmem:[%s10935_s0 + $0x140] sm:$0x1]  ;;  %v2583_v24 = vrot.slane %v9413_v52, 5 }
  0x91   :  { %7535 = vmatmul.mubr.msk.bf16.gmra.mrb[4].mxu1 %vm411_vm1, %v11254_v45  ;;  %v11259_v45 = vld [vmem:[#allocation42_spill] sm:$0xff]  ;;  %11270 = vst [vmem:[#allocation86_spill] sm:$0xff] %v9871_v1 }
  0x92   :  { %7538 = vmatprep.mubr.msk.bf16.mxu1 %vm411_vm1, %v11255_v47  ;;  %11261 = vst [vmem:[#allocation42_spill] sm:$0xff] %v9774_v7  ;;  %v2555_v47 = vrot.slane %v9308_v5, 5  ;;  %11263 = vst [vmem:[#allocation82_spill] sm:$0xff] %v9811_v53  ;;  %v2563_v7 = vsel %vm9291_vm7, %v6875_v39, %v2562_v56  ;;  %v9854_v56 = vld [vmem:[%s10935_s0 + $0x134] sm:$0x1]  ;;  %v6877_v39 = vrot.slane %v9394_v38, 9 }
  0x93   :  { %11266 = vst [vmem:[#allocation83_spill] sm:$0xff] %v9854_v56  ;;  %v9862_v11 = vcombine.low %v2563_v7, %v2566_v51  ;;  %v6878_v51 = vrot.slane %v9408_v61, 9 }
  0x94   :  { %7823 = vmatmul.mubr.msk.bf16.gmra.mrb[28].mxu0 %vm411_vm1, %v9744_v40  ;;  %v2557_v46 = vrot.slane %v2555_v47, 4  ;;  %v2556_v40 = vsel %vm9291_vm7, %v6874_v26, %v2555_v47  ;;  %v2576_v47 = vrot.slane %v9403_v21, 5 }
  0x95   :  { %7826 = vmatprep.mubr.msk.bf16.mxu0 %vm411_vm1, %v9746_v44  ;;  %v9806_v44 = vcombine.low %v2542_v16, %v2545_v35  ;;  %v2569_v16 = vrot.slane %v9365_v43, 5  ;;  %11268 = vst [vmem:[#allocation85_spill] sm:$0xff] %v9862_v11  ;;  %v11269_v35 = vld [vmem:[#allocation22_spill] sm:$0xff] }
  0x96   :  { %v2577_v7 = vsel %vm9291_vm7, %v6877_v39, %v2576_v47 }
  0x97   :  { %11262 = vst [vmem:[#allocation43_spill] sm:$0xff] %v9806_v44  ;;  %v2571_v8 = vrot.slane %v2569_v16, 4 }
  0x99   :  { %7539 = vmatmul.mubr.msk.bf16.gmra.mrb[8].mxu1 %vm411_vm1, %v11264_v55  ;;  %v2559_v55 = vsel %vm9291_vm7, %v2557_v46, %v2558_v10  ;;  %v6876_v10 = vrot.slane %v9351_v13, 9  ;;  %v2572_v46 = vrot.slane %v9844_v23, 5 }
  0x9a   :  { %7542 = vmatprep.mubr.msk.bf16.mxu1 %vm411_vm1, %v11265_v0  ;;  %v9860_v26 = vcombine.low %v2556_v40, %v2559_v55  ;;  %v2578_v0 = vrot.slane %v2576_v47, 4  ;;  %v2590_v55 = vrot.slane %v9466_v34, 5  ;;  %v2597_v40 = vrot.slane %v9483_v48, 5 }
  0x9b   :  { %v2570_v4 = vsel %vm9291_vm7, %v6876_v10, %v2569_v16  ;;  %v9902_v16 = vld [vmem:[%s10935_s0 + $0x158] sm:$0x1]  ;;  %v2585_v10 = vrot.slane %v2583_v24, 4 }
  0x9c   :  { %7827 = vmatmul.mubr.msk.bf16.gmra.mrb[32].mxu0 %vm411_vm1, %v9806_v44  ;;  %11267 = vst [vmem:[#allocation84_spill] sm:$0xff] %v9860_v26  ;;  %v11271_v44 = vld [vmem:[#allocation26_spill] sm:$0xff]  ;;  %11273 = vst [vmem:[#allocation88_spill] sm:$0xff] %v9902_v16  ;;  %v2592_v39 = vrot.slane %v2590_v55, 4  ;;  %v2599_v61 = vrot.slane %v2597_v40, 4 }
  0x9d   :  { %7830 = vmatprep.mubr.msk.bf16.mxu0 %vm411_vm1, %v9811_v53  ;;  %v2579_v53 = vrot.slane %v9854_v56, 5  ;;  %v9884_v56 = vld [vmem:[%s10935_s0 + $0x14c] sm:$0x1] }
  0x9e   :  { %11272 = vst [vmem:[#allocation87_spill] sm:$0xff] %v9884_v56 }
  0x9f   :  { %v2580_v47 = vsel %vm9291_vm7, %v2578_v0, %v2579_v53  ;;  %v9919_v0 = vld [vmem:[%s10935_s0 + $0x164] sm:$0x1]  ;;  %v2611_v53 = vrot.slane %v9553_v57, 5 }
  0xa0   :  { %11275 = vst [vmem:[#allocation90_spill] sm:$0xff] %v9919_v0 }
  0xa1   :  { %7543 = vmatmul.mubr.msk.bf16.gmra.mrb[12].mxu1 %vm411_vm1, %v11269_v35  ;;  %v2573_v35 = vsel %vm9291_vm7, %v2571_v8, %v2572_v46  ;;  %v2593_v8 = vrot.slane %v9884_v56, 5  ;;  %v9922_v56 = vcombine.low %v2577_v7, %v2580_v47  ;;  %v2591_v46 = vsel %vm9291_vm7, %v6879_v19, %v2590_v55  ;;  %v9944_v19 = vld [vmem:[%s10935_s0 + $0x17c] sm:$0x1] }
  0xa2   :  { %7546 = vmatprep.mubr.msk.bf16.mxu1 %vm411_vm1, %v11271_v44  ;;  %v2586_v44 = vrot.slane %v9871_v1, 5  ;;  %v2604_v1 = vrot.slane %v9523_v18, 5  ;;  %v9913_v34 = vcombine.low %v2570_v4, %v2573_v35  ;;  %v9931_v4 = vld [vmem:[%s10935_s0 + $0x170] sm:$0x1]  ;;  %v2618_v35 = vrot.slane %v9584_v28, 5  ;;  %11279 = vst [vmem:[#allocation93_spill] sm:$0xff] %v9944_v19 }
  0xa3   :  { %11276 = vst [vmem:[#allocation91_spill] sm:$0xff] %v9922_v56  ;;  %11277 = vst [vmem:[#allocation92_spill] sm:$0xff] %v9931_v4  ;;  %v2594_v47 = vsel %vm9291_vm7, %v2592_v39, %v2593_v8  ;;  %v1326_v55 = vshll.u32 %v11260_v17, 16  ;;  %v2613_v8 = vrot.slane %v2611_v53, 4  ;;  %v2614_v57 = vrot.slane %v9931_v4, 5 }
  0xa4   :  { %7831 = vmatmul.mubr.msk.bf16.gmra.mrb[36].mxu0 %vm411_vm1, %v9860_v26  ;;  %11274 = vst [vmem:[#allocation89_spill] sm:$0xff] %v9913_v34  ;;  %v2584_v26 = vsel %vm9291_vm7, %v6878_v51, %v2583_v24  ;;  %v2587_v7 = vsel %vm9291_vm7, %v2585_v10, %v2586_v44  ;;  %v6881_v24 = vrot.slane %v9518_v25, 9  ;;  %v11280_v51 = vld [vmem:[#allocation35_spill] sm:$0xff]  ;;  %v2606_v28 = vrot.slane %v2604_v1, 4 }
  0xa5   :  { %7834 = vmatprep.mubr.msk.bf16.mxu0 %vm411_vm1, %v9862_v11  ;;  %v2600_v11 = vrot.slane %v9902_v16, 5  ;;  %v11278_v16 = vld [vmem:[#allocation30_spill] sm:$0xff]  ;;  %v2607_v44 = vrot.slane %v9919_v0, 5  ;;  %v6882_v10 = vrot.slane %v9548_v59, 9  ;;  %v6883_v18 = vrot.slane %v9579_v60, 9 }
  0xa6   :  { %v2621_v63 = vrot.slane %v9944_v19, 5  ;;  %v11282_v0 = vshll.u32 %v11259_v45, 16  ;;  %v9973_v60 = vcombine.low %v2591_v46, %v2594_v47 }
  0xa7   :  { %v2601_v39 = vsel %vm9291_vm7, %v2599_v61, %v2600_v11  ;;  %v9967_v61 = vcombine.low %v2584_v26, %v2587_v7  ;;  %v9969_v11 = vrot.slane %v1326_v55, 5  ;;  %v9984_v26 = vld [vmem:[%s10935_s0 + $0xe0] sm:$0x1]  ;;  %v2612_v7 = vsel %vm9291_vm7, %v6882_v10, %v2611_v53 }
  0xa8   :  { %v1322_v59 = vrot.slane %v11282_v0, 5  ;;  %11285 = vst [vmem:[#allocation95_spill] sm:$0xff] %v9973_v60  ;;  %v2608_v0 = vsel %vm9291_vm7, %v2606_v28, %v2607_v44  ;;  %v1350_v28 = vshll.u32 %v9208_v36, 16  ;;  %v6884_v53 = vrot.slane %v9619_v6, 9 }
  0xa9   :  { %7547 = vmatmul.mubr.msk.bf16.gmra.mrb[16].mxu1 %vm411_vm1, %v11278_v16  ;;  %v2598_v16 = vsel %vm9291_vm7, %v6880_v2, %v2597_v40  ;;  %v11281_v2 = vshrl.u32 %v11259_v45, 16  ;;  %11283 = vst [vmem:[#allocation94_spill] sm:$0xff] %v9967_v61  ;;  %v2605_v45 = vsel %vm9291_vm7, %v6881_v24, %v2604_v1  ;;  %v2625_v1 = vrot.slane %v9631_v32, 5  ;;  %v11287_v24 = vld [vmem:[#allocation40_spill] sm:$0xff] }
  0xaa   :  { %7550 = vmatprep.mubr.msk.bf16.mxu1 %vm411_vm1, %v11280_v51  ;;  %v2620_v51 = vrot.slane %v2618_v35, 4  ;;  %v9975_v19 = vcombine.low %v2598_v16, %v2601_v39  ;;  %v2619_v16 = vsel %vm9291_vm7, %v6883_v18, %v2618_v35  ;;  %v1336_v55 = vshll.u32 %v9984_v26, 16  ;;  %v11290_v18 = vld [vmem:[#allocation44_spill] sm:$0xff] }
  0xab   :  { %v1319_v40 = vrot.slane %v11281_v2, 4  ;;  %v11288_v44 = vshrl.u32 %v11251_v12, 16  ;;  %v11289_v39 = vshll.u32 %v11251_v12, 16  ;;  %v2627_v2 = vrot.slane %v2625_v1, 4 }
  0xac   :  { %7835 = vmatmul.mubr.msk.bf16.gmra.mrb[40].mxu0 %vm411_vm1, %v9913_v34  ;;  %v11284_v34 = vshrl.u32 %v11260_v17, 16  ;;  %11286 = vst [vmem:[#allocation96_spill] sm:$0xff] %v9975_v19  ;;  %v9993_v17 = vld [vmem:[%s10935_s0 + $0x188] sm:$0x1]  ;;  %v2622_v46 = vsel %vm9291_vm7, %v2620_v51, %v2621_v63  ;;  %v10012_v63 = vcombine.low %v2605_v45, %v2608_v0  ;;  %v1374_v51 = vshll.u32 %v9257_v20, 16 }
  0xad   :  { %7838 = vmatprep.mubr.msk.bf16.mxu0 %vm411_vm1, %v9922_v56  ;;  %v1323_v47 = vor.u32 %v1322_v59, %v1319_v40  ;;  %v1343_v10 = vrot.slane %v11288_v44, 4  ;;  %v2628_v59 = vrot.slane %v9993_v17, 5  ;;  %v10020_v40 = vrot.slane %v1350_v28, 5 }
  0xae   :  { %v1332_v4 = vrot.slane %v11284_v34, 4  ;;  %v2615_v34 = vsel %vm9291_vm7, %v2613_v8, %v2614_v57  ;;  %v1346_v8 = vrot.slane %v11289_v39, 5  ;;  %11291 = vst [vmem:[#allocation97_spill] sm:$0xff] %v10012_v63  ;;  %v11294_v44 = vshrl.u32 %v9208_v36, 16  ;;  %v10037_v36 = vld [vmem:[%s10935_s0 + $0x194] sm:$0x1] }
  0xaf   :  { %v10014_v35 = vcombine.low %v2612_v7, %v2615_v34  ;;  %v10028_v45 = vsel %vm9291_vm7, %v6884_v53, %v2625_v1  ;;  %v1324_v0 = vrot.slane %v1323_v47, 4  ;;  %v6885_v7 = vrot.slane %v9675_v29, 9 }
  0xb0   :  { %v1333_v57 = vor.u32 %v1332_v4, %v9969_v11  ;;  %v10018_v4 = vcombine.low %v2619_v16, %v2622_v46  ;;  %v1356_v12 = vrot.slane %v11294_v44, 4  ;;  %v1398_v34 = vshll.u32 %v9282_v22, 16 }
  0xb1   :  { %7551 = vmatmul.mubr.msk.bf16.gmra.mrb[20].mxu1 %vm411_vm1, %v11287_v24  ;;  %11292 = vst [vmem:[#allocation98_spill] sm:$0xff] %v10014_v35  ;;  %v1338_v16 = vrot.slane %v1336_v55, 5  ;;  %v1347_v46 = vor.u32 %v1346_v8, %v1343_v10  ;;  %v1360_v39 = vshll.u32 %v9702_v41, 16  ;;  %v11295_v1 = vshrl.u32 %v9248_v15, 16 }
  0xb2   :  { %7554 = vmatprep.mubr.msk.bf16.mxu1 %vm411_vm1, %v11290_v18  ;;  %11293 = vst [vmem:[#allocation99_spill] sm:$0xff] %v10018_v4  ;;  %v1334_v28 = vrot.slane %v1333_v57, 4  ;;  %v11296_v47 = vshll.u32 %v9248_v15, 16  ;;  %v10044_v25 = vrot.slane %v1374_v51, 5  ;;  %v11297_v18 = vshrl.u32 %v9257_v20, 16 }
  0xb3   :  { %v1367_v53 = vrot.slane %v11295_v1, 4  ;;  %v10050_v55 = vsel %vm9291_vm7, %v2627_v2, %v2628_v59  ;;  %v1357_v24 = vor.u32 %v1356_v12, %v10020_v40  ;;  %v11298_v10 = vshrl.u32 %v9277_v54, 16 }
  0xb4   :  { %7839 = vmatmul.mubr.msk.bf16.gmra.mrb[44].mxu0 %vm411_vm1, %v9967_v61  ;;  %v1370_v44 = vrot.slane %v11296_v47, 5  ;;  %v1380_v57 = vrot.slane %v11297_v18, 4  ;;  %v11299_v8 = vshll.u32 %v9277_v54, 16  ;;  %v2632_v15 = vrot.slane %v9680_v33, 5 }
  0xb5   :  { %7842 = vmatprep.mubr.msk.bf16.mxu0 %vm411_vm1, %v9973_v60  ;;  %v1391_v41 = vrot.slane %v11298_v10, 4  ;;  %v2635_v51 = vrot.slane %v10037_v36, 5  ;;  %v10059_v47 = vrot.slane %v1398_v34, 5  ;;  %v11300_v20 = vshrl.u32 %v9282_v22, 16  ;;  %v11301_v60 = vld [vmem:[#allocation46_spill] sm:$0xff] }
  0xb6   :  { %v1394_v1 = vrot.slane %v11299_v8, 5  ;;  %v1329_v59 = vsel %vm8748_vm4, %v1324_v0, %v9969_v11  ;;  %v1339_v54 = vsel %vm8748_vm4, %v1334_v28, %v1338_v16  ;;  %v1362_v2 = vrot.slane %v1360_v39, 5  ;;  %v10076_v22 = vld [vmem:[%s10935_s0 + $0x19c] sm:$0xf] }
  0xb7   :  { %v1404_v18 = vrot.slane %v11300_v20, 4  ;;  %v1422_v12 = vshll.u32 %v9308_v5, 16  ;;  %v1348_v34 = vrot.slane %v1347_v46, 4  ;;  %v1371_v10 = vor.u32 %v1370_v44, %v1367_v53 }
  0xb8   :  { %v1381_v8 = vor.u32 %v1380_v57, %v10044_v25  ;;  %v1384_v11 = vshll.u32 %v9730_v49, 16  ;;  %v1358_v0 = vrot.slane %v1357_v24, 4  ;;  %v1395_v20 = vor.u32 %v1394_v1, %v1391_v41  ;;  %v10108_v1 = vld [vmem:[%s10935_s0 + $0x1a0] sm:$0x1] }
  0xb9   :  { %7555 = vmatmul.mubr.msk.bf16.gmra.mrb[24].mxu1 %vm411_vm1, %v11301_v60  ;;  %v11302_v28 = vshrl.u32 %v9303_v31, 16  ;;  %v11303_v39 = vshll.u32 %v9303_v31, 16  ;;  %v2633_v46 = vsel %vm9291_vm7, %v6885_v7, %v2632_v15  ;;  %v1405_v53 = vor.u32 %v1404_v18, %v10059_v47  ;;  %v10095_v31 = vld [vmem:[%s10935_s0 + $0x198] sm:$0xf]  ;;  %11305 = vst [vmem:[#allocation100_spill] sm:$0xff] %v10108_v1 }
  0xba   :  { %7558 = vmatprep.mubr.msk.bf16.mxu1 %vm411_vm1, %v9259_v58  ;;  %v2634_v58 = vrot.slane %v2632_v15, 4  ;;  %v1408_v44 = vshll.u32 %v9736_v9, 16  ;;  %v6806_v49 = vcombine.low %v1329_v59, %v1339_v54  ;;  %v4374_v24 = vrot.slane %v10076_v22, 5 }
  0xbb   :  { %v1415_v16 = vrot.slane %v11302_v28, 4  ;;  %v1418_v60 = vrot.slane %v11303_v39, 5  ;;  %v10098_v57 = vrot.slane %v1422_v12, 5  ;;  %v11304_v7 = vshrl.u32 %v9308_v5, 16 }
  0xbc   :  { %7843 = vmatmul.mubr.msk.bf16.gmra.mrb[48].mxu0 %vm411_vm1, %v9975_v19  ;;  %v1353_v9 = vsel %vm8748_vm4, %v1348_v34, %v10020_v40  ;;  %v1372_v15 = vrot.slane %v1371_v10, 4  ;;  %v1382_v18 = vrot.slane %v1381_v8, 4  ;;  %v1386_v59 = vrot.slane %v1384_v11, 5 }
  0xbd   :  { %7846 = vmatprep.mubr.msk.bf16.mxu0 %vm411_vm1, %v10012_v63  ;;  %v1428_v41 = vrot.slane %v11304_v7, 4  ;;  %v1363_v54 = vsel %vm8748_vm4, %v1358_v0, %v1362_v2  ;;  %v1396_v12 = vrot.slane %v1395_v20, 4  ;;  %v1419_v28 = vor.u32 %v1418_v60, %v1415_v16 }
  0xbe   :  { %v1432_v5 = vshll.u32 %v9785_v27, 16  ;;  %v2636_v39 = vsel %vm9291_vm7, %v2634_v58, %v2635_v51  ;;  %v1406_v7 = vrot.slane %v1405_v53, 4  ;;  %v1410_v40 = vrot.slane %v1408_v44, 5 }
  0xbf   :  { %v1446_v34 = vshll.u32 %v9344_v62, 16  ;;  %v7022_v10 = vrot.slane %v10095_v31, 9  ;;  %v4376_v8 = vrot.slane %v4374_v24, 4  ;;  %v4377_v11 = vrot.slane %v10108_v1, 5 }
  0xc0   :  { %v1429_v2 = vor.u32 %v1428_v41, %v10098_v57  ;;  %v10122_v60 = vcombine.low %v1353_v9, %v1363_v54  ;;  %v1377_v58 = vsel %vm8748_vm4, %v1372_v15, %v10044_v25  ;;  %v1387_v27 = vsel %vm8748_vm4, %v1382_v18, %v1386_v59 }
  0xc1   :  { %7559 = vmatmul.mubr.msk.bf16.gmra.mrb[28].mxu1 %vm411_vm1, %v9288_v14  ;;  %v1470_v51 = vshll.u32 %v9365_v43, 16  ;;  %v1401_v0 = vsel %vm8748_vm4, %v1396_v12, %v10059_v47  ;;  %v1420_v20 = vrot.slane %v1419_v28, 4  ;;  %v1434_v16 = vrot.slane %v1432_v5, 5 }
  0xc2   :  { %7562 = vmatprep.mubr.msk.bf16.mxu1 %vm411_vm1, %v6806_v49  ;;  %11306 = vst [vmem:[#allocation101_spill] sm:$0xff] %v10122_v60  ;;  %v11307_v53 = vshrl.u32 %v9339_v50, 16  ;;  %v1411_v25 = vsel %vm8748_vm4, %v1406_v7, %v1410_v40  ;;  %v11308_v49 = vshll.u32 %v9339_v50, 16  ;;  %v10141_v9 = vrot.slane %v1446_v34, 5 }
  0xc3   :  { %v11309_v15 = vshrl.u32 %v9344_v62, 16  ;;  %v1430_v47 = vrot.slane %v1429_v2, 4  ;;  %v1456_v59 = vshll.u32 %v9800_v3, 16  ;;  %v11310_v54 = vshrl.u32 %v9351_v13, 16 }
  0xc4   :  { %v1439_v44 = vrot.slane %v11307_v53, 4  ;;  %7847 = vmatmul.mubr.msk.bf16.gmra.mrb[52].mxu0 %vm411_vm1, %v10014_v35  ;;  %v1442_v41 = vrot.slane %v11308_v49, 5  ;;  %v11311_v28 = vshll.u32 %v9351_v13, 16  ;;  %v10154_v50 = vcombine.low %v10028_v45, %v10050_v55 }
  0xc5   :  { %v1452_v18 = vrot.slane %v11309_v15, 4  ;;  %7850 = vmatprep.mubr.msk.bf16.mxu0 %vm411_vm1, %v10018_v4  ;;  %v1463_v12 = vrot.slane %v11310_v54, 4  ;;  %v10156_v7 = vcombine.low %v1377_v58, %v1387_v27  ;;  %v10158_v62 = vrot.slane %v1470_v51, 5  ;;  %v11322_v54 = vld [vmem:[#allocation60_spill] sm:$0xff] }
  0xc6   :  { %v1466_v5 = vrot.slane %v11311_v28, 5  ;;  %11312 = vst [vmem:[#allocation102_spill] sm:$0xff] %v10154_v50  ;;  %v11313_v40 = vshrl.u32 %v9365_v43, 16  ;;  %v10162_v2 = vcombine.low %v2633_v46, %v2636_v39  ;;  %v4375_v3 = vsel %vm9291_vm7, %v7022_v10, %v4374_v24 }
  0xc7   :  { %v4378_v13 = vsel %vm9291_vm7, %v4376_v8, %v4377_v11  ;;  %v1494_v53 = vshll.u32 %v9403_v21, 16  ;;  %v10169_v49 = vcombine.low %v1401_v0, %v1411_v25  ;;  %v1425_v45 = vsel %vm8748_vm4, %v1420_v20, %v10098_v57  ;;  %v11319_v25 = vld [vmem:[#allocation48_spill] sm:$0xff] }
  0xc8   :  { %v1476_v34 = vrot.slane %v11313_v40, 4  ;;  %11314 = vst [vmem:[#allocation103_spill] sm:$0xff] %v10162_v2  ;;  %v1443_v55 = vor.u32 %v1442_v41, %v1439_v44  ;;  %v1453_v43 = vor.u32 %v1452_v18, %v10141_v9  ;;  %v1435_v46 = vsel %vm8748_vm4, %v1430_v47, %v1434_v16 }
  0xc9   :  { %7563 = vmatmul.mubr.msk.bf16.gmra.mrb[32].mxu1 %vm411_vm1, %v10122_v60  ;;  %v1458_v24 = vrot.slane %v1456_v59, 5  ;;  %v1467_v39 = vor.u32 %v1466_v5, %v1463_v12  ;;  %v1518_v10 = vshll.u32 %v9413_v52, 16  ;;  %v1480_v57 = vshll.u32 %v9844_v23, 16  ;;  %v11321_v23 = vld [vmem:[#allocation29_spill] sm:$0xff]  ;;  %v11345_v60 = vld [vmem:[#allocation87_spill] sm:$0xff] }
  0xca   :  { %7566 = vmatprep.mubr.msk.bf16.mxu1 %vm411_vm1, %v10156_v7  ;;  %v1477_v8 = vor.u32 %v1476_v34, %v10158_v62  ;;  %v11315_v11 = vshrl.u32 %v9394_v38, 16  ;;  %v11316_v27 = vshll.u32 %v9394_v38, 16  ;;  %v10188_v0 = vrot.slane %v1494_v53, 5  ;;  %v11326_v53 = vld [vmem:[#allocation45_spill] sm:$0xff] }
  0xcb   :  { %v11317_v20 = vshrl.u32 %v9403_v21, 16  ;;  %v11318_v44 = vrot.slane %v9741_v42, 5  ;;  %v11320_v41 = vrot.slane %v11319_v25, 9  ;;  %v2418_v18 = vrot.slane %v11321_v23, 5 }
  0xcc   :  { %v1487_v58 = vrot.slane %v11315_v11, 4  ;;  %v1490_v51 = vrot.slane %v11316_v27, 5  ;;  %7851 = vmatmul.mubr.msk.bf16.gmra.mrb[56].mxu0 %vm411_vm1, %v10154_v50  ;;  %v10203_v38 = vcombine.low %v1425_v45, %v1435_v46  ;;  %v1444_v47 = vrot.slane %v1443_v55, 4  ;;  %v11327_v46 = vld [vmem:[#allocation83_spill] sm:$0xff]  ;;  %v11344_v27 = vld [vmem:[#allocation18_spill] sm:$0xff] }
  0xcd   :  { %v1500_v16 = vrot.slane %v11317_v20, 4  ;;  %v10198_v15 = vsel %vm9291_vm7, %v11320_v41, %v11318_v44  ;;  %v1454_v59 = vrot.slane %v1453_v43, 4  ;;  %v11323_v21 = vshrl.u32 %v11322_v54, 16  ;;  %7854 = vmatprep.mubr.msk.bf16.mxu0 %vm411_vm1, %v10162_v2  ;;  %v11328_v20 = vld [vmem:[#allocation73_spill] sm:$0xff] }
  0xce   :  { %v11324_v42 = vshll.u32 %v11322_v54, 16  ;;  %v10211_v5 = vrot.slane %v1518_v10, 5  ;;  %v11325_v40 = vshrl.u32 %v9413_v52, 16  ;;  %v10218_v45 = vsel %vm9291_vm7, %v11326_v53, %v2418_v18 }
  0xcf   :  { %v1511_v12 = vrot.slane %v11323_v21, 4  ;;  %v1468_v55 = vrot.slane %v1467_v39, 4  ;;  %v1491_v43 = vor.u32 %v1490_v51, %v1487_v58  ;;  %v1504_v11 = vshll.u32 %v11327_v46, 16  ;;  %v11330_v58 = vld [vmem:[#allocation67_spill] sm:$0xff] }
  0xd0   :  { %v1514_v28 = vrot.slane %v11324_v42, 5  ;;  %v1524_v34 = vrot.slane %v11325_v40, 4  ;;  %v1581_v44 = vshrl.u32 %v11328_v20, 16  ;;  %v1478_v25 = vrot.slane %v1477_v8, 4 }
  0xd1   :  { %v1482_v10 = vrot.slane %v1480_v57, 5  ;;  %v1501_v41 = vor.u32 %v1500_v16, %v10188_v0  ;;  %v1584_v52 = vshll.u32 %v11328_v20, 16  ;;  %v10226_v23 = vcombine.low %v4375_v3, %v4378_v13  ;;  %7567 = vmatmul.mubr.msk.bf16.gmra.mrb[36].mxu1 %vm411_vm1, %v10169_v49  ;;  %v11331_v16 = vld [vmem:[#allocation86_spill] sm:$0xff] }
  0xd2   :  { %v1449_v39 = vsel %vm8748_vm4, %v1444_v47, %v10141_v9  ;;  %v1542_v51 = vshll.u32 %v11330_v58, 16  ;;  %v1459_v18 = vsel %vm8748_vm4, %v1454_v59, %v1458_v24  ;;  %v1515_v8 = vor.u32 %v1514_v28, %v1511_v12  ;;  %7570 = vmatprep.mubr.msk.bf16.mxu1 %vm411_vm1, %v10203_v38  ;;  %v11332_v59 = vld [vmem:[#allocation66_spill] sm:$0xff] }
  0xd3   :  { %11329 = vst [vmem:[#allocation48_spill] sm:$0xff] %v10226_v23  ;;  %v1525_v57 = vor.u32 %v1524_v34, %v10211_v5  ;;  %v1528_v54 = vshll.u32 %v11331_v16, 16  ;;  %v1473_v9 = vsel %vm8748_vm4, %v1468_v55, %v10158_v62  ;;  %v1492_v3 = vrot.slane %v1491_v43, 4  ;;  %v11336_v55 = vld [vmem:[#allocation68_spill] sm:$0xff] }
  0xd4   :  { %v1506_v13 = vrot.slane %v1504_v11, 5  ;;  %v1566_v47 = vshll.u32 %v9483_v48, 16  ;;  %v1483_v21 = vsel %vm8748_vm4, %v1478_v25, %v1482_v10  ;;  %v1502_v24 = vrot.slane %v1501_v41, 4  ;;  %7855 = vmatmul.mubr.msk.bf16.gmra.mrb[60].mxu0 %vm411_vm1, %v10226_v23  ;;  %v11339_v25 = vld [vmem:[#allocation5_spill] sm:$0xff] }
  0xd5   :  { %v11333_v12 = vshrl.u32 %v11332_v59, 16  ;;  %v11334_v28 = vshll.u32 %v11332_v59, 16  ;;  %v10252_v34 = vrot.slane %v1542_v51, 5  ;;  %v11335_v62 = vshrl.u32 %v11330_v58, 16  ;;  %7860 = vmatprep.mubr.msk.bf16.mxu0 %vm411_vm1, %v11339_v25 }
  0xd6   :  { %v11337_v43 = vshrl.u32 %v11336_v55, 16  ;;  %v11338_v11 = vshll.u32 %v11336_v55, 16  ;;  %v10262_v10 = vcombine.low %v1449_v39, %v1459_v18  ;;  %v1516_v41 = vrot.slane %v1515_v8, 4 }
  0xd7   :  { %v1535_v42 = vrot.slane %v11333_v12, 4  ;;  %v1538_v40 = vrot.slane %v11334_v28, 5  ;;  %v1548_v53 = vrot.slane %v11335_v62, 4  ;;  %v1526_v16 = vrot.slane %v1525_v57, 4  ;;  %v11341_v12 = vld [vmem:[#allocation74_spill] sm:$0xff] }
  0xd8   :  { %v1559_v46 = vrot.slane %v11337_v43, 4  ;;  %v1562_v20 = vrot.slane %v11338_v11, 5  ;;  %11340 = vst [vmem:[#allocation29_spill] sm:$0xff] %v10262_v10  ;;  %v1530_v59 = vrot.slane %v1528_v54, 5  ;;  %v1594_v51 = vshrl.u32 %v11341_v12, 16 }
  0xd9   :  { %v10265_v28 = vcombine.low %v1473_v9, %v1483_v21  ;;  %v10267_v58 = vrot.slane %v1566_v47, 5  ;;  %v11343_v62 = vshrl.u32 %v9483_v48, 16  ;;  %v1605_v55 = vshrl.u32 %v11344_v27, 16  ;;  %v11346_v9 = vld [vmem:[#allocation77_spill] sm:$0xff]  ;;  %7571 = vmatmul.mubr.msk.bf16.gmra.mrb[40].mxu1 %vm411_vm1, %v10262_v10  ;;  %v11348_v21 = vld [vmem:[#allocation88_spill] sm:$0xff] }
  0xda   :  { %v1608_v11 = vshll.u32 %v11344_v27, 16  ;;  %v1539_v23 = vor.u32 %v1538_v40, %v1535_v42  ;;  %v1552_v39 = vshll.u32 %v11345_v60, 16  ;;  %v1497_v18 = vsel %vm8748_vm4, %v1492_v3, %v10188_v0  ;;  %v11347_v3 = vld [vmem:[#allocation61_spill] sm:$0xff] }
  0xdb   :  { %11342 = vst [vmem:[#allocation60_spill] sm:$0xff] %v10265_v28  ;;  %v1572_v43 = vrot.slane %v11343_v62, 4  ;;  %v1507_v8 = vsel %vm8748_vm4, %v1502_v24, %v1506_v13  ;;  %v1549_v57 = vor.u32 %v1548_v53, %v10252_v34  ;;  %v1563_v54 = vor.u32 %v1562_v20, %v1559_v46  ;;  %7574 = vmatprep.mubr.msk.bf16.mxu1 %vm411_vm1, %v10265_v28  ;;  %v10301_v20 = vld [vmem:[%s10934_s1 + $0x10] sm:$0x3] }
  0xdc   :  { %v1618_v48 = vshrl.u32 %v11346_v9, 16  ;;  %v1521_v27 = vsel %vm8748_vm4, %v1516_v41, %v10211_v5  ;;  %v1531_v60 = vsel %vm8748_vm4, %v1526_v16, %v1530_v59  ;;  %v1590_v0 = vshll.u32 %v11341_v12, 16  ;;  %v11350_v41 = vld [vmem:[#allocation6_spill] sm:$0xff] }
  0xdd   :  { %v5506_v13 = vsel %vm508_vm0, %v11347_v3, 0  ;;  %v1573_v47 = vor.u32 %v1572_v43, %v10267_v58  ;;  %v1576_v24 = vshll.u32 %v11348_v21, 16  ;;  %v1614_v42 = vshll.u32 %v11346_v9, 16  ;;  %7861 = vmatmul.mubr.msk.bf16.vlgmr.msra.gmra.mrb[0].mxu0 %vm411_vm1, %v11350_v41  ;;  %v11352_v43 = vld [vmem:[#allocation7_spill] sm:$0xff] }
  0xde   :  { %v10296_v40 = vcombine.low %v1497_v18, %v1507_v8  ;;  %v1540_v5 = vrot.slane %v1539_v23, 4  ;;  %v1554_v53 = vrot.slane %v1552_v39, 5  ;;  %v1583_v46 = vrot.slane %v1581_v44, 4  ;;  %7925 = vmatpush3.bf16.msra.mxu0 %v5506_v13  ;;  %7864 = vmatprep.mubr.msk.bf16.mxu0 %vm411_vm1, %v11352_v43 }
  0xdf   :  { %v10305_v16 = vcombine.low %v1521_v27, %v1531_v60  ;;  %v1550_v59 = vrot.slane %v1549_v57, 4  ;;  %v1564_v12 = vrot.slane %v1563_v54, 4  ;;  %v1586_v62 = vrot.slane %v1584_v52, 5  ;;  %8579 = vmatprep.subr.msk.bf16.mxu0 %vm508_vm0, %v10301_v20  ;;  %v11353_v27 = vld [vmem:[#allocation20_spill] sm:$0xff]  ;;  %v11354_v54 = vld [vmem:[#allocation27_spill] sm:$0xff] }
  0xe0   :  { %11349 = vst [vmem:[#allocation45_spill] sm:$0xff] %v10296_v40  ;;  %v10309_v23 = vrot.slane %v1590_v0, 5  ;;  %v1596_v44 = vrot.slane %v1594_v51, 4  ;;  %v1607_v39 = vrot.slane %v1605_v55, 4  ;;  %v1610_v18 = vrot.slane %v1608_v11, 5  ;;  %v11355_v55 = vld [vmem:[#allocation90_spill] sm:$0xff] }
  0xe1   :  { %11351 = vst [vmem:[#allocation83_spill] sm:$0xff] %v10305_v16  ;;  %v1574_v8 = vrot.slane %v1573_v47, 4  ;;  %v1578_v9 = vrot.slane %v1576_v24, 5  ;;  %v1616_v3 = vrot.slane %v1614_v42, 5  ;;  %v1620_v21 = vrot.slane %v1618_v48, 4  ;;  %7575 = vmatmul.mubr.msk.bf16.gmra.mrb[44].mxu1 %vm411_vm1, %v10296_v40 }
  0xe2   :  { %v1629_v57 = vshrl.u32 %v11353_v27, 16  ;;  %v1632_v52 = vshll.u32 %v11353_v27, 16  ;;  %v1642_v60 = vshrl.u32 %v11354_v54, 16  ;;  %v1545_v0 = vsel %vm8748_vm4, %v1540_v5, %v10252_v34  ;;  %7578 = vmatprep.mubr.msk.bf16.mxu1 %vm411_vm1, %v10305_v16  ;;  %v11356_v5 = vld [vmem:[#allocation92_spill] sm:$0xff] }
  0xe3   :  { %v1587_v51 = vor.u32 %v1586_v62, %v1583_v46  ;;  %v1600_v11 = vshll.u32 %v11355_v55, 16  ;;  %v1555_v48 = vsel %vm8748_vm4, %v1550_v59, %v1554_v53  ;;  %v1569_v13 = vsel %vm8748_vm4, %v1564_v12, %v10267_v58 }
  0xe4   :  { %v1597_v47 = vor.u32 %v1596_v44, %v10309_v23  ;;  %v1611_v24 = vor.u32 %v1610_v18, %v1607_v39  ;;  %v1579_v34 = vsel %vm8748_vm4, %v1574_v8, %v1578_v9  ;;  %v1621_v42 = vor.u32 %v1620_v21, %v1616_v3  ;;  %v11357_v44 = vld [vmem:[#allocation9_spill] sm:$0xff]  ;;  %v11358_v21 = vld [vmem:[#allocation11_spill] sm:$0xff] }
  0xe5   :  { %v1624_v46 = vshll.u32 %v11356_v5, 16  ;;  %v1638_v62 = vshll.u32 %v11354_v54, 16  ;;  %v1653_v53 = vshrl.u32 %v9619_v6, 16  ;;  %v1656_v59 = vshll.u32 %v9619_v6, 16  ;;  %7865 = vmatmul.mubr.msk.bf16.gmra.mrb[4].mxu0 %vm411_vm1, %v11357_v44 }
  0xe6   :  { %v1666_v58 = vshrl.u32 %v9631_v32, 16  ;;  %v1662_v12 = vshll.u32 %v9631_v32, 16  ;;  %v10340_v39 = vcombine.low %v1545_v0, %v1555_v48  ;;  %v1588_v18 = vrot.slane %v1587_v51, 4  ;;  %7868 = vmatprep.mubr.msk.bf16.mxu0 %vm411_vm1, %v11358_v21 }
  0xe7   :  { %v1602_v8 = vrot.slane %v1600_v11, 5  ;;  %v1631_v9 = vrot.slane %v1629_v57, 4  ;;  %v10344_v27 = vcombine.low %v1569_v13, %v1579_v34  ;;  %v1598_v54 = vrot.slane %v1597_v47, 4  ;;  %v11359_v13 = vld [vmem:[#allocation93_spill] sm:$0xff] }
  0xe8   :  { %v1612_v55 = vrot.slane %v1611_v24, 4  ;;  %v1634_v6 = vrot.slane %v1632_v52, 5  ;;  %v1622_v5 = vrot.slane %v1621_v42, 4  ;;  %v1626_v1 = vrot.slane %v1624_v46, 5 }
  0xe9   :  { %v1640_v16 = vrot.slane %v1638_v62, 5  ;;  %v1644_v32 = vrot.slane %v1642_v60, 4  ;;  %v1655_v40 = vrot.slane %v1653_v53, 4  ;;  %v1658_v28 = vrot.slane %v1656_v59, 5  ;;  %7579 = vmatmul.mubr.msk.bf16.gmra.mrb[48].mxu1 %vm411_vm1, %v10340_v39  ;;  %v11360_v53 = vld [vmem:[#allocation13_spill] sm:$0xff] }
  0xea   :  { %v1664_v10 = vrot.slane %v1662_v12, 5  ;;  %v1668_v0 = vrot.slane %v1666_v58, 4  ;;  %v1677_v51 = vshrl.u32 %v9675_v29, 16  ;;  %v1680_v57 = vshll.u32 %v9675_v29, 16  ;;  %7582 = vmatprep.mubr.msk.bf16.mxu1 %vm411_vm1, %v10344_v27  ;;  %v11361_v58 = vld [vmem:[#allocation15_spill] sm:$0xff] }
  0xeb   :  { %v1690_v11 = vshrl.u32 %v9680_v33, 16  ;;  %v1593_v52 = vsel %vm8748_vm4, %v1588_v18, %v10309_v23  ;;  %v1603_v60 = vsel %vm8748_vm4, %v1598_v54, %v1602_v8  ;;  %v1635_v48 = vor.u32 %v1634_v6, %v1631_v9 }
  0xec   :  { %v1648_v47 = vshll.u32 %v11359_v13, 16  ;;  %v1617_v29 = vsel %vm8748_vm4, %v1612_v55, %v1616_v3  ;;  %v1627_v24 = vsel %vm8748_vm4, %v1622_v5, %v1626_v1  ;;  %v1645_v34 = vor.u32 %v1644_v32, %v1640_v16 }
  0xed   :  { %v1686_v42 = vshll.u32 %v9680_v33, 16  ;;  %v1659_v46 = vor.u32 %v1658_v28, %v1655_v40  ;;  %v1669_v23 = vor.u32 %v1668_v0, %v1664_v10  ;;  %v1672_v62 = vshll.u32 %v9993_v17, 16  ;;  %7869 = vmatmul.mubr.msk.bf16.gmra.mrb[8].mxu0 %vm411_vm1, %v11360_v53 }
  0xee   :  { %v10367_v59 = vcombine.low %v1593_v52, %v1603_v60  ;;  %7872 = vmatprep.mubr.msk.bf16.mxu0 %vm411_vm1, %v11361_v58  ;;  %v10371_v12 = vcombine.low %v1617_v29, %v1627_v24  ;;  %v1636_v3 = vrot.slane %v1635_v48, 4  ;;  %v1650_v18 = vrot.slane %v1648_v47, 5  ;;  %v11364_v29 = vld [vmem:[#allocation23_spill] sm:$0xff]  ;;  %v11365_v24 = vld [vmem:[#allocation28_spill] sm:$0xff] }
  0xef   :  { %v1679_v1 = vrot.slane %v1677_v51, 4  ;;  %v1646_v8 = vrot.slane %v1645_v34, 4  ;;  %v1682_v9 = vrot.slane %v1680_v57, 5  ;;  %v1688_v33 = vrot.slane %v1686_v42, 5 }
  0xf0   :  { %v1692_v28 = vrot.slane %v1690_v11, 4  ;;  %v1660_v40 = vrot.slane %v1659_v46, 4  ;;  %v1670_v54 = vrot.slane %v1669_v23, 4  ;;  %v1674_v17 = vrot.slane %v1672_v62, 5  ;;  %v11362_v11 = vld [vmem:[#allocation17_spill] sm:$0xff]  ;;  %v11367_v46 = vld [vmem:[#allocation32_spill] sm:$0xff] }
  0xf1   :  { %7583 = vmatmul.mubr.msk.bf16.gmra.mrb[52].mxu1 %vm411_vm1, %v10367_v59  ;;  %v1641_v55 = vsel %vm8748_vm4, %v1636_v3, %v1640_v16  ;;  %v1651_v6 = vsel %vm8748_vm4, %v1646_v8, %v1650_v18  ;;  %v1683_v5 = vor.u32 %v1682_v9, %v1679_v1  ;;  %v1696_v0 = vshll.u32 %v10037_v36, 16  ;;  %v11363_v16 = vld [vmem:[#allocation21_spill] sm:$0xff]  ;;  %v11368_v23 = vld [vmem:[#allocation36_spill] sm:$0xff]  ;;  %v11369_v62 = vld [vmem:[#allocation42_spill] sm:$0xff] }
  0xf2   :  { %7586 = vmatprep.mubr.msk.bf16.mxu1 %vm411_vm1, %v10371_v12  ;;  %v1693_v32 = vor.u32 %v1692_v28, %v1688_v33  ;;  %v1665_v51 = vsel %vm8748_vm4, %v1660_v40, %v1664_v10  ;;  %v1675_v57 = vsel %vm8748_vm4, %v1670_v54, %v1674_v17  ;;  %v10390_v52 = vcombine.low %v1641_v55, %v1651_v6  ;;  %v8619_v18 = vld [vmem:[%s10935_s0 + $0xc0] sm:$0xf]  ;;  %v8620_v1 = vld [vmem:[%s10935_s0 + $0xc4] sm:$0xf]  ;;  %v11371_v8 = vld [vmem:[#allocation54_spill] sm:$0xff] }
  0xf3   :  { %v10392_v60 = vcombine.low %v1665_v51, %v1675_v57  ;;  %v1684_v48 = vrot.slane %v1683_v5, 4  ;;  %v1698_v47 = vrot.slane %v1696_v0, 5  ;;  %v11366_v42 = vcombine.low %v10198_v15, %v10218_v45  ;;  %v11370_v45 = vld [vmem:[#allocation56_spill] sm:$0xff]  ;;  %v10448_v40 = vld [vmem:[%s10935_s0 + $0xd0] sm:$0xf]  ;;  %v11373_v17 = vld [vmem:[#allocation59_spill] sm:$0xff] }
  0xf4   :  { %v1694_v13 = vrot.slane %v1693_v32, 4  ;;  %v3398_v3 = vsel %vm508_vm0, %v11369_v62, 0  ;;  %v10426_v15 = vcombine.low %v8619_v18, %v8620_v1  ;;  %v8621_v9 = vld [vmem:[%s10934_s1 + $0x8] sm:$0x3]  ;;  %v10443_v28 = vld [vmem:[%s10935_s0 + $0xcc] sm:$0xf] }
  0xf5   :  { %7873 = vmatmul.mubr.msk.bf16.gmra.mrb[12].mxu0 %vm411_vm1, %v11362_v11  ;;  %v1689_v36 = vsel %vm8748_vm4, %v1684_v48, %v1688_v33  ;;  %v11372_v33 = vld [vmem:[#allocation41_spill] sm:$0xff]  ;;  %v7059_v54 = vcombine.low %v10443_v28, %v10448_v40  ;;  %v11374_v55 = vld [vmem:[#allocation64_spill] sm:$0xff]  ;;  %v11375_v6 = vld [vmem:[#allocation50_spill] sm:$0xff] }
  0xf6   :  { %7876 = vmatprep.mubr.msk.bf16.mxu0 %vm411_vm1, %v11363_v16  ;;  %v1699_v10 = vsel %vm8748_vm4, %v1694_v13, %v1698_v47  ;;  %v11376_v5 = vld [vmem:[#allocation65_spill] sm:$0xff]  ;;  %v11377_v32 = vld [vmem:[#allocation71_spill] sm:$0xff]  ;;  %v11378_v0 = vld [vmem:[#allocation52_spill] sm:$0xff] }
  0xf7   :  { %v10406_v34 = vcombine.low %v1689_v36, %v1699_v10  ;;  %v11379_v51 = vld [vmem:[#allocation55_spill] sm:$0xff]  ;;  %v11380_v57 = vld [vmem:[#allocation72_spill] sm:$0xff]  ;;  %v11382_v13 = vld [vmem:[#allocation57_spill] sm:$0xff] }
  0xf8   :  { %v11381_v48 = vld [vmem:[#allocation75_spill] sm:$0xff]  ;;  %v11383_v47 = vld [vmem:[#allocation58_spill] sm:$0xff]  ;;  %v11384_v36 = vld [vmem:[#allocation33_spill] sm:$0xff] }
  0xf9   :  { %7587 = vmatmul.mubr.msk.bf16.gmra.mrb[56].mxu1 %vm411_vm1, %v10390_v52  ;;  %v11385_v10 = vld [vmem:[#allocation79_spill] sm:$0xff]  ;;  %v11389_v18 = vld [vmem:[#allocation37_spill] sm:$0xff]  ;;  %v8622_v1 = vld [vmem:[%s10935_s0 + $0xdc] sm:$0xf] }
  0xfa   :  { %7590 = vmatprep.mubr.msk.bf16.mxu1 %vm411_vm1, %v10392_v60  ;;  %v11387_v62 = vld [vmem:[#allocation63_spill] sm:$0xff] }
  0xfd   :  { %7877 = vmatmul.mubr.msk.bf16.gmra.mrb[16].mxu0 %vm411_vm1, %v11364_v29 }
  0xfe   :  { %7880 = vmatprep.mubr.msk.bf16.mxu0 %vm411_vm1, %v11365_v24 }
 0x101   :  { %7591 = vmatmul.mubr.msk.bf16.gmra.mrb[60].mxu1 %vm411_vm1, %v10406_v34 }
 0x102   :  { %7596 = vmatprep.mubr.msk.bf16.mxu1 %vm411_vm1, %v11366_v42  ;;  %v11386_v42 = vld [vmem:[#allocation62_spill] sm:$0xff] }
 0x105   :  { %7881 = vmatmul.mubr.msk.bf16.gmra.mrb[20].mxu0 %vm411_vm1, %v11367_v46 }
 0x106   :  { %7884 = vmatprep.mubr.msk.bf16.mxu0 %vm411_vm1, %v11368_v23 }
 0x109   :  { %7597 = vmatmul.mubr.msk.bf16.vlgmr.msra.gmra.mrb[0].mxu1 %vm411_vm1, %v11370_v45  ;;  %v2527_v45 = vrot.slane %v8622_v1, 5 }
 0x10a   :  { %7600 = vmatprep.mubr.msk.bf16.mxu1 %vm411_vm1, %v11371_v8  ;;  %7661 = vmatpush3.bf16.msra.mxu1 %v3398_v3  ;;  %v11388_v3 = vld [vmem:[#allocation24_spill] sm:$0xff] }
 0x10b   :  { %8575 = vmatprep.subr.msk.bf16.mxu1 %vm508_vm0, %v8621_v9  ;;  %v11390_v9 = vld [vmem:[#allocation69_spill] sm:$0xff] }
 0x10d   :  { %7885 = vmatmul.mubr.msk.bf16.gmra.mrb[24].mxu0 %vm411_vm1, %v11372_v33 }
 0x10e   :  { %7888 = vmatprep.mubr.msk.bf16.mxu0 %vm411_vm1, %v10426_v15 }
 0x111   :  { %7601 = vmatmul.mubr.msk.bf16.gmra.mrb[4].mxu1 %vm411_vm1, %v11373_v17 }
 0x112   :  { %7604 = vmatprep.mubr.msk.bf16.mxu1 %vm411_vm1, %v11374_v55 }
 0x115   :  { %7889 = vmatmul.mubr.msk.bf16.gmra.mrb[28].mxu0 %vm411_vm1, %v7059_v54  ;;  %v11391_v54 = vld [vmem:[#allocation70_spill] sm:$0xff] }
 0x116   :  { %7892 = vmatprep.mubr.msk.bf16.mxu0 %vm411_vm1, %v11375_v6 }
 0x119   :  { %7605 = vmatmul.mubr.msk.bf16.gmra.mrb[8].mxu1 %vm411_vm1, %v11376_v5  ;;  %v11395_v5 = vld [vmem:[#allocation25_spill] sm:$0xff] }
 0x11a   :  { %7608 = vmatprep.mubr.msk.bf16.mxu1 %vm411_vm1, %v11377_v32  ;;  %v11394_v32 = vld [vmem:[#allocation76_spill] sm:$0xff] }
 0x11d   :  { %7893 = vmatmul.mubr.msk.bf16.gmra.mrb[32].mxu0 %vm411_vm1, %v11378_v0 }
 0x11e   :  { %7896 = vmatprep.mubr.msk.bf16.mxu0 %vm411_vm1, %v11379_v51 }
 0x121   :  { %7609 = vmatmul.mubr.msk.bf16.gmra.mrb[12].mxu1 %vm411_vm1, %v11380_v57  ;;  %v11393_v57 = vld [vmem:[#allocation78_spill] sm:$0xff] }
 0x122   :  { %7612 = vmatprep.mubr.msk.bf16.mxu1 %vm411_vm1, %v11381_v48  ;;  %v2530_v48 = vrot.slane %v9984_v26, 5  ;;  %v11396_v26 = vld [vmem:[#allocation80_spill] sm:$0xff] }
 0x125   :  { %7897 = vmatmul.mubr.msk.bf16.gmra.mrb[36].mxu0 %vm411_vm1, %v11382_v13 }
 0x126   :  { %7900 = vmatprep.mubr.msk.bf16.mxu0 %vm411_vm1, %v11383_v47 }
 0x129   :  { %7613 = vmatmul.mubr.msk.bf16.gmra.mrb[16].mxu1 %vm411_vm1, %v11384_v36 }
 0x12a   :  { %7616 = vmatprep.mubr.msk.bf16.mxu1 %vm411_vm1, %v11385_v10  ;;  %v8623_v10 = vld [vmem:[%s10935_s0 + $0xd8] sm:$0xf] }
 0x12b   :  { %v6870_v36 = vrot.slane %v8623_v10, 9 }
 0x12d   :  { %7901 = vmatmul.mubr.msk.bf16.gmra.mrb[40].mxu0 %vm411_vm1, %v11386_v42  ;;  %v2528_v1 = vsel %vm9291_vm7, %v6870_v36, %v2527_v45  ;;  %v11400_v36 = vld [vmem:[#allocation8_spill] sm:$0xff] }
 0x12e   :  { %7904 = vmatprep.mubr.msk.bf16.mxu0 %vm411_vm1, %v11387_v62 }
 0x131   :  { %7617 = vmatmul.mubr.msk.bf16.gmra.mrb[20].mxu1 %vm411_vm1, %v11388_v3  ;;  %v2529_v3 = vrot.slane %v2527_v45, 4  ;;  %v11402_v45 = vld [vmem:[#allocation81_spill] sm:$0xff] }
 0x132   :  { %7620 = vmatprep.mubr.msk.bf16.mxu1 %vm411_vm1, %v11389_v18  ;;  %v11392_v18 = vld [vmem:[#allocation34_spill] sm:$0xff] }
 0x135   :  { %7905 = vmatmul.mubr.msk.bf16.gmra.mrb[44].mxu0 %vm411_vm1, %v11390_v9 }
 0x136   :  { %7908 = vmatprep.mubr.msk.bf16.mxu0 %vm411_vm1, %v11391_v54  ;;  %v2531_v54 = vsel %vm9291_vm7, %v2529_v3, %v2530_v48  ;;  %v10519_v48 = vcombine.low %v10095_v31, %v10076_v22  ;;  %v11401_v3 = vld [vmem:[#allocation43_spill] sm:$0xff] }
 0x137   :  { %v6903_v10 = vcombine.low %v2528_v1, %v2531_v54  ;;  %v10532_v54 = vld [vmem:[%s10935_s0 + $0x1a4] sm:$0xf]  ;;  %v10537_v1 = vld [vmem:[%s10935_s0 + $0x1a8] sm:$0xf] }
 0x138   :  { %11399 = vst [vmem:[#allocation73_spill] sm:$0xff] %v10519_v48 }
 0x139   :  { %7621 = vmatmul.mubr.msk.bf16.gmra.mrb[24].mxu1 %vm411_vm1, %v11392_v18  ;;  %v11397_v18 = vld [vmem:[#allocation31_spill] sm:$0xff] }
 0x13a   :  { %7624 = vmatprep.mubr.msk.bf16.mxu1 %vm411_vm1, %v11393_v57  ;;  %v11398_v57 = vld [vmem:[#allocation38_spill] sm:$0xff] }
 0x13d   :  { %7909 = vmatmul.mubr.msk.bf16.gmra.mrb[48].mxu0 %vm411_vm1, %v11394_v32 }
 0x13e   :  { %7912 = vmatprep.mubr.msk.bf16.mxu0 %vm411_vm1, %v11395_v5 }
 0x141   :  { %7625 = vmatmul.mubr.msk.bf16.gmra.mrb[28].mxu1 %vm411_vm1, %v11396_v26  ;;  %v11406_v26 = vld [vmem:[#allocation85_spill] sm:$0xff] }
 0x142   :  { %7628 = vmatprep.mubr.msk.bf16.mxu1 %vm411_vm1, %v6903_v10  ;;  %v7060_v10 = vcombine.low %v10532_v54, %v10537_v1 }
 0x145   :  { %7913 = vmatmul.mubr.msk.bf16.gmra.mrb[52].mxu0 %vm411_vm1, %v11397_v18 }
 0x146   :  { %7916 = vmatprep.mubr.msk.bf16.mxu0 %vm411_vm1, %v11398_v57  ;;  %v11408_v57 = vld [vmem:[#allocation12_spill] sm:$0xff] }
 0x149   :  { %7629 = vmatmul.mubr.msk.bf16.gmra.mrb[32].mxu1 %vm411_vm1, %v11400_v36  ;;  %v11403_v36 = vld [vmem:[#allocation82_spill] sm:$0xff] }
 0x14a   :  { %7632 = vmatprep.mubr.msk.bf16.mxu1 %vm411_vm1, %v11401_v3  ;;  %v11404_v3 = vld [vmem:[#allocation84_spill] sm:$0xff] }
 0x14d   :  { %7917 = vmatmul.mubr.msk.bf16.gmra.mrb[56].mxu0 %vm411_vm1, %v11402_v45  ;;  %v11407_v45 = vld [vmem:[#allocation89_spill] sm:$0xff] }
 0x14e   :  { %7920 = vmatprep.mubr.msk.bf16.mxu0 %vm411_vm1, %v10519_v48  ;;  %v6020_v48 = vsel %vm508_vm0, %v10301_v20, 0  ;;  %v11411_v20 = vld [vmem:[#allocation19_spill] sm:$0xff] }
 0x151   :  { %7633 = vmatmul.mubr.msk.bf16.gmra.mrb[36].mxu1 %vm411_vm1, %v11403_v36  ;;  %v11409_v36 = vld [vmem:[#allocation14_spill] sm:$0xff] }
 0x152   :  { %7636 = vmatprep.mubr.msk.bf16.mxu1 %vm411_vm1, %v11404_v3 }
 0x155   :  { %7921 = vmatmul.mubr.msk.bf16.gmra.mrb[60].mxu0 %vm411_vm1, %v7060_v10  ;;  %v11412_v10 = vld [vmem:[#allocation95_spill] sm:$0xff] }
 0x156   :  { %7926 = vmatprep.mubr.msk.bf16.mxu0 %vm411_vm1, %v11405_v30  ;;  %v11410_v30 = vld [vmem:[#allocation16_spill] sm:$0xff] }
 0x159   :  { %7637 = vmatmul.mubr.msk.bf16.gmra.mrb[40].mxu1 %vm411_vm1, %v11406_v26 }
 0x15a   :  { %7640 = vmatprep.mubr.msk.bf16.mxu1 %vm411_vm1, %v11407_v45 }
 0x15d   :  { %7927 = vmatmul.mubr.msk.bf16.vlgmr.msra.gmra.mrb[0].mxu0 %vm411_vm1, %v11408_v57  ;;  %v11413_v57 = vld [vmem:[#allocation22_spill] sm:$0xff] }
 0x15e   :  { %7991 = vmatpush3.bf16.msra.mxu0 %v6020_v48  ;;  %7930 = vmatprep.mubr.msk.bf16.mxu0 %vm411_vm1, %v11409_v36  ;;  %v11414_v48 = vld [vmem:[#allocation26_spill] sm:$0xff] }
 0x15f   :  { %v11415_v36 = vld [vmem:[#allocation30_spill] sm:$0xff] }
 0x161   :  { %7641 = vmatmul.mubr.msk.bf16.gmra.mrb[44].mxu1 %vm411_vm1, %v9922_v56 }
 0x162   :  { %7644 = vmatprep.mubr.msk.bf16.mxu1 %vm411_vm1, %v9967_v61  ;;  %v11420_v61 = vld [vmem:[#allocation46_spill] sm:$0xff] }
 0x165   :  { %7931 = vmatmul.mubr.msk.bf16.gmra.mrb[4].mxu0 %vm411_vm1, %v11410_v30  ;;  %v11416_v30 = vld [vmem:[#allocation35_spill] sm:$0xff] }
 0x166   :  { %7934 = vmatprep.mubr.msk.bf16.mxu0 %vm411_vm1, %v11411_v20  ;;  %v11417_v20 = vld [vmem:[#allocation40_spill] sm:$0xff] }
 0x169   :  { %7645 = vmatmul.mubr.msk.bf16.gmra.mrb[48].mxu1 %vm411_vm1, %v11412_v10  ;;  %v11419_v10 = vld [vmem:[#allocation3_spill] sm:$0xff] }
 0x16a   :  { %7648 = vmatprep.mubr.msk.bf16.mxu1 %vm411_vm1, %v9975_v19 }
 0x16d   :  { %7935 = vmatmul.mubr.msk.bf16.gmra.mrb[8].mxu0 %vm411_vm1, %v11413_v57  ;;  %v5380_v57 = vshrl.u32 %v10443_v28, 16 }
 0x16e   :  { %7938 = vmatprep.mubr.msk.bf16.mxu0 %vm411_vm1, %v11414_v48  ;;  %v5383_v48 = vshll.u32 %v10443_v28, 16 }
 0x171   :  { %7649 = vmatmul.mubr.msk.bf16.gmra.mrb[52].mxu1 %vm411_vm1, %v10012_v63  ;;  %v11418_v63 = vld [vmem:[#allocation44_spill] sm:$0xff] }
 0x172   :  { %7652 = vmatprep.mubr.msk.bf16.mxu1 %vm411_vm1, %v10014_v35  ;;  %v5393_v35 = vshrl.u32 %v10448_v40, 16 }
 0x174   :  { %v5395_v19 = vrot.slane %v5393_v35, 4 }
 0x175   :  { %7939 = vmatmul.mubr.msk.bf16.gmra.mrb[12].mxu0 %vm411_vm1, %v11415_v36  ;;  %v5389_v36 = vshll.u32 %v10448_v40, 16 }
 0x176   :  { %7942 = vmatprep.mubr.msk.bf16.mxu0 %vm411_vm1, %v11416_v30  ;;  %v5382_v30 = vrot.slane %v5380_v57, 4 }
 0x179   :  { %7653 = vmatmul.mubr.msk.bf16.gmra.mrb[56].mxu1 %vm411_vm1, %v10018_v4  ;;  %v5385_v4 = vrot.slane %v5383_v48, 5 }
 0x17a   :  { %7656 = vmatprep.mubr.msk.bf16.mxu1 %vm411_vm1, %v10154_v50  ;;  %v5391_v50 = vrot.slane %v5389_v36, 5  ;;  %v11422_v36 = vld [vmem:[#allocation4_spill] sm:$0xff] }
 0x17b   :  { %v5386_v56 = vor.u32 %v5385_v4, %v5382_v30 }
 0x17d   :  { %7943 = vmatmul.mubr.msk.bf16.gmra.mrb[16].mxu0 %vm411_vm1, %v11417_v20  ;;  %v10601_v20 = vld [vmem:[%s10935_s0 + $0xd4] sm:$0x1]  ;;  %v5387_v35 = vrot.slane %v5386_v56, 4 }
 0x17e   :  { %7946 = vmatprep.mubr.msk.bf16.mxu0 %vm411_vm1, %v11418_v63  ;;  %v11421_v63 = vld [vmem:[#allocation49_spill] sm:$0xff]  ;;  %v5399_v57 = vshll.u32 %v10601_v20, 16 }
 0x180   :  { %v5401_v48 = vrot.slane %v5399_v57, 5 }
 0x181   :  { %7657 = vmatmul.mubr.msk.bf16.gmra.mrb[60].mxu1 %vm411_vm1, %v10162_v2  ;;  %v5396_v2 = vor.u32 %v5395_v19, %v5391_v50  ;;  %v5392_v19 = vsel %vm8748_vm4, %v5387_v35, %v5391_v50  ;;  %v11425_v50 = vld [vmem:[#allocation60_spill] sm:$0xff] }
 0x182   :  { %7662 = vmatprep.mubr.msk.bf16.mxu1 %vm411_vm1, %v11419_v10 }
 0x183   :  { %v5397_v10 = vrot.slane %v5396_v2, 4  ;;  %v11426_v2 = vld [vmem:[#allocation45_spill] sm:$0xff] }
 0x185   :  { %7947 = vmatmul.mubr.msk.bf16.gmra.mrb[20].mxu0 %vm411_vm1, %v11420_v61  ;;  %v11423_v61 = vld [vmem:[#allocation53_spill] sm:$0xff]  ;;  %v5402_v4 = vsel %vm8748_vm4, %v5397_v10, %v5401_v48  ;;  %v11429_v48 = vld [vmem:[#allocation47_spill] sm:$0xff] }
 0x186   :  { %7950 = vmatprep.mubr.msk.bf16.mxu0 %vm411_vm1, %v11421_v63  ;;  %v7094_v56 = vcombine.low %v5392_v19, %v5402_v4  ;;  %v10684_v4 = vld [vmem:[%s10935_s0 + $0x1ac] sm:$0x1] }
 0x189   :  { %7663 = vmatmul.mubr.msk.bf16.vlgmr.msra.gmra.mrb[0].mxu1 %vm411_vm1, %v11339_v25  ;;  %v11427_v25 = vld [vmem:[#allocation83_spill] sm:$0xff] }
 0x18a   :  { %7666 = vmatprep.mubr.msk.bf16.mxu1 %vm411_vm1, %v11350_v41  ;;  %8057 = vmatpush3.bf16.msra.mxu1 %v11422_v36  ;;  %v3842_v41 = vshrl.u32 %v10095_v31, 16 }
 0x18d   :  { %7951 = vmatmul.mubr.msk.bf16.gmra.mrb[24].mxu0 %vm411_vm1, %v9288_v14  ;;  %v11424_v14 = vld [vmem:[#allocation29_spill] sm:$0xff] }
 0x18e   :  { %7954 = vmatprep.mubr.msk.bf16.mxu0 %vm411_vm1, %v11423_v61 }
 0x191   :  { %7667 = vmatmul.mubr.msk.bf16.gmra.mrb[4].mxu1 %vm411_vm1, %v11352_v43  ;;  %v3845_v43 = vshll.u32 %v10095_v31, 16  ;;  %v5407_v31 = vshll.u32 %v10532_v54, 16 }
 0x192   :  { %7670 = vmatprep.mubr.msk.bf16.mxu1 %vm411_vm1, %v11357_v44  ;;  %v3851_v44 = vshll.u32 %v10076_v22, 16 }
 0x193   :  { %v5409_v57 = vrot.slane %v5407_v31, 5 }
 0x195   :  { %7955 = vmatmul.mubr.msk.bf16.gmra.mrb[28].mxu0 %vm411_vm1, %v7094_v56 }
 0x196   :  { %7958 = vmatprep.mubr.msk.bf16.mxu0 %vm411_vm1, %v10156_v7 }
 0x199   :  { %7671 = vmatmul.mubr.msk.bf16.gmra.mrb[8].mxu1 %vm411_vm1, %v11358_v21  ;;  %v3855_v21 = vshrl.u32 %v10076_v22, 16  ;;  %v5413_v22 = vshll.u32 %v10537_v1, 16 }
 0x19a   :  { %7674 = vmatprep.mubr.msk.bf16.mxu1 %vm411_vm1, %v11360_v53  ;;  %v3844_v53 = vrot.slane %v3842_v41, 4  ;;  %v5423_v41 = vshll.u32 %v10684_v4, 16 }
 0x19b   :  { %v5415_v35 = vrot.slane %v5413_v22, 5  ;;  %v7128_v22 = vrot.slane %v10443_v28, 9  ;;  %v11449_v28 = vld [vmem:[#allocation82_spill] sm:$0xff] }
 0x19d   :  { %7959 = vmatmul.mubr.msk.bf16.gmra.mrb[32].mxu0 %vm411_vm1, %v10169_v49 }
 0x19e   :  { %7962 = vmatprep.mubr.msk.bf16.mxu0 %vm411_vm1, %v10203_v38 }
 0x1a1   :  { %7675 = vmatmul.mubr.msk.bf16.gmra.mrb[12].mxu1 %vm411_vm1, %v11361_v58  ;;  %v3847_v58 = vrot.slane %v3845_v43, 5 }
 0x1a2   :  { %7678 = vmatprep.mubr.msk.bf16.mxu1 %vm411_vm1, %v11362_v11  ;;  %v3853_v11 = vrot.slane %v3851_v44, 5 }
 0x1a5   :  { %7963 = vmatmul.mubr.msk.bf16.gmra.mrb[36].mxu0 %vm411_vm1, %v11424_v14 }
 0x1a6   :  { %7966 = vmatprep.mubr.msk.bf16.mxu0 %vm411_vm1, %v11425_v50 }
 0x1a9   :  { %7679 = vmatmul.mubr.msk.bf16.gmra.mrb[16].mxu1 %vm411_vm1, %v11363_v16  ;;  %v3857_v16 = vrot.slane %v3855_v21, 4 }
 0x1aa   :  { %7682 = vmatprep.mubr.msk.bf16.mxu1 %vm411_vm1, %v11364_v29  ;;  %v5404_v29 = vshrl.u32 %v10532_v54, 16 }
 0x1ac   :  { %v5406_v63 = vrot.slane %v5404_v29, 4 }
 0x1ad   :  { %7967 = vmatmul.mubr.msk.bf16.gmra.mrb[40].mxu0 %vm411_vm1, %v11426_v2 }
 0x1ae   :  { %7970 = vmatprep.mubr.msk.bf16.mxu0 %vm411_vm1, %v11427_v25 }
 0x1b1   :  { %7683 = vmatmul.mubr.msk.bf16.gmra.mrb[20].mxu1 %vm411_vm1, %v11365_v24  ;;  %v5417_v24 = vshrl.u32 %v10537_v1, 16 }
 0x1b2   :  { %7686 = vmatprep.mubr.msk.bf16.mxu1 %vm411_vm1, %v11367_v46  ;;  %v3848_v46 = vor.u32 %v3847_v58, %v3844_v53 }
 0x1b3   :  { %v5419_v10 = vrot.slane %v5417_v24, 4  ;;  %v5929_v24 = vrot.slane %v10448_v40, 5 }
 0x1b4   :  { %v3849_v36 = vrot.slane %v3848_v46, 4 }
 0x1b5   :  { %7971 = vmatmul.mubr.msk.bf16.gmra.mrb[44].mxu0 %vm411_vm1, %v10340_v39  ;;  %v5420_v56 = vor.u32 %v5419_v10, %v5415_v35  ;;  %v5931_v46 = vrot.slane %v5929_v24, 4  ;;  %v5930_v40 = vsel %vm9291_vm7, %v7128_v22, %v5929_v24 }
 0x1b6   :  { %7974 = vmatprep.mubr.msk.bf16.mxu0 %vm411_vm1, %v10344_v27  ;;  %v3854_v43 = vsel %vm8748_vm4, %v3849_v36, %v3853_v11 }
 0x1b7   :  { %v5421_v58 = vrot.slane %v5420_v56, 4 }
 0x1b9   :  { %7687 = vmatmul.mubr.msk.bf16.gmra.mrb[24].mxu1 %vm411_vm1, %v11368_v23  ;;  %v3858_v23 = vor.u32 %v3857_v16, %v3853_v11  ;;  %v5425_v16 = vrot.slane %v5423_v41, 5 }
 0x1ba   :  { %7690 = vmatprep.mubr.msk.bf16.mxu1 %vm411_vm1, %v11372_v33  ;;  %v11428_v33 = vld [vmem:[#allocation100_spill] sm:$0xff] }
 0x1bb   :  { %v3861_v30 = vshll.u32 %v11428_v33, 16  ;;  %v3859_v61 = vrot.slane %v3858_v23, 4  ;;  %v5426_v29 = vsel %vm8748_vm4, %v5421_v58, %v5425_v16  ;;  %v5932_v23 = vrot.slane %v10601_v20, 5  ;;  %v11445_v33 = vld [vmem:[#allocation80_spill] sm:$0xff] }
 0x1bc   :  { %v5939_v20 = vrot.slane %v10684_v4, 5 }
 0x1bd   :  { %7975 = vmatmul.mubr.msk.bf16.gmra.mrb[48].mxu0 %vm411_vm1, %v10367_v59  ;;  %v3863_v19 = vrot.slane %v3861_v30, 5  ;;  %v11446_v30 = vld [vmem:[#allocation39_spill] sm:$0xff] }
 0x1be   :  { %7978 = vmatprep.mubr.msk.bf16.mxu0 %vm411_vm1, %v10371_v12 }
 0x1bf   :  { %v3864_v44 = vsel %vm8748_vm4, %v3859_v61, %v3863_v19 }
 0x1c0   :  { %v10695_v21 = vcombine.low %v3854_v43, %v3864_v44 }
 0x1c1   :  { %7691 = vmatmul.mubr.msk.bf16.gmra.mrb[28].mxu1 %vm411_vm1, %v10426_v15  ;;  %v5410_v15 = vor.u32 %v5409_v57, %v5406_v63 }
 0x1c2   :  { %7694 = vmatprep.mubr.msk.bf16.mxu1 %vm411_vm1, %v11429_v48 }
 0x1c3   :  { %v5411_v53 = vrot.slane %v5410_v15, 4 }
 0x1c5   :  { %7979 = vmatmul.mubr.msk.bf16.gmra.mrb[52].mxu0 %vm411_vm1, %v10390_v52  ;;  %v5416_v11 = vsel %vm8748_vm4, %v5411_v53, %v5415_v35 }
 0x1c6   :  { %7982 = vmatprep.mubr.msk.bf16.mxu0 %vm411_vm1, %v10392_v60  ;;  %v7095_v31 = vcombine.low %v5416_v11, %v5426_v29 }
 0x1c9   :  { %7695 = vmatmul.mubr.msk.bf16.gmra.mrb[32].mxu1 %vm411_vm1, %v11375_v6  ;;  %v11432_v6 = vld [vmem:[#allocation70_spill] sm:$0xff] }
 0x1ca   :  { %7698 = vmatprep.mubr.msk.bf16.mxu1 %vm411_vm1, %v11378_v0  ;;  %v11435_v0 = vld [vmem:[#allocation33_spill] sm:$0xff] }
 0x1cd   :  { %7983 = vmatmul.mubr.msk.bf16.gmra.mrb[56].mxu0 %vm411_vm1, %v10406_v34 }
 0x1ce   :  { %7986 = vmatprep.mubr.msk.bf16.mxu0 %vm411_vm1, %v10695_v21 }
 0x1d1   :  { %7699 = vmatmul.mubr.msk.bf16.gmra.mrb[36].mxu1 %vm411_vm1, %v11379_v51  ;;  %v11436_v51 = vld [vmem:[#allocation79_spill] sm:$0xff] }
 0x1d2   :  { %7702 = vmatprep.mubr.msk.bf16.mxu1 %vm411_vm1, %v11382_v13  ;;  %v11437_v13 = vld [vmem:[#allocation38_spill] sm:$0xff] }
 0x1d5   :  { %7987 = vmatmul.mubr.msk.bf16.gmra.mrb[60].mxu0 %vm411_vm1, %v7095_v31 }
 0x1d6   :  { %7992 = vmatprep.mubr.msk.bf16.mxu0 %vm411_vm1, %v11371_v8  ;;  %v11431_v8 = vld [vmem:[#allocation71_spill] sm:$0xff] }
 0x1d9   :  { %7703 = vmatmul.mubr.msk.bf16.gmra.mrb[40].mxu1 %vm411_vm1, %v11383_v47  ;;  %v11439_v47 = vld [vmem:[#allocation24_spill] sm:$0xff] }
 0x1da   :  { %7706 = vmatprep.mubr.msk.bf16.mxu1 %vm411_vm1, %v11386_v42  ;;  %v11440_v42 = vld [vmem:[#allocation37_spill] sm:$0xff] }
 0x1dd   :  { %7993 = vmatmul.mubr.msk.bf16.vlgmr.msra.gmra.mrb[0].mxu0 %vm411_vm1, %v11373_v17  ;;  %v11433_v17 = vld [vmem:[#allocation72_spill] sm:$0xff] }
 0x1de   :  { %7996 = vmatprep.mubr.msk.bf16.mxu0 %vm411_vm1, %v11374_v55  ;;  %v11434_v55 = vld [vmem:[#allocation75_spill] sm:$0xff] }
 0x1e1   :  { %7707 = vmatmul.mubr.msk.bf16.gmra.mrb[44].mxu1 %vm411_vm1, %v11387_v62  ;;  %v11442_v62 = vld [vmem:[#allocation101_spill] sm:$0xff] }
 0x1e2   :  { %7710 = vmatprep.mubr.msk.bf16.mxu1 %vm411_vm1, %v11390_v9  ;;  %v11444_v9 = vld [vmem:[#allocation78_spill] sm:$0xff] }
 0x1e5   :  { %7997 = vmatmul.mubr.msk.bf16.gmra.mrb[4].mxu0 %vm411_vm1, %v11430_v37 }
 0x1e6   :  { %8000 = vmatprep.mubr.msk.bf16.mxu0 %vm411_vm1, %v11431_v8 }
 0x1e9   :  { %7711 = vmatmul.mubr.msk.bf16.gmra.mrb[48].mxu1 %vm411_vm1, %v11432_v6 }
 0x1ea   :  { %7714 = vmatprep.mubr.msk.bf16.mxu1 %vm411_vm1, %v11394_v32  ;;  %v11438_v32 = vld [vmem:[#allocation81_spill] sm:$0xff] }
 0x1ed   :  { %8001 = vmatmul.mubr.msk.bf16.gmra.mrb[8].mxu0 %vm411_vm1, %v11433_v17 }
 0x1ee   :  { %8004 = vmatprep.mubr.msk.bf16.mxu0 %vm411_vm1, %v11434_v55 }
 0x1f1   :  { %7715 = vmatmul.mubr.msk.bf16.gmra.mrb[52].mxu1 %vm411_vm1, %v11395_v5  ;;  %v11441_v5 = vld [vmem:[#allocation73_spill] sm:$0xff] }
 0x1f2   :  { %7718 = vmatprep.mubr.msk.bf16.mxu1 %vm411_vm1, %v11397_v18  ;;  %v11443_v18 = vld [vmem:[#allocation34_spill] sm:$0xff] }
 0x1f5   :  { %8005 = vmatmul.mubr.msk.bf16.gmra.mrb[12].mxu0 %vm411_vm1, %v11435_v0 }
 0x1f6   :  { %8008 = vmatprep.mubr.msk.bf16.mxu0 %vm411_vm1, %v11436_v51 }
 0x1f9   :  { %7719 = vmatmul.mubr.msk.bf16.gmra.mrb[56].mxu1 %vm411_vm1, %v11437_v13 }
 0x1fa   :  { %7722 = vmatprep.mubr.msk.bf16.mxu1 %vm411_vm1, %v11438_v32 }
 0x1fd   :  { %8009 = vmatmul.mubr.msk.bf16.gmra.mrb[16].mxu0 %vm411_vm1, %v11439_v47 }
 0x1fe   :  { %8012 = vmatprep.mubr.msk.bf16.mxu0 %vm411_vm1, %v11440_v42 }
 0x201   :  { %7723 = vmatmul.mubr.msk.bf16.gmra.mrb[60].mxu1 %vm411_vm1, %v11441_v5 }
 0x202   :  { %7760 = vmatprep.mubr.msk.bf16.mxu1 %vm411_vm1, %v11442_v62  ;;  %v8624_v62 = vmov 0.0  }
 0x203   :  { %6443 = vst [vmem:[%s10936_s2] sm:$0x1] %v8624_v62  ;;  %6444 = vst [vmem:[%s10937_s3] sm:$0x1] %v8624_v62 }
 0x205   :  { %8013 = vmatmul.mubr.msk.bf16.gmra.mrb[20].mxu0 %vm411_vm1, %v11443_v18 }
 0x206   :  { %8016 = vmatprep.mubr.msk.bf16.mxu0 %vm411_vm1, %v11444_v9 }
 0x209   :  { %7761 = vmatmul.mubr.msk.bf16.vlgmr.msra.gmra.mrb[32].mxu1 %vm411_vm1, %v10156_v7  ;;  %v5933_v7 = vsel %vm9291_vm7, %v5931_v46, %v5932_v23 }
 0x20a   :  { %7764 = vmatprep.mubr.msk.bf16.mxu1 %vm411_vm1, %v10169_v49  ;;  %v7131_v57 = vcombine.low %v5930_v40, %v5933_v7  ;;  %v11448_v49 = vld [vmem:[#allocation43_spill] sm:$0xff] }
 0x20d   :  { %8017 = vmatmul.mubr.msk.bf16.gmra.mrb[24].mxu0 %vm411_vm1, %v11445_v33 }
 0x20e   :  { %8020 = vmatprep.mubr.msk.bf16.mxu0 %vm411_vm1, %v11446_v30 }
 0x211   :  { %7765 = vmatmul.mubr.msk.bf16.gmra.mrb[36].mxu1 %vm411_vm1, %v10203_v38  ;;  %v11450_v38 = vld [vmem:[#allocation91_spill] sm:$0xff] }
 0x212   :  { %7768 = vmatprep.mubr.msk.bf16.mxu1 %vm411_vm1, %v11424_v14  ;;  %v11458_v14 = vld [vmem:[#allocation103_spill] sm:$0xff] }
 0x215   :  { %8021 = vmatmul.mubr.msk.bf16.gmra.mrb[28].mxu0 %vm411_vm1, %v7131_v57 }
 0x216   :  { %8024 = vmatprep.mubr.msk.bf16.mxu0 %vm411_vm1, %v11448_v49 }
 0x219   :  { %7769 = vmatmul.mubr.msk.bf16.gmra.mrb[40].mxu1 %vm411_vm1, %v11425_v50  ;;  %v11459_v50 = vld [vmem:[#allocation48_spill] sm:$0xff] }
 0x21a   :  { %7772 = vmatprep.mubr.msk.bf16.mxu1 %vm411_vm1, %v11426_v2 }
 0x21d   :  { %8025 = vmatmul.mubr.msk.bf16.gmra.mrb[32].mxu0 %vm411_vm1, %v11449_v28 }
 0x21e   :  { %8028 = vmatprep.mubr.msk.bf16.mxu0 %vm411_vm1, %v11404_v3  ;;  %v11451_v3 = vld [vmem:[#allocation94_spill] sm:$0xff] }
 0x221   :  { %7773 = vmatmul.mubr.msk.bf16.gmra.mrb[44].mxu1 %vm411_vm1, %v11427_v25 }
 0x222   :  { %7776 = vmatprep.mubr.msk.bf16.mxu1 %vm411_vm1, %v10340_v39  ;;  %v11452_v39 = vld [vmem:[#allocation95_spill] sm:$0xff] }
 0x225   :  { %8029 = vmatmul.mubr.msk.bf16.gmra.mrb[36].mxu0 %vm411_vm1, %v11406_v26  ;;  %v11453_v26 = vld [vmem:[#allocation96_spill] sm:$0xff] }
 0x226   :  { %8032 = vmatprep.mubr.msk.bf16.mxu0 %vm411_vm1, %v11407_v45  ;;  %v7129_v45 = vrot.slane %v10532_v54, 9 }
 0x229   :  { %7777 = vmatmul.mubr.msk.bf16.gmra.mrb[48].mxu1 %vm411_vm1, %v10344_v27  ;;  %v11454_v27 = vld [vmem:[#allocation97_spill] sm:$0xff] }
 0x22a   :  { %7780 = vmatprep.mubr.msk.bf16.mxu1 %vm411_vm1, %v10367_v59  ;;  %v11455_v59 = vld [vmem:[#allocation98_spill] sm:$0xff] }
 0x22d   :  { %8033 = vmatmul.mubr.msk.bf16.gmra.mrb[40].mxu0 %vm411_vm1, %v11450_v38 }
 0x22e   :  { %8036 = vmatprep.mubr.msk.bf16.mxu0 %vm411_vm1, %v11451_v3 }
 0x231   :  { %7781 = vmatmul.mubr.msk.bf16.gmra.mrb[52].mxu1 %vm411_vm1, %v10371_v12  ;;  %v11456_v12 = vld [vmem:[#allocation99_spill] sm:$0xff] }
 0x232   :  { %7784 = vmatprep.mubr.msk.bf16.mxu1 %vm411_vm1, %v10390_v52  ;;  %v11457_v52 = vld [vmem:[#allocation102_spill] sm:$0xff] }
 0x235   :  { %8037 = vmatmul.mubr.msk.bf16.gmra.mrb[44].mxu0 %vm411_vm1, %v11452_v39 }
 0x236   :  { %8040 = vmatprep.mubr.msk.bf16.mxu0 %vm411_vm1, %v11453_v26 }
 0x239   :  { %7785 = vmatmul.mubr.msk.bf16.gmra.mrb[56].mxu1 %vm411_vm1, %v10392_v60  ;;  %v5936_v60 = vrot.slane %v10537_v1, 5 }
 0x23a   :  { %7788 = vmatprep.mubr.msk.bf16.mxu1 %vm411_vm1, %v10406_v34 }
 0x23b   :  { %v5938_v34 = vrot.slane %v5936_v60, 4  ;;  %v5937_v2 = vsel %vm9291_vm7, %v7129_v45, %v5936_v60 }
 0x23d   :  { %8041 = vmatmul.mubr.msk.bf16.gmra.mrb[48].mxu0 %vm411_vm1, %v11454_v27  ;;  %v5940_v25 = vsel %vm9291_vm7, %v5938_v34, %v5939_v20 }
 0x23e   :  { %8044 = vmatprep.mubr.msk.bf16.mxu0 %vm411_vm1, %v11455_v59  ;;  %v7132_v35 = vcombine.low %v5937_v2, %v5940_v25 }
 0x241   :  { %7789 = vmatmul.mubr.msk.bf16.gmra.mrb[60].mxu1 %vm411_vm1, %v10695_v21 }
 0x245   :  { %8045 = vmatmul.mubr.msk.bf16.gmra.mrb[52].mxu0 %vm411_vm1, %v11456_v12 }
 0x246   :  { %8048 = vmatprep.mubr.msk.bf16.mxu0 %vm411_vm1, %v11457_v52 }
 0x24d   :  { %8049 = vmatmul.mubr.msk.bf16.gmra.mrb[56].mxu0 %vm411_vm1, %v11458_v14 }
 0x24e   :  { %8052 = vmatprep.mubr.msk.bf16.mxu0 %vm411_vm1, %v11459_v50 }
 0x255   :  { %8053 = vmatmul.mubr.msk.bf16.gmra.mrb[60].mxu0 %vm411_vm1, %v7132_v35 }
 0x25c   :  { %v7664_v1 = vpop.f32.mrb[0].mxu1 }
 0x25d   :  { %v3434_v54 = vpop.f32.mrb[1].mxu1 }
 0x25e   :  { %v7665_v10 = vpop.f32.mrb[2].mxu1 }
 0x25f   :  { %v3437_v48 = vpop.f32.mrb[3].mxu1 }
 0x264   :  { %v7668_v36 = vpop.f32.mrb[4].mxu1 }
 0x265   :  { %v3450_v61 = vpop.f32.mrb[5].mxu1 }
 0x266   :  { %v7669_v19 = vpop.f32.mrb[6].mxu1 }
 0x267   :  { %v3453_v4 = vpop.f32.mrb[7].mxu1 }
 0x26c   :  { %v10844_v15 = vpop.f32.mrb[8].mxu1 }
 0x26d   :  { %v10846_v56 = vpop.f32.mrb[9].mxu1 }
 0x26e   :  { %v10848_v41 = vpop.f32.mrb[10].mxu1 }
 0x26f   :  { %v10850_v43 = vpop.f32.mrb[11].mxu1 }
 0x274   :  { %v10852_v44 = vpop.f32.mrb[12].mxu1 }
 0x275   :  { %v10854_v21 = vpop.f32.mrb[13].mxu1 }
 0x276   :  { %v10856_v53 = vpop.f32.mrb[14].mxu1 }
 0x277   :  { %v10858_v58 = vpop.f32.mrb[15].mxu1 }
 0x27c   :  { %v10860_v16 = vpop.f32.mrb[16].mxu1 }
 0x27d   :  { %v10862_v11 = vpop.f32.mrb[17].mxu1 }
 0x27e   :  { %v10864_v29 = vpop.f32.mrb[18].mxu1 }
 0x27f   :  { %v10866_v31 = vpop.f32.mrb[19].mxu1 }
 0x284   :  { %v10868_v37 = vpop.f32.mrb[20].mxu1 }
 0x285   :  { %v10870_v8 = vpop.f32.mrb[21].mxu1 }
 0x286   :  { %v10872_v6 = vpop.f32.mrb[22].mxu1 }
 0x287   :  { %v10874_v17 = vpop.f32.mrb[23].mxu1 }
 0x28c   :  { %v10876_v55 = vpop.f32.mrb[24].mxu1 }
 0x28d   :  { %v10878_v0 = vpop.f32.mrb[25].mxu1 }
 0x28e   :  { %v10880_v51 = vpop.f32.mrb[26].mxu1 }
 0x28f   :  { %v10882_v13 = vpop.f32.mrb[27].mxu1 }
 0x294   :  { %v10884_v32 = vpop.f32.mrb[28].mxu1 }
 0x295   :  { %v10886_v47 = vpop.f32.mrb[29].mxu1 }
 0x296   :  { %v10888_v42 = vpop.f32.mrb[30].mxu1 }
 0x297   :  { %v10890_v5 = vpop.f32.mrb[31].mxu1 }
 0x2b0   :  { %v7994_v18 = vpop.f32.mrb[0].mxu0 }
 0x2b1   :  { %v8058_v9 = vadd.f32 %v7994_v18, %v7664_v1  ;;  %v6056_v24 = vpop.f32.mrb[1].mxu0 }
 0x2b2   :  { %v8059_v22 = vadd.f32 %v6056_v24, %v3434_v54  ;;  %v7995_v46 = vpop.f32.mrb[2].mxu0 }
 0x2b3   :  { %v8060_v23 = vadd.f32 %v7995_v46, %v7665_v10  ;;  %v6059_v33 = vpop.f32.mrb[3].mxu0  ;;  %v6584_v57 = vmul.f32 %v8058_v9, %v8058_v9 }
 0x2b4   :  { %v8061_v30 = vadd.f32 %v6059_v33, %v3437_v48  ;;  %v6582_v63 = vmul.f32 %v8059_v22, %v8059_v22 }
 0x2b5   :  { %v6585_v26 = vmul.f32 %v8060_v23, %v8060_v23 }
 0x2b6   :  { %v6510_v40 = vadd.f32 %v8061_v30, %v8059_v22  ;;  %v6583_v7 = vmul.f32 %v8061_v30, %v8061_v30 }
 0x2b8   :  { %v6511_v49 = vadd.f32 %v8058_v9, %v6510_v40  ;;  %v6646_v28 = vadd.f32 %v6583_v7, %v6582_v63  ;;  %v7998_v38 = vpop.f32.mrb[4].mxu0 }
 0x2b9   :  { %v8062_v3 = vadd.f32 %v7998_v38, %v7668_v36  ;;  %v6072_v39 = vpop.f32.mrb[5].mxu0 }
 0x2ba   :  { %v6647_v27 = vadd.f32 %v6646_v28, %v6584_v57  ;;  %v8063_v59 = vadd.f32 %v6072_v39, %v3450_v61  ;;  %v6512_v12 = vadd.f32 %v8060_v23, %v6511_v49  ;;  %v7999_v52 = vpop.f32.mrb[6].mxu0 }
 0x2bb   :  { %v8064_v60 = vadd.f32 %v7999_v52, %v7669_v19  ;;  %v6075_v45 = vpop.f32.mrb[7].mxu0  ;;  %v6588_v1 = vmul.f32 %v8062_v3, %v8062_v3 }
 0x2bc   :  { %v6513_v34 = vadd.f32 %v8063_v59, %v6512_v12  ;;  %v6586_v20 = vmul.f32 %v8063_v59, %v8063_v59  ;;  %v6648_v14 = vadd.f32 %v6647_v27, %v6585_v26  ;;  %v8065_v50 = vadd.f32 %v6075_v45, %v3453_v4 }
 0x2bd   :  { %v6589_v18 = vmul.f32 %v8064_v60, %v8064_v60 }
 0x2be   :  { %v6649_v2 = vadd.f32 %v6648_v14, %v6586_v20  ;;  %v6514_v25 = vadd.f32 %v8065_v50, %v6513_v34  ;;  %v6587_v35 = vmul.f32 %v8065_v50, %v8065_v50 }
 0x2c0   :  { %v6515_v54 = vadd.f32 %v8062_v3, %v6514_v25  ;;  %v6650_v10 = vadd.f32 %v6649_v2, %v6587_v35  ;;  %v8002_v48 = vpop.f32.mrb[8].mxu0 }
 0x2c1   :  { %v8066_v36 = vadd.f32 %v8002_v48, %v10844_v15  ;;  %v6088_v62 = vpop.f32.mrb[9].mxu0 }
 0x2c2   :  { %v6651_v61 = vadd.f32 %v6650_v10, %v6588_v1  ;;  %v8067_v9 = vadd.f32 %v6088_v62, %v10846_v56  ;;  %v6516_v19 = vadd.f32 %v8064_v60, %v6515_v54  ;;  %v8003_v24 = vpop.f32.mrb[10].mxu0 }
 0x2c3   :  { %v8068_v22 = vadd.f32 %v8003_v24, %v10848_v41  ;;  %v6091_v46 = vpop.f32.mrb[11].mxu0  ;;  %v6592_v57 = vmul.f32 %v8066_v36, %v8066_v36 }
 0x2c4   :  { %v6517_v4 = vadd.f32 %v8067_v9, %v6516_v19  ;;  %v6590_v23 = vmul.f32 %v8067_v9, %v8067_v9  ;;  %v6652_v33 = vadd.f32 %v6651_v61, %v6589_v18  ;;  %v8069_v30 = vadd.f32 %v6091_v46, %v10850_v43 }
 0x2c5   :  { %v6593_v3 = vmul.f32 %v8068_v22, %v8068_v22 }
 0x2c6   :  { %v6653_v63 = vadd.f32 %v6652_v33, %v6590_v23  ;;  %v6518_v40 = vadd.f32 %v8069_v30, %v6517_v4  ;;  %v6591_v7 = vmul.f32 %v8069_v30, %v8069_v30 }
 0x2c8   :  { %v6519_v15 = vadd.f32 %v8066_v36, %v6518_v40  ;;  %v6654_v49 = vadd.f32 %v6653_v63, %v6591_v7  ;;  %v8006_v28 = vpop.f32.mrb[12].mxu0 }
 0x2c9   :  { %v8070_v38 = vadd.f32 %v8006_v28, %v10852_v44  ;;  %v6104_v56 = vpop.f32.mrb[13].mxu0 }
 0x2ca   :  { %v6655_v39 = vadd.f32 %v6654_v49, %v6592_v57  ;;  %v8071_v41 = vadd.f32 %v6104_v56, %v10854_v21  ;;  %v6520_v26 = vadd.f32 %v8068_v22, %v6519_v15  ;;  %v8007_v27 = vpop.f32.mrb[14].mxu0 }
 0x2cb   :  { %v8072_v59 = vadd.f32 %v8007_v27, %v10856_v53  ;;  %v6107_v12 = vpop.f32.mrb[15].mxu0  ;;  %v6596_v50 = vmul.f32 %v8070_v38, %v8070_v38 }
 0x2cc   :  { %v6521_v43 = vadd.f32 %v8071_v41, %v6520_v26  ;;  %v6594_v52 = vmul.f32 %v8071_v41, %v8071_v41  ;;  %v6656_v60 = vadd.f32 %v6655_v39, %v6593_v3  ;;  %v8073_v45 = vadd.f32 %v6107_v12, %v10858_v58 }
 0x2cd   :  { %v6597_v1 = vmul.f32 %v8072_v59, %v8072_v59 }
 0x2ce   :  { %v6657_v34 = vadd.f32 %v6656_v60, %v6594_v52  ;;  %v6522_v20 = vadd.f32 %v8073_v45, %v6521_v43  ;;  %v6595_v14 = vmul.f32 %v8073_v45, %v8073_v45 }
 0x2d0   :  { %v6523_v44 = vadd.f32 %v8070_v38, %v6522_v20  ;;  %v6658_v2 = vadd.f32 %v6657_v34, %v6595_v14  ;;  %v8010_v25 = vpop.f32.mrb[16].mxu0 }
 0x2d1   :  { %v8074_v35 = vadd.f32 %v8010_v25, %v10860_v16  ;;  %v6120_v21 = vpop.f32.mrb[17].mxu0 }
 0x2d2   :  { %v6659_v54 = vadd.f32 %v6658_v2, %v6596_v50  ;;  %v8075_v53 = vadd.f32 %v6120_v21, %v10862_v11  ;;  %v6524_v10 = vadd.f32 %v8072_v59, %v6523_v44  ;;  %v8011_v48 = vpop.f32.mrb[18].mxu0 }
 0x2d3   :  { %v8076_v36 = vadd.f32 %v8011_v48, %v10864_v29  ;;  %v6123_v62 = vpop.f32.mrb[19].mxu0  ;;  %v6600_v46 = vmul.f32 %v8074_v35, %v8074_v35 }
 0x2d4   :  { %v6525_v58 = vadd.f32 %v8075_v53, %v6524_v10  ;;  %v6598_v18 = vmul.f32 %v8075_v53, %v8075_v53  ;;  %v6660_v61 = vadd.f32 %v6659_v54, %v6597_v1  ;;  %v8077_v9 = vadd.f32 %v6123_v62, %v10866_v31 }
 0x2d5   :  { %v6601_v30 = vmul.f32 %v8076_v36, %v8076_v36 }
 0x2d6   :  { %v6661_v19 = vadd.f32 %v6660_v61, %v6598_v18  ;;  %v6526_v24 = vadd.f32 %v8077_v9, %v6525_v58  ;;  %v6599_v22 = vmul.f32 %v8077_v9, %v8077_v9 }
 0x2d8   :  { %v6527_v16 = vadd.f32 %v8074_v35, %v6526_v24  ;;  %v6662_v4 = vadd.f32 %v6661_v19, %v6599_v22  ;;  %v8014_v23 = vpop.f32.mrb[20].mxu0 }
 0x2d9   :  { %v8078_v33 = vadd.f32 %v8014_v23, %v10868_v37  ;;  %v6136_v11 = vpop.f32.mrb[21].mxu0 }
 0x2da   :  { %v6663_v63 = vadd.f32 %v6662_v4, %v6600_v46  ;;  %v8079_v29 = vadd.f32 %v6136_v11, %v10870_v8  ;;  %v6528_v40 = vadd.f32 %v8076_v36, %v6527_v16  ;;  %v8015_v7 = vpop.f32.mrb[22].mxu0 }
 0x2db   :  { %v8080_v57 = vadd.f32 %v8015_v7, %v10872_v6  ;;  %v6139_v15 = vpop.f32.mrb[23].mxu0  ;;  %v6604_v27 = vmul.f32 %v8078_v33, %v8078_v33 }
 0x2dc   :  { %v6529_v31 = vadd.f32 %v8079_v29, %v6528_v40  ;;  %v6602_v49 = vmul.f32 %v8079_v29, %v8079_v29  ;;  %v6664_v28 = vadd.f32 %v6663_v63, %v6601_v30  ;;  %v8081_v38 = vadd.f32 %v6139_v15, %v10874_v17  ;;  %v7762_v56 = vpop.f32.mrb[32].mxu1 }
 0x2dd   :  { %v4108_v37 = vpop.f32.mrb[33].mxu1  ;;  %v6605_v60 = vmul.f32 %v8080_v57, %v8080_v57 }
 0x2de   :  { %v6665_v3 = vadd.f32 %v6664_v28, %v6602_v49  ;;  %v6530_v39 = vadd.f32 %v8081_v38, %v6529_v31  ;;  %v6603_v41 = vmul.f32 %v8081_v38, %v8081_v38  ;;  %v7763_v26 = vpop.f32.mrb[34].mxu1 }
 0x2df   :  { %v4111_v43 = vpop.f32.mrb[35].mxu1 }
 0x2e0   :  { %v6531_v59 = vadd.f32 %v8078_v33, %v6530_v39  ;;  %v6666_v12 = vadd.f32 %v6665_v3, %v6603_v41  ;;  %v8018_v8 = vpop.f32.mrb[24].mxu0 }
 0x2e1   :  { %v8082_v52 = vadd.f32 %v8018_v8, %v10876_v55  ;;  %v6152_v6 = vpop.f32.mrb[25].mxu0 }
 0x2e2   :  { %v6667_v45 = vadd.f32 %v6666_v12, %v6604_v27  ;;  %v8083_v34 = vadd.f32 %v6152_v6, %v10878_v0  ;;  %v6532_v20 = vadd.f32 %v8080_v57, %v6531_v59  ;;  %v8019_v17 = vpop.f32.mrb[26].mxu0 }
 0x2e3   :  { %v8084_v14 = vadd.f32 %v8019_v17, %v10880_v51  ;;  %v6155_v50 = vpop.f32.mrb[27].mxu0  ;;  %v6608_v48 = vmul.f32 %v8082_v52, %v8082_v52 }
 0x2e4   :  { %v6533_v44 = vadd.f32 %v8083_v34, %v6532_v20  ;;  %v6606_v2 = vmul.f32 %v8083_v34, %v8083_v34  ;;  %v6668_v25 = vadd.f32 %v6667_v45, %v6605_v60  ;;  %v8085_v35 = vadd.f32 %v6155_v50, %v10882_v13  ;;  %v7766_v21 = vpop.f32.mrb[36].mxu1 }
 0x2e5   :  { %v4124_v55 = vpop.f32.mrb[37].mxu1  ;;  %v6609_v61 = vmul.f32 %v8084_v14, %v8084_v14 }
 0x2e6   :  { %v6669_v1 = vadd.f32 %v6668_v25, %v6606_v2  ;;  %v6534_v54 = vadd.f32 %v8085_v35, %v6533_v44  ;;  %v6607_v53 = vmul.f32 %v8085_v35, %v8085_v35  ;;  %v7767_v10 = vpop.f32.mrb[38].mxu1 }
 0x2e7   :  { %v4127_v58 = vpop.f32.mrb[39].mxu1 }
 0x2e8   :  { %v6535_v36 = vadd.f32 %v8082_v52, %v6534_v54  ;;  %v6670_v62 = vadd.f32 %v6669_v1, %v6607_v53  ;;  %v8022_v0 = vpop.f32.mrb[28].mxu0 }
 0x2e9   :  { %v8086_v18 = vadd.f32 %v8022_v0, %v10884_v32  ;;  %v6168_v51 = vpop.f32.mrb[29].mxu0 }
 0x2ea   :  { %v6671_v9 = vadd.f32 %v6670_v62, %v6608_v48  ;;  %v8087_v19 = vadd.f32 %v6168_v51, %v10886_v47  ;;  %v6536_v24 = vadd.f32 %v8084_v14, %v6535_v36  ;;  %v8023_v13 = vpop.f32.mrb[30].mxu0 }
 0x2eb   :  { %v8088_v22 = vadd.f32 %v8023_v13, %v10888_v42  ;;  %v6171_v46 = vpop.f32.mrb[31].mxu0  ;;  %v6612_v7 = vmul.f32 %v8086_v18, %v8086_v18 }
 0x2ec   :  { %v6537_v16 = vadd.f32 %v8087_v19, %v6536_v24  ;;  %v6610_v4 = vmul.f32 %v8087_v19, %v8087_v19  ;;  %v6672_v23 = vadd.f32 %v6671_v9, %v6609_v61  ;;  %v8089_v33 = vadd.f32 %v6171_v46, %v10890_v5  ;;  %v7770_v11 = vpop.f32.mrb[40].mxu1 }
 0x2ed   :  { %v4140_v32 = vpop.f32.mrb[41].mxu1  ;;  %v6613_v42 = vmul.f32 %v8088_v22, %v8088_v22 }
 0x2ee   :  { %v6673_v30 = vadd.f32 %v6672_v23, %v6610_v4  ;;  %v6538_v63 = vadd.f32 %v8089_v33, %v6537_v16  ;;  %v6611_v29 = vmul.f32 %v8089_v33, %v8089_v33  ;;  %v7771_v40 = vpop.f32.mrb[42].mxu1 }
 0x2ef   :  { %v4143_v31 = vpop.f32.mrb[43].mxu1 }
 0x2f0   :  { %v6539_v57 = vadd.f32 %v8086_v18, %v6538_v63  ;;  %v6674_v15 = vadd.f32 %v6673_v30, %v6611_v29  ;;  %v8026_v47 = vpop.f32.mrb[32].mxu0 }
 0x2f1   :  { %v8090_v49 = vadd.f32 %v8026_v47, %v7762_v56  ;;  %v6184_v28 = vpop.f32.mrb[33].mxu0 }
 0x2f2   :  { %v6675_v38 = vadd.f32 %v6674_v15, %v6612_v7  ;;  %v8091_v3 = vadd.f32 %v6184_v28, %v4108_v37  ;;  %v6540_v39 = vadd.f32 %v8088_v22, %v6539_v57  ;;  %v8027_v41 = vpop.f32.mrb[34].mxu0 }
 0x2f3   :  { %v8092_v27 = vadd.f32 %v8027_v41, %v7763_v26  ;;  %v6187_v5 = vpop.f32.mrb[35].mxu0  ;;  %v6616_v14 = vmul.f32 %v8090_v49, %v8090_v49 }
 0x2f4   :  { %v6541_v59 = vadd.f32 %v8091_v3, %v6540_v39  ;;  %v6614_v12 = vmul.f32 %v8091_v3, %v8091_v3  ;;  %v6676_v8 = vadd.f32 %v6675_v38, %v6613_v42  ;;  %v8093_v52 = vadd.f32 %v6187_v5, %v4111_v43  ;;  %v7774_v6 = vpop.f32.mrb[44].mxu1 }
 0x2f5   :  { %v4156_v20 = vpop.f32.mrb[45].mxu1  ;;  %v6617_v35 = vmul.f32 %v8092_v27, %v8092_v27 }
 0x2f6   :  { %v6677_v60 = vadd.f32 %v6676_v8, %v6614_v12  ;;  %v6542_v45 = vadd.f32 %v8093_v52, %v6541_v59  ;;  %v6615_v34 = vmul.f32 %v8093_v52, %v8093_v52  ;;  %v7775_v17 = vpop.f32.mrb[46].mxu1 }
 0x2f7   :  { %v4159_v2 = vpop.f32.mrb[47].mxu1 }
 0x2f8   :  { %v6543_v56 = vadd.f32 %v8090_v49, %v6542_v45  ;;  %v6678_v50 = vadd.f32 %v6677_v60, %v6615_v34  ;;  %v8030_v44 = vpop.f32.mrb[36].mxu0 }
 0x2f9   :  { %v8094_v37 = vadd.f32 %v8030_v44, %v7766_v21  ;;  %v6200_v25 = vpop.f32.mrb[37].mxu0 }
 0x2fa   :  { %v6679_v26 = vadd.f32 %v6678_v50, %v6616_v14  ;;  %v8095_v1 = vadd.f32 %v6200_v25, %v4124_v55  ;;  %v6544_v54 = vadd.f32 %v8092_v27, %v6543_v56  ;;  %v8031_v53 = vpop.f32.mrb[38].mxu0 }
 0x2fb   :  { %v8096_v48 = vadd.f32 %v8031_v53, %v7767_v10  ;;  %v6203_v43 = vpop.f32.mrb[39].mxu0  ;;  %v6620_v22 = vmul.f32 %v8094_v37, %v8094_v37 }
 0x2fc   :  { %v6545_v36 = vadd.f32 %v8095_v1, %v6544_v54  ;;  %v6618_v62 = vmul.f32 %v8095_v1, %v8095_v1  ;;  %v6680_v0 = vadd.f32 %v6679_v26, %v6617_v35  ;;  %v8097_v18 = vadd.f32 %v6203_v43, %v4127_v58  ;;  %v7778_v51 = vpop.f32.mrb[48].mxu1 }
 0x2fd   :  { %v4172_v24 = vpop.f32.mrb[49].mxu1  ;;  %v6621_v33 = vmul.f32 %v8096_v48, %v8096_v48 }
 0x2fe   :  { %v6681_v61 = vadd.f32 %v6680_v0, %v6618_v62  ;;  %v6546_v9 = vadd.f32 %v8097_v18, %v6545_v36  ;;  %v6619_v19 = vmul.f32 %v8097_v18, %v8097_v18  ;;  %v7779_v13 = vpop.f32.mrb[50].mxu1 }
 0x2ff   :  { %v4175_v4 = vpop.f32.mrb[51].mxu1 }
 0x300   :  { %v6547_v21 = vadd.f32 %v8094_v37, %v6546_v9  ;;  %v6682_v46 = vadd.f32 %v6681_v61, %v6619_v19  ;;  %v8034_v16 = vpop.f32.mrb[40].mxu0 }
 0x301   :  { %v8098_v55 = vadd.f32 %v8034_v16, %v7770_v11  ;;  %v6216_v23 = vpop.f32.mrb[41].mxu0 }
 0x302   :  { %v6683_v10 = vadd.f32 %v6682_v46, %v6620_v22  ;;  %v8099_v30 = vadd.f32 %v6216_v23, %v4140_v32  ;;  %v6548_v63 = vadd.f32 %v8096_v48, %v6547_v21  ;;  %v8035_v29 = vpop.f32.mrb[42].mxu0 }
 0x303   :  { %v8100_v7 = vadd.f32 %v8035_v29, %v7771_v40  ;;  %v6219_v58 = vpop.f32.mrb[43].mxu0  ;;  %v6624_v27 = vmul.f32 %v8098_v55, %v8098_v55 }
 0x304   :  { %v6549_v57 = vadd.f32 %v8099_v30, %v6548_v63  ;;  %v6622_v15 = vmul.f32 %v8099_v30, %v8099_v30  ;;  %v6684_v47 = vadd.f32 %v6683_v10, %v6621_v33  ;;  %v8101_v49 = vadd.f32 %v6219_v58, %v4143_v31  ;;  %v7782_v28 = vpop.f32.mrb[52].mxu1 }
 0x305   :  { %v4188_v39 = vpop.f32.mrb[53].mxu1  ;;  %v6625_v52 = vmul.f32 %v8100_v7, %v8100_v7 }
 0x306   :  { %v6685_v42 = vadd.f32 %v6684_v47, %v6622_v15  ;;  %v6550_v38 = vadd.f32 %v8101_v49, %v6549_v57  ;;  %v6623_v3 = vmul.f32 %v8101_v49, %v8101_v49  ;;  %v7783_v41 = vpop.f32.mrb[54].mxu1 }
 0x307   :  { %v4191_v12 = vpop.f32.mrb[55].mxu1 }
 0x308   :  { %v6551_v11 = vadd.f32 %v8098_v55, %v6550_v38  ;;  %v6686_v5 = vadd.f32 %v6685_v42, %v6623_v3  ;;  %v8038_v59 = vpop.f32.mrb[44].mxu0 }
 0x309   :  { %v8102_v32 = vadd.f32 %v8038_v59, %v7774_v6  ;;  %v6232_v8 = vpop.f32.mrb[45].mxu0 }
 0x30a   :  { %v6687_v40 = vadd.f32 %v6686_v5, %v6624_v27  ;;  %v8103_v60 = vadd.f32 %v6232_v8, %v4156_v20  ;;  %v6552_v45 = vadd.f32 %v8100_v7, %v6551_v11  ;;  %v8039_v34 = vpop.f32.mrb[46].mxu0 }
 0x30b   :  { %v8104_v14 = vadd.f32 %v8039_v34, %v7775_v17  ;;  %v6235_v31 = vpop.f32.mrb[47].mxu0  ;;  %v6628_v48 = vmul.f32 %v8102_v32, %v8102_v32 }
 0x30c   :  { %v6553_v56 = vadd.f32 %v8103_v60, %v6552_v45  ;;  %v6626_v50 = vmul.f32 %v8103_v60, %v8103_v60  ;;  %v6688_v44 = vadd.f32 %v6687_v40, %v6625_v52  ;;  %v8105_v37 = vadd.f32 %v6235_v31, %v4159_v2  ;;  %v7786_v25 = vpop.f32.mrb[56].mxu1 }
 0x30d   :  { %v4204_v54 = vpop.f32.mrb[57].mxu1  ;;  %v6629_v18 = vmul.f32 %v8104_v14, %v8104_v14 }
 0x30e   :  { %v6689_v35 = vadd.f32 %v6688_v44, %v6626_v50  ;;  %v6554_v26 = vadd.f32 %v8105_v37, %v6553_v56  ;;  %v6627_v1 = vmul.f32 %v8105_v37, %v8105_v37  ;;  %v7787_v53 = vpop.f32.mrb[58].mxu1 }
 0x30f   :  { %v4207_v62 = vpop.f32.mrb[59].mxu1 }
 0x310   :  { %v6555_v6 = vadd.f32 %v8102_v32, %v6554_v26  ;;  %v6690_v43 = vadd.f32 %v6689_v35, %v6627_v1  ;;  %v8042_v36 = vpop.f32.mrb[48].mxu0 }
 0x311   :  { %v8106_v20 = vadd.f32 %v8042_v36, %v7778_v51  ;;  %v6248_v0 = vpop.f32.mrb[49].mxu0 }
 0x312   :  { %v6691_v17 = vadd.f32 %v6690_v43, %v6628_v48  ;;  %v8107_v61 = vadd.f32 %v6248_v0, %v4172_v24  ;;  %v6556_v9 = vadd.f32 %v8104_v14, %v6555_v6  ;;  %v8043_v19 = vpop.f32.mrb[50].mxu0 }
 0x313   :  { %v8108_v22 = vadd.f32 %v8043_v19, %v7779_v13  ;;  %v6251_v2 = vpop.f32.mrb[51].mxu0  ;;  %v6632_v7 = vmul.f32 %v8106_v20, %v8106_v20 }
 0x314   :  { %v6557_v21 = vadd.f32 %v8107_v61, %v6556_v9  ;;  %v6630_v46 = vmul.f32 %v8107_v61, %v8107_v61  ;;  %v6692_v16 = vadd.f32 %v6691_v17, %v6629_v18  ;;  %v8109_v55 = vadd.f32 %v6251_v2, %v4175_v4  ;;  %v7790_v23 = vpop.f32.mrb[60].mxu1 }
 0x315   :  { %v4220_v63 = vpop.f32.mrb[61].mxu1  ;;  %v6633_v49 = vmul.f32 %v8108_v22, %v8108_v22 }
 0x316   :  { %v6693_v33 = vadd.f32 %v6692_v16, %v6630_v46  ;;  %v6558_v10 = vadd.f32 %v8109_v55, %v6557_v21  ;;  %v6631_v30 = vmul.f32 %v8109_v55, %v8109_v55  ;;  %v7791_v29 = vpop.f32.mrb[62].mxu1 }
 0x317   :  { %v4223_v15 = vpop.f32.mrb[63].mxu1 }
 0x318   :  { %v6559_v51 = vadd.f32 %v8106_v20, %v6558_v10  ;;  %v6694_v58 = vadd.f32 %v6693_v33, %v6631_v30  ;;  %v8046_v57 = vpop.f32.mrb[52].mxu0 }
 0x319   :  { %v8110_v24 = vadd.f32 %v8046_v57, %v7782_v28  ;;  %v6264_v47 = vpop.f32.mrb[53].mxu0 }
 0x31a   :  { %v6695_v13 = vadd.f32 %v6694_v58, %v6632_v7  ;;  %v8111_v42 = vadd.f32 %v6264_v47, %v4188_v39  ;;  %v6560_v38 = vadd.f32 %v8108_v22, %v6559_v51  ;;  %v8047_v3 = vpop.f32.mrb[54].mxu0 }
 0x31b   :  { %v8112_v27 = vadd.f32 %v8047_v3, %v7783_v41  ;;  %v6267_v4 = vpop.f32.mrb[55].mxu0  ;;  %v6636_v60 = vmul.f32 %v8110_v24, %v8110_v24 }
 0x31c   :  { %v6561_v11 = vadd.f32 %v8111_v42, %v6560_v38  ;;  %v6634_v5 = vmul.f32 %v8111_v42, %v8111_v42  ;;  %v6696_v59 = vadd.f32 %v6695_v13, %v6633_v49  ;;  %v8113_v32 = vadd.f32 %v6267_v4, %v4191_v12 }
 0x31d   :  { %v6637_v56 = vmul.f32 %v8112_v27, %v8112_v27 }
 0x31e   :  { %v6697_v8 = vadd.f32 %v6696_v59, %v6634_v5  ;;  %v6562_v52 = vadd.f32 %v8113_v32, %v6561_v11  ;;  %v6635_v40 = vmul.f32 %v8113_v32, %v8113_v32  ;;  %v6581_v59 = vld [vmem:[%s10937_s3] sm:$0x1] }
 0x320   :  { %v6563_v45 = vadd.f32 %v8110_v24, %v6562_v52  ;;  %v6698_v34 = vadd.f32 %v6697_v8, %v6635_v40  ;;  %v8050_v14 = vpop.f32.mrb[56].mxu0 }
 0x321   :  { %v8114_v28 = vadd.f32 %v8050_v14, %v7786_v25  ;;  %v6280_v31 = vpop.f32.mrb[57].mxu0 }
 0x322   :  { %v6699_v50 = vadd.f32 %v6698_v34, %v6636_v60  ;;  %v8115_v39 = vadd.f32 %v6280_v31, %v4204_v54  ;;  %v6564_v44 = vadd.f32 %v8112_v27, %v6563_v45  ;;  %v8051_v37 = vpop.f32.mrb[58].mxu0 }
 0x323   :  { %v8116_v41 = vadd.f32 %v8051_v37, %v7787_v53  ;;  %v6283_v35 = vpop.f32.mrb[59].mxu0  ;;  %v6640_v20 = vmul.f32 %v8114_v28, %v8114_v28 }
 0x324   :  { %v6565_v26 = vadd.f32 %v8115_v39, %v6564_v44  ;;  %v6638_v1 = vmul.f32 %v8115_v39, %v8115_v39  ;;  %v6700_v48 = vadd.f32 %v6699_v50, %v6637_v56  ;;  %v8117_v12 = vadd.f32 %v6283_v35, %v4207_v62 }
 0x325   :  { %v6641_v9 = vmul.f32 %v8116_v41, %v8116_v41 }
 0x326   :  { %v6701_v6 = vadd.f32 %v6700_v48, %v6638_v1  ;;  %v6566_v43 = vadd.f32 %v8117_v12, %v6565_v26  ;;  %v6639_v36 = vmul.f32 %v8117_v12, %v8117_v12 }
 0x328   :  { %v6567_v0 = vadd.f32 %v8114_v28, %v6566_v43  ;;  %v6702_v18 = vadd.f32 %v6701_v6, %v6639_v36  ;;  %v8054_v17 = vpop.f32.mrb[60].mxu0 }
 0x329   :  { %v8118_v25 = vadd.f32 %v8054_v17, %v7790_v23  ;;  %v6296_v61 = vpop.f32.mrb[61].mxu0 }
 0x32a   :  { %v6703_v19 = vadd.f32 %v6702_v18, %v6640_v20  ;;  %v8119_v54 = vadd.f32 %v6296_v61, %v4220_v63  ;;  %v6568_v22 = vadd.f32 %v8116_v41, %v6567_v0  ;;  %v8055_v2 = vpop.f32.mrb[62].mxu0 }
 0x32b   :  { %v8120_v53 = vadd.f32 %v8055_v2, %v7791_v29  ;;  %v6299_v21 = vpop.f32.mrb[63].mxu0  ;;  %v6644_v7 = vmul.f32 %v8118_v25, %v8118_v25 }
 0x32c   :  { %v6569_v46 = vadd.f32 %v8119_v54, %v6568_v22  ;;  %v6642_v16 = vmul.f32 %v8119_v54, %v8119_v54  ;;  %v6704_v55 = vadd.f32 %v6703_v19, %v6641_v9  ;;  %v8121_v62 = vadd.f32 %v6299_v21, %v4223_v15  ;;  %v6509_v15 = vld [vmem:[%s10936_s2] sm:$0x1] }
 0x32d   :  { %v6645_v57 = vmul.f32 %v8120_v53, %v8120_v53 }
 0x32e   :  { %v6705_v33 = vadd.f32 %v6704_v55, %v6642_v16  ;;  %v6570_v10 = vadd.f32 %v8121_v62, %v6569_v46  ;;  %v6643_v30 = vmul.f32 %v8121_v62, %v8121_v62 }
 0x330   :  { %v6571_v51 = vadd.f32 %v8118_v25, %v6570_v10  ;;  %v6706_v58 = vadd.f32 %v6705_v33, %v6643_v30 }
 0x332   :  { %v6572_v23 = vadd.f32 %v8120_v53, %v6571_v51  ;;  %v6707_v24 = vadd.f32 %v6706_v58, %v6644_v7 }
 0x334   :  { %v6573_v47 = vrot.slane %v6572_v23, 4  ;;  %v6708_v49 = vadd.f32 %v6707_v24, %v6645_v57 }
 0x336   :  { %v6574_v63 = vadd.f32 %v6573_v47, %v6572_v23  ;;  %v6709_v13 = vrot.slane %v6708_v49, 4 }
 0x338   :  { %v6575_v42 = vrot.slane %v6574_v63, 2  ;;  %v6710_v29 = vadd.f32 %v6709_v13, %v6708_v49 }
 0x33a   :  { %v6576_v38 = vadd.f32 %v6575_v42, %v6574_v63  ;;  %v6711_v3 = vrot.slane %v6710_v29, 2 }
 0x33c   :  { %v6577_v27 = vrot.slane %v6576_v38, 1  ;;  %v6712_v4 = vadd.f32 %v6711_v3, %v6710_v29 }
 0x33e   :  { %v6578_v11 = vadd.f32 %v6577_v27, %v6576_v38  ;;  %v6713_v5 = vrot.slane %v6712_v4, 1 }
 0x340   :  { %v6579_v32 = vadd.f32 %v6578_v11, %v6509_v15  ;;  %v6714_v8 = vadd.f32 %v6713_v5, %v6712_v4 }
 0x342   :  { %6580 = vst [vmem:[%s10936_s2] sm:$0x1] %v6579_v32  ;;  %v6715_v52 = vadd.f32 %v6714_v8, %v6581_v59 }
 0x344   :  { %6716 = vst [vmem:[%s10937_s3] sm:$0x1] %v6715_v52 }

</bundles_post_ra>
